<compile_context>
chip_gen: v6e
topology: v6e:2x2x1
jax: 0.10.0
libtpu: 0.0.40
codegen_flags: <defaults>
</compile_context>

<pallas_src>
import numpy as np
import jax
import jax.numpy as jnp
from jax.experimental import pallas as pl
from jax.experimental.pallas import tpu as pltpu


# ----------------------------------------------------------------------------
# Deterministic parameter construction (replaces librosa.filters.mel and the
# cuda hann window from the torch module's __init__).
# ----------------------------------------------------------------------------
def _round_up(x, m):
    return (x + m - 1) // m * m


def hann_window(win_length):
    # torch.hann_window default is periodic=True
    n = np.arange(win_length, dtype=np.float64)
    return (0.5 - 0.5 * np.cos(2.0 * np.pi * n / win_length)).astype(np.float32)


def _hz_to_mel(freqs):
    # Slaney mel scale (librosa default, htk=False)
    freqs = np.asarray(freqs, dtype=np.float64)
    f_sp = 200.0 / 3.0
    mels = freqs / f_sp
    min_log_hz = 1000.0
    min_log_mel = min_log_hz / f_sp
    logstep = np.log(6.4) / 27.0
    log_region = freqs >= min_log_hz
    mels = np.where(
        log_region,
        min_log_mel + np.log(np.maximum(freqs, 1e-10) / min_log_hz) / logstep,
        mels)
    return mels


def _mel_to_hz(mels):
    mels = np.asarray(mels, dtype=np.float64)
    f_sp = 200.0 / 3.0
    freqs = f_sp * mels
    min_log_hz = 1000.0
    min_log_mel = min_log_hz / f_sp
    logstep = np.log(6.4) / 27.0
    log_region = mels >= min_log_mel
    freqs = np.where(log_region,
                     min_log_hz * np.exp(logstep * (mels - min_log_mel)),
                     freqs)
    return freqs


def mel_filterbank(sr, n_fft, n_mels, fmin=0.0, fmax=None):
    # TODO(synk): mirrors librosa.filters.mel defaults (Slaney mel scale +
    # 'slaney' area norm) without the librosa dependency; exact bit-parity
    # with librosa is not guaranteed (add a one-off golden check offline).
    if fmax is None:
        fmax = sr / 2.0
    n_freq = n_fft // 2 + 1
    fftfreqs = np.linspace(0.0, sr / 2.0, n_freq)
    mel_pts = np.linspace(_hz_to_mel(fmin), _hz_to_mel(fmax), n_mels + 2)
    hz_pts = _mel_to_hz(mel_pts)                       # (n_mels + 2,)
    fdiff = np.diff(hz_pts)
    ramps = hz_pts[:, None] - fftfreqs[None, :]        # (n_mels + 2, n_freq)

    weights = np.zeros((n_mels, n_freq), dtype=np.float64)
    for i in range(n_mels):
        lower = -ramps[i] / max(fdiff[i], 1e-10)
        upper = ramps[i + 2] / max(fdiff[i + 1], 1e-10)
        weights[i] = np.maximum(0.0, np.minimum(lower, upper))
    # Slaney area normalization
    enorm = 2.0 / np.maximum(hz_pts[2:n_mels + 2] - hz_pts[:n_mels], 1e-10)
    weights *= enorm[:, None]
    return weights.astype(np.float32)


def build_matrices(win_length, n_fft, n_mels, sr, dft_dtype):
    """Window-folded, zero-free [cos | sin] DFT matrix and padded mel^T.

    Column layout (n_half = round_up(n_fft//2, 128) = 512 for n_fft=1024):
      cols [0, n_fft//2)              : cos(2*pi*n*k/N) * w[n],  k = 0..n_fft//2-1
      cols [n_half, n_half+n_fft//2)  : -sin(2*pi*n*k/N) * w[n], k = 0..n_fft//2-1
    The Nyquist bin (k = n_fft//2) is dropped: with librosa's default
    fmax = sr/2 its mel weight is (numerically) zero, which is asserted.
    """
    n_freq = n_fft // 2 + 1
    n_half = _round_up(n_fft // 2, 128)
    n_mels_pad = _round_up(max(n_mels, 1), 128)

    window = hann_window(win_length).astype(np.float64)         # (n_fft,)
    n = np.arange(n_fft, dtype=np.float64)[:, None]
    k = np.arange(n_fft // 2, dtype=np.float64)[None, :]
    ang = 2.0 * np.pi * n * k / n_fft
    cos_w = np.cos(ang) * window[:, None]                       # window folded in
    sin_w = -np.sin(ang) * window[:, None]

    dftw = np.zeros((n_fft, 2 * n_half), dtype=np.float32)
    dftw[:, :n_fft // 2] = cos_w
    dftw[:, n_half:n_half + n_fft // 2] = sin_w

    mel_fb = mel_filterbank(sr, n_fft, n_mels)                  # (n_mels, n_freq)
    assert np.allclose(mel_fb[:, n_freq - 1], 0.0, atol=1e-6), \
        "Nyquist bin carries nonzero mel weight; packed DFT layout drops it"
    melT = np.zeros((n_half, n_mels_pad), dtype=np.float32)
    melT[:n_fft // 2, :n_mels] = mel_fb[:, :n_fft // 2].T

    return (jnp.asarray(dftw, dtype=dft_dtype), jnp.asarray(melT),
            n_half, n_mels_pad)


# ----------------------------------------------------------------------------
# Pallas kernel + wrapper
# ----------------------------------------------------------------------------
def mel_spectrogram(x, *, win_length=1024, hop_length=256, n_fft=1024,
                    n_mels=24, sr=16000, frame_tile=512,
                    dft_precision="bf16_hilo",
                    vmem_limit_bytes=32 * 1024 * 1024):
    """x: (B, T) float32.  Returns (B, n_mels, n_frames), matching torch.

    dft_precision:
      "bf16_hilo" (default): 2 bf16 MXU passes (audio split into hi+lo), f32 acc.
      "bf16"               : 1 bf16 MXU pass.
      "fp32_3x"            : Precision.HIGH (bf16_3x), most accurate / slowest.
    """
    assert win_length == n_fft, "kernel assumes win_length == n_fft (module default)"
    assert n_fft % hop_length == 0, "framing assumes hop | n_fft"
    assert dft_precision in ("bf16_hilo", "bf16", "fp32_3x")
    B, T = x.shape
    assert T > n_fft // 2, "reflect padding (torch.stft center=True) needs T > n_fft//2"
    hop = hop_length
    R = n_fft // hop                                   # hop-chunks per frame
    n_frames = 1 + T // hop                            # torch.stft, center=True

    # Frame-tile sizing: balance tiles to minimize padding, multiple of 8.
    n_tiles = pl.cdiv(n_frames, frame_tile)
    TF = _round_up(pl.cdiv(n_frames, n_tiles), 8)
    n_frames_pad = TF * n_tiles
    n_chunk_rows = n_frames_pad + R - 1

    dft_dtype = jnp.float32 if dft_precision == "fp32_3x" else jnp.bfloat16
    dftw, melT, n_half, n_mels_pad = build_matrices(win_length, n_fft, n_mels,
                                                    sr, dft_dtype)

    # torch.stft(center=True): reflect-pad by n_fft//2 on both sides, then
    # pad/trim with zeros so the audio reshapes exactly into hop-sized rows
    # covering all (padded) frames.
    x_pad = jnp.pad(x.astype(jnp.float32),
                    ((0, 0), (n_fft // 2, n_fft // 2)), mode="reflect")
    L_needed = n_chunk_rows * hop
    L_cur = x_pad.shape[1]
    if L_needed > L_cur:
        x_pad = jnp.pad(x_pad, ((0, 0), (0, L_needed - L_cur)))
    else:
        x_pad = x_pad[:, :L_needed]
    chunks = x_pad.reshape(B, n_chunk_rows, hop)
    # Contiguous frames slab in HBM (B, n_frames_pad, n_fft) = R overlapping hop
    # copies (~4x audio bytes).  Built with R static shifted slices + concat
    # (no gather).  Lets the kernel do a single aligned K=n_fft contraction per
    # tile and bounds the per-step VMEM block at TF*n_fft*4 bytes.
    frames = jnp.concatenate(
        [chunks[:, r:r + n_frames_pad, :] for r in range(R)], axis=-1)

    def kernel(frames_ref, dftw_ref, melT_ref, out_ref):
        # frames_ref: (TF, n_fft) f32   dftw_ref: (n_fft, 2*n_half) bf16/f32
        # melT_ref:   (n_half, n_mels_pad) f32     out_ref: (TF, n_mels_pad) f32
        f = frames_ref[...]
        if dft_precision == "bf16_hilo":
            hi = f.astype(jnp.bfloat16)
            lo = (f - hi.astype(jnp.float32)).astype(jnp.bfloat16)
            acc = jnp.dot(hi, dftw_ref[...], preferred_element_type=jnp.float32)
            acc = acc + jnp.dot(lo, dftw_ref[...],
                                preferred_element_type=jnp.float32)
        elif dft_precision == "bf16":
            acc = jnp.dot(f.astype(jnp.bfloat16), dftw_ref[...],
                          preferred_element_type=jnp.float32)
        else:  # "fp32_3x"
            acc = jnp.dot(f, dftw_ref[...],
                          preferred_element_type=jnp.float32,
                          precision=jax.lax.Precision.HIGH)
        re = acc[:, :n_half]                      # 128-aligned lane split
        im = acc[:, n_half:]
        spec = jnp.sqrt(re * re + im * im)        # |STFT| (Nyquist bin dropped)
        out_ref[...] = jnp.dot(spec, melT_ref[...],
                               preferred_element_type=jnp.float32)

    out = pl.pallas_call(
        kernel,
        out_shape=jax.ShapeDtypeStruct((B, n_frames_pad, n_mels_pad),
                                       jnp.float32),
        grid_spec=pltpu.PrefetchScalarGridSpec(
            num_scalar_prefetch=0,
            grid=(B, n_tiles),
            in_specs=[
                pl.BlockSpec((None, TF, n_fft), lambda b, j: (b, j, 0)),
                pl.BlockSpec((n_fft, 2 * n_half), lambda b, j: (0, 0)),
                pl.BlockSpec((n_half, n_mels_pad), lambda b, j: (0, 0)),
            ],
            out_specs=pl.BlockSpec((None, TF, n_mels_pad),
                                   lambda b, j: (b, j, 0)),
        ),
        compiler_params=pltpu.CompilerParams(
            dimension_semantics=("parallel", "parallel"),
            vmem_limit_bytes=vmem_limit_bytes),
    )(frames, dftw, melT)

    # Drop frame/mel padding and match torch output layout (B, n_mels, n_frames).
    return jnp.transpose(out[:, :n_frames, :n_mels], (0, 2, 1))


# ----------------------------------------------------------------------------
# Pure-JAX reference (jnp.fft) for a sanity check.
# ----------------------------------------------------------------------------
def mel_spectrogram_ref(x, *, win_length, hop_length, n_fft, n_mels, sr=16000):
    B, T = x.shape
    window = jnp.asarray(hann_window(win_length))
    mel_basis = jnp.asarray(mel_filterbank(sr, n_fft, n_mels))
    x_pad = jnp.pad(x.astype(jnp.float32),
                    ((0, 0), (n_fft // 2, n_fft // 2)), mode="reflect")
    n_frames = 1 + T // hop_length
    idx = (jnp.arange(n_frames)[:, None] * hop_length
           + jnp.arange(n_fft)[None, :])
    frames = x_pad[:, idx] * window[None, None, :]          # (B, F, n_fft)
    stft = jnp.fft.rfft(frames, n=n_fft, axis=-1)           # (B, F, n_freq)
    spec = jnp.abs(stft).astype(jnp.float32)
    return jnp.einsum("mf,btf->bmt", mel_basis, spec)


if __name__ == "__main__":
    # Module defaults, small sequence length.
    win_length = 1024
    hop_length = 256
    n_fft = 1024
    n_mels = 24
    B, T = 2, 4096

    key = jax.random.PRNGKey(0)
    x = jax.random.normal(key, (B, T), dtype=jnp.float32)

    mel = mel_spectrogram(x, win_length=win_length, hop_length=hop_length,
                          n_fft=n_fft, n_mels=n_mels)
    mel = jax.block_until_ready(mel)

    ref = mel_spectrogram_ref(x, win_length=win_length, hop_length=hop_length,
                              n_fft=n_fft, n_mels=n_mels)
    ref = jax.block_until_ready(ref)

    n_frames = 1 + T // hop_length
    assert mel.shape == (B, n_mels, n_frames), mel.shape
    # Tolerance accounts for the reduced-precision (2-pass bf16 hi/lo) DFT and
    # the DEFAULT-precision mel matmul; observed error is well below this.
    np.testing.assert_allclose(np.asarray(mel), np.asarray(ref),
                               rtol=3e-3, atol=3e-3)
    print("KERNEL_OK")
</pallas_src>

<mosaic_0001>
module attributes {stable_mosaic.version = 11 : i64} {
  func.func @kernel(%arg0: i32, %arg1: i32, %arg2: memref<1x24x1024xf32, #tpu.memory_space<vmem>>, %arg3: memref<1024x1024xbf16, #tpu.memory_space<vmem>>, %arg4: memref<512x128xf32, #tpu.memory_space<vmem>>, %arg5: memref<1x24x128xf32, #tpu.memory_space<vmem>>) attributes {dimension_semantics = [#tpu.dimension_semantics<parallel>, #tpu.dimension_semantics<parallel>], iteration_bounds = array<i64: 2, 1>, scalar_prefetch = 0 : i64, scratch_operands = 0 : i64, tpu.core_type = #tpu.core_type<tc>, window_params = [{transform_indices = @transform_0, window_bounds = array<i64: 1, 24, 1024>}, {pipeline_mode = #tpu.pipeline_mode<synchronous>, transform_indices = @transform_1, window_bounds = array<i64: 1024, 1024>}, {pipeline_mode = #tpu.pipeline_mode<synchronous>, transform_indices = @transform_2, window_bounds = array<i64: 512, 128>}, {transform_indices = @transform_3, window_bounds = array<i64: 1, 24, 128>}]} {
    %c0 = arith.constant 0 : index
    %c0_0 = arith.constant 0 : index
    %c0_1 = arith.constant 0 : index
    %0 = vector.load %arg2[%c0, %c0_0, %c0_1] : memref<1x24x1024xf32, #tpu.memory_space<vmem>>, vector<1x24x1024xf32>
    %1 = vector.shape_cast %0 : vector<1x24x1024xf32> to vector<24x1024xf32>
    %2 = arith.truncf %1 : vector<24x1024xf32> to vector<24x1024xbf16>
    %3 = arith.extf %2 : vector<24x1024xbf16> to vector<24x1024xf32>
    %4 = arith.subf %1, %3 : vector<24x1024xf32>
    %5 = arith.truncf %4 : vector<24x1024xf32> to vector<24x1024xbf16>
    %c0_2 = arith.constant 0 : index
    %c0_3 = arith.constant 0 : index
    %6 = vector.load %arg3[%c0_2, %c0_3] : memref<1024x1024xbf16, #tpu.memory_space<vmem>>, vector<1024x1024xbf16>
    %cst = arith.constant dense<0.000000e+00> : vector<24x1024xf32>
    %7 = tpu.matmul %2, %6, %cst {dimension_numbers = #tpu.dot_dimension_numbers<[1], [0], [0], [1], [0, 0, 1, 1], [], []>} : vector<24x1024xbf16>, vector<1024x1024xbf16>, vector<24x1024xf32> -> vector<24x1024xf32>
    %c0_4 = arith.constant 0 : index
    %c0_5 = arith.constant 0 : index
    %8 = vector.load %arg3[%c0_4, %c0_5] : memref<1024x1024xbf16, #tpu.memory_space<vmem>>, vector<1024x1024xbf16>
    %cst_6 = arith.constant dense<0.000000e+00> : vector<24x1024xf32>
    %9 = tpu.matmul %5, %8, %cst_6 {dimension_numbers = #tpu.dot_dimension_numbers<[1], [0], [0], [1], [0, 0, 1, 1], [], []>} : vector<24x1024xbf16>, vector<1024x1024xbf16>, vector<24x1024xf32> -> vector<24x1024xf32>
    %10 = arith.addf %7, %9 : vector<24x1024xf32>
    %11 = vector.extract_strided_slice %10 {offsets = [0, 0], sizes = [24, 512], strides = [1, 1]} : vector<24x1024xf32> to vector<24x512xf32>
    %12 = vector.extract_strided_slice %10 {offsets = [0, 512], sizes = [24, 512], strides = [1, 1]} : vector<24x1024xf32> to vector<24x512xf32>
    %13 = arith.mulf %11, %11 : vector<24x512xf32>
    %14 = arith.mulf %12, %12 : vector<24x512xf32>
    %15 = arith.addf %13, %14 : vector<24x512xf32>
    %16 = math.sqrt %15 : vector<24x512xf32>
    %c0_7 = arith.constant 0 : index
    %c0_8 = arith.constant 0 : index
    %17 = vector.load %arg4[%c0_7, %c0_8] : memref<512x128xf32, #tpu.memory_space<vmem>>, vector<512x128xf32>
    %cst_9 = arith.constant dense<0.000000e+00> : vector<24x128xf32>
    %18 = tpu.matmul %16, %17, %cst_9 {dimension_numbers = #tpu.dot_dimension_numbers<[1], [0], [0], [1], [0, 0, 1, 1], [], []>} : vector<24x512xf32>, vector<512x128xf32>, vector<24x128xf32> -> vector<24x128xf32>
    %c0_10 = arith.constant 0 : index
    %c0_11 = arith.constant 0 : index
    %c0_12 = arith.constant 0 : index
    %19 = vector.load %arg5[%c0_10, %c0_11, %c0_12] : memref<1x24x128xf32, #tpu.memory_space<vmem>>, vector<1x24x128xf32>
    %20 = vector.shape_cast %19 : vector<1x24x128xf32> to vector<24x128xf32>
    %21 = vector.shape_cast %18 : vector<24x128xf32> to vector<1x24x128xf32>
    tpu.vector_store %arg5[%c0_10, %c0_11, %c0_12], %21 {strides = array<i32>} : memref<1x24x128xf32, #tpu.memory_space<vmem>>, vector<1x24x128xf32>,
    return
  }
  func.func @transform_0(%arg0: i32, %arg1: i32) -> (i32, i32, i32) {
    %c0_i32 = arith.constant 0 : i32
    %c0_i32_0 = arith.constant 0 : i32
    return %arg0, %arg1, %c0_i32 : i32, i32, i32
  }
  func.func @transform_1(%arg0: i32, %arg1: i32) -> (i32, i32) {
    %c0_i32 = arith.constant 0 : i32
    %c0_i32_0 = arith.constant 0 : i32
    %c0_i32_1 = arith.constant 0 : i32
    return %c0_i32, %c0_i32_0 : i32, i32
  }
  func.func @transform_2(%arg0: i32, %arg1: i32) -> (i32, i32) {
    %c0_i32 = arith.constant 0 : i32
    %c0_i32_0 = arith.constant 0 : i32
    %c0_i32_1 = arith.constant 0 : i32
    return %c0_i32, %c0_i32_0 : i32, i32
  }
  func.func @transform_3(%arg0: i32, %arg1: i32) -> (i32, i32, i32) {
    %c0_i32 = arith.constant 0 : i32
    %c0_i32_0 = arith.constant 0 : i32
    return %arg0, %arg1, %c0_i32 : i32, i32, i32
  }
}

</mosaic_0001>

<bundles_post_ra>
// kernel: tpu_custom_call.1
= control target key start
LH: loop header
LB: loop body
LE: loop exit
PB: predicated region body
PF: predicated region fallthrough
CT: control target
= control target key end

     0   :  { %8 = vsyncpa [#allocation3], 0  ;;  %s9236_s0 = inlined_call_operand.hbm [shape: f32[2,24,1024], index: 0, kind: input, shape index: {}]   ;;  %s9237_s1 = inlined_call_operand.hbm [shape: bf16[1024,1024], index: 1, kind: input, shape index: {}]   ;;  %s9238_s2 = inlined_call_operand.hbm [shape: f32[512,128], index: 2, kind: input, shape index: {}]   ;;  %s9239_s3 = inlined_call_operand.hbm [shape: f32[2,24,128], index: 3, kind: output, shape index: {}]  }
   0x1   :  { %10 = vsyncpa [#allocation3 + $0x1], 0 }
   0x2   :  { %11 = vsyncpa [#allocation6], 0 }
   0x3   :  { %12 = vsyncpa [#allocation4], 0 }
   0x4   :  { %14 = vsyncpa [#allocation4 + $0x1], 0  ;;  %s6441_s12 = smov 0   ;;  %s6443_s13 = smov 0  }
   0x5   :  { %s6445_s14 = smov 0   ;;  %s6447_s15 = smov 0  }
   0x6   :  { %s6449_s16 = smov 0   ;;  %s6451_s17 = smov 0  }
   0x7 LB: > { %s5516_s18 = sadd.s32 4294967295, %s6407_s17   ;;  %s5517_s19 = sadd.s32 4294967294, %s6407_s17   ;;  %s6407_s17 = sphi %s6451_s17, %s20_s17   ;;  %s6403_s16 = sphi %s6449_s16, %s10773_s16   ;;  %s6399_s15 = sphi %s6447_s15, %s10772_s15   ;;  %s6395_s14 = sphi %s6445_s14, %s10771_s14   ;;  %s6391_s13 = sphi %s6443_s13, %s10770_s13   ;;  %s6387_s12 = sphi %s6441_s12, %s10769_s12  }
   0x8   : > { %p54_p0 = scmp.ne.s32.totalorder %s6391_s13, %s6387_s12  ;;  %p6475_p1 = scmp.eq.s32.totalorder %s5516_s18, 0 }
   0x9   : > { %p6479_p2 = scmp.eq.s32.totalorder %s5516_s18, 1  ;;  %p128_p3 = scmp.eq.s32.totalorder %s5517_s19, 1 }
   0xa   : > { %s9743_s20 = scalar_select %p6475_p1, 1, 0 }
   0xb   : > { %p6485_p4 = por %p6475_p1, %p54_p0  ;;  %p5518_p5 = scmp.ge.s32.totalorder %s6407_s17, 1 }
   0xc   : > { %p6490_p6 = por %p128_p3, %p54_p0  ;;  %p135_p7 = scmp.lt.s32.totalorder %s6407_s17, 3 }
   0xd   : > { %s9745_s22 = scalar_select %p6485_p4, 1, 0 }
   0xe   : > { %s9746_s23 = scalar_select %p6490_p6, 1, 0 }
   0xf   : > { %p6495_p8 = pnand %p5518_p5, %p135_p7  ;;  %s6409_s25 = smov [#allocation5]  }
  0x10   : > { %s147_s26 = sshll.u32 %s6409_s25, 4  ;;  %s6410_s28 = smov [#allocation7]   ;;  %s148_s26 = int_to_ptr.vmem [resolvable:$true] %s147_s26 }
  0x11   : > { %p6140_p9 = pneg %p6495_p8  ;;  %s160_s29 = sshll.u32 %s6410_s28, 4  ;;  %s161_s29 = int_to_ptr.vmem [resolvable:$true] %s160_s29 }
  0x12   : > { %s6254_s30 = scalar_lea.vmem %s148_s26, 65536  ;;  %p6262_p5 = scmp.lt.s32.totalorder %s148_s26, %s148_s26 }
  0x13   : > { %p6504_p11 = pnand %p6140_p9, %p6475_p1  ;;  %p6255_p13 = scmp.ne.s32.totalorder %s148_s26, %s6254_s30 }
  0x14   : > { %p6263_p7 = scmp.lt.s32.totalorder %s6254_s30, %s6254_s30 }
  0x15   : > { %p6245_p12 = pneg %p6504_p11 }
  0x16   : > { %p6264_p10 = por %p6263_p7, %p6262_p5 }
  0x17   : > { %p6257_p0 = pnand %p6255_p13, %p6245_p12 }
  0x19   : > { %p6258_p3 = pneg %p6257_p0 }
  0x1b   : > { %p6265_p9 = pnand %p6264_p10, %p6258_p3 }
  0x1d   : > { %6268 = shalt.err (!%p6265_p9)
}
  0x1e   : > { %s6411_s4 = smov 512   ;;  %s6412_s5 = smov 32  }
  0x1f   : > { %6143 = dma.hbm_to_vmem [thread:$0]  (!%p6504_p11), %s9237_s1, 65536, %s148_s26, [#allocation6], %s6411_s4, %s6411_s4, %s6412_s5  }
  0x20   : > { %s6280_s8 = scalar_lea.vmem %s161_s29, 8192  ;;  %p6288_p1 = scmp.lt.s32.totalorder %s161_s29, %s161_s29 }
  0x21   : > { %p6281_p6 = scmp.ne.s32.totalorder %s161_s29, %s6280_s8  ;;  %p6289_p4 = scmp.lt.s32.totalorder %s6280_s8, %s6280_s8 }
  0x23   : > { %p6283_p13 = pnand %p6281_p6, %p6245_p12  ;;  %p6290_p5 = por %p6289_p4, %p6288_p1 }
  0x25   : > { %p6284_p0 = pneg %p6283_p13 }
  0x27   : > { %p6291_p10 = pnand %p6290_p5, %p6284_p0 }
  0x29   : > { %6294 = shalt.err (!%p6291_p10)
}
  0x2a   : > { %s6413_s9 = smov 128   ;;  %s6414_s10 = smov 8  }
  0x2b   : > { %6146 = dma.hbm_to_vmem [thread:$0]  (!%p6504_p11), %s9238_s2, 8192, %s161_s29, [#allocation6], %s6413_s9, %s6413_s9, %s6414_s10  }
  0x2c   : > { %s32_s19 = sadd.s32 1, %s6403_s16  ;;  %s41_s25 = sadd.s32 1, %s6395_s14 }
  0x2d   : > { %p34_p1 = scmp.ge.s32.totalorder %s32_s19, 2  ;;  %p48_p4 = scmp.ne.s32.totalorder %s6395_s14, %s6391_s13 }
  0x2e   : > { %p49_p6 = scmp.eq.s32.totalorder %s6407_s17, 0  ;;  %p6157_p12 = scmp.lt.s32.totalorder %s6407_s17, 2 }
  0x2f   : > { %s10775_s19 = smov (%p34_p1, %s32_s19), 0  ;;  %p6536_p7 = por %p6479_p2, %p48_p4 }
  0x30   : > { %p50_p3 = por %p49_p6, %p48_p4  ;;  %s36_s27 = ssub.s32 %s6403_s16, %s10775_s19 }
  0x31   : > { %s174_s28 = sand.u32 1, %s6395_s14   ;;  %p39_p9 = scmp.eq.s32.totalorder %s36_s27, 0 }
  0x32   : > { %s6123_s29 = smul.u32 192, %s174_s28  ;;  %p6543_p11 = pnand %p6157_p12, %p50_p3 }
  0x33   : > { %s6548_s4 = scalar_select %p39_p9, %s6395_s14, %s41_s25  }
  0x34   : > { %s6124_s5 = smul.u32 3072, %s6403_s16  ;;  %s178_s6 = scalar_lea.vmem [#allocation2], %s6123_s29 }
  0x35   : > { %s188_s7 = sshll.u32 %s178_s6, 4  ;;  %s175_s10 = scalar_lea.sflag [#allocation3], %s174_s28  ;;  %s189_s7 = int_to_ptr.vmem [resolvable:$true] %s188_s7 }
  0x36   : > { %s187_s9 = scalar_lea.hbm %s9236_s0, %s6124_s5  ;;  %p6297_p2 = pneg %p6543_p11 }
  0x37   : > { %s6308_s11 = scalar_lea.vmem %s189_s7, 3072  ;;  %s6415_s18 = smov [#allocation2]  }
  0x38   : > { %p6309_p13 = scmp.ne.s32.totalorder %s189_s7, %s6308_s11  ;;  %s6313_s27 = sshll.u32 %s6415_s18, 4  ;;  %s6314_s27 = int_to_ptr.vmem [resolvable:$false] %s6313_s27 }
  0x39   : > { %s6315_s25 = scalar_lea.vmem %s6314_s27, 6144  ;;  %p6316_p10 = scmp.lt.s32.totalorder %s189_s7, %s6314_s27 }
  0x3a   : > { %p6311_p0 = pnand %p6309_p13, %p6297_p2  ;;  %p6317_p1 = scmp.lt.s32.totalorder %s6315_s25, %s6308_s11 }
  0x3c   : > { %p6312_p5 = pneg %p6311_p0  ;;  %p6318_p4 = por %p6317_p1, %p6316_p10 }
  0x3e   : > { %p6319_p6 = pnand %p6318_p4, %p6312_p5 }
  0x40   : > { %6322 = shalt.err (!%p6319_p6)
}
  0x41   : > { %s6416_s29 = smov 1024   ;;  %s6417_s5 = smov 64  }
  0x42   : > { %6150 = dma.hbm_to_vmem [thread:$0]  (!%p6543_p11), %s187_s9, 3072, %s189_s7, %s175_s10, %s6416_s29, %s6416_s29, %s6417_s5  }
  0x43   : > { %200 = sbr.rel (%p6495_p8) target bundleno = 1556 (0x614), region = 32 }
  0x48   : > { %s6561_s28 = sand.u32 1, %s6391_s13   ;;  %p9751_p12 = scmp.ne.s32.totalorder %s9745_s22, 0 }
  0x49   : > { %s6125_s6 = smul.u32 192, %s6561_s28  ;;  %s203_s8 = scalar_lea.sflag [#allocation3], %s6561_s28 }
  0x4b   : > { %s6565_s21 = scalar_lea.vmem [#allocation2], %s6125_s6 }
  0x4c   : > { %6374 = dma.done.wait (%p9751_p12), %s203_s8, 3072  }
  0x4d   : > { %6376 = vsyncadd (%p9751_p12), %s203_s8, 4294964224  ;;  %p9752_p3 = scmp.ne.s32.totalorder %s9743_s20, 0 }
  0x4f   : > { %6378 = dma.done.wait (%p9752_p3), [#allocation6], 73728  }
  0x50   : > { %6380 = vsyncadd (%p9752_p3), [#allocation6], 4294893568  ;;  %v399_v0 = vld [vmem:[#allocation5 + $0x1c0] sm:$0xff]  ;;  %v240_v54 = vld [vmem:[%s6565_s21 + $0x8] sm:$0xff]  ;;  %s6126_s20 = smul.u32 24, %s6561_s28  ;;  %s5395_s11 = scalar_lea.sflag [#allocation4], %s6561_s28 }
  0x51   : > { %v403_v1 = vld [vmem:[#allocation5 + $0x1e0] sm:$0xff]  ;;  %v248_v55 = vld [vmem:[%s6565_s21 + $0x48] sm:$0xff]  ;;  %v242_v59 = vld [vmem:[%s6565_s21 + $0x18] sm:$0xff]  ;;  %s6127_s30 = smul.u32 384, %s6399_s15  ;;  %s6418_s15 = smov [#allocation8]  }
  0x52   : > { %v527_v2 = vld [vmem:[#allocation5 + $0x5c0] sm:$0xff]  ;;  %v6575_v3 = vcombine.high %v399_v0, %v403_v1  ;;  %v6577_v5 = vcombine.low %v399_v0, %v403_v1  ;;  %v6651_v58 = vpack.c.bf16 %v248_v55, %v240_v54  ;;  %v250_v60 = vld [vmem:[%s6565_s21 + $0x58] sm:$0xff]  ;;  %s236_s22 = scalar_lea.vmem [#allocation8], %s6126_s20  ;;  %s6327_s27 = sshll.u32 %s6418_s15, 4  ;;  %s6328_s27 = int_to_ptr.vmem [resolvable:$false] %s6327_s27 }
  0x53   : > { %v531_v4 = vld [vmem:[#allocation5 + $0x5e0] sm:$0xff]  ;;  %v6655_v63 = vpack.c.bf16 %v250_v60, %v242_v59  ;;  %s5410_s24 = sshll.u32 %s236_s22, 4  ;;  %s9188_s10 = scalar_lea.hbm %s9239_s3, %s6127_s30  ;;  %s9183_s24 = int_to_ptr.vmem [resolvable:$true] %s5410_s24 }
  0x54   : > { %v391_v6 = vld [vmem:[#allocation5 + $0x180] sm:$0xff]  ;;  %v6579_v8 = vcombine.high %v527_v2, %v531_v4  ;;  %v6581_v9 = vcombine.low %v527_v2, %v531_v4  ;;  %3415 = vmatprep.subr.bf16.mxu0 %v6575_v3  ;;  %v280_v1 = vunpack.c.l.bf16 %v6651_v58  ;;  %v288_v2 = vunpack.c.h.bf16 %v6651_v58  ;;  %s6323_s18 = scalar_lea.vmem %s9183_s24, 384  ;;  %s6329_s25 = scalar_lea.vmem %s6328_s27, 768 }
  0x55   : > { %v395_v7 = vld [vmem:[#allocation5 + $0x1a0] sm:$0xff]  ;;  %3416 = vmatpush1.bf16.msra.mxu0 %v6577_v5  ;;  %p6324_p8 = scmp.ne.s32.totalorder %s9183_s24, %s6323_s18  ;;  %p6330_p2 = scmp.lt.s32.totalorder %s9183_s24, %s6328_s27 }
  0x56   : > { %v6583_v10 = vcombine.high %v391_v6, %v395_v7  ;;  %v519_v11 = vld [vmem:[#allocation5 + $0x580] sm:$0xff]  ;;  %3466 = vmatprep.subr.bf16.mxu1 %v6579_v8  ;;  %v6590_v18 = vcombine.low %v391_v6, %v395_v7  ;;  %v282_v7 = vunpack.c.l.bf16 %v6655_v63  ;;  %p6331_p13 = scmp.lt.s32.totalorder %s6329_s25, %s6323_s18 }
  0x57   : > { %v523_v12 = vld [vmem:[#allocation5 + $0x5a0] sm:$0xff]  ;;  %3467 = vmatpush1.bf16.msra.mxu1 %v6581_v9  ;;  %p6325_p9 = pnand %p6324_p8, %p6536_p7 }
  0x58   : > { %v383_v13 = vld [vmem:[#allocation5 + $0x140] sm:$0xff]  ;;  %v6586_v14 = vcombine.high %v519_v11, %v523_v12  ;;  %3417 = vmatprep.subr.bf16.mxu0 %v6583_v10  ;;  %v6594_v19 = vcombine.low %v519_v11, %v523_v12  ;;  %v290_v11 = vunpack.c.h.bf16 %v6655_v63  ;;  %p6332_p0 = por %p6331_p13, %p6330_p2 }
  0x59   : > { %v387_v15 = vld [vmem:[#allocation5 + $0x160] sm:$0xff]  ;;  %3418 = vmatpush1.bf16.msra.mxu0 %v6590_v18  ;;  %p6326_p11 = pneg %p6325_p9 }
  0x5a   : > { %v511_v16 = vld [vmem:[#allocation5 + $0x540] sm:$0xff]  ;;  %v6596_v20 = vcombine.high %v383_v13, %v387_v15  ;;  %3468 = vmatprep.subr.bf16.mxu1 %v6586_v14  ;;  %v6602_v26 = vcombine.low %v383_v13, %v387_v15 }
  0x5b   : > { %v515_v17 = vld [vmem:[#allocation5 + $0x560] sm:$0xff]  ;;  %3469 = vmatpush1.bf16.msra.mxu1 %v6594_v19  ;;  %p6333_p5 = pnand %p6332_p0, %p6326_p11 }
  0x5c   : > { %v6599_v21 = vcombine.high %v511_v16, %v515_v17  ;;  %v375_v22 = vld [vmem:[#allocation5 + $0x100] sm:$0xff]  ;;  %3419 = vmatprep.subr.bf16.mxu0 %v6596_v20  ;;  %v6606_v27 = vcombine.low %v511_v16, %v515_v17  ;;  %v304_v16 = vsub.f32 %v240_v54, %v280_v1  ;;  %v312_v17 = vsub.f32 %v248_v55, %v288_v2 }
  0x5d   : > { %v379_v23 = vld [vmem:[#allocation5 + $0x120] sm:$0xff]  ;;  %3420 = vmatpush1.bf16.msra.mxu0 %v6602_v26 }
  0x5e   : > { %v503_v24 = vld [vmem:[#allocation5 + $0x500] sm:$0xff]  ;;  %v6608_v28 = vcombine.high %v375_v22, %v379_v23  ;;  %3470 = vmatprep.subr.bf16.mxu1 %v6599_v21  ;;  %v6614_v34 = vcombine.low %v375_v22, %v379_v23 }
  0x5f   : > { %v507_v25 = vld [vmem:[#allocation5 + $0x520] sm:$0xff]  ;;  %3471 = vmatpush1.bf16.msra.mxu1 %v6606_v27 }
  0x60   : > { %v6611_v29 = vcombine.high %v503_v24, %v507_v25  ;;  %v367_v30 = vld [vmem:[#allocation5 + $0xc0] sm:$0xff]  ;;  %3421 = vmatprep.subr.bf16.mxu0 %v6608_v28  ;;  %v6618_v35 = vcombine.low %v503_v24, %v507_v25  ;;  %v306_v24 = vsub.f32 %v242_v59, %v282_v7  ;;  %v314_v25 = vsub.f32 %v250_v60, %v290_v11 }
  0x61   : > { %v371_v31 = vld [vmem:[#allocation5 + $0xe0] sm:$0xff]  ;;  %3422 = vmatpush1.bf16.msra.mxu0 %v6614_v34 }
  0x62   : > { %v495_v32 = vld [vmem:[#allocation5 + $0x4c0] sm:$0xff]  ;;  %v6620_v36 = vcombine.high %v367_v30, %v371_v31  ;;  %3472 = vmatprep.subr.bf16.mxu1 %v6611_v29  ;;  %v6626_v42 = vcombine.low %v367_v30, %v371_v31  ;;  %v6676_v31 = vpack.c.bf16 %v312_v17, %v304_v16 }
  0x63   : > { %v499_v33 = vld [vmem:[#allocation5 + $0x4e0] sm:$0xff]  ;;  %3473 = vmatpush1.bf16.msra.mxu1 %v6618_v35 }
  0x64   : > { %v6623_v37 = vcombine.high %v495_v32, %v499_v33  ;;  %v359_v38 = vld [vmem:[#allocation5 + $0x80] sm:$0xff]  ;;  %9754 = vst [vmem:[#allocation13_spill] sm:$0xff] %v6626_v42  ;;  %3423 = vmatprep.subr.bf16.mxu0 %v6620_v36  ;;  %v6630_v43 = vcombine.low %v495_v32, %v499_v33  ;;  %3447 = vmatprep.mubr.bf16.mxu0 %v6676_v31 }
  0x65   : > { %v363_v39 = vld [vmem:[#allocation5 + $0xa0] sm:$0xff]  ;;  %3424 = vmatpush1.bf16.msra.mxu0 %v6626_v42  ;;  %v532_v42 = vld [vmem:[#allocation5 + $0x5e8] sm:$0xff] }
  0x66   : > { %9753 = vst [vmem:[#allocation12_spill] sm:$0xff] %v6623_v37  ;;  %v487_v40 = vld [vmem:[#allocation5 + $0x480] sm:$0xff]  ;;  %9755 = vst [vmem:[#allocation14_spill] sm:$0xff] %v6630_v43  ;;  %v6632_v44 = vcombine.high %v359_v38, %v363_v39  ;;  %3474 = vmatprep.subr.bf16.mxu1 %v6623_v37  ;;  %v6638_v50 = vcombine.low %v359_v38, %v363_v39  ;;  %v6684_v38 = vpack.c.bf16 %v314_v25, %v306_v24 }
  0x67   : > { %v491_v41 = vld [vmem:[#allocation5 + $0x4a0] sm:$0xff]  ;;  %3475 = vmatpush1.bf16.msra.mxu1 %v6630_v43  ;;  %v528_v43 = vld [vmem:[#allocation5 + $0x5c8] sm:$0xff] }
  0x68   : > { %9756 = vst [vmem:[#allocation15_spill] sm:$0xff] %v6632_v44  ;;  %v6635_v45 = vcombine.high %v487_v40, %v491_v41  ;;  %v351_v46 = vld [vmem:[#allocation5 + $0x40] sm:$0xff]  ;;  %9758 = vst [vmem:[#allocation17_spill] sm:$0xff] %v6638_v50  ;;  %3425 = vmatprep.subr.bf16.mxu0 %v6632_v44  ;;  %v6642_v51 = vcombine.low %v487_v40, %v491_v41  ;;  %3498 = vmatprep.mubr.bf16.mxu1 %v6684_v38 }
  0x69   : > { %v355_v47 = vld [vmem:[#allocation5 + $0x60] sm:$0xff]  ;;  %3426 = vmatpush1.bf16.msra.mxu0 %v6638_v50  ;;  %v246_v50 = vld [vmem:[%s6565_s21 + $0x38] sm:$0xff] }
  0x6a   : > { %9757 = vst [vmem:[#allocation16_spill] sm:$0xff] %v6635_v45  ;;  %v479_v48 = vld [vmem:[#allocation5 + $0x440] sm:$0xff]  ;;  %9759 = vst [vmem:[#allocation18_spill] sm:$0xff] %v6642_v51  ;;  %v6644_v52 = vcombine.high %v351_v46, %v355_v47  ;;  %3476 = vmatprep.subr.bf16.mxu1 %v6635_v45  ;;  %v6658_v0 = vcombine.low %v351_v46, %v355_v47  ;;  %v254_v45 = vld [vmem:[%s6565_s21 + $0x78] sm:$0xff] }
  0x6b   : > { %v483_v49 = vld [vmem:[#allocation5 + $0x460] sm:$0xff]  ;;  %3477 = vmatpush1.bf16.msra.mxu1 %v6642_v51 }
  0x6c   : > { %9760 = vst [vmem:[#allocation19_spill] sm:$0xff] %v6644_v52  ;;  %v343_v53 = vld [vmem:[#allocation5] sm:$0xff]  ;;  %v6649_v56 = vcombine.high %v479_v48, %v483_v49  ;;  %9762 = vst [vmem:[#allocation21_spill] sm:$0xff] %v6658_v0  ;;  %3427 = vmatprep.subr.bf16.mxu0 %v6644_v52  ;;  %v6664_v4 = vcombine.low %v479_v48, %v483_v49 }
  0x6d   : > { %v347_v57 = vld [vmem:[#allocation5 + $0x20] sm:$0xff]  ;;  %3428 = vmatpush1.bf16.msra.mxu0 %v6658_v0  ;;  %v252_v0 = vld [vmem:[%s6565_s21 + $0x68] sm:$0xff] }
  0x6e   : > { %9761 = vst [vmem:[#allocation20_spill] sm:$0xff] %v6649_v56  ;;  %v471_v61 = vld [vmem:[#allocation5 + $0x400] sm:$0xff]  ;;  %9763 = vst [vmem:[#allocation22_spill] sm:$0xff] %v6664_v4  ;;  %v6666_v6 = vcombine.high %v343_v53, %v347_v57  ;;  %3478 = vmatprep.subr.bf16.mxu1 %v6649_v56  ;;  %v6674_v30 = vcombine.low %v343_v53, %v347_v57 }
  0x6f   : > { %v475_v62 = vld [vmem:[#allocation5 + $0x420] sm:$0xff]  ;;  %3479 = vmatpush1.bf16.msra.mxu1 %v6664_v4 }
  0x70   : > { %9764 = vst [vmem:[#allocation23_spill] sm:$0xff] %v6666_v6  ;;  %v6671_v12 = vcombine.high %v471_v61, %v475_v62  ;;  %v463_v13 = vld [vmem:[#allocation5 + $0x3c0] sm:$0xff]  ;;  %9766 = vst [vmem:[#allocation25_spill] sm:$0xff] %v6674_v30  ;;  %3429 = vmatprep.subr.bf16.mxu0 %v6666_v6  ;;  %v6680_v32 = vcombine.low %v471_v61, %v475_v62 }
  0x71   : > { %v467_v15 = vld [vmem:[#allocation5 + $0x3e0] sm:$0xff]  ;;  %3430 = vmatpush1.bf16.msra.mxu0 %v6674_v30  ;;  %v257_v30 = vld [vmem:[%s6565_s21 + $0x90] sm:$0xff] }
  0x72   : > { %9765 = vst [vmem:[#allocation24_spill] sm:$0xff] %v6671_v12  ;;  %v591_v22 = vld [vmem:[#allocation5 + $0x7c0] sm:$0xff]  ;;  %9767 = vst [vmem:[#allocation26_spill] sm:$0xff] %v6680_v32  ;;  %v6682_v33 = vcombine.high %v463_v13, %v467_v15  ;;  %3480 = vmatprep.subr.bf16.mxu1 %v6671_v12  ;;  %v6692_v48 = vcombine.low %v463_v13, %v467_v15  ;;  %v6804_v51 = vpack.c.bf16 %v257_v30, %v257_v30 }
  0x73   : > { %v595_v23 = vld [vmem:[#allocation5 + $0x7e0] sm:$0xff]  ;;  %3481 = vmatpush1.bf16.msra.mxu1 %v6680_v32 }
  0x74   : > { %9768 = vst [vmem:[#allocation27_spill] sm:$0xff] %v6682_v33  ;;  %v6687_v39 = vcombine.high %v591_v22, %v595_v23  ;;  %v455_v40 = vld [vmem:[#allocation5 + $0x380] sm:$0xff]  ;;  %9770 = vst [vmem:[#allocation29_spill] sm:$0xff] %v6692_v48  ;;  %3431 = vmatprep.subr.bf16.mxu0 %v6682_v33  ;;  %v6696_v49 = vcombine.low %v591_v22, %v595_v23 }
  0x75   : > { %v459_v41 = vld [vmem:[#allocation5 + $0x3a0] sm:$0xff]  ;;  %3432 = vmatpush2.bf16.msra.mxu0 %v6692_v48  ;;  %9804 = vst [vmem:[#allocation63_spill] sm:$0xff] %v6804_v51 }
  0x76   : > { %9769 = vst [vmem:[#allocation28_spill] sm:$0xff] %v6687_v39  ;;  %v583_v46 = vld [vmem:[#allocation5 + $0x780] sm:$0xff]  ;;  %9771 = vst [vmem:[#allocation30_spill] sm:$0xff] %v6696_v49  ;;  %v6698_v53 = vcombine.high %v455_v40, %v459_v41  ;;  %3482 = vmatprep.subr.bf16.mxu1 %v6687_v39  ;;  %v6704_v61 = vcombine.low %v455_v40, %v459_v41 }
  0x77   : > { %v587_v47 = vld [vmem:[#allocation5 + $0x7a0] sm:$0xff]  ;;  %3483 = vmatpush2.bf16.msra.mxu1 %v6696_v49 }
  0x78   : > { %9772 = vst [vmem:[#allocation31_spill] sm:$0xff] %v6698_v53  ;;  %v6701_v54 = vcombine.high %v583_v46, %v587_v47  ;;  %v447_v55 = vld [vmem:[#allocation5 + $0x340] sm:$0xff]  ;;  %9774 = vst [vmem:[#allocation33_spill] sm:$0xff] %v6704_v61  ;;  %3433 = vmatprep.subr.bf16.mxu0 %v6698_v53  ;;  %v6708_v62 = vcombine.low %v583_v46, %v587_v47 }
  0x79   : > { %v451_v57 = vld [vmem:[#allocation5 + $0x360] sm:$0xff]  ;;  %3434 = vmatpush2.bf16.msra.mxu0 %v6704_v61 }
  0x7a   : > { %9773 = vst [vmem:[#allocation32_spill] sm:$0xff] %v6701_v54  ;;  %v575_v59 = vld [vmem:[#allocation5 + $0x740] sm:$0xff]  ;;  %9775 = vst [vmem:[#allocation34_spill] sm:$0xff] %v6708_v62  ;;  %v6710_v1 = vcombine.high %v447_v55, %v451_v57  ;;  %3484 = vmatprep.subr.bf16.mxu1 %v6701_v54  ;;  %v6716_v16 = vcombine.low %v447_v55, %v451_v57 }
  0x7b   : > { %v579_v60 = vld [vmem:[#allocation5 + $0x760] sm:$0xff]  ;;  %3485 = vmatpush2.bf16.msra.mxu1 %v6708_v62 }
  0x7c   : > { %9776 = vst [vmem:[#allocation35_spill] sm:$0xff] %v6710_v1  ;;  %v6713_v2 = vcombine.high %v575_v59, %v579_v60  ;;  %v439_v7 = vld [vmem:[#allocation5 + $0x300] sm:$0xff]  ;;  %9778 = vst [vmem:[#allocation37_spill] sm:$0xff] %v6716_v16  ;;  %3435 = vmatprep.subr.bf16.mxu0 %v6710_v1  ;;  %v6720_v17 = vcombine.low %v575_v59, %v579_v60 }
  0x7d   : > { %v443_v11 = vld [vmem:[#allocation5 + $0x320] sm:$0xff]  ;;  %3436 = vmatpush2.bf16.msra.mxu0 %v6716_v16 }
  0x7e   : > { %9777 = vst [vmem:[#allocation36_spill] sm:$0xff] %v6713_v2  ;;  %v567_v13 = vld [vmem:[#allocation5 + $0x700] sm:$0xff]  ;;  %9779 = vst [vmem:[#allocation38_spill] sm:$0xff] %v6720_v17  ;;  %v6722_v22 = vcombine.high %v439_v7, %v443_v11  ;;  %3486 = vmatprep.subr.bf16.mxu1 %v6713_v2  ;;  %v6728_v46 = vcombine.low %v439_v7, %v443_v11 }
  0x7f   : > { %v571_v15 = vld [vmem:[#allocation5 + $0x720] sm:$0xff]  ;;  %3487 = vmatpush2.bf16.msra.mxu1 %v6720_v17  ;;  %v249_v17 = vld [vmem:[%s6565_s21 + $0x50] sm:$0xff] }
  0x80   : > { %9780 = vst [vmem:[#allocation39_spill] sm:$0xff] %v6722_v22  ;;  %v6725_v23 = vcombine.high %v567_v13, %v571_v15  ;;  %v431_v24 = vld [vmem:[#allocation5 + $0x2c0] sm:$0xff]  ;;  %9782 = vst [vmem:[#allocation41_spill] sm:$0xff] %v6728_v46  ;;  %3437 = vmatprep.subr.bf16.mxu0 %v6722_v22  ;;  %v6732_v47 = vcombine.low %v567_v13, %v571_v15  ;;  %v241_v22 = vld [vmem:[%s6565_s21 + $0x10] sm:$0xff] }
  0x81   : > { %v435_v25 = vld [vmem:[#allocation5 + $0x2e0] sm:$0xff]  ;;  %3438 = vmatpush2.bf16.msra.mxu0 %v6728_v46 }
  0x82   : > { %9781 = vst [vmem:[#allocation40_spill] sm:$0xff] %v6725_v23  ;;  %v559_v40 = vld [vmem:[#allocation5 + $0x6c0] sm:$0xff]  ;;  %9783 = vst [vmem:[#allocation42_spill] sm:$0xff] %v6732_v47  ;;  %v6734_v55 = vcombine.high %v431_v24, %v435_v25  ;;  %3488 = vmatprep.subr.bf16.mxu1 %v6725_v23  ;;  %v6740_v7 = vcombine.low %v431_v24, %v435_v25 }
  0x83   : > { %v563_v41 = vld [vmem:[#allocation5 + $0x6e0] sm:$0xff]  ;;  %3489 = vmatpush2.bf16.msra.mxu1 %v6732_v47  ;;  %v256_v47 = vld [vmem:[%s6565_s21 + $0x88] sm:$0xff] }
  0x84   : > { %9784 = vst [vmem:[#allocation43_spill] sm:$0xff] %v6734_v55  ;;  %v6737_v57 = vcombine.high %v559_v40, %v563_v41  ;;  %v423_v59 = vld [vmem:[#allocation5 + $0x280] sm:$0xff]  ;;  %9786 = vst [vmem:[#allocation45_spill] sm:$0xff] %v6740_v7  ;;  %3439 = vmatprep.subr.bf16.mxu0 %v6734_v55  ;;  %v6746_v15 = vcombine.low %v559_v40, %v563_v41  ;;  %v6761_v40 = vpack.c.bf16 %v249_v17, %v241_v22  ;;  %v258_v41 = vld [vmem:[%s6565_s21 + $0x98] sm:$0xff] }
  0x85   : > { %v427_v60 = vld [vmem:[#allocation5 + $0x2a0] sm:$0xff]  ;;  %3440 = vmatpush2.bf16.msra.mxu0 %v6740_v7 }
  0x86   : > { %9785 = vst [vmem:[#allocation44_spill] sm:$0xff] %v6737_v57  ;;  %v551_v2 = vld [vmem:[#allocation5 + $0x680] sm:$0xff]  ;;  %9787 = vst [vmem:[#allocation46_spill] sm:$0xff] %v6746_v15  ;;  %v6748_v23 = vcombine.high %v423_v59, %v427_v60  ;;  %3490 = vmatprep.subr.bf16.mxu1 %v6737_v57  ;;  %v6759_v55 = vcombine.low %v423_v59, %v427_v60  ;;  %v6773_v59 = vpack.c.bf16 %v256_v47, %v256_v47 }
  0x87   : > { %v555_v16 = vld [vmem:[#allocation5 + $0x6a0] sm:$0xff]  ;;  %9792 = vst [vmem:[#allocation51_spill] sm:$0xff] %v6761_v40  ;;  %3491 = vmatpush2.bf16.msra.mxu1 %v6746_v15  ;;  %v289_v39 = vunpack.c.h.bf16 %v6761_v40 }
  0x88   : > { %v239_v11 = vld [vmem:[%s6565_s21] sm:$0xff]  ;;  %9788 = vst [vmem:[#allocation47_spill] sm:$0xff] %v6748_v23  ;;  %v6753_v1 = vcombine.high %v551_v2, %v555_v16  ;;  %9791 = vst [vmem:[#allocation50_spill] sm:$0xff] %v6759_v55  ;;  %3441 = vmatprep.subr.bf16.mxu0 %v6748_v23  ;;  %v6766_v57 = vcombine.low %v551_v2, %v555_v16  ;;  %v6777_v2 = vpack.c.bf16 %v258_v41, %v258_v41 }
  0x89   : > { %v247_v13 = vld [vmem:[%s6565_s21 + $0x40] sm:$0xff]  ;;  %9796 = vst [vmem:[#allocation55_spill] sm:$0xff] %v6773_v59  ;;  %3442 = vmatpush2.bf16.msra.mxu0 %v6759_v55  ;;  %v313_v52 = vsub.f32 %v249_v17, %v289_v39 }
  0x8a   : > { %9789 = vst [vmem:[#allocation48_spill] sm:$0xff] %v6753_v1  ;;  %v415_v24 = vld [vmem:[#allocation5 + $0x240] sm:$0xff]  ;;  %v6755_v61 = vpack.c.bf16 %v247_v13, %v239_v11  ;;  %9793 = vst [vmem:[#allocation52_spill] sm:$0xff] %v6766_v57  ;;  %3492 = vmatprep.subr.bf16.mxu1 %v6753_v1  ;;  %v281_v1 = vunpack.c.l.bf16 %v6761_v40 }
  0x8b   : > { %v419_v25 = vld [vmem:[#allocation5 + $0x260] sm:$0xff]  ;;  %9797 = vst [vmem:[#allocation56_spill] sm:$0xff] %v6777_v2  ;;  %3493 = vmatpush2.bf16.msra.mxu1 %v6766_v57  ;;  %v296_v57 = vunpack.c.l.bf16 %v6773_v59 }
  0x8c   : > { %v543_v46 = vld [vmem:[#allocation5 + $0x640] sm:$0xff]  ;;  %9790 = vst [vmem:[#allocation49_spill] sm:$0xff] %v6755_v61  ;;  %v6768_v54 = vcombine.high %v415_v24, %v419_v25  ;;  %v279_v15 = vunpack.c.l.bf16 %v6755_v61  ;;  %v287_v23 = vunpack.c.h.bf16 %v6755_v61  ;;  %v6780_v16 = vcombine.low %v415_v24, %v419_v25 }
  0x8d   : > { %v547_v62 = vld [vmem:[#allocation5 + $0x660] sm:$0xff]  ;;  %v305_v56 = vsub.f32 %v241_v22, %v281_v1  ;;  %v320_v1 = vsub.f32 %v256_v47, %v296_v57 }
  0x8e   : > { %9794 = vst [vmem:[#allocation53_spill] sm:$0xff] %v6768_v54  ;;  %v6771_v53 = vcombine.high %v543_v46, %v547_v62  ;;  %v407_v49 = vld [vmem:[#allocation5 + $0x200] sm:$0xff]  ;;  %9798 = vst [vmem:[#allocation57_spill] sm:$0xff] %v6780_v16  ;;  %3443 = vmatprep.subr.bf16.mxu0 %v6768_v54  ;;  %v6787_v32 = vcombine.low %v543_v46, %v547_v62  ;;  %v303_v12 = vsub.f32 %v239_v11, %v279_v15  ;;  %v244_v46 = vld [vmem:[%s6565_s21 + $0x28] sm:$0xff] }
  0x8f   : > { %v411_v7 = vld [vmem:[#allocation5 + $0x220] sm:$0xff]  ;;  %v311_v6 = vsub.f32 %v247_v13, %v287_v23  ;;  %v298_v62 = vunpack.c.l.bf16 %v6777_v2  ;;  %3444 = vmatpush2.bf16.msra.mxu0 %v6780_v16  ;;  %v6817_v39 = vpack.c.bf16 %v252_v0, %v244_v46 }
  0x90   : > { %9795 = vst [vmem:[#allocation54_spill] sm:$0xff] %v6771_v53  ;;  %v535_v60 = vld [vmem:[#allocation5 + $0x600] sm:$0xff]  ;;  %9799 = vst [vmem:[#allocation58_spill] sm:$0xff] %v6787_v32  ;;  %v6789_v61 = vcombine.high %v407_v49, %v411_v7  ;;  %3494 = vmatprep.subr.bf16.mxu1 %v6771_v53  ;;  %v6802_v53 = vcombine.low %v407_v49, %v411_v7 }
  0x91   : > { %v539_v48 = vld [vmem:[#allocation5 + $0x620] sm:$0xff]  ;;  %3495 = vmatpush2.bf16.msra.mxu1 %v6787_v32  ;;  %9808 = vst [vmem:[#allocation67_spill] sm:$0xff] %v6817_v39  ;;  %v6819_v17 = vpack.c.bf16 %v311_v6, %v303_v12  ;;  %v322_v59 = vsub.f32 %v258_v41, %v298_v62 }
  0x92   : > { %v255_v33 = vld [vmem:[%s6565_s21 + $0x80] sm:$0xff]  ;;  %9800 = vst [vmem:[#allocation59_spill] sm:$0xff] %v6789_v61  ;;  %v6793_v24 = vcombine.high %v535_v60, %v539_v48  ;;  %9803 = vst [vmem:[#allocation62_spill] sm:$0xff] %v6802_v53  ;;  %3445 = vmatprep.subr.bf16.mxu0 %v6789_v61  ;;  %v6810_v23 = vcombine.low %v535_v60, %v539_v48  ;;  %v6822_v48 = vpack.c.bf16 %v254_v45, %v246_v50 }
  0x93   : > { %v655_v25 = vld [vmem:[#allocation5 + $0x9c0] sm:$0xff]  ;;  %v6796_v4 = vpack.c.bf16 %v255_v33, %v255_v33  ;;  %3446 = vmatpush2.bf16.msra.mxu0 %v6802_v53  ;;  %v6825_v60 = vpack.c.bf16 %v313_v52, %v305_v56  ;;  %v297_v61 = vunpack.c.l.bf16 %v6804_v51  ;;  %v6839_v52 = vpack.c.bf16 %v320_v1, %v320_v1 }
  0x94   : > { %9801 = vst [vmem:[#allocation60_spill] sm:$0xff] %v6793_v24  ;;  %v659_v55 = vld [vmem:[#allocation5 + $0x9e0] sm:$0xff]  ;;  %9805 = vst [vmem:[#allocation64_spill] sm:$0xff] %v6810_v23  ;;  %3496 = vmatprep.subr.bf16.mxu1 %v6793_v24  ;;  %v284_v56 = vunpack.c.l.bf16 %v6817_v39  ;;  %v286_v51 = vunpack.c.l.bf16 %v6822_v48 }
  0x95   : > { %v783_v40 = vld [vmem:[#allocation5 + $0xdc0] sm:$0xff]  ;;  %9802 = vst [vmem:[#allocation61_spill] sm:$0xff] %v6796_v4  ;;  %v6812_v11 = vcombine.high %v655_v25, %v659_v55  ;;  %v295_v2 = vunpack.c.l.bf16 %v6796_v4  ;;  %9809 = vst [vmem:[#allocation68_spill] sm:$0xff] %v6822_v48  ;;  %v6827_v24 = vcombine.low %v655_v25, %v659_v55  ;;  %3497 = vmatpush2.bf16.msra.mxu1 %v6810_v23  ;;  %v292_v55 = vunpack.c.h.bf16 %v6817_v39 }
  0x96   : > { %v787_v54 = vld [vmem:[#allocation5 + $0xde0] sm:$0xff]  ;;  %3448 = vmatmul.mubr.bf16.vlgmr.msra.gmra.mxu0 %v6819_v17  ;;  %v294_v4 = vunpack.c.h.bf16 %v6822_v48 }
  0x97   : > { %9806 = vst [vmem:[#allocation65_spill] sm:$0xff] %v6812_v11  ;;  %v6815_v13 = vcombine.high %v783_v40, %v787_v54  ;;  %v647_v49 = vld [vmem:[#allocation5 + $0x980] sm:$0xff]  ;;  %9810 = vst [vmem:[#allocation69_spill] sm:$0xff] %v6827_v24  ;;  %3517 = vmatprep.subr.bf16.mxu0 %v6812_v11  ;;  %v6832_v6 = vcombine.low %v783_v40, %v787_v54  ;;  %v319_v54 = vsub.f32 %v255_v33, %v295_v2 }
  0x98   : > { %v651_v7 = vld [vmem:[#allocation5 + $0x9a0] sm:$0xff]  ;;  %v6844_v40 = vpack.c.bf16 %v322_v59, %v322_v59  ;;  %3499 = vmatmul.mubr.bf16.vlgmr.msra.gmra.mxu1 %v6825_v60  ;;  %3518 = vmatpush1.bf16.msra.mxu0 %v6827_v24  ;;  %v308_v24 = vsub.f32 %v244_v46, %v284_v56 }
  0x99   : > { %9807 = vst [vmem:[#allocation66_spill] sm:$0xff] %v6815_v13  ;;  %v775_v22 = vld [vmem:[#allocation5 + $0xd80] sm:$0xff]  ;;  %9811 = vst [vmem:[#allocation70_spill] sm:$0xff] %v6832_v6  ;;  %v6834_v12 = vcombine.high %v647_v49, %v651_v7  ;;  %3568 = vmatprep.subr.bf16.mxu1 %v6815_v13  ;;  %v6850_v1 = vcombine.low %v647_v49, %v651_v7  ;;  %v321_v13 = vsub.f32 %v257_v30, %v297_v61 }
  0x9a   : > { %v779_v15 = vld [vmem:[#allocation5 + $0xda0] sm:$0xff]  ;;  %3569 = vmatpush1.bf16.msra.mxu1 %v6832_v6  ;;  %3457 = vmatprep.mubr.bf16.mxu0 %v6839_v52  ;;  %v316_v49 = vsub.f32 %v252_v0, %v292_v55  ;;  %v6862_v61 = vpack.c.bf16 %v319_v54, %v319_v54 }
  0x9b   : > { %9812 = vst [vmem:[#allocation71_spill] sm:$0xff] %v6834_v12  ;;  %v6837_v47 = vcombine.high %v775_v22, %v779_v15  ;;  %v639_v57 = vld [vmem:[#allocation5 + $0x940] sm:$0xff]  ;;  %9814 = vst [vmem:[#allocation73_spill] sm:$0xff] %v6850_v1  ;;  %3519 = vmatprep.subr.bf16.mxu0 %v6834_v12  ;;  %v6854_v39 = vcombine.low %v775_v22, %v779_v15  ;;  %3508 = vmatprep.mubr.bf16.mxu1 %v6844_v40 }
  0x9c   : > { %v643_v41 = vld [vmem:[#allocation5 + $0x960] sm:$0xff]  ;;  %v310_v22 = vsub.f32 %v246_v50, %v286_v51  ;;  %v318_v15 = vsub.f32 %v254_v45, %v294_v4  ;;  %3520 = vmatpush1.bf16.msra.mxu0 %v6850_v1  ;;  %v6879_v51 = vpack.c.bf16 %v316_v49, %v308_v24 }
  0x9d   : > { %9813 = vst [vmem:[#allocation72_spill] sm:$0xff] %v6837_v47  ;;  %v767_v25 = vld [vmem:[#allocation5 + $0xd40] sm:$0xff]  ;;  %9815 = vst [vmem:[#allocation74_spill] sm:$0xff] %v6854_v39  ;;  %v6856_v33 = vcombine.high %v639_v57, %v643_v41  ;;  %3570 = vmatprep.subr.bf16.mxu1 %v6837_v47  ;;  %v6866_v12 = vcombine.low %v639_v57, %v643_v41  ;;  %v6868_v47 = vpack.c.bf16 %v321_v13, %v321_v13 }
  0x9e   : > { %v771_v62 = vld [vmem:[#allocation5 + $0xd60] sm:$0xff]  ;;  %3571 = vmatpush1.bf16.msra.mxu1 %v6854_v39  ;;  %3458 = vmatmul.mubr.bf16.gmra.mxu0 %v6862_v61  ;;  %v6882_v13 = vpack.c.bf16 %v318_v15, %v310_v22 }
  0x9f   : > { %9816 = vst [vmem:[#allocation75_spill] sm:$0xff] %v6856_v33  ;;  %v6859_v59 = vcombine.high %v767_v25, %v771_v62  ;;  %v631_v2 = vld [vmem:[#allocation5 + $0x900] sm:$0xff]  ;;  %9818 = vst [vmem:[#allocation77_spill] sm:$0xff] %v6866_v12  ;;  %3521 = vmatprep.subr.bf16.mxu0 %v6856_v33  ;;  %v6872_v46 = vcombine.low %v767_v25, %v771_v62  ;;  %3549 = vmatprep.mubr.bf16.mxu0 %v6879_v51 }
  0xa0   : > { %v635_v48 = vld [vmem:[#allocation5 + $0x920] sm:$0xff]  ;;  %3522 = vmatpush1.bf16.msra.mxu0 %v6866_v12  ;;  %3509 = vmatmul.mubr.bf16.gmra.mxu1 %v6868_v47 }
  0xa1   : > { %9817 = vst [vmem:[#allocation76_spill] sm:$0xff] %v6859_v59  ;;  %v759_v7 = vld [vmem:[#allocation5 + $0xd00] sm:$0xff]  ;;  %9819 = vst [vmem:[#allocation78_spill] sm:$0xff] %v6872_v46  ;;  %v6874_v0 = vcombine.high %v631_v2, %v635_v48  ;;  %3572 = vmatprep.subr.bf16.mxu1 %v6859_v59  ;;  %v6885_v41 = vcombine.low %v631_v2, %v635_v48  ;;  %3600 = vmatprep.mubr.bf16.mxu1 %v6882_v13 }
  0xa2   : > { %v763_v30 = vld [vmem:[#allocation5 + $0xd20] sm:$0xff]  ;;  %3573 = vmatpush1.bf16.msra.mxu1 %v6872_v46 }
  0xa3   : > { %9820 = vst [vmem:[#allocation79_spill] sm:$0xff] %v6874_v0  ;;  %v6877_v56 = vcombine.high %v759_v7, %v763_v30  ;;  %v623_v50 = vld [vmem:[#allocation5 + $0x8c0] sm:$0xff]  ;;  %9822 = vst [vmem:[#allocation81_spill] sm:$0xff] %v6885_v41  ;;  %3523 = vmatprep.subr.bf16.mxu0 %v6874_v0  ;;  %v6890_v55 = vcombine.low %v759_v7, %v763_v30 }
  0xa4   : > { %v627_v45 = vld [vmem:[#allocation5 + $0x8e0] sm:$0xff]  ;;  %3524 = vmatpush1.bf16.msra.mxu0 %v6885_v41 }
  0xa5   : > { %9821 = vst [vmem:[#allocation80_spill] sm:$0xff] %v6877_v56  ;;  %v751_v4 = vld [vmem:[#allocation5 + $0xcc0] sm:$0xff]  ;;  %9823 = vst [vmem:[#allocation82_spill] sm:$0xff] %v6890_v55  ;;  %v6892_v24 = vcombine.high %v623_v50, %v627_v45  ;;  %3574 = vmatprep.subr.bf16.mxu1 %v6877_v56  ;;  %v6900_v49 = vcombine.low %v623_v50, %v627_v45 }
  0xa6   : > { %v755_v57 = vld [vmem:[#allocation5 + $0xce0] sm:$0xff]  ;;  %3575 = vmatpush1.bf16.msra.mxu1 %v6890_v55 }
  0xa7   : > { %9824 = vst [vmem:[#allocation83_spill] sm:$0xff] %v6892_v24  ;;  %v6895_v25 = vcombine.high %v751_v4, %v755_v57  ;;  %v615_v62 = vld [vmem:[#allocation5 + $0x880] sm:$0xff]  ;;  %9826 = vst [vmem:[#allocation85_spill] sm:$0xff] %v6900_v49  ;;  %3525 = vmatprep.subr.bf16.mxu0 %v6892_v24  ;;  %v6904_v7 = vcombine.low %v751_v4, %v755_v57 }
  0xa8   : > { %v619_v54 = vld [vmem:[#allocation5 + $0x8a0] sm:$0xff]  ;;  %3526 = vmatpush1.bf16.msra.mxu0 %v6900_v49 }
  0xa9   : > { %9825 = vst [vmem:[#allocation84_spill] sm:$0xff] %v6895_v25  ;;  %v743_v48 = vld [vmem:[#allocation5 + $0xc80] sm:$0xff]  ;;  %9827 = vst [vmem:[#allocation86_spill] sm:$0xff] %v6904_v7  ;;  %v6906_v30 = vcombine.high %v615_v62, %v619_v54  ;;  %3576 = vmatprep.subr.bf16.mxu1 %v6895_v25  ;;  %v6912_v50 = vcombine.low %v615_v62, %v619_v54 }
  0xaa   : > { %v747_v2 = vld [vmem:[#allocation5 + $0xca0] sm:$0xff]  ;;  %3577 = vmatpush1.bf16.msra.mxu1 %v6904_v7 }
  0xab   : > { %9828 = vst [vmem:[#allocation87_spill] sm:$0xff] %v6906_v30  ;;  %v6909_v22 = vcombine.high %v743_v48, %v747_v2  ;;  %v607_v15 = vld [vmem:[#allocation5 + $0x840] sm:$0xff]  ;;  %9830 = vst [vmem:[#allocation89_spill] sm:$0xff] %v6912_v50  ;;  %3527 = vmatprep.subr.bf16.mxu0 %v6906_v30  ;;  %v6916_v45 = vcombine.low %v743_v48, %v747_v2 }
  0xac   : > { %v611_v56 = vld [vmem:[#allocation5 + $0x860] sm:$0xff]  ;;  %3528 = vmatpush1.bf16.msra.mxu0 %v6912_v50 }
  0xad   : > { %9829 = vst [vmem:[#allocation88_spill] sm:$0xff] %v6909_v22  ;;  %v735_v0 = vld [vmem:[#allocation5 + $0xc40] sm:$0xff]  ;;  %9831 = vst [vmem:[#allocation90_spill] sm:$0xff] %v6916_v45  ;;  %v6918_v4 = vcombine.high %v607_v15, %v611_v56  ;;  %3578 = vmatprep.subr.bf16.mxu1 %v6909_v22  ;;  %v6924_v62 = vcombine.low %v607_v15, %v611_v56 }
  0xae   : > { %v739_v46 = vld [vmem:[#allocation5 + $0xc60] sm:$0xff]  ;;  %3579 = vmatpush1.bf16.msra.mxu1 %v6916_v45 }
  0xaf   : > { %9832 = vst [vmem:[#allocation91_spill] sm:$0xff] %v6918_v4  ;;  %v6921_v57 = vcombine.high %v735_v0, %v739_v46  ;;  %v599_v25 = vld [vmem:[#allocation5 + $0x800] sm:$0xff]  ;;  %9834 = vst [vmem:[#allocation93_spill] sm:$0xff] %v6924_v62  ;;  %3529 = vmatprep.subr.bf16.mxu0 %v6918_v4  ;;  %v6928_v54 = vcombine.low %v735_v0, %v739_v46 }
  0xb0   : > { %v603_v24 = vld [vmem:[#allocation5 + $0x820] sm:$0xff]  ;;  %3530 = vmatpush1.bf16.msra.mxu0 %v6924_v62 }
  0xb1   : > { %9833 = vst [vmem:[#allocation92_spill] sm:$0xff] %v6921_v57  ;;  %v727_v55 = vld [vmem:[#allocation5 + $0xc00] sm:$0xff]  ;;  %9835 = vst [vmem:[#allocation94_spill] sm:$0xff] %v6928_v54  ;;  %v6930_v48 = vcombine.high %v599_v25, %v603_v24  ;;  %3580 = vmatprep.subr.bf16.mxu1 %v6921_v57  ;;  %v6936_v56 = vcombine.low %v599_v25, %v603_v24 }
  0xb2   : > { %v731_v41 = vld [vmem:[#allocation5 + $0xc20] sm:$0xff]  ;;  %3581 = vmatpush1.bf16.msra.mxu1 %v6928_v54 }
  0xb3   : > { %9836 = vst [vmem:[#allocation95_spill] sm:$0xff] %v6930_v48  ;;  %v6933_v2 = vcombine.high %v727_v55, %v731_v41  ;;  %v719_v22 = vld [vmem:[#allocation5 + $0xbc0] sm:$0xff]  ;;  %9838 = vst [vmem:[#allocation97_spill] sm:$0xff] %v6936_v56  ;;  %3531 = vmatprep.subr.bf16.mxu0 %v6930_v48  ;;  %v6940_v46 = vcombine.low %v727_v55, %v731_v41 }
  0xb4   : > { %v723_v30 = vld [vmem:[#allocation5 + $0xbe0] sm:$0xff]  ;;  %3532 = vmatpush1.bf16.msra.mxu0 %v6936_v56 }
  0xb5   : > { %9837 = vst [vmem:[#allocation96_spill] sm:$0xff] %v6933_v2  ;;  %v847_v7 = vld [vmem:[#allocation5 + $0xfc0] sm:$0xff]  ;;  %9839 = vst [vmem:[#allocation98_spill] sm:$0xff] %v6940_v46  ;;  %v6942_v0 = vcombine.high %v719_v22, %v723_v30  ;;  %3582 = vmatprep.subr.bf16.mxu1 %v6933_v2  ;;  %v6948_v24 = vcombine.low %v719_v22, %v723_v30 }
  0xb6   : > { %v851_v49 = vld [vmem:[#allocation5 + $0xfe0] sm:$0xff]  ;;  %3583 = vmatpush1.bf16.msra.mxu1 %v6940_v46 }
  0xb7   : > { %9840 = vst [vmem:[#allocation99_spill] sm:$0xff] %v6942_v0  ;;  %v6945_v15 = vcombine.high %v847_v7, %v851_v49  ;;  %v711_v57 = vld [vmem:[#allocation5 + $0xb80] sm:$0xff]  ;;  %9842 = vst [vmem:[#allocation101_spill] sm:$0xff] %v6948_v24  ;;  %3533 = vmatprep.subr.bf16.mxu0 %v6942_v0  ;;  %v6952_v41 = vcombine.low %v847_v7, %v851_v49 }
  0xb8   : > { %v715_v4 = vld [vmem:[#allocation5 + $0xba0] sm:$0xff]  ;;  %3534 = vmatpush2.bf16.msra.mxu0 %v6948_v24 }
  0xb9   : > { %9841 = vst [vmem:[#allocation100_spill] sm:$0xff] %v6945_v15  ;;  %v839_v45 = vld [vmem:[#allocation5 + $0xf80] sm:$0xff]  ;;  %9843 = vst [vmem:[#allocation102_spill] sm:$0xff] %v6952_v41  ;;  %v6954_v55 = vcombine.high %v711_v57, %v715_v4  ;;  %3584 = vmatprep.subr.bf16.mxu1 %v6945_v15  ;;  %v6960_v30 = vcombine.low %v711_v57, %v715_v4 }
  0xba   : > { %v843_v50 = vld [vmem:[#allocation5 + $0xfa0] sm:$0xff]  ;;  %3585 = vmatpush2.bf16.msra.mxu1 %v6952_v41 }
  0xbb   : > { %9844 = vst [vmem:[#allocation103_spill] sm:$0xff] %v6954_v55  ;;  %v6957_v25 = vcombine.high %v839_v45, %v843_v50  ;;  %v703_v2 = vld [vmem:[#allocation5 + $0xb40] sm:$0xff]  ;;  %9846 = vst [vmem:[#allocation105_spill] sm:$0xff] %v6960_v30  ;;  %3535 = vmatprep.subr.bf16.mxu0 %v6954_v55  ;;  %v6964_v49 = vcombine.low %v839_v45, %v843_v50 }
  0xbc   : > { %v707_v48 = vld [vmem:[#allocation5 + $0xb60] sm:$0xff]  ;;  %3536 = vmatpush2.bf16.msra.mxu0 %v6960_v30 }
  0xbd   : > { %9845 = vst [vmem:[#allocation104_spill] sm:$0xff] %v6957_v25  ;;  %v831_v54 = vld [vmem:[#allocation5 + $0xf40] sm:$0xff]  ;;  %9847 = vst [vmem:[#allocation106_spill] sm:$0xff] %v6964_v49  ;;  %v6966_v7 = vcombine.high %v703_v2, %v707_v48  ;;  %3586 = vmatprep.subr.bf16.mxu1 %v6957_v25  ;;  %v6972_v4 = vcombine.low %v703_v2, %v707_v48 }
  0xbe   : > { %v835_v62 = vld [vmem:[#allocation5 + $0xf60] sm:$0xff]  ;;  %3587 = vmatpush2.bf16.msra.mxu1 %v6964_v49 }
  0xbf   : > { %9848 = vst [vmem:[#allocation107_spill] sm:$0xff] %v6966_v7  ;;  %v6969_v22 = vcombine.high %v831_v54, %v835_v62  ;;  %v695_v15 = vld [vmem:[#allocation5 + $0xb00] sm:$0xff]  ;;  %9850 = vst [vmem:[#allocation109_spill] sm:$0xff] %v6972_v4  ;;  %3537 = vmatprep.subr.bf16.mxu0 %v6966_v7  ;;  %v6976_v50 = vcombine.low %v831_v54, %v835_v62 }
  0xc0   : > { %v699_v0 = vld [vmem:[#allocation5 + $0xb20] sm:$0xff]  ;;  %3538 = vmatpush2.bf16.msra.mxu0 %v6972_v4 }
  0xc1   : > { %9849 = vst [vmem:[#allocation108_spill] sm:$0xff] %v6969_v22  ;;  %v823_v46 = vld [vmem:[#allocation5 + $0xf00] sm:$0xff]  ;;  %9851 = vst [vmem:[#allocation110_spill] sm:$0xff] %v6976_v50  ;;  %v6978_v45 = vcombine.high %v695_v15, %v699_v0  ;;  %3588 = vmatprep.subr.bf16.mxu1 %v6969_v22  ;;  %v6984_v48 = vcombine.low %v695_v15, %v699_v0 }
  0xc2   : > { %v827_v56 = vld [vmem:[#allocation5 + $0xf20] sm:$0xff]  ;;  %3589 = vmatpush2.bf16.msra.mxu1 %v6976_v50  ;;  %v253_v50 = vld [vmem:[%s6565_s21 + $0x70] sm:$0xff] }
  0xc3   : > { %9852 = vst [vmem:[#allocation111_spill] sm:$0xff] %v6978_v45  ;;  %v6981_v57 = vcombine.high %v823_v46, %v827_v56  ;;  %v687_v25 = vld [vmem:[#allocation5 + $0xac0] sm:$0xff]  ;;  %9854 = vst [vmem:[#allocation113_spill] sm:$0xff] %v6984_v48  ;;  %3539 = vmatprep.subr.bf16.mxu0 %v6978_v45  ;;  %v6988_v62 = vcombine.low %v823_v46, %v827_v56  ;;  %v245_v45 = vld [vmem:[%s6565_s21 + $0x30] sm:$0xff] }
  0xc4   : > { %v691_v55 = vld [vmem:[#allocation5 + $0xae0] sm:$0xff]  ;;  %3540 = vmatpush2.bf16.msra.mxu0 %v6984_v48 }
  0xc5   : > { %9853 = vst [vmem:[#allocation112_spill] sm:$0xff] %v6981_v57  ;;  %v815_v41 = vld [vmem:[#allocation5 + $0xec0] sm:$0xff]  ;;  %9855 = vst [vmem:[#allocation114_spill] sm:$0xff] %v6988_v62  ;;  %v6990_v54 = vcombine.high %v687_v25, %v691_v55  ;;  %3590 = vmatprep.subr.bf16.mxu1 %v6981_v57  ;;  %v6996_v0 = vcombine.low %v687_v25, %v691_v55 }
  0xc6   : > { %v819_v24 = vld [vmem:[#allocation5 + $0xee0] sm:$0xff]  ;;  %3591 = vmatpush2.bf16.msra.mxu1 %v6988_v62  ;;  %v260_v62 = vld [vmem:[%s6565_s21 + $0xa8] sm:$0xff] }
  0xc7   : > { %9856 = vst [vmem:[#allocation115_spill] sm:$0xff] %v6990_v54  ;;  %v6993_v2 = vcombine.high %v815_v41, %v819_v24  ;;  %v679_v22 = vld [vmem:[#allocation5 + $0xa80] sm:$0xff]  ;;  %9858 = vst [vmem:[#allocation117_spill] sm:$0xff] %v6996_v0  ;;  %3541 = vmatprep.subr.bf16.mxu0 %v6990_v54  ;;  %v7002_v46 = vcombine.low %v815_v41, %v819_v24  ;;  %v7017_v24 = vpack.c.bf16 %v253_v50, %v245_v45  ;;  %v262_v41 = vld [vmem:[%s6565_s21 + $0xb8] sm:$0xff] }
  0xc8   : > { %v683_v7 = vld [vmem:[#allocation5 + $0xaa0] sm:$0xff]  ;;  %3542 = vmatpush2.bf16.msra.mxu0 %v6996_v0 }
  0xc9   : > { %9857 = vst [vmem:[#allocation116_spill] sm:$0xff] %v6993_v2  ;;  %v807_v49 = vld [vmem:[#allocation5 + $0xe80] sm:$0xff]  ;;  %9859 = vst [vmem:[#allocation118_spill] sm:$0xff] %v7002_v46  ;;  %v7004_v57 = vcombine.high %v679_v22, %v683_v7  ;;  %3592 = vmatprep.subr.bf16.mxu1 %v6993_v2  ;;  %v7015_v54 = vcombine.low %v679_v22, %v683_v7  ;;  %v7029_v7 = vpack.c.bf16 %v260_v62, %v260_v62 }
  0xca   : > { %v811_v4 = vld [vmem:[#allocation5 + $0xea0] sm:$0xff]  ;;  %9864 = vst [vmem:[#allocation123_spill] sm:$0xff] %v7017_v24  ;;  %3593 = vmatpush2.bf16.msra.mxu1 %v7002_v46  ;;  %v293_v11 = vunpack.c.h.bf16 %v7017_v24 }
  0xcb   : > { %v243_v15 = vld [vmem:[%s6565_s21 + $0x20] sm:$0xff]  ;;  %9860 = vst [vmem:[#allocation119_spill] sm:$0xff] %v7004_v57  ;;  %v7009_v30 = vcombine.high %v807_v49, %v811_v4  ;;  %9863 = vst [vmem:[#allocation122_spill] sm:$0xff] %v7015_v54  ;;  %3543 = vmatprep.subr.bf16.mxu0 %v7004_v57  ;;  %v7022_v2 = vcombine.low %v807_v49, %v811_v4  ;;  %v7033_v49 = vpack.c.bf16 %v262_v41, %v262_v41 }
  0xcc   : > { %v251_v56 = vld [vmem:[%s6565_s21 + $0x60] sm:$0xff]  ;;  %9868 = vst [vmem:[#allocation127_spill] sm:$0xff] %v7029_v7  ;;  %3544 = vmatpush2.bf16.msra.mxu0 %v7015_v54  ;;  %v300_v54 = vunpack.c.l.bf16 %v7029_v7 }
  0xcd   : > { %9861 = vst [vmem:[#allocation120_spill] sm:$0xff] %v7009_v30  ;;  %v671_v55 = vld [vmem:[#allocation5 + $0xa40] sm:$0xff]  ;;  %v7011_v59 = vpack.c.bf16 %v251_v56, %v243_v15  ;;  %9865 = vst [vmem:[#allocation124_spill] sm:$0xff] %v7022_v2  ;;  %3594 = vmatprep.subr.bf16.mxu1 %v7009_v30  ;;  %v285_v30 = vunpack.c.l.bf16 %v7017_v24 }
  0xce   : > { %v675_v25 = vld [vmem:[#allocation5 + $0xa60] sm:$0xff]  ;;  %9869 = vst [vmem:[#allocation128_spill] sm:$0xff] %v7033_v49  ;;  %3595 = vmatpush2.bf16.msra.mxu1 %v7022_v2 }
  0xcf   : > { %v799_v48 = vld [vmem:[#allocation5 + $0xe40] sm:$0xff]  ;;  %9862 = vst [vmem:[#allocation121_spill] sm:$0xff] %v7011_v59  ;;  %v7024_v33 = vcombine.high %v671_v55, %v675_v25  ;;  %v283_v46 = vunpack.c.l.bf16 %v7011_v59  ;;  %v291_v57 = vunpack.c.h.bf16 %v7011_v59  ;;  %v7036_v4 = vcombine.low %v671_v55, %v675_v25  ;;  %v261_v59 = vld [vmem:[%s6565_s21 + $0xb0] sm:$0xff]  ;;  %v400_v55 = vld [vmem:[#allocation5 + $0x1c8] sm:$0xff] }
  0xd0   : > { %v803_v12 = vld [vmem:[#allocation5 + $0xe60] sm:$0xff]  ;;  %v404_v25 = vld [vmem:[#allocation5 + $0x1e8] sm:$0xff]  ;;  %v7058_v37 = vpack.c.bf16 %v261_v59, %v261_v59 }
  0xd1   : > { %9866 = vst [vmem:[#allocation125_spill] sm:$0xff] %v7024_v33  ;;  %v7027_v39 = vcombine.high %v799_v48, %v803_v12  ;;  %v663_v1 = vld [vmem:[#allocation5 + $0xa00] sm:$0xff]  ;;  %3545 = vmatprep.subr.bf16.mxu0 %v7024_v33  ;;  %v7043_v53 = vcombine.low %v799_v48, %v803_v12  ;;  %v307_v44 = vsub.f32 %v243_v15, %v283_v46  ;;  %v302_v12 = vunpack.c.l.bf16 %v7033_v49  ;;  %v392_v46 = vld [vmem:[#allocation5 + $0x188] sm:$0xff] }
  0xd2   : > { %v667_v0 = vld [vmem:[#allocation5 + $0xa20] sm:$0xff]  ;;  %v315_v24 = vsub.f32 %v251_v56, %v291_v57  ;;  %3546 = vmatpush2.bf16.msra.mxu0 %v7036_v4  ;;  %v309_v33 = vsub.f32 %v245_v45, %v285_v30  ;;  %9875 = vst [vmem:[#allocation134_spill] sm:$0xff] %v7058_v37  ;;  %v7064_v57 = vcombine.high %v400_v55, %v404_v25  ;;  %v396_v49 = vld [vmem:[#allocation5 + $0x1a8] sm:$0xff]  ;;  %v301_v7 = vunpack.c.l.bf16 %v7058_v37 }
  0xd3   : > { %9867 = vst [vmem:[#allocation126_spill] sm:$0xff] %v7027_v39  ;;  %v791_v22 = vld [vmem:[#allocation5 + $0xe00] sm:$0xff]  ;;  %9870 = vst [vmem:[#allocation129_spill] sm:$0xff] %v7043_v53  ;;  %v7045_v32 = vcombine.high %v663_v1, %v667_v0  ;;  %3596 = vmatprep.subr.bf16.mxu1 %v7027_v39  ;;  %v7056_v48 = vcombine.low %v663_v1, %v667_v0  ;;  %v317_v39 = vsub.f32 %v253_v50, %v293_v11  ;;  %v520_v11 = vld [vmem:[#allocation5 + $0x588] sm:$0xff] }
  0xd4   : > { %v795_v6 = vld [vmem:[#allocation5 + $0xe20] sm:$0xff]  ;;  %3597 = vmatpush2.bf16.msra.mxu1 %v7043_v53  ;;  %9877 = vst [vmem:[#allocation136_spill] sm:$0xff] %v7064_v57  ;;  %v7067_v56 = vcombine.high %v528_v43, %v532_v42  ;;  %v324_v1 = vsub.f32 %v260_v62, %v300_v54  ;;  %v7069_v0 = vpack.c.bf16 %v315_v24, %v307_v44  ;;  %v524_v30 = vld [vmem:[#allocation5 + $0x5a8] sm:$0xff] }
  0xd5   : > { %v259_v23 = vld [vmem:[%s6565_s21 + $0xa0] sm:$0xff]  ;;  %9871 = vst [vmem:[#allocation130_spill] sm:$0xff] %v7045_v32  ;;  %v7049_v16 = vcombine.high %v791_v22, %v795_v6  ;;  %9874 = vst [vmem:[#allocation133_spill] sm:$0xff] %v7056_v48  ;;  %3547 = vmatprep.subr.bf16.mxu0 %v7045_v32  ;;  %v7062_v15 = vcombine.low %v791_v22, %v795_v6  ;;  %v326_v45 = vsub.f32 %v262_v41, %v302_v12 }
  0xd6   : > { %v7052_v2 = vpack.c.bf16 %v259_v23, %v259_v23  ;;  %9878 = vst [vmem:[#allocation137_spill] sm:$0xff] %v7067_v56  ;;  %3548 = vmatpush2.bf16.msra.mxu0 %v7056_v48  ;;  %v7073_v6 = vpack.c.bf16 %v317_v39, %v309_v33  ;;  %v7075_v22 = vcombine.low %v400_v55, %v404_v25  ;;  %v384_v39 = vld [vmem:[#allocation5 + $0x148] sm:$0xff] }
  0xd7   : > { %9872 = vst [vmem:[#allocation131_spill] sm:$0xff] %v7049_v16  ;;  %9876 = vst [vmem:[#allocation135_spill] sm:$0xff] %v7062_v15  ;;  %3598 = vmatprep.subr.bf16.mxu1 %v7049_v16  ;;  %3619 = vmatprep.subr.bf16.mxu0 %v7064_v57  ;;  %v7080_v62 = vcombine.low %v528_v43, %v532_v42  ;;  %v7082_v44 = vcombine.high %v392_v46, %v396_v49  ;;  %v388_v33 = vld [vmem:[#allocation5 + $0x168] sm:$0xff] }
  0xd8   : > { %9873 = vst [vmem:[#allocation132_spill] sm:$0xff] %v7052_v2  ;;  %v299_v50 = vunpack.c.l.bf16 %v7052_v2  ;;  %9879 = vst [vmem:[#allocation138_spill] sm:$0xff] %v7075_v22  ;;  %3599 = vmatpush2.bf16.msra.mxu1 %v7062_v15  ;;  %v7085_v54 = vcombine.high %v520_v11, %v524_v30  ;;  %v7087_v24 = vpack.c.bf16 %v324_v1, %v324_v1  ;;  %v512_v55 = vld [vmem:[#allocation5 + $0x548] sm:$0xff]  ;;  %v365_v15 = vld [vmem:[#allocation5 + $0xb0] sm:$0xff] }
  0xd9   : > { %9880 = vst [vmem:[#allocation139_spill] sm:$0xff] %v7080_v62  ;;  %9881 = vst [vmem:[#allocation140_spill] sm:$0xff] %v7082_v44  ;;  %3670 = vmatprep.subr.bf16.mxu1 %v7067_v56  ;;  %3550 = vmatmul.mubr.bf16.vlgmr.msra.gmra.mxu0 %v7069_v0  ;;  %v516_v25 = vld [vmem:[#allocation5 + $0x568] sm:$0xff]  ;;  %v7090_v12 = vpack.c.bf16 %v326_v45, %v326_v45  ;;  %v7094_v42 = vcombine.low %v392_v46, %v396_v49 }
  0xda   : > { %9882 = vst [vmem:[#allocation141_spill] sm:$0xff] %v7085_v54  ;;  %v323_v41 = vsub.f32 %v259_v23, %v299_v50  ;;  %3620 = vmatpush1.bf16.msra.mxu0 %v7075_v22  ;;  %v325_v43 = vsub.f32 %v261_v59, %v301_v7  ;;  %v7098_v1 = vcombine.low %v520_v11, %v524_v30  ;;  %v376_v50 = vld [vmem:[#allocation5 + $0x108] sm:$0xff] }
  0xdb   : > { %3601 = vmatmul.mubr.bf16.vlgmr.msra.gmra.mxu1 %v7073_v6  ;;  %9883 = vst [vmem:[#allocation142_spill] sm:$0xff] %v7094_v42  ;;  %3621 = vmatprep.subr.bf16.mxu0 %v7082_v44  ;;  %v7100_v37 = vcombine.high %v384_v39, %v388_v33  ;;  %v7104_v23 = vcombine.high %v512_v55, %v516_v25  ;;  %v380_v45 = vld [vmem:[#allocation5 + $0x128] sm:$0xff] }
  0xdc   : > { %3671 = vmatpush1.bf16.msra.mxu1 %v7080_v62  ;;  %9884 = vst [vmem:[#allocation143_spill] sm:$0xff] %v7098_v1  ;;  %3559 = vmatprep.mubr.bf16.mxu0 %v7087_v24  ;;  %v7106_v2 = vpack.c.bf16 %v323_v41, %v323_v41  ;;  %v504_v59 = vld [vmem:[#allocation5 + $0x508] sm:$0xff]  ;;  %v7110_v49 = vcombine.low %v384_v39, %v388_v33 }
  0xdd   : > { %9885 = vst [vmem:[#allocation144_spill] sm:$0xff] %v7100_v37  ;;  %3672 = vmatprep.subr.bf16.mxu1 %v7085_v54  ;;  %9886 = vst [vmem:[#allocation145_spill] sm:$0xff] %v7104_v23  ;;  %3610 = vmatprep.mubr.bf16.mxu1 %v7090_v12  ;;  %v508_v7 = vld [vmem:[#allocation5 + $0x528] sm:$0xff]  ;;  %v7112_v46 = vpack.c.bf16 %v325_v43, %v325_v43  ;;  %v7116_v11 = vcombine.low %v512_v55, %v516_v25 }
  0xde   : > { %3622 = vmatpush1.bf16.msra.mxu0 %v7094_v42  ;;  %9887 = vst [vmem:[#allocation146_spill] sm:$0xff] %v7110_v49  ;;  %v7118_v30 = vcombine.high %v376_v50, %v380_v45  ;;  %v7121_v41 = vcombine.high %v504_v59, %v508_v7  ;;  %v368_v54 = vld [vmem:[#allocation5 + $0xc8] sm:$0xff]  ;;  %v7126_v43 = vcombine.low %v376_v50, %v380_v45 }
  0xdf   : > { %3623 = vmatprep.subr.bf16.mxu0 %v7100_v37  ;;  %9888 = vst [vmem:[#allocation147_spill] sm:$0xff] %v7116_v11  ;;  %v372_v44 = vld [vmem:[#allocation5 + $0xe8] sm:$0xff]  ;;  %v7130_v55 = vcombine.low %v504_v59, %v508_v7 }
  0xe0   : > { %3673 = vmatpush1.bf16.msra.mxu1 %v7098_v1  ;;  %9889 = vst [vmem:[#allocation148_spill] sm:$0xff] %v7118_v30  ;;  %9890 = vst [vmem:[#allocation149_spill] sm:$0xff] %v7121_v41  ;;  %v496_v39 = vld [vmem:[#allocation5 + $0x4c8] sm:$0xff]  ;;  %v7132_v25 = vcombine.high %v368_v54, %v372_v44  ;;  %v7140_v50 = vcombine.low %v368_v54, %v372_v44 }
  0xe1   : > { %3674 = vmatprep.subr.bf16.mxu1 %v7104_v23  ;;  %3560 = vmatmul.mubr.bf16.gmra.mxu0 %v7106_v2  ;;  %v500_v33 = vld [vmem:[#allocation5 + $0x4e8] sm:$0xff]  ;;  %9891 = vst [vmem:[#allocation150_spill] sm:$0xff] %v7126_v43  ;;  %9892 = vst [vmem:[#allocation151_spill] sm:$0xff] %v7130_v55 }
  0xe2   : > { %3624 = vmatpush1.bf16.msra.mxu0 %v7110_v49  ;;  %9893 = vst [vmem:[#allocation152_spill] sm:$0xff] %v7132_v25  ;;  %v7135_v23 = vcombine.high %v496_v39, %v500_v33  ;;  %v360_v37 = vld [vmem:[#allocation5 + $0x88] sm:$0xff]  ;;  %3651 = vmatprep.mubr.bf16.mxu0 %v6676_v31  ;;  %9895 = vst [vmem:[#allocation154_spill] sm:$0xff] %v7140_v50  ;;  %v7144_v45 = vcombine.low %v496_v39, %v500_v33 }
  0xe3   : > { %3611 = vmatmul.mubr.bf16.gmra.mxu1 %v7112_v46  ;;  %3625 = vmatprep.subr.bf16.mxu0 %v7118_v30  ;;  %v364_v1 = vld [vmem:[#allocation5 + $0xa8] sm:$0xff] }
  0xe4   : > { %3675 = vmatpush1.bf16.msra.mxu1 %v7116_v11  ;;  %9894 = vst [vmem:[#allocation153_spill] sm:$0xff] %v7135_v23  ;;  %v488_v49 = vld [vmem:[#allocation5 + $0x488] sm:$0xff]  ;;  %3702 = vmatprep.mubr.bf16.mxu1 %v6684_v38  ;;  %9896 = vst [vmem:[#allocation155_spill] sm:$0xff] %v7144_v45  ;;  %v7146_v59 = vcombine.high %v360_v37, %v364_v1  ;;  %v7152_v44 = vcombine.low %v360_v37, %v364_v1 }
  0xe5   : > { %3676 = vmatprep.subr.bf16.mxu1 %v7121_v41  ;;  %v492_v42 = vld [vmem:[#allocation5 + $0x4a8] sm:$0xff] }
  0xe6   : > { %3626 = vmatpush1.bf16.msra.mxu0 %v7126_v43  ;;  %9897 = vst [vmem:[#allocation156_spill] sm:$0xff] %v7146_v59  ;;  %v7149_v7 = vcombine.high %v488_v49, %v492_v42  ;;  %v352_v41 = vld [vmem:[#allocation5 + $0x48] sm:$0xff]  ;;  %9899 = vst [vmem:[#allocation158_spill] sm:$0xff] %v7152_v44  ;;  %v7156_v54 = vcombine.low %v488_v49, %v492_v42 }
  0xe7   : > { %3627 = vmatprep.subr.bf16.mxu0 %v7132_v25  ;;  %v356_v30 = vld [vmem:[#allocation5 + $0x68] sm:$0xff] }
  0xe8   : > { %3677 = vmatpush1.bf16.msra.mxu1 %v7130_v55  ;;  %9898 = vst [vmem:[#allocation157_spill] sm:$0xff] %v7149_v7  ;;  %v480_v11 = vld [vmem:[#allocation5 + $0x448] sm:$0xff]  ;;  %9900 = vst [vmem:[#allocation159_spill] sm:$0xff] %v7156_v54  ;;  %v7158_v39 = vcombine.high %v352_v41, %v356_v30  ;;  %v7164_v37 = vcombine.low %v352_v41, %v356_v30 }
  0xe9   : > { %3678 = vmatprep.subr.bf16.mxu1 %v7135_v23  ;;  %v484_v62 = vld [vmem:[#allocation5 + $0x468] sm:$0xff] }
  0xea   : > { %3628 = vmatpush1.bf16.msra.mxu0 %v7140_v50  ;;  %9901 = vst [vmem:[#allocation160_spill] sm:$0xff] %v7158_v39  ;;  %v7161_v33 = vcombine.high %v480_v11, %v484_v62  ;;  %v344_v23 = vld [vmem:[#allocation5 + $0x8] sm:$0xff]  ;;  %9903 = vst [vmem:[#allocation162_spill] sm:$0xff] %v7164_v37  ;;  %v7168_v42 = vcombine.low %v480_v11, %v484_v62 }
  0xeb   : > { %3629 = vmatprep.subr.bf16.mxu0 %v7146_v59  ;;  %v348_v25 = vld [vmem:[#allocation5 + $0x28] sm:$0xff] }
  0xec   : > { %3679 = vmatpush1.bf16.msra.mxu1 %v7144_v45  ;;  %9902 = vst [vmem:[#allocation161_spill] sm:$0xff] %v7161_v33  ;;  %v472_v55 = vld [vmem:[#allocation5 + $0x408] sm:$0xff]  ;;  %9904 = vst [vmem:[#allocation163_spill] sm:$0xff] %v7168_v42  ;;  %v7170_v1 = vcombine.high %v344_v23, %v348_v25  ;;  %v7176_v30 = vcombine.low %v344_v23, %v348_v25 }
  0xed   : > { %3680 = vmatprep.subr.bf16.mxu1 %v7149_v7  ;;  %v476_v43 = vld [vmem:[#allocation5 + $0x428] sm:$0xff] }
  0xee   : > { %3630 = vmatpush1.bf16.msra.mxu0 %v7152_v44  ;;  %9905 = vst [vmem:[#allocation164_spill] sm:$0xff] %v7170_v1  ;;  %v7173_v49 = vcombine.high %v472_v55, %v476_v43  ;;  %v464_v7 = vld [vmem:[#allocation5 + $0x3c8] sm:$0xff]  ;;  %9907 = vst [vmem:[#allocation166_spill] sm:$0xff] %v7176_v30  ;;  %v7180_v62 = vcombine.low %v472_v55, %v476_v43 }
  0xef   : > { %3631 = vmatprep.subr.bf16.mxu0 %v7158_v39  ;;  %v468_v59 = vld [vmem:[#allocation5 + $0x3e8] sm:$0xff] }
  0xf0   : > { %3681 = vmatpush1.bf16.msra.mxu1 %v7156_v54  ;;  %9906 = vst [vmem:[#allocation165_spill] sm:$0xff] %v7173_v49  ;;  %v592_v45 = vld [vmem:[#allocation5 + $0x7c8] sm:$0xff]  ;;  %9908 = vst [vmem:[#allocation167_spill] sm:$0xff] %v7180_v62  ;;  %v7182_v11 = vcombine.high %v464_v7, %v468_v59  ;;  %v7188_v23 = vcombine.low %v464_v7, %v468_v59 }
  0xf1   : > { %3682 = vmatprep.subr.bf16.mxu1 %v7161_v33  ;;  %v596_v50 = vld [vmem:[#allocation5 + $0x7e8] sm:$0xff] }
  0xf2   : > { %3632 = vmatpush1.bf16.msra.mxu0 %v7164_v37  ;;  %9909 = vst [vmem:[#allocation168_spill] sm:$0xff] %v7182_v11  ;;  %v7185_v41 = vcombine.high %v592_v45, %v596_v50  ;;  %v456_v33 = vld [vmem:[#allocation5 + $0x388] sm:$0xff]  ;;  %9911 = vst [vmem:[#allocation170_spill] sm:$0xff] %v7188_v23  ;;  %v7192_v43 = vcombine.low %v592_v45, %v596_v50 }
  0xf3   : > { %3633 = vmatprep.subr.bf16.mxu0 %v7170_v1  ;;  %v460_v39 = vld [vmem:[#allocation5 + $0x3a8] sm:$0xff] }
  0xf4   : > { %3683 = vmatpush1.bf16.msra.mxu1 %v7168_v42  ;;  %9910 = vst [vmem:[#allocation169_spill] sm:$0xff] %v7185_v41  ;;  %v584_v54 = vld [vmem:[#allocation5 + $0x788] sm:$0xff]  ;;  %9912 = vst [vmem:[#allocation171_spill] sm:$0xff] %v7192_v43  ;;  %v7194_v55 = vcombine.high %v456_v33, %v460_v39  ;;  %v7200_v59 = vcombine.low %v456_v33, %v460_v39 }
  0xf5   : > { %3684 = vmatprep.subr.bf16.mxu1 %v7173_v49  ;;  %v588_v44 = vld [vmem:[#allocation5 + $0x7a8] sm:$0xff] }
  0xf6   : > { %3634 = vmatpush1.bf16.msra.mxu0 %v7176_v30  ;;  %9913 = vst [vmem:[#allocation172_spill] sm:$0xff] %v7194_v55  ;;  %v7197_v25 = vcombine.high %v584_v54, %v588_v44  ;;  %v448_v49 = vld [vmem:[#allocation5 + $0x348] sm:$0xff]  ;;  %9915 = vst [vmem:[#allocation174_spill] sm:$0xff] %v7200_v59  ;;  %v7204_v50 = vcombine.low %v584_v54, %v588_v44 }
  0xf7   : > { %3635 = vmatprep.subr.bf16.mxu0 %v7182_v11  ;;  %v452_v1 = vld [vmem:[#allocation5 + $0x368] sm:$0xff] }
  0xf8   : > { %3685 = vmatpush1.bf16.msra.mxu1 %v7180_v62  ;;  %9914 = vst [vmem:[#allocation173_spill] sm:$0xff] %v7197_v25  ;;  %v576_v42 = vld [vmem:[#allocation5 + $0x748] sm:$0xff]  ;;  %9916 = vst [vmem:[#allocation175_spill] sm:$0xff] %v7204_v50  ;;  %v7206_v45 = vcombine.high %v448_v49, %v452_v1  ;;  %v7212_v39 = vcombine.low %v448_v49, %v452_v1 }
  0xf9   : > { %3686 = vmatprep.subr.bf16.mxu1 %v7185_v41  ;;  %v580_v37 = vld [vmem:[#allocation5 + $0x768] sm:$0xff] }
  0xfa   : > { %3636 = vmatpush2.bf16.msra.mxu0 %v7188_v23  ;;  %9917 = vst [vmem:[#allocation176_spill] sm:$0xff] %v7206_v45  ;;  %v7209_v7 = vcombine.high %v576_v42, %v580_v37  ;;  %v440_v41 = vld [vmem:[#allocation5 + $0x308] sm:$0xff]  ;;  %9919 = vst [vmem:[#allocation178_spill] sm:$0xff] %v7212_v39  ;;  %v7216_v44 = vcombine.low %v576_v42, %v580_v37 }
  0xfb   : > { %3637 = vmatprep.subr.bf16.mxu0 %v7194_v55  ;;  %v444_v11 = vld [vmem:[#allocation5 + $0x328] sm:$0xff] }
  0xfc   : > { %3687 = vmatpush2.bf16.msra.mxu1 %v7192_v43  ;;  %9918 = vst [vmem:[#allocation177_spill] sm:$0xff] %v7209_v7  ;;  %v568_v62 = vld [vmem:[#allocation5 + $0x708] sm:$0xff]  ;;  %9920 = vst [vmem:[#allocation179_spill] sm:$0xff] %v7216_v44  ;;  %v7218_v54 = vcombine.high %v440_v41, %v444_v11  ;;  %v7224_v1 = vcombine.low %v440_v41, %v444_v11 }
  0xfd   : > { %3688 = vmatprep.subr.bf16.mxu1 %v7197_v25  ;;  %v572_v30 = vld [vmem:[#allocation5 + $0x728] sm:$0xff] }
  0xfe   : > { %3638 = vmatpush2.bf16.msra.mxu0 %v7200_v59  ;;  %9921 = vst [vmem:[#allocation180_spill] sm:$0xff] %v7218_v54  ;;  %v7221_v33 = vcombine.high %v568_v62, %v572_v30  ;;  %v432_v25 = vld [vmem:[#allocation5 + $0x2c8] sm:$0xff]  ;;  %9923 = vst [vmem:[#allocation182_spill] sm:$0xff] %v7224_v1  ;;  %v7228_v37 = vcombine.low %v568_v62, %v572_v30 }
  0xff   : > { %3639 = vmatprep.subr.bf16.mxu0 %v7206_v45  ;;  %v436_v55 = vld [vmem:[#allocation5 + $0x2e8] sm:$0xff] }
 0x100   : > { %3689 = vmatpush2.bf16.msra.mxu1 %v7204_v50  ;;  %9922 = vst [vmem:[#allocation181_spill] sm:$0xff] %v7221_v33  ;;  %v560_v43 = vld [vmem:[#allocation5 + $0x6c8] sm:$0xff]  ;;  %9924 = vst [vmem:[#allocation183_spill] sm:$0xff] %v7228_v37  ;;  %v7230_v42 = vcombine.high %v432_v25, %v436_v55  ;;  %v7236_v11 = vcombine.low %v432_v25, %v436_v55 }
 0x101   : > { %3690 = vmatprep.subr.bf16.mxu1 %v7209_v7  ;;  %v564_v23 = vld [vmem:[#allocation5 + $0x6e8] sm:$0xff] }
 0x102   : > { %3640 = vmatpush2.bf16.msra.mxu0 %v7212_v39  ;;  %9925 = vst [vmem:[#allocation184_spill] sm:$0xff] %v7230_v42  ;;  %v7233_v49 = vcombine.high %v560_v43, %v564_v23  ;;  %v424_v7 = vld [vmem:[#allocation5 + $0x288] sm:$0xff]  ;;  %9927 = vst [vmem:[#allocation186_spill] sm:$0xff] %v7236_v11  ;;  %v7240_v30 = vcombine.low %v560_v43, %v564_v23 }
 0x103   : > { %3641 = vmatprep.subr.bf16.mxu0 %v7218_v54  ;;  %v428_v45 = vld [vmem:[#allocation5 + $0x2a8] sm:$0xff] }
 0x104   : > { %3691 = vmatpush2.bf16.msra.mxu1 %v7216_v44  ;;  %9926 = vst [vmem:[#allocation185_spill] sm:$0xff] %v7233_v49  ;;  %v552_v50 = vld [vmem:[#allocation5 + $0x688] sm:$0xff]  ;;  %9928 = vst [vmem:[#allocation187_spill] sm:$0xff] %v7240_v30  ;;  %v7242_v62 = vcombine.high %v424_v7, %v428_v45  ;;  %v7248_v55 = vcombine.low %v424_v7, %v428_v45 }
 0x105   : > { %3692 = vmatprep.subr.bf16.mxu1 %v7221_v33  ;;  %v556_v59 = vld [vmem:[#allocation5 + $0x6a8] sm:$0xff] }
 0x106   : > { %3642 = vmatpush2.bf16.msra.mxu0 %v7224_v1  ;;  %9929 = vst [vmem:[#allocation188_spill] sm:$0xff] %v7242_v62  ;;  %v7245_v41 = vcombine.high %v552_v50, %v556_v59  ;;  %v416_v33 = vld [vmem:[#allocation5 + $0x248] sm:$0xff]  ;;  %9931 = vst [vmem:[#allocation190_spill] sm:$0xff] %v7248_v55  ;;  %v7252_v23 = vcombine.low %v552_v50, %v556_v59 }
 0x107   : > { %3643 = vmatprep.subr.bf16.mxu0 %v7230_v42  ;;  %v420_v54 = vld [vmem:[#allocation5 + $0x268] sm:$0xff] }
 0x108   : > { %3693 = vmatpush2.bf16.msra.mxu1 %v7228_v37  ;;  %9930 = vst [vmem:[#allocation189_spill] sm:$0xff] %v7245_v41  ;;  %v544_v44 = vld [vmem:[#allocation5 + $0x648] sm:$0xff]  ;;  %9932 = vst [vmem:[#allocation191_spill] sm:$0xff] %v7252_v23  ;;  %v7254_v43 = vcombine.high %v416_v33, %v420_v54  ;;  %v7260_v45 = vcombine.low %v416_v33, %v420_v54 }
 0x109   : > { %3694 = vmatprep.subr.bf16.mxu1 %v7233_v49  ;;  %v548_v39 = vld [vmem:[#allocation5 + $0x668] sm:$0xff] }
 0x10a   : > { %3644 = vmatpush2.bf16.msra.mxu0 %v7236_v11  ;;  %9933 = vst [vmem:[#allocation192_spill] sm:$0xff] %v7254_v43  ;;  %v7257_v25 = vcombine.high %v544_v44, %v548_v39  ;;  %v408_v49 = vld [vmem:[#allocation5 + $0x208] sm:$0xff]  ;;  %9935 = vst [vmem:[#allocation194_spill] sm:$0xff] %v7260_v45  ;;  %v7264_v59 = vcombine.low %v544_v44, %v548_v39 }
 0x10b   : > { %3645 = vmatprep.subr.bf16.mxu0 %v7242_v62  ;;  %v412_v42 = vld [vmem:[#allocation5 + $0x228] sm:$0xff] }
 0x10c   : > { %3695 = vmatpush2.bf16.msra.mxu1 %v7240_v30  ;;  %9934 = vst [vmem:[#allocation193_spill] sm:$0xff] %v7257_v25  ;;  %v536_v37 = vld [vmem:[#allocation5 + $0x608] sm:$0xff]  ;;  %9936 = vst [vmem:[#allocation195_spill] sm:$0xff] %v7264_v59  ;;  %v7266_v50 = vcombine.high %v408_v49, %v412_v42  ;;  %v7272_v54 = vcombine.low %v408_v49, %v412_v42 }
 0x10d   : > { %3696 = vmatprep.subr.bf16.mxu1 %v7245_v41  ;;  %v540_v1 = vld [vmem:[#allocation5 + $0x628] sm:$0xff] }
 0x10e   : > { %3646 = vmatpush2.bf16.msra.mxu0 %v7248_v55  ;;  %9937 = vst [vmem:[#allocation196_spill] sm:$0xff] %v7266_v50  ;;  %v7269_v7 = vcombine.high %v536_v37, %v540_v1  ;;  %v656_v41 = vld [vmem:[#allocation5 + $0x9c8] sm:$0xff]  ;;  %9939 = vst [vmem:[#allocation198_spill] sm:$0xff] %v7272_v54  ;;  %v7276_v39 = vcombine.low %v536_v37, %v540_v1 }
 0x10f   : > { %3647 = vmatprep.subr.bf16.mxu0 %v7254_v43  ;;  %v660_v62 = vld [vmem:[#allocation5 + $0x9e8] sm:$0xff] }
 0x110   : > { %3697 = vmatpush2.bf16.msra.mxu1 %v7252_v23  ;;  %9938 = vst [vmem:[#allocation197_spill] sm:$0xff] %v7269_v7  ;;  %v784_v30 = vld [vmem:[#allocation5 + $0xdc8] sm:$0xff]  ;;  %9940 = vst [vmem:[#allocation199_spill] sm:$0xff] %v7276_v39  ;;  %v7278_v44 = vcombine.high %v656_v41, %v660_v62  ;;  %v7284_v42 = vcombine.low %v656_v41, %v660_v62 }
 0x111   : > { %3698 = vmatprep.subr.bf16.mxu1 %v7257_v25  ;;  %v788_v11 = vld [vmem:[#allocation5 + $0xde8] sm:$0xff] }
 0x112   : > { %3648 = vmatpush2.bf16.msra.mxu0 %v7260_v45  ;;  %9941 = vst [vmem:[#allocation200_spill] sm:$0xff] %v7278_v44  ;;  %v7281_v33 = vcombine.high %v784_v30, %v788_v11  ;;  %v648_v25 = vld [vmem:[#allocation5 + $0x988] sm:$0xff]  ;;  %9943 = vst [vmem:[#allocation202_spill] sm:$0xff] %v7284_v42  ;;  %v7288_v1 = vcombine.low %v784_v30, %v788_v11 }
 0x113   : > { %3649 = vmatprep.subr.bf16.mxu0 %v7266_v50  ;;  %v652_v43 = vld [vmem:[#allocation5 + $0x9a8] sm:$0xff] }
 0x114   : > { %3699 = vmatpush2.bf16.msra.mxu1 %v7264_v59  ;;  %9942 = vst [vmem:[#allocation201_spill] sm:$0xff] %v7281_v33  ;;  %v776_v23 = vld [vmem:[#allocation5 + $0xd88] sm:$0xff]  ;;  %9944 = vst [vmem:[#allocation203_spill] sm:$0xff] %v7288_v1  ;;  %v7290_v37 = vcombine.high %v648_v25, %v652_v43  ;;  %v7298_v62 = vcombine.low %v648_v25, %v652_v43 }
 0x115   : > { %3700 = vmatprep.subr.bf16.mxu1 %v7269_v7  ;;  %v780_v55 = vld [vmem:[#allocation5 + $0xda8] sm:$0xff] }
 0x116   : > { %3650 = vmatpush2.bf16.msra.mxu0 %v7272_v54  ;;  %9945 = vst [vmem:[#allocation204_spill] sm:$0xff] %v7290_v37  ;;  %v7293_v49 = vcombine.high %v776_v23, %v780_v55  ;;  %v640_v7 = vld [vmem:[#allocation5 + $0x948] sm:$0xff]  ;;  %9947 = vst [vmem:[#allocation206_spill] sm:$0xff] %v7298_v62  ;;  %v7302_v11 = vcombine.low %v776_v23, %v780_v55 }
 0x117   : > { %3721 = vmatprep.subr.bf16.mxu0 %v7278_v44  ;;  %v644_v50 = vld [vmem:[#allocation5 + $0x968] sm:$0xff] }
 0x118   : > { %3701 = vmatpush2.bf16.msra.mxu1 %v7276_v39  ;;  %9946 = vst [vmem:[#allocation205_spill] sm:$0xff] %v7293_v49  ;;  %v768_v59 = vld [vmem:[#allocation5 + $0xd48] sm:$0xff]  ;;  %9948 = vst [vmem:[#allocation207_spill] sm:$0xff] %v7302_v11  ;;  %v7304_v30 = vcombine.high %v640_v7, %v644_v50  ;;  %v7312_v43 = vcombine.low %v640_v7, %v644_v50 }
 0x119   : > { %3772 = vmatprep.subr.bf16.mxu1 %v7281_v33  ;;  %3652 = vmatmul.mubr.bf16.vlgmr.msra.gmra.mxu0 %v6819_v17  ;;  %v772_v54 = vld [vmem:[#allocation5 + $0xd68] sm:$0xff] }
 0x11a   : > { %3722 = vmatpush1.bf16.msra.mxu0 %v7284_v42  ;;  %9949 = vst [vmem:[#allocation208_spill] sm:$0xff] %v7304_v30  ;;  %v7307_v41 = vcombine.high %v768_v59, %v772_v54  ;;  %v632_v33 = vld [vmem:[#allocation5 + $0x908] sm:$0xff]  ;;  %3661 = vmatprep.mubr.bf16.mxu0 %v6839_v52  ;;  %9951 = vst [vmem:[#allocation210_spill] sm:$0xff] %v7312_v43  ;;  %v7316_v55 = vcombine.low %v768_v59, %v772_v54 }
 0x11b   : > { %3703 = vmatmul.mubr.bf16.vlgmr.msra.gmra.mxu1 %v6825_v60  ;;  %3723 = vmatprep.subr.bf16.mxu0 %v7290_v37  ;;  %v636_v44 = vld [vmem:[#allocation5 + $0x928] sm:$0xff] }
 0x11c   : > { %3773 = vmatpush1.bf16.msra.mxu1 %v7288_v1  ;;  %9950 = vst [vmem:[#allocation209_spill] sm:$0xff] %v7307_v41  ;;  %v760_v39 = vld [vmem:[#allocation5 + $0xd08] sm:$0xff]  ;;  %3712 = vmatprep.mubr.bf16.mxu1 %v6844_v40  ;;  %9952 = vst [vmem:[#allocation211_spill] sm:$0xff] %v7316_v55  ;;  %v7318_v23 = vcombine.high %v632_v33, %v636_v44  ;;  %v7325_v50 = vcombine.low %v632_v33, %v636_v44 }
 0x11d   : > { %3774 = vmatprep.subr.bf16.mxu1 %v7293_v49  ;;  %v764_v42 = vld [vmem:[#allocation5 + $0xd28] sm:$0xff] }
 0x11e   : > { %3724 = vmatpush1.bf16.msra.mxu0 %v7298_v62  ;;  %9953 = vst [vmem:[#allocation212_spill] sm:$0xff] %v7318_v23  ;;  %v7321_v25 = vcombine.high %v760_v39, %v764_v42  ;;  %v624_v49 = vld [vmem:[#allocation5 + $0x8c8] sm:$0xff]  ;;  %9955 = vst [vmem:[#allocation214_spill] sm:$0xff] %v7325_v50  ;;  %v7330_v59 = vcombine.low %v760_v39, %v764_v42 }
 0x11f   : > { %3725 = vmatprep.subr.bf16.mxu0 %v7304_v30  ;;  %v628_v37 = vld [vmem:[#allocation5 + $0x8e8] sm:$0xff] }
 0x120   : > { %3775 = vmatpush1.bf16.msra.mxu1 %v7302_v11  ;;  %9954 = vst [vmem:[#allocation213_spill] sm:$0xff] %v7321_v25  ;;  %v752_v1 = vld [vmem:[#allocation5 + $0xcc8] sm:$0xff]  ;;  %9956 = vst [vmem:[#allocation215_spill] sm:$0xff] %v7330_v59  ;;  %v7332_v7 = vcombine.high %v624_v49, %v628_v37 }
 0x121   : > { %3776 = vmatprep.subr.bf16.mxu1 %v7307_v41  ;;  %v756_v45 = vld [vmem:[#allocation5 + $0xce8] sm:$0xff]  ;;  %3662 = vmatmul.mubr.bf16.gmra.mxu0 %v6862_v61 }
 0x122   : > { %3726 = vmatpush1.bf16.msra.mxu0 %v7312_v43  ;;  %9957 = vst [vmem:[#allocation216_spill] sm:$0xff] %v7332_v7  ;;  %v7335_v54 = vcombine.high %v752_v1, %v756_v45  ;;  %v616_v41 = vld [vmem:[#allocation5 + $0x888] sm:$0xff]  ;;  %3753 = vmatprep.mubr.bf16.mxu0 %v6879_v51  ;;  %v7344_v39 = vcombine.low %v752_v1, %v756_v45 }
 0x123   : > { %3713 = vmatmul.mubr.bf16.gmra.mxu1 %v6868_v47  ;;  %3727 = vmatprep.subr.bf16.mxu0 %v7318_v23  ;;  %v620_v30 = vld [vmem:[#allocation5 + $0x8a8] sm:$0xff] }
 0x124   : > { %3777 = vmatpush1.bf16.msra.mxu1 %v7316_v55  ;;  %9958 = vst [vmem:[#allocation217_spill] sm:$0xff] %v7335_v54  ;;  %v744_v44 = vld [vmem:[#allocation5 + $0xc88] sm:$0xff]  ;;  %3804 = vmatprep.mubr.bf16.mxu1 %v6882_v13  ;;  %v7340_v55 = vcombine.low %v624_v49, %v628_v37  ;;  %9960 = vst [vmem:[#allocation219_spill] sm:$0xff] %v7344_v39  ;;  %v7346_v42 = vcombine.high %v616_v41, %v620_v30 }
 0x125   : > { %3778 = vmatprep.subr.bf16.mxu1 %v7321_v25  ;;  %v748_v33 = vld [vmem:[#allocation5 + $0xca8] sm:$0xff]  ;;  %v7352_v37 = vcombine.low %v616_v41, %v620_v30 }
 0x126   : > { %3728 = vmatpush1.bf16.msra.mxu0 %v7325_v50  ;;  %9959 = vst [vmem:[#allocation218_spill] sm:$0xff] %v7340_v55  ;;  %9961 = vst [vmem:[#allocation220_spill] sm:$0xff] %v7346_v42  ;;  %v7349_v25 = vcombine.high %v744_v44, %v748_v33  ;;  %v608_v23 = vld [vmem:[#allocation5 + $0x848] sm:$0xff]  ;;  %v7356_v45 = vcombine.low %v744_v44, %v748_v33 }
 0x127   : > { %3729 = vmatprep.subr.bf16.mxu0 %v7332_v7  ;;  %v612_v43 = vld [vmem:[#allocation5 + $0x868] sm:$0xff]  ;;  %9963 = vst [vmem:[#allocation222_spill] sm:$0xff] %v7352_v37 }
 0x128   : > { %3779 = vmatpush1.bf16.msra.mxu1 %v7330_v59  ;;  %9962 = vst [vmem:[#allocation221_spill] sm:$0xff] %v7349_v25  ;;  %v736_v11 = vld [vmem:[#allocation5 + $0xc48] sm:$0xff]  ;;  %9964 = vst [vmem:[#allocation223_spill] sm:$0xff] %v7356_v45  ;;  %v7358_v1 = vcombine.high %v608_v23, %v612_v43  ;;  %v7364_v30 = vcombine.low %v608_v23, %v612_v43 }
 0x129   : > { %3780 = vmatprep.subr.bf16.mxu1 %v7335_v54  ;;  %v740_v62 = vld [vmem:[#allocation5 + $0xc68] sm:$0xff] }
 0x12a   : > { %3730 = vmatpush1.bf16.msra.mxu0 %v7340_v55  ;;  %9965 = vst [vmem:[#allocation224_spill] sm:$0xff] %v7358_v1  ;;  %v7361_v49 = vcombine.high %v736_v11, %v740_v62  ;;  %v600_v54 = vld [vmem:[#allocation5 + $0x808] sm:$0xff]  ;;  %9967 = vst [vmem:[#allocation226_spill] sm:$0xff] %v7364_v30  ;;  %v7368_v41 = vcombine.low %v736_v11, %v740_v62 }
 0x12b   : > { %3731 = vmatprep.subr.bf16.mxu0 %v7346_v42  ;;  %v604_v7 = vld [vmem:[#allocation5 + $0x828] sm:$0xff] }
 0x12c   : > { %3781 = vmatpush1.bf16.msra.mxu1 %v7344_v39  ;;  %9966 = vst [vmem:[#allocation225_spill] sm:$0xff] %v7361_v49  ;;  %v728_v59 = vld [vmem:[#allocation5 + $0xc08] sm:$0xff]  ;;  %9968 = vst [vmem:[#allocation227_spill] sm:$0xff] %v7368_v41  ;;  %v7370_v44 = vcombine.high %v600_v54, %v604_v7  ;;  %v7376_v43 = vcombine.low %v600_v54, %v604_v7 }
 0x12d   : > { %3782 = vmatprep.subr.bf16.mxu1 %v7349_v25  ;;  %v732_v50 = vld [vmem:[#allocation5 + $0xc28] sm:$0xff] }
 0x12e   : > { %3732 = vmatpush1.bf16.msra.mxu0 %v7352_v37  ;;  %9969 = vst [vmem:[#allocation228_spill] sm:$0xff] %v7370_v44  ;;  %v7373_v33 = vcombine.high %v728_v59, %v732_v50  ;;  %v720_v25 = vld [vmem:[#allocation5 + $0xbc8] sm:$0xff]  ;;  %9971 = vst [vmem:[#allocation230_spill] sm:$0xff] %v7376_v43  ;;  %v7380_v62 = vcombine.low %v728_v59, %v732_v50 }
 0x12f   : > { %3733 = vmatprep.subr.bf16.mxu0 %v7358_v1  ;;  %v724_v42 = vld [vmem:[#allocation5 + $0xbe8] sm:$0xff] }
 0x130   : > { %3783 = vmatpush1.bf16.msra.mxu1 %v7356_v45  ;;  %9970 = vst [vmem:[#allocation229_spill] sm:$0xff] %v7373_v33  ;;  %v848_v39 = vld [vmem:[#allocation5 + $0xfc8] sm:$0xff]  ;;  %9972 = vst [vmem:[#allocation231_spill] sm:$0xff] %v7380_v62  ;;  %v7382_v11 = vcombine.high %v720_v25, %v724_v42  ;;  %v7388_v7 = vcombine.low %v720_v25, %v724_v42 }
 0x131   : > { %3784 = vmatprep.subr.bf16.mxu1 %v7361_v49  ;;  %v852_v55 = vld [vmem:[#allocation5 + $0xfe8] sm:$0xff] }
 0x132   : > { %3734 = vmatpush1.bf16.msra.mxu0 %v7364_v30  ;;  %9973 = vst [vmem:[#allocation232_spill] sm:$0xff] %v7382_v11  ;;  %v7385_v23 = vcombine.high %v848_v39, %v852_v55  ;;  %v712_v49 = vld [vmem:[#allocation5 + $0xb88] sm:$0xff]  ;;  %9975 = vst [vmem:[#allocation234_spill] sm:$0xff] %v7388_v7  ;;  %v7392_v50 = vcombine.low %v848_v39, %v852_v55 }
 0x133   : > { %3735 = vmatprep.subr.bf16.mxu0 %v7370_v44  ;;  %v716_v1 = vld [vmem:[#allocation5 + $0xba8] sm:$0xff] }
 0x134   : > { %3785 = vmatpush1.bf16.msra.mxu1 %v7368_v41  ;;  %9974 = vst [vmem:[#allocation233_spill] sm:$0xff] %v7385_v23  ;;  %v840_v45 = vld [vmem:[#allocation5 + $0xf88] sm:$0xff]  ;;  %9976 = vst [vmem:[#allocation235_spill] sm:$0xff] %v7392_v50  ;;  %v7394_v59 = vcombine.high %v712_v49, %v716_v1  ;;  %v7400_v25 = vcombine.low %v712_v49, %v716_v1 }
 0x135   : > { %3786 = vmatprep.subr.bf16.mxu1 %v7373_v33  ;;  %v844_v37 = vld [vmem:[#allocation5 + $0xfa8] sm:$0xff] }
 0x136   : > { %3736 = vmatpush1.bf16.msra.mxu0 %v7376_v43  ;;  %9977 = vst [vmem:[#allocation236_spill] sm:$0xff] %v7394_v59  ;;  %v7397_v54 = vcombine.high %v840_v45, %v844_v37  ;;  %v704_v33 = vld [vmem:[#allocation5 + $0xb48] sm:$0xff]  ;;  %9979 = vst [vmem:[#allocation238_spill] sm:$0xff] %v7400_v25  ;;  %v7404_v55 = vcombine.low %v840_v45, %v844_v37 }
 0x137   : > { %3737 = vmatprep.subr.bf16.mxu0 %v7382_v11  ;;  %v708_v44 = vld [vmem:[#allocation5 + $0xb68] sm:$0xff] }
 0x138   : > { %3787 = vmatpush1.bf16.msra.mxu1 %v7380_v62  ;;  %9978 = vst [vmem:[#allocation237_spill] sm:$0xff] %v7397_v54  ;;  %v832_v41 = vld [vmem:[#allocation5 + $0xf48] sm:$0xff]  ;;  %9980 = vst [vmem:[#allocation239_spill] sm:$0xff] %v7404_v55  ;;  %v7406_v39 = vcombine.high %v704_v33, %v708_v44  ;;  %v7412_v1 = vcombine.low %v704_v33, %v708_v44 }
 0x139   : > { %3788 = vmatprep.subr.bf16.mxu1 %v7385_v23  ;;  %v836_v30 = vld [vmem:[#allocation5 + $0xf68] sm:$0xff] }
 0x13a   : > { %3738 = vmatpush2.bf16.msra.mxu0 %v7388_v7  ;;  %9981 = vst [vmem:[#allocation240_spill] sm:$0xff] %v7406_v39  ;;  %v7409_v42 = vcombine.high %v832_v41, %v836_v30  ;;  %v696_v23 = vld [vmem:[#allocation5 + $0xb08] sm:$0xff]  ;;  %9983 = vst [vmem:[#allocation242_spill] sm:$0xff] %v7412_v1  ;;  %v7416_v37 = vcombine.low %v832_v41, %v836_v30 }
 0x13b   : > { %3739 = vmatprep.subr.bf16.mxu0 %v7394_v59  ;;  %v700_v11 = vld [vmem:[#allocation5 + $0xb28] sm:$0xff] }
 0x13c   : > { %3789 = vmatpush2.bf16.msra.mxu1 %v7392_v50  ;;  %9982 = vst [vmem:[#allocation241_spill] sm:$0xff] %v7409_v42  ;;  %v824_v62 = vld [vmem:[#allocation5 + $0xf08] sm:$0xff]  ;;  %9984 = vst [vmem:[#allocation243_spill] sm:$0xff] %v7416_v37  ;;  %v7418_v45 = vcombine.high %v696_v23, %v700_v11  ;;  %v7424_v44 = vcombine.low %v696_v23, %v700_v11 }
 0x13d   : > { %3790 = vmatprep.subr.bf16.mxu1 %v7397_v54  ;;  %v828_v43 = vld [vmem:[#allocation5 + $0xf28] sm:$0xff] }
 0x13e   : > { %3740 = vmatpush2.bf16.msra.mxu0 %v7400_v25  ;;  %9985 = vst [vmem:[#allocation244_spill] sm:$0xff] %v7418_v45  ;;  %v7421_v49 = vcombine.high %v824_v62, %v828_v43  ;;  %v688_v54 = vld [vmem:[#allocation5 + $0xac8] sm:$0xff]  ;;  %9987 = vst [vmem:[#allocation246_spill] sm:$0xff] %v7424_v44  ;;  %v7428_v30 = vcombine.low %v824_v62, %v828_v43 }
 0x13f   : > { %3741 = vmatprep.subr.bf16.mxu0 %v7406_v39  ;;  %v692_v59 = vld [vmem:[#allocation5 + $0xae8] sm:$0xff] }
 0x140   : > { %3791 = vmatpush2.bf16.msra.mxu1 %v7404_v55  ;;  %9986 = vst [vmem:[#allocation245_spill] sm:$0xff] %v7421_v49  ;;  %v816_v50 = vld [vmem:[#allocation5 + $0xec8] sm:$0xff]  ;;  %9988 = vst [vmem:[#allocation247_spill] sm:$0xff] %v7428_v30  ;;  %v7430_v41 = vcombine.high %v688_v54, %v692_v59  ;;  %v7436_v11 = vcombine.low %v688_v54, %v692_v59 }
 0x141   : > { %3792 = vmatprep.subr.bf16.mxu1 %v7409_v42  ;;  %v820_v7 = vld [vmem:[#allocation5 + $0xee8] sm:$0xff] }
 0x142   : > { %3742 = vmatpush2.bf16.msra.mxu0 %v7412_v1  ;;  %9989 = vst [vmem:[#allocation248_spill] sm:$0xff] %v7430_v41  ;;  %v7433_v33 = vcombine.high %v816_v50, %v820_v7  ;;  %v680_v42 = vld [vmem:[#allocation5 + $0xa88] sm:$0xff]  ;;  %9991 = vst [vmem:[#allocation250_spill] sm:$0xff] %v7436_v11  ;;  %v7440_v43 = vcombine.low %v816_v50, %v820_v7 }
 0x143   : > { %3743 = vmatprep.subr.bf16.mxu0 %v7418_v45  ;;  %v684_v39 = vld [vmem:[#allocation5 + $0xaa8] sm:$0xff] }
 0x144   : > { %3793 = vmatpush2.bf16.msra.mxu1 %v7416_v37  ;;  %9990 = vst [vmem:[#allocation249_spill] sm:$0xff] %v7433_v33  ;;  %v808_v55 = vld [vmem:[#allocation5 + $0xe88] sm:$0xff]  ;;  %9992 = vst [vmem:[#allocation251_spill] sm:$0xff] %v7440_v43  ;;  %v7442_v62 = vcombine.high %v680_v42, %v684_v39  ;;  %v7448_v59 = vcombine.low %v680_v42, %v684_v39 }
 0x145   : > { %3794 = vmatprep.subr.bf16.mxu1 %v7421_v49  ;;  %v812_v25 = vld [vmem:[#allocation5 + $0xea8] sm:$0xff] }
 0x146   : > { %3744 = vmatpush2.bf16.msra.mxu0 %v7424_v44  ;;  %9993 = vst [vmem:[#allocation252_spill] sm:$0xff] %v7442_v62  ;;  %v7445_v23 = vcombine.high %v808_v55, %v812_v25  ;;  %v672_v49 = vld [vmem:[#allocation5 + $0xa48] sm:$0xff]  ;;  %9995 = vst [vmem:[#allocation254_spill] sm:$0xff] %v7448_v59  ;;  %v7452_v7 = vcombine.low %v808_v55, %v812_v25 }
 0x147   : > { %3745 = vmatprep.subr.bf16.mxu0 %v7430_v41  ;;  %v676_v45 = vld [vmem:[#allocation5 + $0xa68] sm:$0xff] }
 0x148   : > { %3795 = vmatpush2.bf16.msra.mxu1 %v7428_v30  ;;  %9994 = vst [vmem:[#allocation253_spill] sm:$0xff] %v7445_v23  ;;  %v800_v37 = vld [vmem:[#allocation5 + $0xe48] sm:$0xff]  ;;  %9996 = vst [vmem:[#allocation255_spill] sm:$0xff] %v7452_v7  ;;  %v7454_v50 = vcombine.high %v672_v49, %v676_v45  ;;  %v7460_v39 = vcombine.low %v672_v49, %v676_v45 }
 0x149   : > { %3796 = vmatprep.subr.bf16.mxu1 %v7433_v33  ;;  %v804_v1 = vld [vmem:[#allocation5 + $0xe68] sm:$0xff] }
 0x14a   : > { %3746 = vmatpush2.bf16.msra.mxu0 %v7436_v11  ;;  %9997 = vst [vmem:[#allocation256_spill] sm:$0xff] %v7454_v50  ;;  %v7457_v54 = vcombine.high %v800_v37, %v804_v1  ;;  %v664_v33 = vld [vmem:[#allocation5 + $0xa08] sm:$0xff]  ;;  %9999 = vst [vmem:[#allocation258_spill] sm:$0xff] %v7460_v39  ;;  %v7464_v25 = vcombine.low %v800_v37, %v804_v1  ;;  %v533_v11 = vld [vmem:[#allocation5 + $0x5f0] sm:$0xff] }
 0x14b   : > { %3747 = vmatprep.subr.bf16.mxu0 %v7442_v62  ;;  %v668_v41 = vld [vmem:[#allocation5 + $0xa28] sm:$0xff]  ;;  %v405_v62 = vld [vmem:[#allocation5 + $0x1f0] sm:$0xff] }
 0x14c   : > { %3797 = vmatpush2.bf16.msra.mxu1 %v7440_v43  ;;  %9998 = vst [vmem:[#allocation257_spill] sm:$0xff] %v7457_v54  ;;  %v792_v30 = vld [vmem:[#allocation5 + $0xe08] sm:$0xff]  ;;  %10000 = vst [vmem:[#allocation259_spill] sm:$0xff] %v7464_v25  ;;  %v7466_v55 = vcombine.high %v664_v33, %v668_v41  ;;  %v529_v43 = vld [vmem:[#allocation5 + $0x5d0] sm:$0xff]  ;;  %v7472_v45 = vcombine.low %v664_v33, %v668_v41 }
 0x14d   : > { %3798 = vmatprep.subr.bf16.mxu1 %v7445_v23  ;;  %v796_v44 = vld [vmem:[#allocation5 + $0xe28] sm:$0xff]  ;;  %v401_v23 = vld [vmem:[#allocation5 + $0x1d0] sm:$0xff]  ;;  %v7481_v49 = vcombine.high %v529_v43, %v533_v11 }
 0x14e   : > { %3748 = vmatpush2.bf16.msra.mxu0 %v7448_v59  ;;  %10001 = vst [vmem:[#allocation260_spill] sm:$0xff] %v7466_v55  ;;  %v7469_v42 = vcombine.high %v792_v30, %v796_v44  ;;  %10003 = vst [vmem:[#allocation262_spill] sm:$0xff] %v7472_v45  ;;  %v7476_v1 = vcombine.low %v792_v30, %v796_v44  ;;  %v7478_v37 = vcombine.high %v401_v23, %v405_v62  ;;  %v525_v59 = vld [vmem:[#allocation5 + $0x5b0] sm:$0xff] }
 0x14f   : > { %3749 = vmatprep.subr.bf16.mxu0 %v7454_v50  ;;  %10006 = vst [vmem:[#allocation265_spill] sm:$0xff] %v7481_v49  ;;  %v397_v50 = vld [vmem:[#allocation5 + $0x1b0] sm:$0xff]  ;;  %v7484_v41 = vcombine.low %v401_v23, %v405_v62  ;;  %v7488_v44 = vcombine.low %v529_v43, %v533_v11 }
 0x150   : > { %3799 = vmatpush2.bf16.msra.mxu1 %v7452_v7  ;;  %10002 = vst [vmem:[#allocation261_spill] sm:$0xff] %v7469_v42  ;;  %10004 = vst [vmem:[#allocation263_spill] sm:$0xff] %v7476_v1  ;;  %v521_v7 = vld [vmem:[#allocation5 + $0x590] sm:$0xff] }
 0x151   : > { %3800 = vmatprep.subr.bf16.mxu1 %v7457_v54  ;;  %10005 = vst [vmem:[#allocation264_spill] sm:$0xff] %v7478_v37  ;;  %v393_v54 = vld [vmem:[#allocation5 + $0x190] sm:$0xff]  ;;  %10007 = vst [vmem:[#allocation266_spill] sm:$0xff] %v7484_v41  ;;  %v7493_v33 = vcombine.high %v521_v7, %v525_v59 }
 0x152   : > { %3750 = vmatpush2.bf16.msra.mxu0 %v7460_v39  ;;  %10008 = vst [vmem:[#allocation267_spill] sm:$0xff] %v7488_v44  ;;  %v7490_v30 = vcombine.high %v393_v54, %v397_v50  ;;  %v517_v62 = vld [vmem:[#allocation5 + $0x570] sm:$0xff]  ;;  %v7498_v11 = vcombine.low %v393_v54, %v397_v50 }
 0x153   : > { %3751 = vmatprep.subr.bf16.mxu0 %v7466_v55  ;;  %10010 = vst [vmem:[#allocation269_spill] sm:$0xff] %v7493_v33  ;;  %v389_v55 = vld [vmem:[#allocation5 + $0x170] sm:$0xff] }
 0x154   : > { %3801 = vmatpush2.bf16.msra.mxu1 %v7464_v25  ;;  %10009 = vst [vmem:[#allocation268_spill] sm:$0xff] %v7490_v30  ;;  %10011 = vst [vmem:[#allocation270_spill] sm:$0xff] %v7498_v11  ;;  %v377_v50 = vld [vmem:[#allocation5 + $0x110] sm:$0xff] }
 0x155   : > { %3802 = vmatprep.subr.bf16.mxu1 %v7469_v42  ;;  %v385_v42 = vld [vmem:[#allocation5 + $0x150] sm:$0xff] }
 0x156   : > { %3752 = vmatpush2.bf16.msra.mxu0 %v7472_v45  ;;  %v3449_v25 = vpop.f32.mrf.mxu0  ;;  %v513_v45 = vld [vmem:[#allocation5 + $0x550] sm:$0xff] }
 0x157   : > { %3823 = vmatprep.subr.bf16.mxu0 %v7478_v37  ;;  %v7504_v37 = vcombine.low %v521_v7, %v525_v59  ;;  %v7510_v22 = vcombine.high %v513_v45, %v517_v62  ;;  %v381_v54 = vld [vmem:[#allocation5 + $0x130] sm:$0xff]  ;;  %v7516_v7 = vcombine.low %v385_v42, %v389_v55 }
 0x158   : > { %3803 = vmatpush2.bf16.msra.mxu1 %v7476_v1  ;;  %v3500_v23 = vpop.f32.mrf.mxu1  ;;  %v7506_v1 = vcombine.high %v385_v42, %v389_v55  ;;  %v369_v55 = vld [vmem:[#allocation5 + $0xd0] sm:$0xff] }
 0x159   : > { %3874 = vmatprep.subr.bf16.mxu1 %v7481_v49  ;;  %3754 = vmatmul.mubr.bf16.vlgmr.msra.gmra.mxu0 %v7069_v0  ;;  %v7500_v43 = vadd.f32 %v3500_v23, %v3449_v25  ;;  %v3451_v49 = vpop.f32.mrf.mxu0  ;;  %10012 = vst [vmem:[#allocation271_spill] sm:$0xff] %v7504_v37  ;;  %10014 = vst [vmem:[#allocation273_spill] sm:$0xff] %v7510_v22  ;;  %v373_v42 = vld [vmem:[#allocation5 + $0xf0] sm:$0xff] }
 0x15a   : > { %3824 = vmatpush1.bf16.msra.mxu0 %v7484_v41  ;;  %10013 = vst [vmem:[#allocation272_spill] sm:$0xff] %v7506_v1  ;;  %v3502_v39 = vpop.f32.mrf.mxu1  ;;  %3763 = vmatprep.mubr.bf16.mxu0 %v7087_v24  ;;  %10015 = vst [vmem:[#allocation274_spill] sm:$0xff] %v7516_v7 }
 0x15b   : > { %3805 = vmatmul.mubr.bf16.vlgmr.msra.gmra.mxu1 %v7073_v6  ;;  %3825 = vmatprep.subr.bf16.mxu0 %v7490_v30  ;;  %v7512_v25 = vadd.f32 %v3502_v39, %v3451_v49  ;;  %v3453_v23 = vpop.f32.mrf.mxu0  ;;  %v509_v30 = vld [vmem:[#allocation5 + $0x530] sm:$0xff]  ;;  %v7524_v39 = vcombine.low %v513_v45, %v517_v62  ;;  %v7526_v49 = vcombine.high %v377_v50, %v381_v54 }
 0x15c   : > { %3875 = vmatpush1.bf16.msra.mxu1 %v7488_v44  ;;  %3814 = vmatprep.mubr.bf16.mxu1 %v7090_v12  ;;  %v505_v44 = vld [vmem:[#allocation5 + $0x510] sm:$0xff]  ;;  %v3504_v59 = vpop.f32.mrf.mxu1  ;;  %v7536_v45 = vcombine.low %v377_v50, %v381_v54 }
 0x15d   : > { %3876 = vmatprep.subr.bf16.mxu1 %v7493_v33  ;;  %v7518_v41 = vadd.f32 %v3504_v59, %v3453_v23  ;;  %v7521_v33 = vpop.f32.mrf.mxu0  ;;  %10017 = vst [vmem:[#allocation276_spill] sm:$0xff] %v7524_v39  ;;  %10018 = vst [vmem:[#allocation277_spill] sm:$0xff] %v7526_v49  ;;  %v7531_v57 = vcombine.high %v505_v44, %v509_v30  ;;  %v497_v23 = vld [vmem:[#allocation5 + $0x4d0] sm:$0xff] }
 0x15e   : > { %3826 = vmatpush1.bf16.msra.mxu0 %v7498_v11  ;;  %10016 = vst [vmem:[#allocation275_spill] sm:$0xff] %v7521_v33  ;;  %v7528_v56 = vpop.f32.mrf.mxu1  ;;  %v501_v59 = vld [vmem:[#allocation5 + $0x4f0] sm:$0xff]  ;;  %10021 = vst [vmem:[#allocation280_spill] sm:$0xff] %v7536_v45 }
 0x15f   : > { %3827 = vmatprep.subr.bf16.mxu0 %v7506_v1  ;;  %10019 = vst [vmem:[#allocation278_spill] sm:$0xff] %v7528_v56  ;;  %10020 = vst [vmem:[#allocation279_spill] sm:$0xff] %v7531_v57  ;;  %v7542_v1 = vcombine.high %v369_v55, %v373_v42  ;;  %v7547_v33 = vcombine.high %v497_v23, %v501_v59  ;;  %v489_v54 = vld [vmem:[#allocation5 + $0x490] sm:$0xff] }
 0x160   : > { %3877 = vmatpush1.bf16.msra.mxu1 %v7504_v37  ;;  %v3459_v37 = vpop.f32.mrf.mxu0  ;;  %v3510_v62 = vpop.f32.mrf.mxu1 }
 0x161   : > { %3878 = vmatprep.subr.bf16.mxu1 %v7510_v22  ;;  %3764 = vmatmul.mubr.bf16.gmra.mxu0 %v7106_v2  ;;  %v7540_v22 = vcombine.low %v505_v44, %v509_v30  ;;  %10023 = vst [vmem:[#allocation282_spill] sm:$0xff] %v7542_v1  ;;  %v7544_v56 = vadd.f32 %v3510_v62, %v3459_v37  ;;  %10024 = vst [vmem:[#allocation283_spill] sm:$0xff] %v7547_v33 }
 0x162   : > { %3828 = vmatpush1.bf16.msra.mxu0 %v7516_v7  ;;  %v3461_v11 = vpop.f32.mrf.mxu0  ;;  %v361_v7 = vld [vmem:[#allocation5 + $0x90] sm:$0xff]  ;;  %v3512_v50 = vpop.f32.mrf.mxu1  ;;  %3855 = vmatprep.mubr.bf16.mxu0 %v6676_v31  ;;  %v7554_v37 = vcombine.low %v369_v55, %v373_v42  ;;  %v7558_v30 = vcombine.low %v497_v23, %v501_v59 }
 0x163   : > { %3815 = vmatmul.mubr.bf16.gmra.mxu1 %v7112_v46  ;;  %3829 = vmatprep.subr.bf16.mxu0 %v7526_v49  ;;  %10022 = vst [vmem:[#allocation281_spill] sm:$0xff] %v7540_v22  ;;  %v7550_v49 = vadd.f32 %v3512_v50, %v3461_v11  ;;  %v7560_v62 = vcombine.high %v361_v7, %v365_v15  ;;  %v353_v11 = vld [vmem:[#allocation5 + $0x50] sm:$0xff] }
 0x164   : > { %3879 = vmatpush1.bf16.msra.mxu1 %v7524_v39  ;;  %v493_v39 = vld [vmem:[#allocation5 + $0x4b0] sm:$0xff]  ;;  %v3463_v48 = vpop.f32.mrf.mxu0  ;;  %3906 = vmatprep.mubr.bf16.mxu1 %v6684_v38  ;;  %10025 = vst [vmem:[#allocation284_spill] sm:$0xff] %v7554_v37  ;;  %v3514_v44 = vpop.f32.mrf.mxu1  ;;  %10026 = vst [vmem:[#allocation285_spill] sm:$0xff] %v7558_v30  ;;  %v7566_v42 = vcombine.low %v361_v7, %v365_v15 }
 0x165   : > { %3880 = vmatprep.subr.bf16.mxu1 %v7531_v57  ;;  %10027 = vst [vmem:[#allocation286_spill] sm:$0xff] %v7560_v62  ;;  %v7563_v48 = vcombine.high %v489_v54, %v493_v39  ;;  %v357_v50 = vld [vmem:[#allocation5 + $0x70] sm:$0xff]  ;;  %v7570_v23 = vcombine.low %v489_v54, %v493_v39 }
 0x166   : > { %3830 = vmatpush1.bf16.msra.mxu0 %v7536_v45  ;;  %v3464_v57 = vpop.f32.mrf.mxu0  ;;  %v3515_v16 = vpop.f32.mrf.mxu1  ;;  %v481_v45 = vld [vmem:[#allocation5 + $0x450] sm:$0xff]  ;;  %10029 = vst [vmem:[#allocation288_spill] sm:$0xff] %v7566_v42  ;;  %v7578_v15 = vcombine.low %v353_v11, %v357_v50 }
 0x167   : > { %3831 = vmatprep.subr.bf16.mxu0 %v7542_v1  ;;  %10028 = vst [vmem:[#allocation287_spill] sm:$0xff] %v7563_v48  ;;  %v485_v55 = vld [vmem:[#allocation5 + $0x470] sm:$0xff]  ;;  %10030 = vst [vmem:[#allocation289_spill] sm:$0xff] %v7570_v23  ;;  %v7572_v57 = vcombine.high %v353_v11, %v357_v50 }
 0x168   : > { %3881 = vmatpush1.bf16.msra.mxu1 %v7540_v22  ;;  %v7575_v59 = vcombine.high %v481_v45, %v485_v55  ;;  %v345_v44 = vld [vmem:[#allocation5 + $0x10] sm:$0xff]  ;;  %10033 = vst [vmem:[#allocation292_spill] sm:$0xff] %v7578_v15  ;;  %v7582_v7 = vcombine.low %v481_v45, %v485_v55 }
 0x169   : > { %3882 = vmatprep.subr.bf16.mxu1 %v7547_v33  ;;  %10031 = vst [vmem:[#allocation290_spill] sm:$0xff] %v7572_v57  ;;  %v349_v16 = vld [vmem:[#allocation5 + $0x30] sm:$0xff] }
 0x16a   : > { %3832 = vmatpush1.bf16.msra.mxu0 %v7554_v37  ;;  %10032 = vst [vmem:[#allocation291_spill] sm:$0xff] %v7575_v59  ;;  %v473_v33 = vld [vmem:[#allocation5 + $0x410] sm:$0xff]  ;;  %10034 = vst [vmem:[#allocation293_spill] sm:$0xff] %v7582_v7  ;;  %v7584_v39 = vcombine.high %v345_v44, %v349_v16  ;;  %v7590_v11 = vcombine.low %v345_v44, %v349_v16 }
 0x16b   : > { %3833 = vmatprep.subr.bf16.mxu0 %v7560_v62  ;;  %v477_v1 = vld [vmem:[#allocation5 + $0x430] sm:$0xff] }
 0x16c   : > { %3883 = vmatpush1.bf16.msra.mxu1 %v7558_v30  ;;  %10035 = vst [vmem:[#allocation294_spill] sm:$0xff] %v7584_v39  ;;  %v7587_v54 = vcombine.high %v473_v33, %v477_v1  ;;  %v469_v62 = vld [vmem:[#allocation5 + $0x3f0] sm:$0xff]  ;;  %10037 = vst [vmem:[#allocation296_spill] sm:$0xff] %v7590_v11  ;;  %v7594_v45 = vcombine.low %v473_v33, %v477_v1 }
 0x16d   : > { %3884 = vmatprep.subr.bf16.mxu1 %v7563_v48  ;;  %v465_v48 = vld [vmem:[#allocation5 + $0x3d0] sm:$0xff] }
 0x16e   : > { %3834 = vmatpush1.bf16.msra.mxu0 %v7566_v42  ;;  %10036 = vst [vmem:[#allocation295_spill] sm:$0xff] %v7587_v54  ;;  %v593_v30 = vld [vmem:[#allocation5 + $0x7d0] sm:$0xff]  ;;  %10038 = vst [vmem:[#allocation297_spill] sm:$0xff] %v7594_v45  ;;  %v7596_v50 = vcombine.high %v465_v48, %v469_v62  ;;  %v7602_v44 = vcombine.low %v465_v48, %v469_v62 }
 0x16f   : > { %3835 = vmatprep.subr.bf16.mxu0 %v7572_v57  ;;  %v597_v37 = vld [vmem:[#allocation5 + $0x7f0] sm:$0xff] }
 0x170   : > { %3885 = vmatpush1.bf16.msra.mxu1 %v7570_v23  ;;  %10039 = vst [vmem:[#allocation298_spill] sm:$0xff] %v7596_v50  ;;  %v7599_v55 = vcombine.high %v593_v30, %v597_v37  ;;  %v461_v57 = vld [vmem:[#allocation5 + $0x3b0] sm:$0xff]  ;;  %10041 = vst [vmem:[#allocation300_spill] sm:$0xff] %v7602_v44  ;;  %v7606_v1 = vcombine.low %v593_v30, %v597_v37 }
 0x171   : > { %3886 = vmatprep.subr.bf16.mxu1 %v7575_v59  ;;  %v457_v59 = vld [vmem:[#allocation5 + $0x390] sm:$0xff] }
 0x172   : > { %3836 = vmatpush1.bf16.msra.mxu0 %v7578_v15  ;;  %10040 = vst [vmem:[#allocation299_spill] sm:$0xff] %v7599_v55  ;;  %v585_v23 = vld [vmem:[#allocation5 + $0x790] sm:$0xff]  ;;  %10042 = vst [vmem:[#allocation301_spill] sm:$0xff] %v7606_v1  ;;  %v7608_v33 = vcombine.high %v457_v59, %v461_v57  ;;  %v7614_v62 = vcombine.low %v457_v59, %v461_v57 }
 0x173   : > { %3837 = vmatprep.subr.bf16.mxu0 %v7584_v39  ;;  %v589_v42 = vld [vmem:[#allocation5 + $0x7b0] sm:$0xff] }
 0x174   : > { %3887 = vmatpush1.bf16.msra.mxu1 %v7582_v7  ;;  %10043 = vst [vmem:[#allocation302_spill] sm:$0xff] %v7608_v33  ;;  %v7611_v16 = vcombine.high %v585_v23, %v589_v42  ;;  %v453_v39 = vld [vmem:[#allocation5 + $0x370] sm:$0xff]  ;;  %10045 = vst [vmem:[#allocation304_spill] sm:$0xff] %v7614_v62  ;;  %v7618_v37 = vcombine.low %v585_v23, %v589_v42 }
 0x175   : > { %3888 = vmatprep.subr.bf16.mxu1 %v7587_v54  ;;  %v449_v54 = vld [vmem:[#allocation5 + $0x350] sm:$0xff] }
 0x176   : > { %3838 = vmatpush1.bf16.msra.mxu0 %v7590_v11  ;;  %10044 = vst [vmem:[#allocation303_spill] sm:$0xff] %v7611_v16  ;;  %v577_v7 = vld [vmem:[#allocation5 + $0x750] sm:$0xff]  ;;  %10046 = vst [vmem:[#allocation305_spill] sm:$0xff] %v7618_v37  ;;  %v7620_v30 = vcombine.high %v449_v54, %v453_v39  ;;  %v7626_v57 = vcombine.low %v449_v54, %v453_v39 }
 0x177   : > { %3839 = vmatprep.subr.bf16.mxu0 %v7596_v50  ;;  %v581_v15 = vld [vmem:[#allocation5 + $0x770] sm:$0xff] }
 0x178   : > { %3889 = vmatpush1.bf16.msra.mxu1 %v7594_v45  ;;  %10047 = vst [vmem:[#allocation306_spill] sm:$0xff] %v7620_v30  ;;  %v7623_v48 = vcombine.high %v577_v7, %v581_v15  ;;  %v445_v50 = vld [vmem:[#allocation5 + $0x330] sm:$0xff]  ;;  %10049 = vst [vmem:[#allocation308_spill] sm:$0xff] %v7626_v57  ;;  %v7630_v42 = vcombine.low %v577_v7, %v581_v15 }
 0x179   : > { %3890 = vmatprep.subr.bf16.mxu1 %v7599_v55  ;;  %v441_v55 = vld [vmem:[#allocation5 + $0x310] sm:$0xff] }
 0x17a   : > { %3840 = vmatpush2.bf16.msra.mxu0 %v7602_v44  ;;  %10048 = vst [vmem:[#allocation307_spill] sm:$0xff] %v7623_v48  ;;  %v569_v45 = vld [vmem:[#allocation5 + $0x710] sm:$0xff]  ;;  %10050 = vst [vmem:[#allocation309_spill] sm:$0xff] %v7630_v42  ;;  %v7632_v23 = vcombine.high %v441_v55, %v445_v50  ;;  %v7638_v39 = vcombine.low %v441_v55, %v445_v50 }
 0x17b   : > { %3841 = vmatprep.subr.bf16.mxu0 %v7608_v33  ;;  %v573_v11 = vld [vmem:[#allocation5 + $0x730] sm:$0xff] }
 0x17c   : > { %3891 = vmatpush2.bf16.msra.mxu1 %v7606_v1  ;;  %10051 = vst [vmem:[#allocation310_spill] sm:$0xff] %v7632_v23  ;;  %v7635_v59 = vcombine.high %v569_v45, %v573_v11  ;;  %v437_v33 = vld [vmem:[#allocation5 + $0x2f0] sm:$0xff]  ;;  %10053 = vst [vmem:[#allocation312_spill] sm:$0xff] %v7638_v39  ;;  %v7642_v15 = vcombine.low %v569_v45, %v573_v11 }
 0x17d   : > { %3892 = vmatprep.subr.bf16.mxu1 %v7611_v16  ;;  %v433_v16 = vld [vmem:[#allocation5 + $0x2d0] sm:$0xff] }
 0x17e   : > { %3842 = vmatpush2.bf16.msra.mxu0 %v7614_v62  ;;  %10052 = vst [vmem:[#allocation311_spill] sm:$0xff] %v7635_v59  ;;  %v561_v1 = vld [vmem:[#allocation5 + $0x6d0] sm:$0xff]  ;;  %10054 = vst [vmem:[#allocation313_spill] sm:$0xff] %v7642_v15  ;;  %v7644_v7 = vcombine.high %v433_v16, %v437_v33  ;;  %v7650_v50 = vcombine.low %v433_v16, %v437_v33 }
 0x17f   : > { %3843 = vmatprep.subr.bf16.mxu0 %v7620_v30  ;;  %v565_v44 = vld [vmem:[#allocation5 + $0x6f0] sm:$0xff] }
 0x180   : > { %3893 = vmatpush2.bf16.msra.mxu1 %v7618_v37  ;;  %10055 = vst [vmem:[#allocation314_spill] sm:$0xff] %v7644_v7  ;;  %v7647_v54 = vcombine.high %v561_v1, %v565_v44  ;;  %v429_v30 = vld [vmem:[#allocation5 + $0x2b0] sm:$0xff]  ;;  %10057 = vst [vmem:[#allocation316_spill] sm:$0xff] %v7650_v50  ;;  %v7654_v11 = vcombine.low %v561_v1, %v565_v44 }
 0x181   : > { %3894 = vmatprep.subr.bf16.mxu1 %v7623_v48  ;;  %v425_v48 = vld [vmem:[#allocation5 + $0x290] sm:$0xff] }
 0x182   : > { %3844 = vmatpush2.bf16.msra.mxu0 %v7626_v57  ;;  %10056 = vst [vmem:[#allocation315_spill] sm:$0xff] %v7647_v54  ;;  %v553_v37 = vld [vmem:[#allocation5 + $0x690] sm:$0xff]  ;;  %10058 = vst [vmem:[#allocation317_spill] sm:$0xff] %v7654_v11  ;;  %v7656_v45 = vcombine.high %v425_v48, %v429_v30  ;;  %v7662_v33 = vcombine.low %v425_v48, %v429_v30 }
 0x183   : > { %3845 = vmatprep.subr.bf16.mxu0 %v7632_v23  ;;  %v557_v62 = vld [vmem:[#allocation5 + $0x6b0] sm:$0xff] }
 0x184   : > { %3895 = vmatpush2.bf16.msra.mxu1 %v7630_v42  ;;  %10059 = vst [vmem:[#allocation318_spill] sm:$0xff] %v7656_v45  ;;  %v7659_v55 = vcombine.high %v553_v37, %v557_v62  ;;  %v421_v23 = vld [vmem:[#allocation5 + $0x270] sm:$0xff]  ;;  %10061 = vst [vmem:[#allocation320_spill] sm:$0xff] %v7662_v33  ;;  %v7666_v44 = vcombine.low %v553_v37, %v557_v62 }
 0x185   : > { %3896 = vmatprep.subr.bf16.mxu1 %v7635_v59  ;;  %v417_v59 = vld [vmem:[#allocation5 + $0x250] sm:$0xff] }
 0x186   : > { %3846 = vmatpush2.bf16.msra.mxu0 %v7638_v39  ;;  %10060 = vst [vmem:[#allocation319_spill] sm:$0xff] %v7659_v55  ;;  %v545_v42 = vld [vmem:[#allocation5 + $0x650] sm:$0xff]  ;;  %10062 = vst [vmem:[#allocation321_spill] sm:$0xff] %v7666_v44  ;;  %v7668_v1 = vcombine.high %v417_v59, %v421_v23  ;;  %v7674_v30 = vcombine.low %v417_v59, %v421_v23 }
 0x187   : > { %3847 = vmatprep.subr.bf16.mxu0 %v7644_v7  ;;  %v549_v57 = vld [vmem:[#allocation5 + $0x670] sm:$0xff] }
 0x188   : > { %3897 = vmatpush2.bf16.msra.mxu1 %v7642_v15  ;;  %10063 = vst [vmem:[#allocation322_spill] sm:$0xff] %v7668_v1  ;;  %v7671_v16 = vcombine.high %v545_v42, %v549_v57  ;;  %v413_v7 = vld [vmem:[#allocation5 + $0x230] sm:$0xff]  ;;  %10065 = vst [vmem:[#allocation324_spill] sm:$0xff] %v7674_v30  ;;  %v7678_v62 = vcombine.low %v545_v42, %v549_v57 }
 0x189   : > { %3898 = vmatprep.subr.bf16.mxu1 %v7647_v54  ;;  %v409_v54 = vld [vmem:[#allocation5 + $0x210] sm:$0xff] }
 0x18a   : > { %3848 = vmatpush2.bf16.msra.mxu0 %v7650_v50  ;;  %10064 = vst [vmem:[#allocation323_spill] sm:$0xff] %v7671_v16  ;;  %v537_v15 = vld [vmem:[#allocation5 + $0x610] sm:$0xff]  ;;  %10066 = vst [vmem:[#allocation325_spill] sm:$0xff] %v7678_v62  ;;  %v7680_v37 = vcombine.high %v409_v54, %v413_v7  ;;  %v7686_v23 = vcombine.low %v409_v54, %v413_v7 }
 0x18b   : > { %3849 = vmatprep.subr.bf16.mxu0 %v7656_v45  ;;  %v541_v39 = vld [vmem:[#allocation5 + $0x630] sm:$0xff] }
 0x18c   : > { %3899 = vmatpush2.bf16.msra.mxu1 %v7654_v11  ;;  %10067 = vst [vmem:[#allocation326_spill] sm:$0xff] %v7680_v37  ;;  %v7683_v48 = vcombine.high %v537_v15, %v541_v39  ;;  %v661_v45 = vld [vmem:[#allocation5 + $0x9f0] sm:$0xff]  ;;  %10069 = vst [vmem:[#allocation328_spill] sm:$0xff] %v7686_v23  ;;  %v7690_v57 = vcombine.low %v537_v15, %v541_v39 }
 0x18d   : > { %3900 = vmatprep.subr.bf16.mxu1 %v7659_v55  ;;  %v657_v55 = vld [vmem:[#allocation5 + $0x9d0] sm:$0xff] }
 0x18e   : > { %3850 = vmatpush2.bf16.msra.mxu0 %v7662_v33  ;;  %10068 = vst [vmem:[#allocation327_spill] sm:$0xff] %v7683_v48  ;;  %v785_v11 = vld [vmem:[#allocation5 + $0xdd0] sm:$0xff]  ;;  %10070 = vst [vmem:[#allocation329_spill] sm:$0xff] %v7690_v57  ;;  %v7692_v42 = vcombine.high %v657_v55, %v661_v45  ;;  %v7698_v7 = vcombine.low %v657_v55, %v661_v45 }
 0x18f   : > { %3851 = vmatprep.subr.bf16.mxu0 %v7668_v1  ;;  %v789_v50 = vld [vmem:[#allocation5 + $0xdf0] sm:$0xff] }
 0x190   : > { %3901 = vmatpush2.bf16.msra.mxu1 %v7666_v44  ;;  %10071 = vst [vmem:[#allocation330_spill] sm:$0xff] %v7692_v42  ;;  %v7695_v59 = vcombine.high %v785_v11, %v789_v50  ;;  %v653_v1 = vld [vmem:[#allocation5 + $0x9b0] sm:$0xff]  ;;  %10073 = vst [vmem:[#allocation332_spill] sm:$0xff] %v7698_v7  ;;  %v7702_v39 = vcombine.low %v785_v11, %v789_v50 }
 0x191   : > { %3902 = vmatprep.subr.bf16.mxu1 %v7671_v16  ;;  %v649_v16 = vld [vmem:[#allocation5 + $0x990] sm:$0xff] }
 0x192   : > { %3852 = vmatpush2.bf16.msra.mxu0 %v7674_v30  ;;  %10072 = vst [vmem:[#allocation331_spill] sm:$0xff] %v7695_v59  ;;  %v777_v44 = vld [vmem:[#allocation5 + $0xd90] sm:$0xff]  ;;  %10074 = vst [vmem:[#allocation333_spill] sm:$0xff] %v7702_v39  ;;  %v7704_v15 = vcombine.high %v649_v16, %v653_v1  ;;  %v7713_v50 = vcombine.low %v649_v16, %v653_v1 }
 0x193   : > { %3853 = vmatprep.subr.bf16.mxu0 %v7680_v37  ;;  %v781_v33 = vld [vmem:[#allocation5 + $0xdb0] sm:$0xff] }
 0x194   : > { %3903 = vmatpush2.bf16.msra.mxu1 %v7678_v62  ;;  %10075 = vst [vmem:[#allocation334_spill] sm:$0xff] %v7704_v15  ;;  %v7707_v54 = vcombine.high %v777_v44, %v781_v33  ;;  %v645_v37 = vld [vmem:[#allocation5 + $0x970] sm:$0xff]  ;;  %10077 = vst [vmem:[#allocation336_spill] sm:$0xff] %v7713_v50 }
 0x195   : > { %3904 = vmatprep.subr.bf16.mxu1 %v7683_v48  ;;  %v641_v48 = vld [vmem:[#allocation5 + $0x950] sm:$0xff] }
 0x196   : > { %3854 = vmatpush2.bf16.msra.mxu0 %v7686_v23  ;;  %10076 = vst [vmem:[#allocation335_spill] sm:$0xff] %v7707_v54  ;;  %v769_v23 = vld [vmem:[#allocation5 + $0xd50] sm:$0xff] }
 0x197   : > { %3925 = vmatprep.subr.bf16.mxu0 %v7692_v42  ;;  %v773_v45 = vld [vmem:[#allocation5 + $0xd70] sm:$0xff]  ;;  %v7719_v42 = vcombine.high %v641_v48, %v645_v37 }
 0x198   : > { %3905 = vmatpush2.bf16.msra.mxu1 %v7690_v57  ;;  %v7725_v22 = vcombine.high %v769_v23, %v773_v45  ;;  %v633_v1 = vld [vmem:[#allocation5 + $0x910] sm:$0xff] }
 0x199   : > { %3976 = vmatprep.subr.bf16.mxu1 %v7695_v59  ;;  %v3551_v62 = vpop.f32.mrf.mxu0  ;;  %3856 = vmatmul.mubr.bf16.vlgmr.msra.gmra.mxu0 %v6819_v17  ;;  %v7717_v59 = vcombine.low %v777_v44, %v781_v33  ;;  %10079 = vst [vmem:[#allocation338_spill] sm:$0xff] %v7719_v42  ;;  %v637_v16 = vld [vmem:[#allocation5 + $0x930] sm:$0xff] }
 0x19a   : > { %v3552_v55 = vadd.f32 %v3551_v62, %v7500_v43  ;;  %3926 = vmatpush1.bf16.msra.mxu0 %v7698_v7  ;;  %10081 = vst [vmem:[#allocation340_spill] sm:$0xff] %v7725_v22  ;;  %3865 = vmatprep.mubr.bf16.mxu0 %v6839_v52  ;;  %v761_v7 = vld [vmem:[#allocation5 + $0xd10] sm:$0xff] }
 0x19b   : > { %v3602_v57 = vpop.f32.mrf.mxu1  ;;  %3907 = vmatmul.mubr.bf16.vlgmr.msra.gmra.mxu1 %v6825_v60  ;;  %v3553_v11 = vpop.f32.mrf.mxu0  ;;  %3927 = vmatprep.subr.bf16.mxu0 %v7704_v15  ;;  %10078 = vst [vmem:[#allocation337_spill] sm:$0xff] %v7717_v59  ;;  %v765_v15 = vld [vmem:[#allocation5 + $0xd30] sm:$0xff] }
 0x19c   : > { %3977 = vmatpush1.bf16.msra.mxu1 %v7702_v39  ;;  %v7721_v30 = vadd.f32 %v3602_v57, %v3552_v55  ;;  %v3554_v43 = vadd.f32 %v3553_v11, %v7512_v25  ;;  %3916 = vmatprep.mubr.bf16.mxu1 %v6844_v40  ;;  %v7733_v25 = vcombine.low %v641_v48, %v645_v37  ;;  %v625_v37 = vld [vmem:[#allocation5 + $0x8d0] sm:$0xff] }
 0x19d   : > { %v3604_v62 = vpop.f32.mrf.mxu1  ;;  %3978 = vmatprep.subr.bf16.mxu1 %v7707_v54  ;;  %v3555_v39 = vpop.f32.mrf.mxu0  ;;  %v7739_v11 = vcombine.low %v769_v23, %v773_v45  ;;  %v7741_v54 = vcombine.high %v633_v1, %v637_v16  ;;  %v629_v48 = vld [vmem:[#allocation5 + $0x8f0] sm:$0xff] }
 0x19e   : > { %10080 = vst [vmem:[#allocation339_spill] sm:$0xff] %v7721_v30  ;;  %v7729_v33 = vadd.f32 %v3604_v62, %v3554_v43  ;;  %v3556_v44 = vadd.f32 %v3555_v39, %v7518_v41  ;;  %3928 = vmatpush1.bf16.msra.mxu0 %v7713_v50  ;;  %10083 = vst [vmem:[#allocation342_spill] sm:$0xff] %v7733_v25  ;;  %v7748_v41 = vcombine.high %v761_v7, %v765_v15  ;;  %v753_v62 = vld [vmem:[#allocation5 + $0xcd0] sm:$0xff] }
 0x19f   : > { %v3606_v57 = vpop.f32.mrf.mxu1  ;;  %v7736_v55 = vpop.f32.mrf.mxu0  ;;  %3929 = vmatprep.subr.bf16.mxu0 %v7719_v42  ;;  %10085 = vst [vmem:[#allocation344_spill] sm:$0xff] %v7739_v11  ;;  %10086 = vst [vmem:[#allocation345_spill] sm:$0xff] %v7741_v54  ;;  %v7760_v42 = vcombine.high %v625_v37, %v629_v48 }
 0x1a0   : > { %10082 = vst [vmem:[#allocation341_spill] sm:$0xff] %v7729_v33  ;;  %3979 = vmatpush1.bf16.msra.mxu1 %v7717_v59  ;;  %10084 = vst [vmem:[#allocation343_spill] sm:$0xff] %v7736_v55  ;;  %v7743_v30 = vadd.f32 %v3606_v57, %v3556_v44  ;;  %v757_v59 = vld [vmem:[#allocation5 + $0xcf0] sm:$0xff]  ;;  %v7753_v44 = vcombine.low %v633_v1, %v637_v16  ;;  %v362_v55 = vld [vmem:[#allocation5 + $0x98] sm:$0xff] }
 0x1a1   : > { %v7745_v43 = vpop.f32.mrf.mxu1  ;;  %3980 = vmatprep.subr.bf16.mxu1 %v7725_v22  ;;  %10089 = vst [vmem:[#allocation348_spill] sm:$0xff] %v7748_v41  ;;  %v3561_v39 = vpop.f32.mrf.mxu0  ;;  %3866 = vmatmul.mubr.bf16.gmra.mxu0 %v6862_v61  ;;  %v7758_v22 = vcombine.low %v761_v7, %v765_v15  ;;  %10092 = vst [vmem:[#allocation351_spill] sm:$0xff] %v7760_v42  ;;  %v7766_v1 = vcombine.high %v753_v62, %v757_v59  ;;  %v617_v16 = vld [vmem:[#allocation5 + $0x890] sm:$0xff] }
 0x1a2   : > { %10087 = vst [vmem:[#allocation346_spill] sm:$0xff] %v7743_v30  ;;  %10088 = vst [vmem:[#allocation347_spill] sm:$0xff] %v7745_v43  ;;  %v3562_v23 = vadd.f32 %v3561_v39, %v7544_v56  ;;  %3930 = vmatpush1.bf16.msra.mxu0 %v7733_v25  ;;  %v621_v39 = vld [vmem:[#allocation5 + $0x8b0] sm:$0xff]  ;;  %3957 = vmatprep.mubr.bf16.mxu0 %v6879_v51 }
 0x1a3   : > { %v3612_v45 = vpop.f32.mrf.mxu1  ;;  %10090 = vst [vmem:[#allocation349_spill] sm:$0xff] %v7753_v44  ;;  %3917 = vmatmul.mubr.bf16.gmra.mxu1 %v6868_v47  ;;  %v3563_v57 = vpop.f32.mrf.mxu0  ;;  %3931 = vmatprep.subr.bf16.mxu0 %v7741_v54  ;;  %10091 = vst [vmem:[#allocation350_spill] sm:$0xff] %v7758_v22  ;;  %v749_v25 = vld [vmem:[#allocation5 + $0xcb0] sm:$0xff] }
 0x1a4   : > { %3981 = vmatpush1.bf16.msra.mxu1 %v7739_v11  ;;  %v3564_v50 = vadd.f32 %v3563_v57, %v7550_v49  ;;  %v7763_v30 = vadd.f32 %v3612_v45, %v3562_v23  ;;  %10094 = vst [vmem:[#allocation353_spill] sm:$0xff] %v7766_v1  ;;  %v745_v11 = vld [vmem:[#allocation5 + $0xc90] sm:$0xff]  ;;  %4008 = vmatprep.mubr.bf16.mxu1 %v6882_v13 }
 0x1a5   : > { %v3614_v56 = vpop.f32.mrf.mxu1  ;;  %3982 = vmatprep.subr.bf16.mxu1 %v7748_v41  ;;  %v3565_v54 = vpop.f32.mrf.mxu0  ;;  %v7773_v49 = vcombine.low %v625_v37, %v629_v48  ;;  %v7777_v23 = vcombine.low %v753_v62, %v757_v59  ;;  %v7779_v45 = vcombine.high %v617_v16, %v621_v39  ;;  %v741_v37 = vld [vmem:[#allocation5 + $0xc70] sm:$0xff]  ;;  %v7785_v48 = vcombine.low %v617_v16, %v621_v39 }
 0x1a6   : > { %10093 = vst [vmem:[#allocation352_spill] sm:$0xff] %v7763_v30  ;;  %v7770_v7 = vadd.f32 %v3614_v56, %v3564_v50  ;;  %3932 = vmatpush1.bf16.msra.mxu0 %v7753_v44  ;;  %v7782_v54 = vcombine.high %v745_v11, %v749_v25  ;;  %v609_v50 = vld [vmem:[#allocation5 + $0x850] sm:$0xff]  ;;  %v7789_v59 = vcombine.low %v745_v11, %v749_v25 }
 0x1a7   : > { %10096 = vst [vmem:[#allocation355_spill] sm:$0xff] %v7773_v49  ;;  %v3616_v15 = vpop.f32.mrf.mxu1  ;;  %3933 = vmatprep.subr.bf16.mxu0 %v7760_v42  ;;  %10097 = vst [vmem:[#allocation356_spill] sm:$0xff] %v7777_v23  ;;  %v3566_v57 = vpop.f32.mrf.mxu0  ;;  %v613_v56 = vld [vmem:[#allocation5 + $0x870] sm:$0xff] }
 0x1a8   : > { %10095 = vst [vmem:[#allocation354_spill] sm:$0xff] %v7770_v7  ;;  %3983 = vmatpush1.bf16.msra.mxu1 %v7758_v22  ;;  %10098 = vst [vmem:[#allocation357_spill] sm:$0xff] %v7779_v45  ;;  %v737_v44 = vld [vmem:[#allocation5 + $0xc50] sm:$0xff]  ;;  %v7791_v62 = vcombine.high %v609_v50, %v613_v56  ;;  %v7797_v16 = vcombine.low %v609_v50, %v613_v56 }
 0x1a9   : > { %3984 = vmatprep.subr.bf16.mxu1 %v7766_v1  ;;  %10099 = vst [vmem:[#allocation358_spill] sm:$0xff] %v7782_v54  ;;  %v3617_v41 = vpop.f32.mrf.mxu1  ;;  %10100 = vst [vmem:[#allocation359_spill] sm:$0xff] %v7785_v48  ;;  %v7794_v15 = vcombine.high %v737_v44, %v741_v37  ;;  %v601_v57 = vld [vmem:[#allocation5 + $0x810] sm:$0xff]  ;;  %v7801_v25 = vcombine.low %v737_v44, %v741_v37 }
 0x1aa   : > { %3934 = vmatpush1.bf16.msra.mxu0 %v7773_v49  ;;  %10101 = vst [vmem:[#allocation360_spill] sm:$0xff] %v7789_v59  ;;  %10102 = vst [vmem:[#allocation361_spill] sm:$0xff] %v7791_v62  ;;  %v605_v41 = vld [vmem:[#allocation5 + $0x830] sm:$0xff] }
 0x1ab   : > { %3935 = vmatprep.subr.bf16.mxu0 %v7779_v45  ;;  %10103 = vst [vmem:[#allocation362_spill] sm:$0xff] %v7794_v15  ;;  %v729_v1 = vld [vmem:[#allocation5 + $0xc10] sm:$0xff]  ;;  %10104 = vst [vmem:[#allocation363_spill] sm:$0xff] %v7797_v16  ;;  %v7803_v11 = vcombine.high %v601_v57, %v605_v41  ;;  %v7809_v50 = vcombine.low %v601_v57, %v605_v41 }
 0x1ac   : > { %3985 = vmatpush1.bf16.msra.mxu1 %v7777_v23  ;;  %v733_v42 = vld [vmem:[#allocation5 + $0xc30] sm:$0xff]  ;;  %10105 = vst [vmem:[#allocation364_spill] sm:$0xff] %v7801_v25 }
 0x1ad   : > { %3986 = vmatprep.subr.bf16.mxu1 %v7782_v54  ;;  %10106 = vst [vmem:[#allocation365_spill] sm:$0xff] %v7803_v11  ;;  %v7806_v39 = vcombine.high %v729_v1, %v733_v42  ;;  %v721_v54 = vld [vmem:[#allocation5 + $0xbd0] sm:$0xff]  ;;  %10108 = vst [vmem:[#allocation367_spill] sm:$0xff] %v7809_v50  ;;  %v7813_v44 = vcombine.low %v729_v1, %v733_v42 }
 0x1ae   : > { %3936 = vmatpush1.bf16.msra.mxu0 %v7785_v48  ;;  %v725_v45 = vld [vmem:[#allocation5 + $0xbf0] sm:$0xff] }
 0x1af   : > { %3937 = vmatprep.subr.bf16.mxu0 %v7791_v62  ;;  %10107 = vst [vmem:[#allocation366_spill] sm:$0xff] %v7806_v39  ;;  %v849_v23 = vld [vmem:[#allocation5 + $0xfd0] sm:$0xff]  ;;  %10109 = vst [vmem:[#allocation368_spill] sm:$0xff] %v7813_v44  ;;  %v7815_v56 = vcombine.high %v721_v54, %v725_v45  ;;  %v7821_v57 = vcombine.low %v721_v54, %v725_v45 }
 0x1b0   : > { %3987 = vmatpush1.bf16.msra.mxu1 %v7789_v59  ;;  %v853_v49 = vld [vmem:[#allocation5 + $0xff0] sm:$0xff] }
 0x1b1   : > { %3988 = vmatprep.subr.bf16.mxu1 %v7794_v15  ;;  %10110 = vst [vmem:[#allocation369_spill] sm:$0xff] %v7815_v56  ;;  %v7818_v37 = vcombine.high %v849_v23, %v853_v49  ;;  %v713_v15 = vld [vmem:[#allocation5 + $0xb90] sm:$0xff]  ;;  %10112 = vst [vmem:[#allocation371_spill] sm:$0xff] %v7821_v57  ;;  %v7825_v42 = vcombine.low %v849_v23, %v853_v49 }
 0x1b2   : > { %3938 = vmatpush1.bf16.msra.mxu0 %v7797_v16  ;;  %v717_v62 = vld [vmem:[#allocation5 + $0xbb0] sm:$0xff] }
 0x1b3   : > { %3939 = vmatprep.subr.bf16.mxu0 %v7803_v11  ;;  %10111 = vst [vmem:[#allocation370_spill] sm:$0xff] %v7818_v37  ;;  %v841_v59 = vld [vmem:[#allocation5 + $0xf90] sm:$0xff]  ;;  %10113 = vst [vmem:[#allocation372_spill] sm:$0xff] %v7825_v42  ;;  %v7827_v1 = vcombine.high %v713_v15, %v717_v62  ;;  %v7833_v45 = vcombine.low %v713_v15, %v717_v62 }
 0x1b4   : > { %3989 = vmatpush1.bf16.msra.mxu1 %v7801_v25  ;;  %v845_v48 = vld [vmem:[#allocation5 + $0xfb0] sm:$0xff] }
 0x1b5   : > { %3990 = vmatprep.subr.bf16.mxu1 %v7806_v39  ;;  %10114 = vst [vmem:[#allocation373_spill] sm:$0xff] %v7827_v1  ;;  %v7830_v41 = vcombine.high %v841_v59, %v845_v48  ;;  %v705_v39 = vld [vmem:[#allocation5 + $0xb50] sm:$0xff]  ;;  %10116 = vst [vmem:[#allocation375_spill] sm:$0xff] %v7833_v45  ;;  %v7837_v49 = vcombine.low %v841_v59, %v845_v48 }
 0x1b6   : > { %3940 = vmatpush1.bf16.msra.mxu0 %v7809_v50  ;;  %v709_v11 = vld [vmem:[#allocation5 + $0xb70] sm:$0xff] }
 0x1b7   : > { %3941 = vmatprep.subr.bf16.mxu0 %v7815_v56  ;;  %10115 = vst [vmem:[#allocation374_spill] sm:$0xff] %v7830_v41  ;;  %v833_v25 = vld [vmem:[#allocation5 + $0xf50] sm:$0xff]  ;;  %10117 = vst [vmem:[#allocation376_spill] sm:$0xff] %v7837_v49  ;;  %v7839_v23 = vcombine.high %v705_v39, %v709_v11  ;;  %v7845_v62 = vcombine.low %v705_v39, %v709_v11 }
 0x1b8   : > { %3991 = vmatpush1.bf16.msra.mxu1 %v7813_v44  ;;  %v837_v16 = vld [vmem:[#allocation5 + $0xf70] sm:$0xff] }
 0x1b9   : > { %3992 = vmatprep.subr.bf16.mxu1 %v7818_v37  ;;  %10118 = vst [vmem:[#allocation377_spill] sm:$0xff] %v7839_v23  ;;  %v7842_v54 = vcombine.high %v833_v25, %v837_v16  ;;  %v697_v37 = vld [vmem:[#allocation5 + $0xb10] sm:$0xff]  ;;  %10120 = vst [vmem:[#allocation379_spill] sm:$0xff] %v7845_v62  ;;  %v7849_v48 = vcombine.low %v833_v25, %v837_v16 }
 0x1ba   : > { %3942 = vmatpush2.bf16.msra.mxu0 %v7821_v57  ;;  %v701_v56 = vld [vmem:[#allocation5 + $0xb30] sm:$0xff] }
 0x1bb   : > { %3943 = vmatprep.subr.bf16.mxu0 %v7827_v1  ;;  %10119 = vst [vmem:[#allocation378_spill] sm:$0xff] %v7842_v54  ;;  %v825_v44 = vld [vmem:[#allocation5 + $0xf10] sm:$0xff]  ;;  %10121 = vst [vmem:[#allocation380_spill] sm:$0xff] %v7849_v48  ;;  %v7851_v59 = vcombine.high %v697_v37, %v701_v56  ;;  %v7857_v11 = vcombine.low %v697_v37, %v701_v56 }
 0x1bc   : > { %3993 = vmatpush2.bf16.msra.mxu1 %v7825_v42  ;;  %v829_v50 = vld [vmem:[#allocation5 + $0xf30] sm:$0xff] }
 0x1bd   : > { %3994 = vmatprep.subr.bf16.mxu1 %v7830_v41  ;;  %10122 = vst [vmem:[#allocation381_spill] sm:$0xff] %v7851_v59  ;;  %v7854_v15 = vcombine.high %v825_v44, %v829_v50  ;;  %v689_v41 = vld [vmem:[#allocation5 + $0xad0] sm:$0xff]  ;;  %10124 = vst [vmem:[#allocation383_spill] sm:$0xff] %v7857_v11  ;;  %v7861_v16 = vcombine.low %v825_v44, %v829_v50 }
 0x1be   : > { %3944 = vmatpush2.bf16.msra.mxu0 %v7833_v45  ;;  %v693_v1 = vld [vmem:[#allocation5 + $0xaf0] sm:$0xff] }
 0x1bf   : > { %3945 = vmatprep.subr.bf16.mxu0 %v7839_v23  ;;  %10123 = vst [vmem:[#allocation382_spill] sm:$0xff] %v7854_v15  ;;  %v817_v42 = vld [vmem:[#allocation5 + $0xed0] sm:$0xff]  ;;  %10125 = vst [vmem:[#allocation384_spill] sm:$0xff] %v7861_v16  ;;  %v7863_v25 = vcombine.high %v689_v41, %v693_v1  ;;  %v7869_v56 = vcombine.low %v689_v41, %v693_v1 }
 0x1c0   : > { %3995 = vmatpush2.bf16.msra.mxu1 %v7837_v49  ;;  %v821_v57 = vld [vmem:[#allocation5 + $0xef0] sm:$0xff] }
 0x1c1   : > { %3996 = vmatprep.subr.bf16.mxu1 %v7842_v54  ;;  %10126 = vst [vmem:[#allocation385_spill] sm:$0xff] %v7863_v25  ;;  %v7866_v39 = vcombine.high %v817_v42, %v821_v57  ;;  %v681_v54 = vld [vmem:[#allocation5 + $0xa90] sm:$0xff]  ;;  %10128 = vst [vmem:[#allocation387_spill] sm:$0xff] %v7869_v56  ;;  %v7873_v50 = vcombine.low %v817_v42, %v821_v57 }
 0x1c2   : > { %3946 = vmatpush2.bf16.msra.mxu0 %v7845_v62  ;;  %v685_v23 = vld [vmem:[#allocation5 + $0xab0] sm:$0xff] }
 0x1c3   : > { %3947 = vmatprep.subr.bf16.mxu0 %v7851_v59  ;;  %10127 = vst [vmem:[#allocation386_spill] sm:$0xff] %v7866_v39  ;;  %v809_v49 = vld [vmem:[#allocation5 + $0xe90] sm:$0xff]  ;;  %10129 = vst [vmem:[#allocation388_spill] sm:$0xff] %v7873_v50  ;;  %v7875_v44 = vcombine.high %v681_v54, %v685_v23  ;;  %v7881_v1 = vcombine.low %v681_v54, %v685_v23 }
 0x1c4   : > { %3997 = vmatpush2.bf16.msra.mxu1 %v7849_v48  ;;  %v813_v45 = vld [vmem:[#allocation5 + $0xeb0] sm:$0xff] }
 0x1c5   : > { %3998 = vmatprep.subr.bf16.mxu1 %v7854_v15  ;;  %10130 = vst [vmem:[#allocation389_spill] sm:$0xff] %v7875_v44  ;;  %v7878_v37 = vcombine.high %v809_v49, %v813_v45  ;;  %v673_v15 = vld [vmem:[#allocation5 + $0xa50] sm:$0xff]  ;;  %10132 = vst [vmem:[#allocation391_spill] sm:$0xff] %v7881_v1  ;;  %v7885_v57 = vcombine.low %v809_v49, %v813_v45 }
 0x1c6   : > { %3948 = vmatpush2.bf16.msra.mxu0 %v7857_v11  ;;  %v677_v59 = vld [vmem:[#allocation5 + $0xa70] sm:$0xff] }
 0x1c7   : > { %3949 = vmatprep.subr.bf16.mxu0 %v7863_v25  ;;  %10131 = vst [vmem:[#allocation390_spill] sm:$0xff] %v7878_v37  ;;  %v801_v48 = vld [vmem:[#allocation5 + $0xe50] sm:$0xff]  ;;  %10133 = vst [vmem:[#allocation392_spill] sm:$0xff] %v7885_v57  ;;  %v7887_v42 = vcombine.high %v673_v15, %v677_v59  ;;  %v7893_v23 = vcombine.low %v673_v15, %v677_v59 }
 0x1c8   : > { %3999 = vmatpush2.bf16.msra.mxu1 %v7861_v16  ;;  %v805_v62 = vld [vmem:[#allocation5 + $0xe70] sm:$0xff] }
 0x1c9   : > { %4000 = vmatprep.subr.bf16.mxu1 %v7866_v39  ;;  %10134 = vst [vmem:[#allocation393_spill] sm:$0xff] %v7887_v42  ;;  %v7890_v41 = vcombine.high %v801_v48, %v805_v62  ;;  %v665_v39 = vld [vmem:[#allocation5 + $0xa10] sm:$0xff]  ;;  %10136 = vst [vmem:[#allocation395_spill] sm:$0xff] %v7893_v23  ;;  %v7897_v45 = vcombine.low %v801_v48, %v805_v62 }
 0x1ca   : > { %3950 = vmatpush2.bf16.msra.mxu0 %v7869_v56  ;;  %v669_v25 = vld [vmem:[#allocation5 + $0xa30] sm:$0xff]  ;;  %v534_v56 = vld [vmem:[#allocation5 + $0x5f8] sm:$0xff] }
 0x1cb   : > { %3951 = vmatprep.subr.bf16.mxu0 %v7875_v44  ;;  %10135 = vst [vmem:[#allocation394_spill] sm:$0xff] %v7890_v41  ;;  %v793_v16 = vld [vmem:[#allocation5 + $0xe10] sm:$0xff]  ;;  %10137 = vst [vmem:[#allocation396_spill] sm:$0xff] %v7897_v45  ;;  %v7899_v49 = vcombine.high %v665_v39, %v669_v25  ;;  %v406_v44 = vld [vmem:[#allocation5 + $0x1f8] sm:$0xff]  ;;  %v7905_v59 = vcombine.low %v665_v39, %v669_v25 }
 0x1cc   : > { %4001 = vmatpush2.bf16.msra.mxu1 %v7873_v50  ;;  %v797_v11 = vld [vmem:[#allocation5 + $0xe30] sm:$0xff]  ;;  %v530_v50 = vld [vmem:[#allocation5 + $0x5d8] sm:$0xff] }
 0x1cd   : > { %4002 = vmatprep.subr.bf16.mxu1 %v7878_v37  ;;  %10138 = vst [vmem:[#allocation397_spill] sm:$0xff] %v7899_v49  ;;  %v7902_v54 = vcombine.high %v793_v16, %v797_v11  ;;  %v402_v37 = vld [vmem:[#allocation5 + $0x1d8] sm:$0xff]  ;;  %10140 = vst [vmem:[#allocation399_spill] sm:$0xff] %v7905_v59  ;;  %v7909_v62 = vcombine.low %v793_v16, %v797_v11  ;;  %v7914_v15 = vcombine.high %v530_v50, %v534_v56 }
 0x1ce   : > { %3952 = vmatpush2.bf16.msra.mxu0 %v7881_v1  ;;  %v7911_v48 = vcombine.high %v402_v37, %v406_v44  ;;  %v526_v1 = vld [vmem:[#allocation5 + $0x5b8] sm:$0xff]  ;;  %v7917_v25 = vcombine.low %v402_v37, %v406_v44  ;;  %v7921_v11 = vcombine.low %v530_v50, %v534_v56 }
 0x1cf   : > { %3953 = vmatprep.subr.bf16.mxu0 %v7887_v42  ;;  %10139 = vst [vmem:[#allocation398_spill] sm:$0xff] %v7902_v54  ;;  %10141 = vst [vmem:[#allocation400_spill] sm:$0xff] %v7909_v62  ;;  %v398_v42 = vld [vmem:[#allocation5 + $0x1b8] sm:$0xff] }
 0x1d0   : > { %4003 = vmatpush2.bf16.msra.mxu1 %v7885_v57  ;;  %10142 = vst [vmem:[#allocation401_spill] sm:$0xff] %v7911_v48  ;;  %10143 = vst [vmem:[#allocation402_spill] sm:$0xff] %v7914_v15  ;;  %v522_v57 = vld [vmem:[#allocation5 + $0x598] sm:$0xff] }
 0x1d1   : > { %4004 = vmatprep.subr.bf16.mxu1 %v7890_v41  ;;  %v394_v41 = vld [vmem:[#allocation5 + $0x198] sm:$0xff]  ;;  %10144 = vst [vmem:[#allocation403_spill] sm:$0xff] %v7917_v25  ;;  %10145 = vst [vmem:[#allocation404_spill] sm:$0xff] %v7921_v11  ;;  %v7926_v39 = vcombine.high %v522_v57, %v526_v1 }
 0x1d2   : > { %3954 = vmatpush2.bf16.msra.mxu0 %v7893_v23  ;;  %v7923_v16 = vcombine.high %v394_v41, %v398_v42  ;;  %v518_v44 = vld [vmem:[#allocation5 + $0x578] sm:$0xff]  ;;  %v7931_v56 = vcombine.low %v394_v41, %v398_v42 }
 0x1d3   : > { %3955 = vmatprep.subr.bf16.mxu0 %v7899_v49  ;;  %10147 = vst [vmem:[#allocation406_spill] sm:$0xff] %v7926_v39  ;;  %v390_v49 = vld [vmem:[#allocation5 + $0x178] sm:$0xff] }
 0x1d4   : > { %4005 = vmatpush2.bf16.msra.mxu1 %v7897_v45  ;;  %10146 = vst [vmem:[#allocation405_spill] sm:$0xff] %v7923_v16  ;;  %10148 = vst [vmem:[#allocation407_spill] sm:$0xff] %v7931_v56  ;;  %v378_v41 = vld [vmem:[#allocation5 + $0x118] sm:$0xff] }
 0x1d5   : > { %4006 = vmatprep.subr.bf16.mxu1 %v7902_v54  ;;  %v386_v54 = vld [vmem:[#allocation5 + $0x158] sm:$0xff] }
 0x1d6   : > { %3956 = vmatpush2.bf16.msra.mxu0 %v7905_v59  ;;  %v514_v59 = vld [vmem:[#allocation5 + $0x558] sm:$0xff] }
 0x1d7   : > { %4027 = vmatprep.subr.bf16.mxu0 %v7911_v48  ;;  %v7939_v48 = vcombine.low %v522_v57, %v526_v1  ;;  %v7947_v42 = vcombine.high %v514_v59, %v518_v44  ;;  %v7951_v1 = vcombine.low %v386_v54, %v390_v49  ;;  %v7959_v22 = vcombine.low %v514_v59, %v518_v44 }
 0x1d8   : > { %4007 = vmatpush2.bf16.msra.mxu1 %v7909_v62  ;;  %v7941_v62 = vcombine.high %v386_v54, %v390_v49  ;;  %v370_v49 = vld [vmem:[#allocation5 + $0xd8] sm:$0xff] }
 0x1d9   : > { %4078 = vmatprep.subr.bf16.mxu1 %v7914_v15  ;;  %v3653_v45 = vpop.f32.mrf.mxu0  ;;  %3958 = vmatmul.mubr.bf16.vlgmr.msra.gmra.mxu0 %v7069_v0  ;;  %10149 = vst [vmem:[#allocation408_spill] sm:$0xff] %v7939_v48  ;;  %10151 = vst [vmem:[#allocation410_spill] sm:$0xff] %v7947_v42  ;;  %v374_v54 = vld [vmem:[#allocation5 + $0xf8] sm:$0xff] }
 0x1da   : > { %4028 = vmatpush1.bf16.msra.mxu0 %v7917_v25  ;;  %10150 = vst [vmem:[#allocation409_spill] sm:$0xff] %v7941_v62  ;;  %3967 = vmatprep.mubr.bf16.mxu0 %v7087_v24  ;;  %v510_v25 = vld [vmem:[#allocation5 + $0x538] sm:$0xff]  ;;  %10152 = vst [vmem:[#allocation411_spill] sm:$0xff] %v7951_v1 }
 0x1db   : > { %v3704_v37 = vpop.f32.mrf.mxu1  ;;  %4009 = vmatmul.mubr.bf16.vlgmr.msra.gmra.mxu1 %v7073_v6  ;;  %v7936_v15 = vpop.f32.mrf.mxu0  ;;  %4029 = vmatprep.subr.bf16.mxu0 %v7923_v16  ;;  %10153 = vst [vmem:[#allocation412_spill] sm:$0xff] %v7959_v22 }
 0x1dc   : > { %v7933_v50 = vadd.f32 %v3704_v37, %v3653_v45  ;;  %4079 = vmatpush1.bf16.msra.mxu1 %v7921_v11  ;;  %v382_v45 = vld [vmem:[#allocation5 + $0x138] sm:$0xff]  ;;  %4018 = vmatprep.mubr.bf16.mxu1 %v7090_v12 }
 0x1dd   : > { %v7943_v23 = vpop.f32.mrf.mxu1  ;;  %4080 = vmatprep.subr.bf16.mxu1 %v7926_v39  ;;  %v3657_v37 = vpop.f32.mrf.mxu0  ;;  %v506_v11 = vld [vmem:[#allocation5 + $0x518] sm:$0xff]  ;;  %v7961_v7 = vcombine.high %v378_v41, %v382_v45  ;;  %v7971_v59 = vcombine.low %v378_v41, %v382_v45 }
 0x1de   : > { %4030 = vmatpush1.bf16.msra.mxu0 %v7931_v56  ;;  %v7966_v43 = vcombine.high %v506_v11, %v510_v25  ;;  %v366_v41 = vld [vmem:[#allocation5 + $0xb8] sm:$0xff] }
 0x1df   : > { %v3708_v16 = vpop.f32.mrf.mxu1  ;;  %v7956_v39 = vpop.f32.mrf.mxu0  ;;  %4031 = vmatprep.subr.bf16.mxu0 %v7941_v62  ;;  %10154 = vst [vmem:[#allocation413_spill] sm:$0xff] %v7961_v7  ;;  %10156 = vst [vmem:[#allocation415_spill] sm:$0xff] %v7971_v59  ;;  %v7977_v62 = vcombine.high %v370_v49, %v374_v54 }
 0x1e0   : > { %v7953_v57 = vadd.f32 %v3708_v16, %v3657_v37  ;;  %4081 = vmatpush1.bf16.msra.mxu1 %v7939_v48  ;;  %10155 = vst [vmem:[#allocation414_spill] sm:$0xff] %v7966_v43  ;;  %v498_v16 = vld [vmem:[#allocation5 + $0x4d8] sm:$0xff] }
 0x1e1   : > { %v7963_v30 = vpop.f32.mrf.mxu1  ;;  %4082 = vmatprep.subr.bf16.mxu1 %v7947_v42  ;;  %3968 = vmatmul.mubr.bf16.gmra.mxu0 %v7106_v2  ;;  %v502_v37 = vld [vmem:[#allocation5 + $0x4f8] sm:$0xff]  ;;  %v3663_v48 = vpop.f32.mrf.mxu0  ;;  %v7975_v42 = vcombine.low %v506_v11, %v510_v25  ;;  %10157 = vst [vmem:[#allocation416_spill] sm:$0xff] %v7977_v62  ;;  %v7991_v11 = vcombine.low %v370_v49, %v374_v54 }
 0x1e2   : > { %4032 = vmatpush1.bf16.msra.mxu0 %v7951_v1  ;;  %v7984_v1 = vcombine.high %v498_v16, %v502_v37  ;;  %4059 = vmatprep.mubr.bf16.mxu0 %v6676_v31  ;;  %v486_v49 = vld [vmem:[#allocation5 + $0x478] sm:$0xff]  ;;  %v8003_v54 = vcombine.low %v362_v55, %v366_v41 }
 0x1e3   : > { %4019 = vmatmul.mubr.bf16.gmra.mxu1 %v7112_v46  ;;  %v3714_v44 = vpop.f32.mrf.mxu1  ;;  %4033 = vmatprep.subr.bf16.mxu0 %v7961_v7  ;;  %v7979_v56 = vpop.f32.mrf.mxu0  ;;  %v494_v7 = vld [vmem:[#allocation5 + $0x4b8] sm:$0xff]  ;;  %10159 = vst [vmem:[#allocation418_spill] sm:$0xff] %v7991_v11 }
 0x1e4   : > { %4083 = vmatpush1.bf16.msra.mxu1 %v7959_v22  ;;  %v7981_v33 = vadd.f32 %v3714_v44, %v3663_v48  ;;  %10158 = vst [vmem:[#allocation417_spill] sm:$0xff] %v7984_v1  ;;  %v490_v22 = vld [vmem:[#allocation5 + $0x498] sm:$0xff]  ;;  %4110 = vmatprep.mubr.bf16.mxu1 %v6684_v38  ;;  %v7995_v44 = vcombine.low %v498_v16, %v502_v37  ;;  %10163 = vst [vmem:[#allocation422_spill] sm:$0xff] %v8003_v54 }
 0x1e5   : > { %4084 = vmatprep.subr.bf16.mxu1 %v7966_v43  ;;  %v7986_v45 = vpop.f32.mrf.mxu1  ;;  %v3667_v25 = vpop.f32.mrf.mxu0  ;;  %v7997_v43 = vcombine.high %v362_v55, %v366_v41  ;;  %v8000_v31 = vcombine.high %v490_v22, %v494_v7  ;;  %v358_v38 = vld [vmem:[#allocation5 + $0x78] sm:$0xff]  ;;  %v8007_v16 = vcombine.low %v490_v22, %v494_v7 }
 0x1e6   : > { %4034 = vmatpush1.bf16.msra.mxu0 %v7971_v59  ;;  %10160 = vst [vmem:[#allocation419_spill] sm:$0xff] %v7995_v44  ;;  %v354_v25 = vld [vmem:[#allocation5 + $0x58] sm:$0xff] }
 0x1e7   : > { %v3718_v48 = vpop.f32.mrf.mxu1  ;;  %4035 = vmatprep.subr.bf16.mxu0 %v7977_v62  ;;  %10161 = vst [vmem:[#allocation420_spill] sm:$0xff] %v7997_v43  ;;  %v3668_v32 = vpop.f32.mrf.mxu0  ;;  %10162 = vst [vmem:[#allocation421_spill] sm:$0xff] %v8000_v31  ;;  %v482_v59 = vld [vmem:[#allocation5 + $0x458] sm:$0xff]  ;;  %v8015_v55 = vcombine.low %v354_v25, %v358_v38 }
 0x1e8   : > { %4085 = vmatpush1.bf16.msra.mxu1 %v7975_v42  ;;  %10164 = vst [vmem:[#allocation423_spill] sm:$0xff] %v8007_v16  ;;  %v8009_v32 = vcombine.high %v354_v25, %v358_v38  ;;  %v8012_v37 = vcombine.high %v482_v59, %v486_v49  ;;  %v346_v48 = vld [vmem:[#allocation5 + $0x18] sm:$0xff]  ;;  %v8019_v22 = vcombine.low %v482_v59, %v486_v49 }
 0x1e9   : > { %4086 = vmatprep.subr.bf16.mxu1 %v7984_v1  ;;  %v3719_v53 = vpop.f32.mrf.mxu1  ;;  %v474_v1 = vld [vmem:[#allocation5 + $0x418] sm:$0xff]  ;;  %10167 = vst [vmem:[#allocation426_spill] sm:$0xff] %v8015_v55 }
 0x1ea   : > { %4036 = vmatpush1.bf16.msra.mxu0 %v7991_v11  ;;  %10165 = vst [vmem:[#allocation424_spill] sm:$0xff] %v8009_v32  ;;  %10166 = vst [vmem:[#allocation425_spill] sm:$0xff] %v8012_v37  ;;  %v350_v53 = vld [vmem:[#allocation5 + $0x38] sm:$0xff] }
 0x1eb   : > { %4037 = vmatprep.subr.bf16.mxu0 %v7997_v43  ;;  %v478_v62 = vld [vmem:[#allocation5 + $0x438] sm:$0xff]  ;;  %10168 = vst [vmem:[#allocation427_spill] sm:$0xff] %v8019_v22  ;;  %v8021_v7 = vcombine.high %v346_v48, %v350_v53  ;;  %v8027_v25 = vcombine.low %v346_v48, %v350_v53 }
 0x1ec   : > { %4087 = vmatpush1.bf16.msra.mxu1 %v7995_v44  ;;  %v8024_v41 = vcombine.high %v474_v1, %v478_v62  ;;  %v470_v43 = vld [vmem:[#allocation5 + $0x3f8] sm:$0xff]  ;;  %v8031_v59 = vcombine.low %v474_v1, %v478_v62 }
 0x1ed   : > { %4088 = vmatprep.subr.bf16.mxu1 %v8000_v31  ;;  %10169 = vst [vmem:[#allocation428_spill] sm:$0xff] %v8021_v7  ;;  %v466_v31 = vld [vmem:[#allocation5 + $0x3d8] sm:$0xff]  ;;  %10171 = vst [vmem:[#allocation430_spill] sm:$0xff] %v8027_v25 }
 0x1ee   : > { %4038 = vmatpush1.bf16.msra.mxu0 %v8003_v54  ;;  %10170 = vst [vmem:[#allocation429_spill] sm:$0xff] %v8024_v41  ;;  %v594_v44 = vld [vmem:[#allocation5 + $0x7d8] sm:$0xff]  ;;  %10172 = vst [vmem:[#allocation431_spill] sm:$0xff] %v8031_v59  ;;  %v8033_v38 = vcombine.high %v466_v31, %v470_v43  ;;  %v8039_v48 = vcombine.low %v466_v31, %v470_v43 }
 0x1ef   : > { %4039 = vmatprep.subr.bf16.mxu0 %v8009_v32  ;;  %v598_v11 = vld [vmem:[#allocation5 + $0x7f8] sm:$0xff] }
 0x1f0   : > { %4089 = vmatpush1.bf16.msra.mxu1 %v8007_v16  ;;  %10173 = vst [vmem:[#allocation432_spill] sm:$0xff] %v8033_v38  ;;  %v8036_v49 = vcombine.high %v594_v44, %v598_v11  ;;  %v462_v32 = vld [vmem:[#allocation5 + $0x3b8] sm:$0xff]  ;;  %10175 = vst [vmem:[#allocation434_spill] sm:$0xff] %v8039_v48  ;;  %v8043_v62 = vcombine.low %v594_v44, %v598_v11 }
 0x1f1   : > { %4090 = vmatprep.subr.bf16.mxu1 %v8012_v37  ;;  %v458_v37 = vld [vmem:[#allocation5 + $0x398] sm:$0xff] }
 0x1f2   : > { %4040 = vmatpush1.bf16.msra.mxu0 %v8015_v55  ;;  %10174 = vst [vmem:[#allocation433_spill] sm:$0xff] %v8036_v49  ;;  %v586_v16 = vld [vmem:[#allocation5 + $0x798] sm:$0xff]  ;;  %10176 = vst [vmem:[#allocation435_spill] sm:$0xff] %v8043_v62  ;;  %v8045_v1 = vcombine.high %v458_v37, %v462_v32  ;;  %v8051_v43 = vcombine.low %v458_v37, %v462_v32 }
 0x1f3   : > { %4041 = vmatprep.subr.bf16.mxu0 %v8021_v7  ;;  %v590_v54 = vld [vmem:[#allocation5 + $0x7b8] sm:$0xff] }
 0x1f4   : > { %4091 = vmatpush1.bf16.msra.mxu1 %v8019_v22  ;;  %10177 = vst [vmem:[#allocation436_spill] sm:$0xff] %v8045_v1  ;;  %v8048_v53 = vcombine.high %v586_v16, %v590_v54  ;;  %v454_v7 = vld [vmem:[#allocation5 + $0x378] sm:$0xff]  ;;  %10179 = vst [vmem:[#allocation438_spill] sm:$0xff] %v8051_v43  ;;  %v8055_v11 = vcombine.low %v586_v16, %v590_v54 }
 0x1f5   : > { %4092 = vmatprep.subr.bf16.mxu1 %v8024_v41  ;;  %v450_v41 = vld [vmem:[#allocation5 + $0x358] sm:$0xff] }
 0x1f6   : > { %4042 = vmatpush1.bf16.msra.mxu0 %v8027_v25  ;;  %10178 = vst [vmem:[#allocation437_spill] sm:$0xff] %v8048_v53  ;;  %v578_v22 = vld [vmem:[#allocation5 + $0x758] sm:$0xff]  ;;  %10180 = vst [vmem:[#allocation439_spill] sm:$0xff] %v8055_v11  ;;  %v8057_v44 = vcombine.high %v450_v41, %v454_v7  ;;  %v8063_v32 = vcombine.low %v450_v41, %v454_v7 }
 0x1f7   : > { %4043 = vmatprep.subr.bf16.mxu0 %v8033_v38  ;;  %v582_v55 = vld [vmem:[#allocation5 + $0x778] sm:$0xff] }
 0x1f8   : > { %4093 = vmatpush1.bf16.msra.mxu1 %v8031_v59  ;;  %10181 = vst [vmem:[#allocation440_spill] sm:$0xff] %v8057_v44  ;;  %v8060_v31 = vcombine.high %v578_v22, %v582_v55  ;;  %v446_v38 = vld [vmem:[#allocation5 + $0x338] sm:$0xff]  ;;  %10183 = vst [vmem:[#allocation442_spill] sm:$0xff] %v8063_v32  ;;  %v8067_v54 = vcombine.low %v578_v22, %v582_v55 }
 0x1f9   : > { %4094 = vmatprep.subr.bf16.mxu1 %v8036_v49  ;;  %v442_v49 = vld [vmem:[#allocation5 + $0x318] sm:$0xff] }
 0x1fa   : > { %4044 = vmatpush2.bf16.msra.mxu0 %v8039_v48  ;;  %10182 = vst [vmem:[#allocation441_spill] sm:$0xff] %v8060_v31  ;;  %v570_v59 = vld [vmem:[#allocation5 + $0x718] sm:$0xff]  ;;  %10184 = vst [vmem:[#allocation443_spill] sm:$0xff] %v8067_v54  ;;  %v8069_v16 = vcombine.high %v442_v49, %v446_v38  ;;  %v8075_v7 = vcombine.low %v442_v49, %v446_v38 }
 0x1fb   : > { %4045 = vmatprep.subr.bf16.mxu0 %v8045_v1  ;;  %v574_v25 = vld [vmem:[#allocation5 + $0x738] sm:$0xff] }
 0x1fc   : > { %4095 = vmatpush2.bf16.msra.mxu1 %v8043_v62  ;;  %10185 = vst [vmem:[#allocation444_spill] sm:$0xff] %v8069_v16  ;;  %v8072_v37 = vcombine.high %v570_v59, %v574_v25  ;;  %v438_v1 = vld [vmem:[#allocation5 + $0x2f8] sm:$0xff]  ;;  %10187 = vst [vmem:[#allocation446_spill] sm:$0xff] %v8075_v7  ;;  %v8079_v55 = vcombine.low %v570_v59, %v574_v25 }
 0x1fd   : > { %4096 = vmatprep.subr.bf16.mxu1 %v8048_v53  ;;  %v434_v53 = vld [vmem:[#allocation5 + $0x2d8] sm:$0xff] }
 0x1fe   : > { %4046 = vmatpush2.bf16.msra.mxu0 %v8051_v43  ;;  %10186 = vst [vmem:[#allocation445_spill] sm:$0xff] %v8072_v37  ;;  %v562_v62 = vld [vmem:[#allocation5 + $0x6d8] sm:$0xff]  ;;  %10188 = vst [vmem:[#allocation447_spill] sm:$0xff] %v8079_v55  ;;  %v8081_v22 = vcombine.high %v434_v53, %v438_v1  ;;  %v8087_v38 = vcombine.low %v434_v53, %v438_v1 }
 0x1ff   : > { %4047 = vmatprep.subr.bf16.mxu0 %v8057_v44  ;;  %v566_v48 = vld [vmem:[#allocation5 + $0x6f8] sm:$0xff] }
 0x200   : > { %4097 = vmatpush2.bf16.msra.mxu1 %v8055_v11  ;;  %10189 = vst [vmem:[#allocation448_spill] sm:$0xff] %v8081_v22  ;;  %v8084_v41 = vcombine.high %v562_v62, %v566_v48  ;;  %v430_v44 = vld [vmem:[#allocation5 + $0x2b8] sm:$0xff]  ;;  %10191 = vst [vmem:[#allocation450_spill] sm:$0xff] %v8087_v38  ;;  %v8091_v25 = vcombine.low %v562_v62, %v566_v48 }
 0x201   : > { %4098 = vmatprep.subr.bf16.mxu1 %v8060_v31  ;;  %v426_v31 = vld [vmem:[#allocation5 + $0x298] sm:$0xff] }
 0x202   : > { %4048 = vmatpush2.bf16.msra.mxu0 %v8063_v32  ;;  %10190 = vst [vmem:[#allocation449_spill] sm:$0xff] %v8084_v41  ;;  %v554_v11 = vld [vmem:[#allocation5 + $0x698] sm:$0xff]  ;;  %10192 = vst [vmem:[#allocation451_spill] sm:$0xff] %v8091_v25  ;;  %v8093_v59 = vcombine.high %v426_v31, %v430_v44  ;;  %v8099_v1 = vcombine.low %v426_v31, %v430_v44 }
 0x203   : > { %4049 = vmatprep.subr.bf16.mxu0 %v8069_v16  ;;  %v558_v43 = vld [vmem:[#allocation5 + $0x6b8] sm:$0xff] }
 0x204   : > { %4099 = vmatpush2.bf16.msra.mxu1 %v8067_v54  ;;  %10193 = vst [vmem:[#allocation452_spill] sm:$0xff] %v8093_v59  ;;  %v8096_v49 = vcombine.high %v554_v11, %v558_v43  ;;  %v422_v16 = vld [vmem:[#allocation5 + $0x278] sm:$0xff]  ;;  %10195 = vst [vmem:[#allocation454_spill] sm:$0xff] %v8099_v1  ;;  %v8103_v48 = vcombine.low %v554_v11, %v558_v43 }
 0x205   : > { %4100 = vmatprep.subr.bf16.mxu1 %v8072_v37  ;;  %v418_v37 = vld [vmem:[#allocation5 + $0x258] sm:$0xff] }
 0x206   : > { %4050 = vmatpush2.bf16.msra.mxu0 %v8075_v7  ;;  %10194 = vst [vmem:[#allocation453_spill] sm:$0xff] %v8096_v49  ;;  %v546_v54 = vld [vmem:[#allocation5 + $0x658] sm:$0xff]  ;;  %10196 = vst [vmem:[#allocation455_spill] sm:$0xff] %v8103_v48  ;;  %v8105_v62 = vcombine.high %v418_v37, %v422_v16  ;;  %v8111_v44 = vcombine.low %v418_v37, %v422_v16 }
 0x207   : > { %4051 = vmatprep.subr.bf16.mxu0 %v8081_v22  ;;  %v550_v32 = vld [vmem:[#allocation5 + $0x678] sm:$0xff] }
 0x208   : > { %4101 = vmatpush2.bf16.msra.mxu1 %v8079_v55  ;;  %10197 = vst [vmem:[#allocation456_spill] sm:$0xff] %v8105_v62  ;;  %v8108_v53 = vcombine.high %v546_v54, %v550_v32  ;;  %v414_v22 = vld [vmem:[#allocation5 + $0x238] sm:$0xff]  ;;  %10199 = vst [vmem:[#allocation458_spill] sm:$0xff] %v8111_v44  ;;  %v8115_v43 = vcombine.low %v546_v54, %v550_v32 }
 0x209   : > { %4102 = vmatprep.subr.bf16.mxu1 %v8084_v41  ;;  %v410_v41 = vld [vmem:[#allocation5 + $0x218] sm:$0xff] }
 0x20a   : > { %4052 = vmatpush2.bf16.msra.mxu0 %v8087_v38  ;;  %10198 = vst [vmem:[#allocation457_spill] sm:$0xff] %v8108_v53  ;;  %v538_v55 = vld [vmem:[#allocation5 + $0x618] sm:$0xff]  ;;  %10200 = vst [vmem:[#allocation459_spill] sm:$0xff] %v8115_v43  ;;  %v8117_v11 = vcombine.high %v410_v41, %v414_v22  ;;  %v8123_v16 = vcombine.low %v410_v41, %v414_v22 }
 0x20b   : > { %4053 = vmatprep.subr.bf16.mxu0 %v8093_v59  ;;  %v542_v7 = vld [vmem:[#allocation5 + $0x638] sm:$0xff] }
 0x20c   : > { %4103 = vmatpush2.bf16.msra.mxu1 %v8091_v25  ;;  %10201 = vst [vmem:[#allocation460_spill] sm:$0xff] %v8117_v11  ;;  %v8120_v31 = vcombine.high %v538_v55, %v542_v7  ;;  %v662_v59 = vld [vmem:[#allocation5 + $0x9f8] sm:$0xff]  ;;  %10203 = vst [vmem:[#allocation462_spill] sm:$0xff] %v8123_v16  ;;  %v8127_v32 = vcombine.low %v538_v55, %v542_v7 }
 0x20d   : > { %4104 = vmatprep.subr.bf16.mxu1 %v8096_v49  ;;  %v658_v49 = vld [vmem:[#allocation5 + $0x9d8] sm:$0xff] }
 0x20e   : > { %4054 = vmatpush2.bf16.msra.mxu0 %v8099_v1  ;;  %10202 = vst [vmem:[#allocation461_spill] sm:$0xff] %v8120_v31  ;;  %v786_v25 = vld [vmem:[#allocation5 + $0xdd8] sm:$0xff]  ;;  %10204 = vst [vmem:[#allocation463_spill] sm:$0xff] %v8127_v32  ;;  %v8129_v54 = vcombine.high %v658_v49, %v662_v59  ;;  %v8135_v22 = vcombine.low %v658_v49, %v662_v59  ;;  %v3707_v49 = vadd.f32 %v7943_v23, %v7936_v15 }
 0x20f   : > { %4055 = vmatprep.subr.bf16.mxu0 %v8105_v62  ;;  %v790_v38 = vld [vmem:[#allocation5 + $0xdf8] sm:$0xff] }
 0x210   : > { %4105 = vmatpush2.bf16.msra.mxu1 %v8103_v48  ;;  %10205 = vst [vmem:[#allocation464_spill] sm:$0xff] %v8129_v54  ;;  %v8132_v37 = vcombine.high %v786_v25, %v790_v38  ;;  %v654_v62 = vld [vmem:[#allocation5 + $0x9b8] sm:$0xff]  ;;  %v8139_v7 = vcombine.low %v786_v25, %v790_v38 }
 0x211   : > { %4106 = vmatprep.subr.bf16.mxu1 %v8108_v53  ;;  %v650_v53 = vld [vmem:[#allocation5 + $0x998] sm:$0xff] }
 0x212   : > { %4056 = vmatpush2.bf16.msra.mxu0 %v8111_v44  ;;  %10206 = vst [vmem:[#allocation465_spill] sm:$0xff] %v8132_v37  ;;  %v778_v48 = vld [vmem:[#allocation5 + $0xd98] sm:$0xff]  ;;  %10207 = vst [vmem:[#allocation466_spill] sm:$0xff] %v8139_v7  ;;  %v8141_v55 = vcombine.high %v650_v53, %v654_v62  ;;  %v8152_v25 = vcombine.low %v650_v53, %v654_v62 }
 0x213   : > { %4057 = vmatprep.subr.bf16.mxu0 %v8117_v11  ;;  %v782_v1 = vld [vmem:[#allocation5 + $0xdb8] sm:$0xff] }
 0x214   : > { %4107 = vmatpush2.bf16.msra.mxu1 %v8115_v43  ;;  %v8144_v41 = vcombine.high %v778_v48, %v782_v1  ;;  %v646_v11 = vld [vmem:[#allocation5 + $0x978] sm:$0xff] }
 0x215   : > { %4108 = vmatprep.subr.bf16.mxu1 %v8120_v31  ;;  %v642_v31 = vld [vmem:[#allocation5 + $0x958] sm:$0xff] }
 0x216   : > { %4058 = vmatpush2.bf16.msra.mxu0 %v8123_v16  ;;  %10208 = vst [vmem:[#allocation467_spill] sm:$0xff] %v8144_v41  ;;  %v770_v16 = vld [vmem:[#allocation5 + $0xd58] sm:$0xff] }
 0x217   : > { %4129 = vmatprep.subr.bf16.mxu0 %v8129_v54  ;;  %v774_v59 = vld [vmem:[#allocation5 + $0xd78] sm:$0xff] }
 0x218   : > { %4109 = vmatpush2.bf16.msra.mxu1 %v8127_v32  ;;  %v8158_v32 = vcombine.high %v642_v31, %v646_v11  ;;  %v638_v62 = vld [vmem:[#allocation5 + $0x938] sm:$0xff] }
 0x219   : > { %4180 = vmatprep.subr.bf16.mxu1 %v8132_v37  ;;  %v3755_v43 = vpop.f32.mrf.mxu0  ;;  %4060 = vmatmul.mubr.bf16.vlgmr.msra.gmra.mxu0 %v6819_v17  ;;  %v8156_v17 = vcombine.low %v778_v48, %v782_v1  ;;  %v3711_v1 = vadd.f32 %v7963_v30, %v7956_v39 }
 0x21a   : > { %v3756_v54 = vadd.f32 %v3755_v43, %v7933_v50  ;;  %4130 = vmatpush1.bf16.msra.mxu0 %v8135_v22  ;;  %v634_v50 = vld [vmem:[#allocation5 + $0x918] sm:$0xff]  ;;  %4069 = vmatprep.mubr.bf16.mxu0 %v6839_v52 }
 0x21b   : > { %v3806_v38 = vpop.f32.mrf.mxu1  ;;  %4111 = vmatmul.mubr.bf16.vlgmr.msra.gmra.mxu1 %v6825_v60  ;;  %v3757_v37 = vpop.f32.mrf.mxu0  ;;  %4131 = vmatprep.subr.bf16.mxu0 %v8141_v55  ;;  %10209 = vst [vmem:[#allocation468_spill] sm:$0xff] %v8156_v17  ;;  %v8163_v60 = vcombine.high %v770_v16, %v774_v59  ;;  %v762_v43 = vld [vmem:[#allocation5 + $0xd18] sm:$0xff] }
 0x21c   : > { %4181 = vmatpush1.bf16.msra.mxu1 %v8139_v7  ;;  %v8160_v44 = vadd.f32 %v3806_v38, %v3756_v54  ;;  %v3758_v23 = vadd.f32 %v3757_v37, %v3707_v49  ;;  %v766_v7 = vld [vmem:[#allocation5 + $0xd38] sm:$0xff]  ;;  %4120 = vmatprep.mubr.bf16.mxu1 %v6844_v40  ;;  %v8173_v49 = vcombine.low %v642_v31, %v646_v11 }
 0x21d   : > { %v3808_v15 = vpop.f32.mrf.mxu1  ;;  %4182 = vmatprep.subr.bf16.mxu1 %v8144_v41  ;;  %v3759_v53 = vpop.f32.mrf.mxu0  ;;  %v8177_v38 = vcombine.low %v770_v16, %v774_v59  ;;  %v8179_v40 = vcombine.high %v634_v50, %v638_v62  ;;  %v630_v11 = vld [vmem:[#allocation5 + $0x8f8] sm:$0xff]  ;;  %v3717_v16 = vadd.f32 %v7986_v45, %v7979_v56 }
 0x21e   : > { %v8169_v48 = vadd.f32 %v3808_v15, %v3758_v23  ;;  %v3760_v54 = vadd.f32 %v3759_v53, %v7953_v57  ;;  %4132 = vmatpush1.bf16.msra.mxu0 %v8152_v25  ;;  %v8184_v57 = vcombine.high %v762_v43, %v766_v7  ;;  %v626_v23 = vld [vmem:[#allocation5 + $0x8d8] sm:$0xff]  ;;  %v8186_v15 = vcombine.low %v634_v50, %v638_v62 }
 0x21f   : > { %v3810_v37 = vpop.f32.mrf.mxu1  ;;  %v3761_v52 = vpop.f32.mrf.mxu0  ;;  %4133 = vmatprep.subr.bf16.mxu0 %v8158_v32  ;;  %v754_v53 = vld [vmem:[#allocation5 + $0xcd8] sm:$0xff]  ;;  %v8198_v62 = vcombine.low %v762_v43, %v766_v7  ;;  %v8212_v43 = vcombine.low %v626_v23, %v630_v11 }
 0x220   : > { %4183 = vmatpush1.bf16.msra.mxu1 %v8156_v17  ;;  %v8181_v41 = vadd.f32 %v3810_v37, %v3760_v54  ;;  %v3762_v30 = vadd.f32 %v3761_v52, %v3711_v1  ;;  %v758_v17 = vld [vmem:[#allocation5 + $0xcf8] sm:$0xff] }
 0x221   : > { %v3812_v39 = vpop.f32.mrf.mxu1  ;;  %4184 = vmatprep.subr.bf16.mxu1 %v8163_v60  ;;  %v3765_v31 = vpop.f32.mrf.mxu0  ;;  %4070 = vmatmul.mubr.bf16.gmra.mxu0 %v6862_v61  ;;  %v8200_v61 = vcombine.high %v626_v23, %v630_v11  ;;  %v618_v52 = vld [vmem:[#allocation5 + $0x898] sm:$0xff]  ;;  %10212 = vst [vmem:[#allocation471_spill] sm:$0xff] %v8212_v43 }
 0x222   : > { %v8191_v59 = vadd.f32 %v3812_v39, %v3762_v30  ;;  %v3766_v1 = vadd.f32 %v3765_v31, %v7981_v33  ;;  %4134 = vmatpush1.bf16.msra.mxu0 %v8173_v49  ;;  %v8205_v33 = vcombine.high %v754_v53, %v758_v17  ;;  %v622_v30 = vld [vmem:[#allocation5 + $0x8b8] sm:$0xff]  ;;  %4161 = vmatprep.mubr.bf16.mxu0 %v6879_v51 }
 0x223   : > { %v3816_v54 = vpop.f32.mrf.mxu1  ;;  %4121 = vmatmul.mubr.bf16.gmra.mxu1 %v6868_v47  ;;  %v3767_v50 = vpop.f32.mrf.mxu0  ;;  %4135 = vmatprep.subr.bf16.mxu0 %v8179_v40  ;;  %10210 = vst [vmem:[#allocation469_spill] sm:$0xff] %v8200_v61  ;;  %v746_v47 = vld [vmem:[#allocation5 + $0xc98] sm:$0xff]  ;;  %v8224_v11 = vcombine.low %v618_v52, %v622_v30 }
 0x224   : > { %4185 = vmatpush1.bf16.msra.mxu1 %v8177_v38  ;;  %v3768_v37 = vadd.f32 %v3767_v50, %v3717_v16  ;;  %v8202_v56 = vadd.f32 %v3816_v54, %v3766_v1  ;;  %10211 = vst [vmem:[#allocation470_spill] sm:$0xff] %v8205_v33  ;;  %v750_v39 = vld [vmem:[#allocation5 + $0xcb8] sm:$0xff]  ;;  %4212 = vmatprep.mubr.bf16.mxu1 %v6882_v13 }
 0x225   : > { %v3818_v45 = vpop.f32.mrf.mxu1  ;;  %4186 = vmatprep.subr.bf16.mxu1 %v8184_v57  ;;  %v3769_v31 = vpop.f32.mrf.mxu0  ;;  %v8216_v1 = vcombine.low %v754_v53, %v758_v17  ;;  %v8218_v54 = vcombine.high %v618_v52, %v622_v30  ;;  %v8221_v50 = vcombine.high %v746_v47, %v750_v39  ;;  %v610_v13 = vld [vmem:[#allocation5 + $0x858] sm:$0xff]  ;;  %10216 = vst [vmem:[#allocation475_spill] sm:$0xff] %v8224_v11 }
 0x226   : > { %v8209_v7 = vadd.f32 %v3818_v45, %v3768_v37  ;;  %4136 = vmatpush1.bf16.msra.mxu0 %v8186_v15  ;;  %v614_v37 = vld [vmem:[#allocation5 + $0x878] sm:$0xff]  ;;  %v8228_v17 = vcombine.low %v746_v47, %v750_v39 }
 0x227   : > { %v3820_v16 = vpop.f32.mrf.mxu1  ;;  %4137 = vmatprep.subr.bf16.mxu0 %v8200_v61  ;;  %10213 = vst [vmem:[#allocation472_spill] sm:$0xff] %v8216_v1  ;;  %10214 = vst [vmem:[#allocation473_spill] sm:$0xff] %v8218_v54  ;;  %v3770_v51 = vpop.f32.mrf.mxu0  ;;  %v738_v31 = vld [vmem:[#allocation5 + $0xc58] sm:$0xff]  ;;  %v8230_v53 = vcombine.high %v610_v13, %v614_v37  ;;  %v8236_v52 = vcombine.low %v610_v13, %v614_v37 }
 0x228   : > { %4187 = vmatpush1.bf16.msra.mxu1 %v8198_v62  ;;  %10215 = vst [vmem:[#allocation474_spill] sm:$0xff] %v8221_v50  ;;  %v742_v23 = vld [vmem:[#allocation5 + $0xc78] sm:$0xff]  ;;  %10217 = vst [vmem:[#allocation476_spill] sm:$0xff] %v8228_v17 }
 0x229   : > { %4188 = vmatprep.subr.bf16.mxu1 %v8205_v33  ;;  %v3821_v45 = vpop.f32.mrf.mxu1  ;;  %10218 = vst [vmem:[#allocation477_spill] sm:$0xff] %v8230_v53  ;;  %v8233_v16 = vcombine.high %v738_v31, %v742_v23  ;;  %v602_v51 = vld [vmem:[#allocation5 + $0x818] sm:$0xff]  ;;  %10220 = vst [vmem:[#allocation479_spill] sm:$0xff] %v8236_v52  ;;  %v8240_v30 = vcombine.low %v738_v31, %v742_v23 }
 0x22a   : > { %4138 = vmatpush1.bf16.msra.mxu0 %v8212_v43  ;;  %v606_v45 = vld [vmem:[#allocation5 + $0x838] sm:$0xff] }
 0x22b   : > { %4139 = vmatprep.subr.bf16.mxu0 %v8218_v54  ;;  %10219 = vst [vmem:[#allocation478_spill] sm:$0xff] %v8233_v16  ;;  %v730_v33 = vld [vmem:[#allocation5 + $0xc18] sm:$0xff]  ;;  %10221 = vst [vmem:[#allocation480_spill] sm:$0xff] %v8240_v30  ;;  %v8242_v47 = vcombine.high %v602_v51, %v606_v45  ;;  %v8248_v13 = vcombine.low %v602_v51, %v606_v45 }
 0x22c   : > { %4189 = vmatpush1.bf16.msra.mxu1 %v8216_v1  ;;  %v734_v61 = vld [vmem:[#allocation5 + $0xc38] sm:$0xff] }
 0x22d   : > { %4190 = vmatprep.subr.bf16.mxu1 %v8221_v50  ;;  %10222 = vst [vmem:[#allocation481_spill] sm:$0xff] %v8242_v47  ;;  %v8245_v39 = vcombine.high %v730_v33, %v734_v61  ;;  %v722_v50 = vld [vmem:[#allocation5 + $0xbd8] sm:$0xff]  ;;  %10224 = vst [vmem:[#allocation483_spill] sm:$0xff] %v8248_v13  ;;  %v8252_v37 = vcombine.low %v730_v33, %v734_v61 }
 0x22e   : > { %4140 = vmatpush1.bf16.msra.mxu0 %v8224_v11  ;;  %v726_v54 = vld [vmem:[#allocation5 + $0xbf8] sm:$0xff] }
 0x22f   : > { %4141 = vmatprep.subr.bf16.mxu0 %v8230_v53  ;;  %10223 = vst [vmem:[#allocation482_spill] sm:$0xff] %v8245_v39  ;;  %v850_v1 = vld [vmem:[#allocation5 + $0xfd8] sm:$0xff]  ;;  %10225 = vst [vmem:[#allocation484_spill] sm:$0xff] %v8252_v37  ;;  %v8254_v31 = vcombine.high %v722_v50, %v726_v54  ;;  %v8260_v51 = vcombine.low %v722_v50, %v726_v54 }
 0x230   : > { %4191 = vmatpush1.bf16.msra.mxu1 %v8228_v17  ;;  %v854_v43 = vld [vmem:[#allocation5 + $0xff8] sm:$0xff] }
 0x231   : > { %4192 = vmatprep.subr.bf16.mxu1 %v8233_v16  ;;  %10226 = vst [vmem:[#allocation485_spill] sm:$0xff] %v8254_v31  ;;  %v8257_v23 = vcombine.high %v850_v1, %v854_v43  ;;  %v714_v16 = vld [vmem:[#allocation5 + $0xb98] sm:$0xff]  ;;  %10228 = vst [vmem:[#allocation487_spill] sm:$0xff] %v8260_v51  ;;  %v8264_v61 = vcombine.low %v850_v1, %v854_v43 }
 0x232   : > { %4142 = vmatpush1.bf16.msra.mxu0 %v8236_v52  ;;  %v718_v53 = vld [vmem:[#allocation5 + $0xbb8] sm:$0xff] }
 0x233   : > { %4143 = vmatprep.subr.bf16.mxu0 %v8242_v47  ;;  %10227 = vst [vmem:[#allocation486_spill] sm:$0xff] %v8257_v23  ;;  %v842_v17 = vld [vmem:[#allocation5 + $0xf98] sm:$0xff]  ;;  %10229 = vst [vmem:[#allocation488_spill] sm:$0xff] %v8264_v61  ;;  %v8266_v33 = vcombine.high %v714_v16, %v718_v53  ;;  %v8272_v54 = vcombine.low %v714_v16, %v718_v53 }
 0x234   : > { %4193 = vmatpush1.bf16.msra.mxu1 %v8240_v30  ;;  %v846_v11 = vld [vmem:[#allocation5 + $0xfb8] sm:$0xff] }
 0x235   : > { %4194 = vmatprep.subr.bf16.mxu1 %v8245_v39  ;;  %10230 = vst [vmem:[#allocation489_spill] sm:$0xff] %v8266_v33  ;;  %v8269_v45 = vcombine.high %v842_v17, %v846_v11  ;;  %v706_v39 = vld [vmem:[#allocation5 + $0xb58] sm:$0xff]  ;;  %10232 = vst [vmem:[#allocation491_spill] sm:$0xff] %v8272_v54  ;;  %v8276_v43 = vcombine.low %v842_v17, %v846_v11 }
 0x236   : > { %4144 = vmatpush1.bf16.msra.mxu0 %v8248_v13  ;;  %v710_v47 = vld [vmem:[#allocation5 + $0xb78] sm:$0xff] }
 0x237   : > { %4145 = vmatprep.subr.bf16.mxu0 %v8254_v31  ;;  %10231 = vst [vmem:[#allocation490_spill] sm:$0xff] %v8269_v45  ;;  %v834_v30 = vld [vmem:[#allocation5 + $0xf58] sm:$0xff]  ;;  %10233 = vst [vmem:[#allocation492_spill] sm:$0xff] %v8276_v43  ;;  %v8278_v1 = vcombine.high %v706_v39, %v710_v47  ;;  %v8284_v53 = vcombine.low %v706_v39, %v710_v47 }
 0x238   : > { %4195 = vmatpush1.bf16.msra.mxu1 %v8252_v37  ;;  %v838_v52 = vld [vmem:[#allocation5 + $0xf78] sm:$0xff] }
 0x239   : > { %4196 = vmatprep.subr.bf16.mxu1 %v8257_v23  ;;  %10234 = vst [vmem:[#allocation493_spill] sm:$0xff] %v8278_v1  ;;  %v8281_v50 = vcombine.high %v834_v30, %v838_v52  ;;  %v698_v23 = vld [vmem:[#allocation5 + $0xb18] sm:$0xff]  ;;  %10236 = vst [vmem:[#allocation495_spill] sm:$0xff] %v8284_v53  ;;  %v8288_v11 = vcombine.low %v834_v30, %v838_v52 }
 0x23a   : > { %4146 = vmatpush2.bf16.msra.mxu0 %v8260_v51  ;;  %v702_v31 = vld [vmem:[#allocation5 + $0xb38] sm:$0xff] }
 0x23b   : > { %4147 = vmatprep.subr.bf16.mxu0 %v8266_v33  ;;  %10235 = vst [vmem:[#allocation494_spill] sm:$0xff] %v8281_v50  ;;  %v826_v37 = vld [vmem:[#allocation5 + $0xf18] sm:$0xff]  ;;  %10237 = vst [vmem:[#allocation496_spill] sm:$0xff] %v8288_v11  ;;  %v8290_v17 = vcombine.high %v698_v23, %v702_v31  ;;  %v8296_v47 = vcombine.low %v698_v23, %v702_v31 }
 0x23c   : > { %4197 = vmatpush2.bf16.msra.mxu1 %v8264_v61  ;;  %v830_v13 = vld [vmem:[#allocation5 + $0xf38] sm:$0xff] }
 0x23d   : > { %4198 = vmatprep.subr.bf16.mxu1 %v8269_v45  ;;  %10238 = vst [vmem:[#allocation497_spill] sm:$0xff] %v8290_v17  ;;  %v8293_v16 = vcombine.high %v826_v37, %v830_v13  ;;  %v690_v45 = vld [vmem:[#allocation5 + $0xad8] sm:$0xff]  ;;  %10240 = vst [vmem:[#allocation499_spill] sm:$0xff] %v8296_v47  ;;  %v8300_v52 = vcombine.low %v826_v37, %v830_v13 }
 0x23e   : > { %4148 = vmatpush2.bf16.msra.mxu0 %v8272_v54  ;;  %v694_v33 = vld [vmem:[#allocation5 + $0xaf8] sm:$0xff] }
 0x23f   : > { %4149 = vmatprep.subr.bf16.mxu0 %v8278_v1  ;;  %10239 = vst [vmem:[#allocation498_spill] sm:$0xff] %v8293_v16  ;;  %v818_v61 = vld [vmem:[#allocation5 + $0xed8] sm:$0xff]  ;;  %10241 = vst [vmem:[#allocation500_spill] sm:$0xff] %v8300_v52  ;;  %v8302_v30 = vcombine.high %v690_v45, %v694_v33  ;;  %v8308_v31 = vcombine.low %v690_v45, %v694_v33 }
 0x240   : > { %4199 = vmatpush2.bf16.msra.mxu1 %v8276_v43  ;;  %v822_v51 = vld [vmem:[#allocation5 + $0xef8] sm:$0xff] }
 0x241   : > { %4200 = vmatprep.subr.bf16.mxu1 %v8281_v50  ;;  %10242 = vst [vmem:[#allocation501_spill] sm:$0xff] %v8302_v30  ;;  %v8305_v39 = vcombine.high %v818_v61, %v822_v51  ;;  %v682_v50 = vld [vmem:[#allocation5 + $0xa98] sm:$0xff]  ;;  %v8312_v13 = vcombine.low %v818_v61, %v822_v51 }
 0x242   : > { %4150 = vmatpush2.bf16.msra.mxu0 %v8284_v53  ;;  %v686_v1 = vld [vmem:[#allocation5 + $0xab8] sm:$0xff] }
 0x243   : > { %4151 = vmatprep.subr.bf16.mxu0 %v8290_v17  ;;  %10243 = vst [vmem:[#allocation502_spill] sm:$0xff] %v8305_v39  ;;  %v810_v43 = vld [vmem:[#allocation5 + $0xe98] sm:$0xff]  ;;  %v8314_v37 = vcombine.high %v682_v50, %v686_v1  ;;  %v8320_v33 = vcombine.low %v682_v50, %v686_v1 }
 0x244   : > { %4201 = vmatpush2.bf16.msra.mxu1 %v8288_v11  ;;  %v814_v54 = vld [vmem:[#allocation5 + $0xeb8] sm:$0xff] }
 0x245   : > { %4202 = vmatprep.subr.bf16.mxu1 %v8293_v16  ;;  %v8317_v23 = vcombine.high %v810_v43, %v814_v54  ;;  %v674_v16 = vld [vmem:[#allocation5 + $0xa58] sm:$0xff]  ;;  %v8324_v51 = vcombine.low %v810_v43, %v814_v54 }
 0x246   : > { %4152 = vmatpush2.bf16.msra.mxu0 %v8296_v47  ;;  %v678_v17 = vld [vmem:[#allocation5 + $0xa78] sm:$0xff] }
 0x247   : > { %4153 = vmatprep.subr.bf16.mxu0 %v8302_v30  ;;  %10244 = vst [vmem:[#allocation503_spill] sm:$0xff] %v8317_v23  ;;  %v802_v11 = vld [vmem:[#allocation5 + $0xe58] sm:$0xff]  ;;  %v8326_v61 = vcombine.high %v674_v16, %v678_v17  ;;  %v8332_v1 = vcombine.low %v674_v16, %v678_v17 }
 0x248   : > { %4203 = vmatpush2.bf16.msra.mxu1 %v8300_v52  ;;  %v806_v53 = vld [vmem:[#allocation5 + $0xe78] sm:$0xff] }
 0x249   : > { %4204 = vmatprep.subr.bf16.mxu1 %v8305_v39  ;;  %v8329_v45 = vcombine.high %v802_v11, %v806_v53  ;;  %v666_v39 = vld [vmem:[#allocation5 + $0xa18] sm:$0xff]  ;;  %v8336_v54 = vcombine.low %v802_v11, %v806_v53 }
 0x24a   : > { %4154 = vmatpush2.bf16.msra.mxu0 %v8308_v31  ;;  %v670_v30 = vld [vmem:[#allocation5 + $0xa38] sm:$0xff] }
 0x24b   : > { %4155 = vmatprep.subr.bf16.mxu0 %v8314_v37  ;;  %v794_v52 = vld [vmem:[#allocation5 + $0xe18] sm:$0xff]  ;;  %v8338_v43 = vcombine.high %v666_v39, %v670_v30 }
 0x24c   : > { %4205 = vmatpush2.bf16.msra.mxu1 %v8312_v13  ;;  %v798_v47 = vld [vmem:[#allocation5 + $0xe38] sm:$0xff] }
 0x24d   : > { %4206 = vmatprep.subr.bf16.mxu1 %v8317_v23  ;;  %v8341_v50 = vcombine.high %v794_v52, %v798_v47  ;;  %v8344_v23 = vcombine.low %v666_v39, %v670_v30  ;;  %v8348_v17 = vcombine.low %v794_v52, %v798_v47  ;;  %v10251_v30 = vld [vmem:[#allocation15_spill] sm:$0xff]  ;;  %v10252_v39 = vld [vmem:[#allocation16_spill] sm:$0xff] }
 0x24e   : > { %4156 = vmatpush2.bf16.msra.mxu0 %v8320_v33 }
 0x24f   : > { %4157 = vmatprep.subr.bf16.mxu0 %v8326_v61  ;;  %10245 = vst [vmem:[#allocation504_spill] sm:$0xff] %v8341_v50  ;;  %10246 = vst [vmem:[#allocation505_spill] sm:$0xff] %v8344_v23 }
 0x250   : > { %4207 = vmatpush2.bf16.msra.mxu1 %v8324_v51  ;;  %10247 = vst [vmem:[#allocation506_spill] sm:$0xff] %v8348_v17 }
 0x251   : > { %4208 = vmatprep.subr.bf16.mxu1 %v8329_v45 }
 0x252   : > { %4158 = vmatpush2.bf16.msra.mxu0 %v8332_v1 }
 0x253   : > { %4159 = vmatprep.subr.bf16.mxu0 %v8338_v43 }
 0x254   : > { %4209 = vmatpush2.bf16.msra.mxu1 %v8336_v54 }
 0x255   : > { %4210 = vmatprep.subr.bf16.mxu1 %v8341_v50 }
 0x256   : > { %4160 = vmatpush2.bf16.msra.mxu0 %v8344_v23 }
 0x257   : > { %4231 = vmatprep.subr.bf16.mxu0 %v6575_v3 }
 0x258   : > { %4211 = vmatpush2.bf16.msra.mxu1 %v8348_v17  ;;  %v10397_v17 = vld [vmem:[#allocation155_spill] sm:$0xff] }
 0x259   : > { %4282 = vmatprep.subr.bf16.mxu1 %v6579_v8  ;;  %v3857_v53 = vpop.f32.mrf.mxu0  ;;  %4162 = vmatmul.mubr.bf16.vlgmr.msra.gmra.mxu0 %v7069_v0 }
 0x25a   : > { %4232 = vmatpush1.bf16.msra.mxu0 %v6577_v5  ;;  %4171 = vmatprep.mubr.bf16.mxu0 %v7087_v24 }
 0x25b   : > { %v3908_v11 = vpop.f32.mrf.mxu1  ;;  %4213 = vmatmul.mubr.bf16.vlgmr.msra.gmra.mxu1 %v7073_v6  ;;  %v3859_v47 = vpop.f32.mrf.mxu0  ;;  %4233 = vmatprep.subr.bf16.mxu0 %v6583_v10 }
 0x25c   : > { %v8358_v16 = vadd.f32 %v3908_v11, %v3857_v53  ;;  %4283 = vmatpush1.bf16.msra.mxu1 %v6581_v9  ;;  %4222 = vmatprep.mubr.bf16.mxu1 %v7090_v12  ;;  %v10253_v53 = vld [vmem:[#allocation17_spill] sm:$0xff]  ;;  %v10255_v11 = vld [vmem:[#allocation19_spill] sm:$0xff] }
 0x25d   : > { %v3910_v52 = vpop.f32.mrf.mxu1  ;;  %4284 = vmatprep.subr.bf16.mxu1 %v6586_v14  ;;  %v3861_v8 = vpop.f32.mrf.mxu0 }
 0x25e   : > { %v8364_v3 = vadd.f32 %v3910_v52, %v3859_v47  ;;  %4234 = vmatpush1.bf16.msra.mxu0 %v6590_v18  ;;  %v10258_v47 = vld [vmem:[#allocation22_spill] sm:$0xff]  ;;  %v10259_v52 = vld [vmem:[#allocation23_spill] sm:$0xff] }
 0x25f   : > { %v3912_v0 = vpop.f32.mrf.mxu1  ;;  %v3863_v9 = vpop.f32.mrf.mxu0  ;;  %4235 = vmatprep.subr.bf16.mxu0 %v6596_v20 }
 0x260   : > { %v8368_v5 = vadd.f32 %v3912_v0, %v3861_v8  ;;  %4285 = vmatpush1.bf16.msra.mxu1 %v6594_v19  ;;  %v10260_v8 = vld [vmem:[#allocation24_spill] sm:$0xff]  ;;  %v10261_v0 = vld [vmem:[#allocation25_spill] sm:$0xff] }
 0x261   : > { %v3914_v10 = vpop.f32.mrf.mxu1  ;;  %4286 = vmatprep.subr.bf16.mxu1 %v6599_v21  ;;  %4172 = vmatmul.mubr.bf16.gmra.mxu0 %v7106_v2  ;;  %v3867_v6 = vpop.f32.mrf.mxu0 }
 0x262   : > { %v8373_v14 = vadd.f32 %v3914_v10, %v3863_v9  ;;  %4236 = vmatpush1.bf16.msra.mxu0 %v6602_v26  ;;  %4263 = vmatprep.mubr.bf16.mxu0 %v6651_v58  ;;  %v10262_v9 = vld [vmem:[#allocation26_spill] sm:$0xff]  ;;  %v10263_v10 = vld [vmem:[#allocation27_spill] sm:$0xff] }
 0x263   : > { %4223 = vmatmul.mubr.bf16.gmra.mxu1 %v7112_v46  ;;  %v3918_v18 = vpop.f32.mrf.mxu1  ;;  %4237 = vmatprep.subr.bf16.mxu0 %v6608_v28  ;;  %v3869_v19 = vpop.f32.mrf.mxu0  ;;  %v10248_v28 = vld [vmem:[#allocation12_spill] sm:$0xff]  ;;  %v10250_v46 = vld [vmem:[#allocation14_spill] sm:$0xff] }
 0x264   : > { %4287 = vmatpush1.bf16.msra.mxu1 %v6606_v27  ;;  %v8380_v24 = vadd.f32 %v3918_v18, %v3867_v6  ;;  %4314 = vmatprep.mubr.bf16.mxu1 %v6655_v63  ;;  %v10264_v6 = vld [vmem:[#allocation28_spill] sm:$0xff]  ;;  %v10265_v18 = vld [vmem:[#allocation29_spill] sm:$0xff] }
 0x265   : > { %4288 = vmatprep.subr.bf16.mxu1 %v6611_v29  ;;  %v3920_v20 = vpop.f32.mrf.mxu1  ;;  %v3871_v21 = vpop.f32.mrf.mxu0  ;;  %v10249_v29 = vld [vmem:[#allocation13_spill] sm:$0xff] }
 0x266   : > { %v8384_v2 = vadd.f32 %v3920_v20, %v3869_v19  ;;  %4238 = vmatpush1.bf16.msra.mxu0 %v6614_v34  ;;  %v10254_v34 = vld [vmem:[#allocation18_spill] sm:$0xff]  ;;  %v10267_v20 = vld [vmem:[#allocation31_spill] sm:$0xff]  ;;  %v10268_v21 = vld [vmem:[#allocation32_spill] sm:$0xff] }
 0x267   : > { %v3922_v26 = vpop.f32.mrf.mxu1  ;;  %4239 = vmatprep.subr.bf16.mxu0 %v6620_v36  ;;  %v3872_v27 = vpop.f32.mrf.mxu0  ;;  %v10257_v36 = vld [vmem:[#allocation21_spill] sm:$0xff]  ;;  %v10266_v19 = vld [vmem:[#allocation30_spill] sm:$0xff] }
 0x268   : > { %4289 = vmatpush1.bf16.msra.mxu1 %v6618_v35  ;;  %v10256_v35 = vld [vmem:[#allocation20_spill] sm:$0xff]  ;;  %v10269_v26 = vld [vmem:[#allocation33_spill] sm:$0xff]  ;;  %v10270_v27 = vld [vmem:[#allocation34_spill] sm:$0xff] }
 0x269   : > { %4290 = vmatprep.subr.bf16.mxu1 %v10248_v28  ;;  %v3923_v12 = vpop.f32.mrf.mxu1  ;;  %v10271_v28 = vld [vmem:[#allocation35_spill] sm:$0xff] }
 0x26a   : > { %4240 = vmatpush1.bf16.msra.mxu0 %v10249_v29  ;;  %v10272_v12 = vld [vmem:[#allocation36_spill] sm:$0xff]  ;;  %v10273_v29 = vld [vmem:[#allocation37_spill] sm:$0xff] }
 0x26b   : > { %4241 = vmatprep.subr.bf16.mxu0 %v10251_v30  ;;  %v10275_v30 = vld [vmem:[#allocation39_spill] sm:$0xff] }
 0x26c   : > { %4291 = vmatpush1.bf16.msra.mxu1 %v10250_v46  ;;  %v10274_v46 = vld [vmem:[#allocation38_spill] sm:$0xff] }
 0x26d   : > { %4292 = vmatprep.subr.bf16.mxu1 %v10252_v39  ;;  %v10276_v39 = vld [vmem:[#allocation40_spill] sm:$0xff] }
 0x26e   : > { %4242 = vmatpush1.bf16.msra.mxu0 %v10253_v53  ;;  %v10277_v53 = vld [vmem:[#allocation41_spill] sm:$0xff] }
 0x26f   : > { %4243 = vmatprep.subr.bf16.mxu0 %v10255_v11  ;;  %v10279_v11 = vld [vmem:[#allocation43_spill] sm:$0xff] }
 0x270   : > { %4293 = vmatpush1.bf16.msra.mxu1 %v10254_v34  ;;  %v10278_v34 = vld [vmem:[#allocation42_spill] sm:$0xff] }
 0x271   : > { %4294 = vmatprep.subr.bf16.mxu1 %v10256_v35  ;;  %v10280_v35 = vld [vmem:[#allocation44_spill] sm:$0xff] }
 0x272   : > { %4244 = vmatpush1.bf16.msra.mxu0 %v10257_v36  ;;  %v10281_v36 = vld [vmem:[#allocation45_spill] sm:$0xff] }
 0x273   : > { %4245 = vmatprep.subr.bf16.mxu0 %v10259_v52  ;;  %v10283_v52 = vld [vmem:[#allocation47_spill] sm:$0xff] }
 0x274   : > { %4295 = vmatpush1.bf16.msra.mxu1 %v10258_v47  ;;  %v10282_v47 = vld [vmem:[#allocation46_spill] sm:$0xff] }
 0x275   : > { %4296 = vmatprep.subr.bf16.mxu1 %v10260_v8  ;;  %v10284_v8 = vld [vmem:[#allocation48_spill] sm:$0xff] }
 0x276   : > { %4246 = vmatpush1.bf16.msra.mxu0 %v10261_v0  ;;  %v10285_v0 = vld [vmem:[#allocation50_spill] sm:$0xff] }
 0x277   : > { %4247 = vmatprep.subr.bf16.mxu0 %v10263_v10  ;;  %v10287_v10 = vld [vmem:[#allocation53_spill] sm:$0xff] }
 0x278   : > { %4297 = vmatpush1.bf16.msra.mxu1 %v10262_v9  ;;  %v10286_v9 = vld [vmem:[#allocation52_spill] sm:$0xff] }
 0x279   : > { %4298 = vmatprep.subr.bf16.mxu1 %v10264_v6  ;;  %v10288_v6 = vld [vmem:[#allocation54_spill] sm:$0xff] }
 0x27a   : > { %4248 = vmatpush2.bf16.msra.mxu0 %v10265_v18  ;;  %v10289_v18 = vld [vmem:[#allocation57_spill] sm:$0xff] }
 0x27b   : > { %4249 = vmatprep.subr.bf16.mxu0 %v10267_v20  ;;  %v10291_v20 = vld [vmem:[#allocation59_spill] sm:$0xff] }
 0x27c   : > { %4299 = vmatpush2.bf16.msra.mxu1 %v10266_v19  ;;  %v10290_v19 = vld [vmem:[#allocation58_spill] sm:$0xff] }
 0x27d   : > { %4300 = vmatprep.subr.bf16.mxu1 %v10268_v21  ;;  %v10292_v21 = vld [vmem:[#allocation60_spill] sm:$0xff] }
 0x27e   : > { %4250 = vmatpush2.bf16.msra.mxu0 %v10269_v26  ;;  %v10293_v26 = vld [vmem:[#allocation62_spill] sm:$0xff] }
 0x27f   : > { %4251 = vmatprep.subr.bf16.mxu0 %v10271_v28  ;;  %v10295_v28 = vld [vmem:[#allocation65_spill] sm:$0xff] }
 0x280   : > { %4301 = vmatpush2.bf16.msra.mxu1 %v10270_v27  ;;  %v10294_v27 = vld [vmem:[#allocation64_spill] sm:$0xff] }
 0x281   : > { %4302 = vmatprep.subr.bf16.mxu1 %v10272_v12  ;;  %v10296_v12 = vld [vmem:[#allocation66_spill] sm:$0xff] }
 0x282   : > { %4252 = vmatpush2.bf16.msra.mxu0 %v10273_v29 }
 0x283   : > { %4253 = vmatprep.subr.bf16.mxu0 %v10275_v30 }
 0x284   : > { %4303 = vmatpush2.bf16.msra.mxu1 %v10274_v46  ;;  %v10297_v46 = vld [vmem:[#allocation49_spill] sm:$0xff] }
 0x285   : > { %4304 = vmatprep.subr.bf16.mxu1 %v10276_v39 }
 0x286   : > { %4254 = vmatpush2.bf16.msra.mxu0 %v10277_v53  ;;  %v10298_v53 = vld [vmem:[#allocation51_spill] sm:$0xff] }
 0x287   : > { %4255 = vmatprep.subr.bf16.mxu0 %v10279_v11  ;;  %v10300_v11 = vld [vmem:[#allocation70_spill] sm:$0xff] }
 0x288   : > { %4305 = vmatpush2.bf16.msra.mxu1 %v10278_v34  ;;  %v10299_v34 = vld [vmem:[#allocation69_spill] sm:$0xff] }
 0x289   : > { %4306 = vmatprep.subr.bf16.mxu1 %v10280_v35 }
 0x28a   : > { %4256 = vmatpush2.bf16.msra.mxu0 %v10281_v36  ;;  %v10301_v36 = vld [vmem:[#allocation71_spill] sm:$0xff] }
 0x28b   : > { %4257 = vmatprep.subr.bf16.mxu0 %v10283_v52 }
 0x28c   : > { %4307 = vmatpush2.bf16.msra.mxu1 %v10282_v47 }
 0x28d   : > { %4308 = vmatprep.subr.bf16.mxu1 %v10284_v8 }
 0x28e   : > { %4258 = vmatpush2.bf16.msra.mxu0 %v10285_v0  ;;  %v10303_v0 = vld [vmem:[#allocation72_spill] sm:$0xff] }
 0x28f   : > { %4259 = vmatprep.subr.bf16.mxu0 %v10287_v10  ;;  %v10305_v10 = vld [vmem:[#allocation56_spill] sm:$0xff] }
 0x290   : > { %4309 = vmatpush2.bf16.msra.mxu1 %v10286_v9  ;;  %v10304_v9 = vld [vmem:[#allocation55_spill] sm:$0xff] }
 0x291   : > { %4310 = vmatprep.subr.bf16.mxu1 %v10288_v6 }
 0x292   : > { %4260 = vmatpush2.bf16.msra.mxu0 %v10289_v18 }
 0x293   : > { %4261 = vmatprep.subr.bf16.mxu0 %v10291_v20  ;;  %v10307_v20 = vld [vmem:[#allocation73_spill] sm:$0xff] }
 0x294   : > { %4311 = vmatpush2.bf16.msra.mxu1 %v10290_v19 }
 0x295   : > { %4312 = vmatprep.subr.bf16.mxu1 %v10292_v21  ;;  %v10308_v21 = vld [vmem:[#allocation74_spill] sm:$0xff] }
 0x296   : > { %4262 = vmatpush2.bf16.msra.mxu0 %v10293_v26 }
 0x297   : > { %4333 = vmatprep.subr.bf16.mxu0 %v10295_v28 }
 0x298   : > { %4313 = vmatpush2.bf16.msra.mxu1 %v10294_v27  ;;  %v10309_v27 = vld [vmem:[#allocation75_spill] sm:$0xff] }
 0x299   : > { %4384 = vmatprep.subr.bf16.mxu1 %v10296_v12  ;;  %v3959_v29 = vpop.f32.mrf.mxu0  ;;  %4264 = vmatmul.mubr.bf16.vlgmr.msra.gmra.mxu0 %v10297_v46 }
 0x29a   : > { %v3960_v30 = vadd.f32 %v3959_v29, %v8358_v16  ;;  %4334 = vmatpush1.bf16.msra.mxu0 %v10299_v34  ;;  %4273 = vmatprep.mubr.bf16.mxu0 %v10304_v9  ;;  %v10311_v29 = vld [vmem:[#allocation76_spill] sm:$0xff] }
 0x29b   : > { %v4010_v39 = vpop.f32.mrf.mxu1  ;;  %4315 = vmatmul.mubr.bf16.vlgmr.msra.gmra.mxu1 %v10298_v53  ;;  %v3961_v35 = vpop.f32.mrf.mxu0  ;;  %4335 = vmatprep.subr.bf16.mxu0 %v10301_v36  ;;  %v10315_v36 = vld [vmem:[#allocation63_spill] sm:$0xff] }
 0x29c   : > { %4385 = vmatpush1.bf16.msra.mxu1 %v10300_v11  ;;  %v8445_v47 = vadd.f32 %v4010_v39, %v3960_v30  ;;  %v3962_v52 = vadd.f32 %v3961_v35, %v8364_v3  ;;  %4324 = vmatprep.mubr.bf16.mxu1 %v10305_v10  ;;  %v10312_v39 = vld [vmem:[#allocation61_spill] sm:$0xff] }
 0x29d   : > { %v4012_v8 = vpop.f32.mrf.mxu1  ;;  %4386 = vmatprep.subr.bf16.mxu1 %v10303_v0  ;;  %v3963_v16 = vpop.f32.mrf.mxu0  ;;  %v10314_v11 = vld [vmem:[#allocation77_spill] sm:$0xff]  ;;  %v10317_v0 = vld [vmem:[#allocation79_spill] sm:$0xff] }
 0x29e   : > { %10302 = vst [vmem:[#allocation12_spill] sm:$0xff] %v8445_v47  ;;  %v8451_v6 = vadd.f32 %v4012_v8, %v3962_v52  ;;  %v3964_v18 = vadd.f32 %v3963_v16, %v8368_v5  ;;  %4336 = vmatpush1.bf16.msra.mxu0 %v10307_v20  ;;  %v10316_v52 = vld [vmem:[#allocation78_spill] sm:$0xff]  ;;  %v10320_v20 = vld [vmem:[#allocation67_spill] sm:$0xff] }
 0x29f   : > { %v4014_v19 = vpop.f32.mrf.mxu1  ;;  %v3965_v26 = vpop.f32.mrf.mxu0  ;;  %4337 = vmatprep.subr.bf16.mxu0 %v10309_v27  ;;  %v10323_v27 = vld [vmem:[#allocation81_spill] sm:$0xff]  ;;  %v10393_v47 = vld [vmem:[#allocation151_spill] sm:$0xff] }
 0x2a0   : > { %10306 = vst [vmem:[#allocation13_spill] sm:$0xff] %v8451_v6  ;;  %4387 = vmatpush1.bf16.msra.mxu1 %v10308_v21  ;;  %v8457_v3 = vadd.f32 %v4014_v19, %v3964_v18  ;;  %v3966_v28 = vadd.f32 %v3965_v26, %v8373_v14  ;;  %v10319_v19 = vld [vmem:[#allocation80_spill] sm:$0xff]  ;;  %v10388_v6 = vld [vmem:[#allocation134_spill] sm:$0xff] }
 0x2a1   : > { %v4016_v12 = vpop.f32.mrf.mxu1  ;;  %4388 = vmatprep.subr.bf16.mxu1 %v10311_v29  ;;  %v3969_v30 = vpop.f32.mrf.mxu0  ;;  %4274 = vmatmul.mubr.bf16.gmra.mxu0 %v10312_v39  ;;  %v10321_v21 = vld [vmem:[#allocation68_spill] sm:$0xff]  ;;  %v10325_v29 = vld [vmem:[#allocation83_spill] sm:$0xff] }
 0x2a2   : > { %10310 = vst [vmem:[#allocation14_spill] sm:$0xff] %v8457_v3  ;;  %v8462_v34 = vadd.f32 %v4016_v12, %v3966_v28  ;;  %v3970_v5 = vadd.f32 %v3969_v30, %v8380_v24  ;;  %4338 = vmatpush1.bf16.msra.mxu0 %v10314_v11  ;;  %4365 = vmatprep.mubr.bf16.mxu0 %v10320_v20  ;;  %v10324_v12 = vld [vmem:[#allocation82_spill] sm:$0xff]  ;;  %v10326_v30 = vld [vmem:[#allocation84_spill] sm:$0xff]  ;;  %v10327_v11 = vld [vmem:[#allocation85_spill] sm:$0xff] }
 0x2a3   : > { %v4020_v35 = vpop.f32.mrf.mxu1  ;;  %4325 = vmatmul.mubr.bf16.gmra.mxu1 %v10315_v36  ;;  %v3971_v8 = vpop.f32.mrf.mxu0  ;;  %4339 = vmatprep.subr.bf16.mxu0 %v10317_v0  ;;  %v10331_v0 = vld [vmem:[#allocation89_spill] sm:$0xff] }
 0x2a4   : > { %10313 = vst [vmem:[#allocation15_spill] sm:$0xff] %v8462_v34  ;;  %4389 = vmatpush1.bf16.msra.mxu1 %v10316_v52  ;;  %v3972_v14 = vadd.f32 %v3971_v8, %v8384_v2  ;;  %v8470_v16 = vadd.f32 %v4020_v35, %v3970_v5  ;;  %4416 = vmatprep.mubr.bf16.mxu1 %v10321_v21  ;;  %v10328_v35 = vld [vmem:[#allocation86_spill] sm:$0xff]  ;;  %v10329_v52 = vld [vmem:[#allocation87_spill] sm:$0xff]  ;;  %v10330_v8 = vld [vmem:[#allocation88_spill] sm:$0xff] }
 0x2a5   : > { %v4022_v18 = vpop.f32.mrf.mxu1  ;;  %4390 = vmatprep.subr.bf16.mxu1 %v10319_v19  ;;  %v3973_v24 = vpop.f32.mrf.mxu0  ;;  %v10334_v19 = vld [vmem:[#allocation92_spill] sm:$0xff]  ;;  %v10387_v34 = vld [vmem:[#allocation146_spill] sm:$0xff] }
 0x2a6   : > { %10318 = vst [vmem:[#allocation16_spill] sm:$0xff] %v8470_v16  ;;  %v8475_v26 = vadd.f32 %v4022_v18, %v3972_v14  ;;  %4340 = vmatpush1.bf16.msra.mxu0 %v10323_v27  ;;  %v10332_v14 = vld [vmem:[#allocation90_spill] sm:$0xff]  ;;  %v10333_v18 = vld [vmem:[#allocation91_spill] sm:$0xff]  ;;  %v10335_v24 = vld [vmem:[#allocation93_spill] sm:$0xff] }
 0x2a7   : > { %v4024_v28 = vpop.f32.mrf.mxu1  ;;  %4341 = vmatprep.subr.bf16.mxu0 %v10325_v29  ;;  %v3974_v2 = vpop.f32.mrf.mxu0  ;;  %v10336_v27 = vld [vmem:[#allocation94_spill] sm:$0xff]  ;;  %v10339_v29 = vld [vmem:[#allocation97_spill] sm:$0xff] }
 0x2a8   : > { %10322 = vst [vmem:[#allocation17_spill] sm:$0xff] %v8475_v26  ;;  %4391 = vmatpush1.bf16.msra.mxu1 %v10324_v12  ;;  %v10337_v28 = vld [vmem:[#allocation95_spill] sm:$0xff]  ;;  %v10338_v12 = vld [vmem:[#allocation96_spill] sm:$0xff]  ;;  %v10340_v2 = vld [vmem:[#allocation98_spill] sm:$0xff] }
 0x2a9   : > { %4392 = vmatprep.subr.bf16.mxu1 %v10326_v30  ;;  %v4025_v5 = vpop.f32.mrf.mxu1  ;;  %v10341_v30 = vld [vmem:[#allocation99_spill] sm:$0xff]  ;;  %v10385_v26 = vld [vmem:[#allocation145_spill] sm:$0xff] }
 0x2aa   : > { %4342 = vmatpush1.bf16.msra.mxu0 %v10327_v11  ;;  %v10342_v5 = vld [vmem:[#allocation100_spill] sm:$0xff]  ;;  %v10343_v11 = vld [vmem:[#allocation101_spill] sm:$0xff] }
 0x2ab   : > { %4343 = vmatprep.subr.bf16.mxu0 %v10329_v52  ;;  %v10345_v52 = vld [vmem:[#allocation103_spill] sm:$0xff] }
 0x2ac   : > { %4393 = vmatpush1.bf16.msra.mxu1 %v10328_v35  ;;  %v10344_v35 = vld [vmem:[#allocation102_spill] sm:$0xff] }
 0x2ad   : > { %4394 = vmatprep.subr.bf16.mxu1 %v10330_v8  ;;  %v10346_v8 = vld [vmem:[#allocation104_spill] sm:$0xff] }
 0x2ae   : > { %4344 = vmatpush1.bf16.msra.mxu0 %v10331_v0  ;;  %v10347_v0 = vld [vmem:[#allocation105_spill] sm:$0xff] }
 0x2af   : > { %4345 = vmatprep.subr.bf16.mxu0 %v10333_v18  ;;  %v10349_v18 = vld [vmem:[#allocation107_spill] sm:$0xff] }
 0x2b0   : > { %4395 = vmatpush1.bf16.msra.mxu1 %v10332_v14  ;;  %v10348_v14 = vld [vmem:[#allocation106_spill] sm:$0xff] }
 0x2b1   : > { %4396 = vmatprep.subr.bf16.mxu1 %v10334_v19  ;;  %v10350_v19 = vld [vmem:[#allocation108_spill] sm:$0xff] }
 0x2b2   : > { %4346 = vmatpush1.bf16.msra.mxu0 %v10335_v24  ;;  %v10351_v24 = vld [vmem:[#allocation109_spill] sm:$0xff] }
 0x2b3   : > { %4347 = vmatprep.subr.bf16.mxu0 %v10337_v28  ;;  %v10353_v28 = vld [vmem:[#allocation111_spill] sm:$0xff] }
 0x2b4   : > { %4397 = vmatpush1.bf16.msra.mxu1 %v10336_v27  ;;  %v10352_v27 = vld [vmem:[#allocation110_spill] sm:$0xff] }
 0x2b5   : > { %4398 = vmatprep.subr.bf16.mxu1 %v10338_v12  ;;  %v10354_v12 = vld [vmem:[#allocation112_spill] sm:$0xff] }
 0x2b6   : > { %4348 = vmatpush1.bf16.msra.mxu0 %v10339_v29  ;;  %v10355_v29 = vld [vmem:[#allocation113_spill] sm:$0xff] }
 0x2b7   : > { %4349 = vmatprep.subr.bf16.mxu0 %v10341_v30  ;;  %v10357_v30 = vld [vmem:[#allocation115_spill] sm:$0xff] }
 0x2b8   : > { %4399 = vmatpush1.bf16.msra.mxu1 %v10340_v2  ;;  %v10356_v2 = vld [vmem:[#allocation114_spill] sm:$0xff] }
 0x2b9   : > { %4400 = vmatprep.subr.bf16.mxu1 %v10342_v5  ;;  %v10358_v5 = vld [vmem:[#allocation116_spill] sm:$0xff] }
 0x2ba   : > { %4350 = vmatpush2.bf16.msra.mxu0 %v10343_v11  ;;  %v10359_v11 = vld [vmem:[#allocation117_spill] sm:$0xff] }
 0x2bb   : > { %4351 = vmatprep.subr.bf16.mxu0 %v10345_v52  ;;  %v10361_v52 = vld [vmem:[#allocation119_spill] sm:$0xff] }
 0x2bc   : > { %4401 = vmatpush2.bf16.msra.mxu1 %v10344_v35  ;;  %v10360_v35 = vld [vmem:[#allocation118_spill] sm:$0xff] }
 0x2bd   : > { %4402 = vmatprep.subr.bf16.mxu1 %v10346_v8  ;;  %v10362_v8 = vld [vmem:[#allocation120_spill] sm:$0xff] }
 0x2be   : > { %4352 = vmatpush2.bf16.msra.mxu0 %v10347_v0  ;;  %v10363_v0 = vld [vmem:[#allocation122_spill] sm:$0xff] }
 0x2bf   : > { %4353 = vmatprep.subr.bf16.mxu0 %v10349_v18  ;;  %v10365_v18 = vld [vmem:[#allocation125_spill] sm:$0xff] }
 0x2c0   : > { %4403 = vmatpush2.bf16.msra.mxu1 %v10348_v14  ;;  %v10364_v14 = vld [vmem:[#allocation124_spill] sm:$0xff] }
 0x2c1   : > { %4404 = vmatprep.subr.bf16.mxu1 %v10350_v19  ;;  %v10366_v19 = vld [vmem:[#allocation126_spill] sm:$0xff] }
 0x2c2   : > { %4354 = vmatpush2.bf16.msra.mxu0 %v10351_v24  ;;  %v10367_v24 = vld [vmem:[#allocation129_spill] sm:$0xff] }
 0x2c3   : > { %4355 = vmatprep.subr.bf16.mxu0 %v10353_v28  ;;  %v10369_v28 = vld [vmem:[#allocation131_spill] sm:$0xff] }
 0x2c4   : > { %4405 = vmatpush2.bf16.msra.mxu1 %v10352_v27  ;;  %v10368_v27 = vld [vmem:[#allocation130_spill] sm:$0xff] }
 0x2c5   : > { %4406 = vmatprep.subr.bf16.mxu1 %v10354_v12  ;;  %v10370_v12 = vld [vmem:[#allocation133_spill] sm:$0xff] }
 0x2c6   : > { %4356 = vmatpush2.bf16.msra.mxu0 %v10355_v29  ;;  %v10371_v29 = vld [vmem:[#allocation135_spill] sm:$0xff] }
 0x2c7   : > { %4357 = vmatprep.subr.bf16.mxu0 %v10357_v30  ;;  %v10373_v30 = vld [vmem:[#allocation137_spill] sm:$0xff] }
 0x2c8   : > { %4407 = vmatpush2.bf16.msra.mxu1 %v10356_v2  ;;  %v10372_v2 = vld [vmem:[#allocation136_spill] sm:$0xff] }
 0x2c9   : > { %4408 = vmatprep.subr.bf16.mxu1 %v10358_v5 }
 0x2ca   : > { %4358 = vmatpush2.bf16.msra.mxu0 %v10359_v11  ;;  %v10374_v11 = vld [vmem:[#allocation121_spill] sm:$0xff] }
 0x2cb   : > { %4359 = vmatprep.subr.bf16.mxu0 %v10361_v52  ;;  %v10375_v52 = vld [vmem:[#allocation123_spill] sm:$0xff] }
 0x2cc   : > { %4409 = vmatpush2.bf16.msra.mxu1 %v10360_v35 }
 0x2cd   : > { %4410 = vmatprep.subr.bf16.mxu1 %v10362_v8 }
 0x2ce   : > { %4360 = vmatpush2.bf16.msra.mxu0 %v10363_v0  ;;  %v10377_v0 = vld [vmem:[#allocation139_spill] sm:$0xff] }
 0x2cf   : > { %4361 = vmatprep.subr.bf16.mxu0 %v10365_v18  ;;  %v10378_v18 = vld [vmem:[#allocation140_spill] sm:$0xff] }
 0x2d0   : > { %4411 = vmatpush2.bf16.msra.mxu1 %v10364_v14 }
 0x2d1   : > { %4412 = vmatprep.subr.bf16.mxu1 %v10366_v19 }
 0x2d2   : > { %4362 = vmatpush2.bf16.msra.mxu0 %v7036_v4  ;;  %v10376_v4 = vld [vmem:[#allocation138_spill] sm:$0xff] }
 0x2d3   : > { %4363 = vmatprep.subr.bf16.mxu0 %v10368_v27  ;;  %v10380_v27 = vld [vmem:[#allocation127_spill] sm:$0xff] }
 0x2d4   : > { %4413 = vmatpush2.bf16.msra.mxu1 %v10367_v24  ;;  %v10379_v24 = vld [vmem:[#allocation141_spill] sm:$0xff] }
 0x2d5   : > { %4414 = vmatprep.subr.bf16.mxu1 %v10369_v28 }
 0x2d6   : > { %4364 = vmatpush2.bf16.msra.mxu0 %v10370_v12 }
 0x2d7   : > { %4435 = vmatprep.subr.bf16.mxu0 %v10372_v2 }
 0x2d8   : > { %4415 = vmatpush2.bf16.msra.mxu1 %v10371_v29  ;;  %v10381_v29 = vld [vmem:[#allocation128_spill] sm:$0xff] }
 0x2d9   : > { %4486 = vmatprep.subr.bf16.mxu1 %v10373_v30  ;;  %v4061_v5 = vpop.f32.mrf.mxu0  ;;  %4366 = vmatmul.mubr.bf16.vlgmr.msra.gmra.mxu0 %v10374_v11  ;;  %v10382_v30 = vld [vmem:[#allocation142_spill] sm:$0xff] }
 0x2da   : > { %4436 = vmatpush1.bf16.msra.mxu0 %v10376_v4  ;;  %4375 = vmatprep.mubr.bf16.mxu0 %v10380_v27 }
 0x2db   : > { %v4112_v35 = vpop.f32.mrf.mxu1  ;;  %4417 = vmatmul.mubr.bf16.vlgmr.msra.gmra.mxu1 %v10375_v52  ;;  %v4063_v14 = vpop.f32.mrf.mxu0  ;;  %4437 = vmatprep.subr.bf16.mxu0 %v10378_v18 }
 0x2dc   : > { %v8532_v8 = vadd.f32 %v4112_v35, %v4061_v5  ;;  %4487 = vmatpush1.bf16.msra.mxu1 %v10377_v0  ;;  %4426 = vmatprep.mubr.bf16.mxu1 %v10381_v29  ;;  %v10383_v35 = vld [vmem:[#allocation143_spill] sm:$0xff]  ;;  %v10384_v0 = vld [vmem:[#allocation144_spill] sm:$0xff] }
 0x2dd   : > { %v4114_v19 = vpop.f32.mrf.mxu1  ;;  %4488 = vmatprep.subr.bf16.mxu1 %v10379_v24  ;;  %v4065_v12 = vpop.f32.mrf.mxu0 }
 0x2de   : > { %v8538_v28 = vadd.f32 %v4114_v19, %v4063_v14  ;;  %4438 = vmatpush1.bf16.msra.mxu0 %v10382_v30  ;;  %v10386_v14 = vld [vmem:[#allocation132_spill] sm:$0xff] }
 0x2df   : > { %v4116_v2 = vpop.f32.mrf.mxu1  ;;  %v4067_v4 = vpop.f32.mrf.mxu0  ;;  %4439 = vmatprep.subr.bf16.mxu0 %v10384_v0  ;;  %v10391_v0 = vld [vmem:[#allocation149_spill] sm:$0xff] }
 0x2e0   : > { %v8542_v5 = vadd.f32 %v4116_v2, %v4065_v12  ;;  %4489 = vmatpush1.bf16.msra.mxu1 %v10383_v35  ;;  %v10389_v12 = vld [vmem:[#allocation147_spill] sm:$0xff]  ;;  %v10390_v2 = vld [vmem:[#allocation148_spill] sm:$0xff] }
 0x2e1   : > { %v4118_v18 = vpop.f32.mrf.mxu1  ;;  %4490 = vmatprep.subr.bf16.mxu1 %v10385_v26  ;;  %4376 = vmatmul.mubr.bf16.gmra.mxu0 %v10386_v14  ;;  %v4071_v19 = vpop.f32.mrf.mxu0 }
 0x2e2   : > { %v8547_v24 = vadd.f32 %v4118_v18, %v4067_v4  ;;  %4440 = vmatpush1.bf16.msra.mxu0 %v10387_v34  ;;  %4467 = vmatprep.mubr.bf16.mxu0 %v6651_v58  ;;  %v10392_v34 = vld [vmem:[#allocation150_spill] sm:$0xff] }
 0x2e3   : > { %4427 = vmatmul.mubr.bf16.gmra.mxu1 %v10388_v6  ;;  %v4122_v30 = vpop.f32.mrf.mxu1  ;;  %4441 = vmatprep.subr.bf16.mxu0 %v10390_v2  ;;  %v4073_v35 = vpop.f32.mrf.mxu0 }
 0x2e4   : > { %4491 = vmatpush1.bf16.msra.mxu1 %v10389_v12  ;;  %v8554_v16 = vadd.f32 %v4122_v30, %v4071_v19  ;;  %4518 = vmatprep.mubr.bf16.mxu1 %v6655_v63  ;;  %v10394_v12 = vld [vmem:[#allocation152_spill] sm:$0xff]  ;;  %v10395_v19 = vld [vmem:[#allocation153_spill] sm:$0xff] }
 0x2e5   : > { %4492 = vmatprep.subr.bf16.mxu1 %v10391_v0  ;;  %v4124_v26 = vpop.f32.mrf.mxu1  ;;  %v4075_v4 = vpop.f32.mrf.mxu0  ;;  %v10396_v0 = vld [vmem:[#allocation154_spill] sm:$0xff] }
 0x2e6   : > { %v8558_v18 = vadd.f32 %v4124_v26, %v4073_v35  ;;  %4442 = vmatpush1.bf16.msra.mxu0 %v10392_v34  ;;  %v10398_v4 = vld [vmem:[#allocation156_spill] sm:$0xff]  ;;  %v10399_v35 = vld [vmem:[#allocation157_spill] sm:$0xff]  ;;  %v10400_v26 = vld [vmem:[#allocation158_spill] sm:$0xff] }
 0x2e7   : > { %v4126_v3 = vpop.f32.mrf.mxu1  ;;  %4443 = vmatprep.subr.bf16.mxu0 %v10394_v12  ;;  %v4076_v2 = vpop.f32.mrf.mxu0  ;;  %v10401_v34 = vld [vmem:[#allocation159_spill] sm:$0xff]  ;;  %v10404_v12 = vld [vmem:[#allocation162_spill] sm:$0xff] }
 0x2e8   : > { %4493 = vmatpush1.bf16.msra.mxu1 %v10393_v47  ;;  %v10402_v3 = vld [vmem:[#allocation160_spill] sm:$0xff]  ;;  %v10403_v47 = vld [vmem:[#allocation161_spill] sm:$0xff]  ;;  %v10405_v2 = vld [vmem:[#allocation163_spill] sm:$0xff] }
 0x2e9   : > { %4494 = vmatprep.subr.bf16.mxu1 %v10395_v19  ;;  %v4127_v30 = vpop.f32.mrf.mxu1  ;;  %v10406_v19 = vld [vmem:[#allocation164_spill] sm:$0xff] }
 0x2ea   : > { %4444 = vmatpush1.bf16.msra.mxu0 %v10396_v0  ;;  %v10407_v30 = vld [vmem:[#allocation165_spill] sm:$0xff]  ;;  %v10409_v0 = vld [vmem:[#allocation167_spill] sm:$0xff] }
 0x2eb   : > { %4445 = vmatprep.subr.bf16.mxu0 %v10398_v4  ;;  %v10410_v4 = vld [vmem:[#allocation168_spill] sm:$0xff] }
 0x2ec   : > { %4495 = vmatpush1.bf16.msra.mxu1 %v10397_v17  ;;  %v10408_v17 = vld [vmem:[#allocation166_spill] sm:$0xff] }
 0x2ed   : > { %4496 = vmatprep.subr.bf16.mxu1 %v10399_v35  ;;  %v10411_v35 = vld [vmem:[#allocation169_spill] sm:$0xff] }
 0x2ee   : > { %4446 = vmatpush1.bf16.msra.mxu0 %v10400_v26  ;;  %v10412_v26 = vld [vmem:[#allocation170_spill] sm:$0xff] }
 0x2ef   : > { %4447 = vmatprep.subr.bf16.mxu0 %v10402_v3  ;;  %v10414_v3 = vld [vmem:[#allocation172_spill] sm:$0xff] }
 0x2f0   : > { %4497 = vmatpush1.bf16.msra.mxu1 %v10401_v34  ;;  %v10413_v34 = vld [vmem:[#allocation171_spill] sm:$0xff] }
 0x2f1   : > { %4498 = vmatprep.subr.bf16.mxu1 %v10403_v47  ;;  %v10415_v47 = vld [vmem:[#allocation173_spill] sm:$0xff] }
 0x2f2   : > { %4448 = vmatpush1.bf16.msra.mxu0 %v10404_v12  ;;  %v10416_v12 = vld [vmem:[#allocation174_spill] sm:$0xff] }
 0x2f3   : > { %4449 = vmatprep.subr.bf16.mxu0 %v10406_v19  ;;  %v10418_v19 = vld [vmem:[#allocation176_spill] sm:$0xff] }
 0x2f4   : > { %4499 = vmatpush1.bf16.msra.mxu1 %v10405_v2  ;;  %v10417_v2 = vld [vmem:[#allocation175_spill] sm:$0xff] }
 0x2f5   : > { %4500 = vmatprep.subr.bf16.mxu1 %v10407_v30  ;;  %v10419_v30 = vld [vmem:[#allocation177_spill] sm:$0xff] }
 0x2f6   : > { %4450 = vmatpush1.bf16.msra.mxu0 %v10408_v17  ;;  %v10420_v17 = vld [vmem:[#allocation178_spill] sm:$0xff] }
 0x2f7   : > { %4451 = vmatprep.subr.bf16.mxu0 %v10410_v4  ;;  %v10422_v4 = vld [vmem:[#allocation180_spill] sm:$0xff] }
 0x2f8   : > { %4501 = vmatpush1.bf16.msra.mxu1 %v10409_v0  ;;  %v10421_v0 = vld [vmem:[#allocation179_spill] sm:$0xff] }
 0x2f9   : > { %4502 = vmatprep.subr.bf16.mxu1 %v10411_v35  ;;  %v10423_v35 = vld [vmem:[#allocation181_spill] sm:$0xff] }
 0x2fa   : > { %4452 = vmatpush2.bf16.msra.mxu0 %v10412_v26  ;;  %v10424_v26 = vld [vmem:[#allocation182_spill] sm:$0xff] }
 0x2fb   : > { %4453 = vmatprep.subr.bf16.mxu0 %v10414_v3  ;;  %v10426_v3 = vld [vmem:[#allocation184_spill] sm:$0xff] }
 0x2fc   : > { %4503 = vmatpush2.bf16.msra.mxu1 %v10413_v34  ;;  %v10425_v34 = vld [vmem:[#allocation183_spill] sm:$0xff] }
 0x2fd   : > { %4504 = vmatprep.subr.bf16.mxu1 %v10415_v47  ;;  %v10427_v47 = vld [vmem:[#allocation185_spill] sm:$0xff] }
 0x2fe   : > { %4454 = vmatpush2.bf16.msra.mxu0 %v10416_v12  ;;  %v10428_v12 = vld [vmem:[#allocation186_spill] sm:$0xff] }
 0x2ff   : > { %4455 = vmatprep.subr.bf16.mxu0 %v10418_v19  ;;  %v10430_v19 = vld [vmem:[#allocation188_spill] sm:$0xff] }
 0x300   : > { %4505 = vmatpush2.bf16.msra.mxu1 %v10417_v2  ;;  %v10429_v2 = vld [vmem:[#allocation187_spill] sm:$0xff] }
 0x301   : > { %4506 = vmatprep.subr.bf16.mxu1 %v10419_v30  ;;  %v10431_v30 = vld [vmem:[#allocation189_spill] sm:$0xff] }
 0x302   : > { %4456 = vmatpush2.bf16.msra.mxu0 %v10420_v17  ;;  %v10432_v17 = vld [vmem:[#allocation190_spill] sm:$0xff] }
 0x303   : > { %4457 = vmatprep.subr.bf16.mxu0 %v10422_v4  ;;  %v10434_v4 = vld [vmem:[#allocation192_spill] sm:$0xff] }
 0x304   : > { %4507 = vmatpush2.bf16.msra.mxu1 %v10421_v0  ;;  %v10433_v0 = vld [vmem:[#allocation191_spill] sm:$0xff] }
 0x305   : > { %4508 = vmatprep.subr.bf16.mxu1 %v10423_v35  ;;  %v10435_v35 = vld [vmem:[#allocation193_spill] sm:$0xff] }
 0x306   : > { %4458 = vmatpush2.bf16.msra.mxu0 %v10424_v26  ;;  %v10436_v26 = vld [vmem:[#allocation194_spill] sm:$0xff] }
 0x307   : > { %4459 = vmatprep.subr.bf16.mxu0 %v10426_v3  ;;  %v10438_v3 = vld [vmem:[#allocation196_spill] sm:$0xff] }
 0x308   : > { %4509 = vmatpush2.bf16.msra.mxu1 %v10425_v34  ;;  %v10437_v34 = vld [vmem:[#allocation195_spill] sm:$0xff] }
 0x309   : > { %4510 = vmatprep.subr.bf16.mxu1 %v10427_v47  ;;  %v10439_v47 = vld [vmem:[#allocation197_spill] sm:$0xff] }
 0x30a   : > { %4460 = vmatpush2.bf16.msra.mxu0 %v10428_v12  ;;  %v10440_v12 = vld [vmem:[#allocation198_spill] sm:$0xff] }
 0x30b   : > { %4461 = vmatprep.subr.bf16.mxu0 %v10430_v19  ;;  %v10442_v19 = vld [vmem:[#allocation200_spill] sm:$0xff] }
 0x30c   : > { %4511 = vmatpush2.bf16.msra.mxu1 %v10429_v2  ;;  %v10441_v2 = vld [vmem:[#allocation199_spill] sm:$0xff] }
 0x30d   : > { %4512 = vmatprep.subr.bf16.mxu1 %v10431_v30  ;;  %v10443_v30 = vld [vmem:[#allocation201_spill] sm:$0xff] }
 0x30e   : > { %4462 = vmatpush2.bf16.msra.mxu0 %v10432_v17 }
 0x30f   : > { %4463 = vmatprep.subr.bf16.mxu0 %v10434_v4 }
 0x310   : > { %4513 = vmatpush2.bf16.msra.mxu1 %v10433_v0 }
 0x311   : > { %4514 = vmatprep.subr.bf16.mxu1 %v10435_v35  ;;  %v10444_v35 = vld [vmem:[#allocation202_spill] sm:$0xff] }
 0x312   : > { %4464 = vmatpush2.bf16.msra.mxu0 %v10436_v26  ;;  %v10445_v26 = vld [vmem:[#allocation203_spill] sm:$0xff] }
 0x313   : > { %4465 = vmatprep.subr.bf16.mxu0 %v10438_v3  ;;  %v10446_v3 = vld [vmem:[#allocation204_spill] sm:$0xff] }
 0x314   : > { %4515 = vmatpush2.bf16.msra.mxu1 %v10437_v34 }
 0x315   : > { %4516 = vmatprep.subr.bf16.mxu1 %v10439_v47 }
 0x316   : > { %4466 = vmatpush2.bf16.msra.mxu0 %v10440_v12 }
 0x317   : > { %4537 = vmatprep.subr.bf16.mxu0 %v10442_v19  ;;  %v10448_v19 = vld [vmem:[#allocation205_spill] sm:$0xff] }
 0x318   : > { %4517 = vmatpush2.bf16.msra.mxu1 %v10441_v2 }
 0x319   : > { %4588 = vmatprep.subr.bf16.mxu1 %v10443_v30  ;;  %v4163_v17 = vpop.f32.mrf.mxu0  ;;  %4468 = vmatmul.mubr.bf16.vlgmr.msra.gmra.mxu0 %v10297_v46 }
 0x31a   : > { %v4164_v0 = vadd.f32 %v4163_v17, %v8532_v8  ;;  %4538 = vmatpush1.bf16.msra.mxu0 %v10444_v35  ;;  %4477 = vmatprep.mubr.bf16.mxu0 %v10304_v9 }
 0x31b   : > { %v4214_v4 = vpop.f32.mrf.mxu1  ;;  %4519 = vmatmul.mubr.bf16.vlgmr.msra.gmra.mxu1 %v10298_v53  ;;  %v4165_v34 = vpop.f32.mrf.mxu0  ;;  %4539 = vmatprep.subr.bf16.mxu0 %v10446_v3  ;;  %v10451_v3 = vld [vmem:[#allocation207_spill] sm:$0xff] }
 0x31c   : > { %4589 = vmatpush1.bf16.msra.mxu1 %v10445_v26  ;;  %v8619_v47 = vadd.f32 %v4214_v4, %v4164_v0  ;;  %v4166_v12 = vadd.f32 %v4165_v34, %v8538_v28  ;;  %4528 = vmatprep.mubr.bf16.mxu1 %v10305_v10  ;;  %v10450_v26 = vld [vmem:[#allocation206_spill] sm:$0xff]  ;;  %v10452_v4 = vld [vmem:[#allocation208_spill] sm:$0xff] }
 0x31d   : > { %v4216_v2 = vpop.f32.mrf.mxu1  ;;  %4590 = vmatprep.subr.bf16.mxu1 %v10448_v19  ;;  %v4167_v8 = vpop.f32.mrf.mxu0 }
 0x31e   : > { %10447 = vst [vmem:[#allocation18_spill] sm:$0xff] %v8619_v47  ;;  %v8625_v30 = vadd.f32 %v4216_v2, %v4166_v12  ;;  %v4168_v17 = vadd.f32 %v4167_v8, %v8542_v5  ;;  %4540 = vmatpush1.bf16.msra.mxu0 %v10450_v26  ;;  %v10454_v47 = vld [vmem:[#allocation209_spill] sm:$0xff]  ;;  %v10456_v2 = vld [vmem:[#allocation210_spill] sm:$0xff]  ;;  %v10457_v26 = vld [vmem:[#allocation211_spill] sm:$0xff] }
 0x31f   : > { %v4218_v35 = vpop.f32.mrf.mxu1  ;;  %v4169_v0 = vpop.f32.mrf.mxu0  ;;  %4541 = vmatprep.subr.bf16.mxu0 %v10452_v4  ;;  %v10462_v4 = vld [vmem:[#allocation214_spill] sm:$0xff] }
 0x320   : > { %10449 = vst [vmem:[#allocation19_spill] sm:$0xff] %v8625_v30  ;;  %4591 = vmatpush1.bf16.msra.mxu1 %v10451_v3  ;;  %v8631_v28 = vadd.f32 %v4218_v35, %v4168_v17  ;;  %v4170_v34 = vadd.f32 %v4169_v0, %v8547_v24  ;;  %v10458_v35 = vld [vmem:[#allocation212_spill] sm:$0xff]  ;;  %v10460_v0 = vld [vmem:[#allocation213_spill] sm:$0xff] }
 0x321   : > { %v4220_v19 = vpop.f32.mrf.mxu1  ;;  %4592 = vmatprep.subr.bf16.mxu1 %v10454_v47  ;;  %v4173_v23 = vpop.f32.mrf.mxu0  ;;  %4478 = vmatmul.mubr.bf16.gmra.mxu0 %v10312_v39 }
 0x322   : > { %10453 = vst [vmem:[#allocation20_spill] sm:$0xff] %v8631_v28  ;;  %v8636_v12 = vadd.f32 %v4220_v19, %v4170_v34  ;;  %v4174_v5 = vadd.f32 %v4173_v23, %v8554_v16  ;;  %4542 = vmatpush1.bf16.msra.mxu0 %v10456_v2  ;;  %4569 = vmatprep.mubr.bf16.mxu0 %v10320_v20  ;;  %v10463_v19 = vld [vmem:[#allocation215_spill] sm:$0xff]  ;;  %v10464_v2 = vld [vmem:[#allocation216_spill] sm:$0xff]  ;;  %v10528_v28 = vld [vmem:[#allocation273_spill] sm:$0xff] }
 0x323   : > { %v4224_v8 = vpop.f32.mrf.mxu1  ;;  %4529 = vmatmul.mubr.bf16.gmra.mxu1 %v10315_v36  ;;  %v4175_v17 = vpop.f32.mrf.mxu0  ;;  %4543 = vmatprep.subr.bf16.mxu0 %v10458_v35  ;;  %v10468_v35 = vld [vmem:[#allocation220_spill] sm:$0xff] }
 0x324   : > { %10455 = vst [vmem:[#allocation21_spill] sm:$0xff] %v8636_v12  ;;  %4593 = vmatpush1.bf16.msra.mxu1 %v10457_v26  ;;  %v4176_v24 = vadd.f32 %v4175_v17, %v8558_v18  ;;  %v8644_v47 = vadd.f32 %v4224_v8, %v4174_v5  ;;  %4620 = vmatprep.mubr.bf16.mxu1 %v10321_v21  ;;  %v10465_v5 = vld [vmem:[#allocation217_spill] sm:$0xff]  ;;  %v10466_v26 = vld [vmem:[#allocation218_spill] sm:$0xff]  ;;  %v10467_v17 = vld [vmem:[#allocation219_spill] sm:$0xff] }
 0x325   : > { %v4226_v3 = vpop.f32.mrf.mxu1  ;;  %4594 = vmatprep.subr.bf16.mxu1 %v10460_v0  ;;  %v4177_v23 = vpop.f32.mrf.mxu0  ;;  %v10469_v0 = vld [vmem:[#allocation221_spill] sm:$0xff] }
 0x326   : > { %10459 = vst [vmem:[#allocation22_spill] sm:$0xff] %v8644_v47  ;;  %v8649_v16 = vadd.f32 %v4226_v3, %v4176_v24  ;;  %4544 = vmatpush1.bf16.msra.mxu0 %v10462_v4  ;;  %v10470_v24 = vld [vmem:[#allocation222_spill] sm:$0xff]  ;;  %v10471_v3 = vld [vmem:[#allocation223_spill] sm:$0xff]  ;;  %v10472_v23 = vld [vmem:[#allocation224_spill] sm:$0xff] }
 0x327   : > { %v4228_v34 = vpop.f32.mrf.mxu1  ;;  %4545 = vmatprep.subr.bf16.mxu0 %v10464_v2  ;;  %v4178_v18 = vpop.f32.mrf.mxu0  ;;  %v10473_v4 = vld [vmem:[#allocation225_spill] sm:$0xff]  ;;  %v10476_v2 = vld [vmem:[#allocation228_spill] sm:$0xff] }
 0x328   : > { %10461 = vst [vmem:[#allocation23_spill] sm:$0xff] %v8649_v16  ;;  %4595 = vmatpush1.bf16.msra.mxu1 %v10463_v19  ;;  %v10474_v34 = vld [vmem:[#allocation226_spill] sm:$0xff]  ;;  %v10475_v19 = vld [vmem:[#allocation227_spill] sm:$0xff]  ;;  %v10477_v18 = vld [vmem:[#allocation229_spill] sm:$0xff] }
 0x329   : > { %4596 = vmatprep.subr.bf16.mxu1 %v10465_v5  ;;  %v4229_v8 = vpop.f32.mrf.mxu1  ;;  %v10478_v5 = vld [vmem:[#allocation230_spill] sm:$0xff]  ;;  %v10522_v12 = vld [vmem:[#allocation269_spill] sm:$0xff] }
 0x32a   : > { %4546 = vmatpush1.bf16.msra.mxu0 %v10466_v26  ;;  %v10479_v8 = vld [vmem:[#allocation231_spill] sm:$0xff]  ;;  %v10480_v26 = vld [vmem:[#allocation232_spill] sm:$0xff] }
 0x32b   : > { %4547 = vmatprep.subr.bf16.mxu0 %v10468_v35  ;;  %v10482_v35 = vld [vmem:[#allocation234_spill] sm:$0xff] }
 0x32c   : > { %4597 = vmatpush1.bf16.msra.mxu1 %v10467_v17  ;;  %v10481_v17 = vld [vmem:[#allocation233_spill] sm:$0xff] }
 0x32d   : > { %4598 = vmatprep.subr.bf16.mxu1 %v10469_v0  ;;  %v10483_v0 = vld [vmem:[#allocation235_spill] sm:$0xff] }
 0x32e   : > { %4548 = vmatpush1.bf16.msra.mxu0 %v10470_v24  ;;  %v10484_v24 = vld [vmem:[#allocation236_spill] sm:$0xff] }
 0x32f   : > { %4549 = vmatprep.subr.bf16.mxu0 %v10472_v23  ;;  %v10486_v23 = vld [vmem:[#allocation238_spill] sm:$0xff] }
 0x330   : > { %4599 = vmatpush1.bf16.msra.mxu1 %v10471_v3  ;;  %v10485_v3 = vld [vmem:[#allocation237_spill] sm:$0xff] }
 0x331   : > { %4600 = vmatprep.subr.bf16.mxu1 %v10473_v4  ;;  %v10487_v4 = vld [vmem:[#allocation239_spill] sm:$0xff] }
 0x332   : > { %4550 = vmatpush1.bf16.msra.mxu0 %v10474_v34  ;;  %v10488_v34 = vld [vmem:[#allocation240_spill] sm:$0xff] }
 0x333   : > { %4551 = vmatprep.subr.bf16.mxu0 %v10476_v2  ;;  %v10490_v2 = vld [vmem:[#allocation242_spill] sm:$0xff] }
 0x334   : > { %4601 = vmatpush1.bf16.msra.mxu1 %v10475_v19  ;;  %v10489_v19 = vld [vmem:[#allocation241_spill] sm:$0xff] }
 0x335   : > { %4602 = vmatprep.subr.bf16.mxu1 %v10477_v18  ;;  %v10491_v18 = vld [vmem:[#allocation243_spill] sm:$0xff] }
 0x336   : > { %4552 = vmatpush1.bf16.msra.mxu0 %v10478_v5  ;;  %v10492_v5 = vld [vmem:[#allocation244_spill] sm:$0xff] }
 0x337   : > { %4553 = vmatprep.subr.bf16.mxu0 %v10480_v26  ;;  %v10494_v26 = vld [vmem:[#allocation246_spill] sm:$0xff] }
 0x338   : > { %4603 = vmatpush1.bf16.msra.mxu1 %v10479_v8  ;;  %v10493_v8 = vld [vmem:[#allocation245_spill] sm:$0xff] }
 0x339   : > { %4604 = vmatprep.subr.bf16.mxu1 %v10481_v17  ;;  %v10495_v17 = vld [vmem:[#allocation247_spill] sm:$0xff] }
 0x33a   : > { %4554 = vmatpush2.bf16.msra.mxu0 %v10482_v35  ;;  %v10496_v35 = vld [vmem:[#allocation248_spill] sm:$0xff] }
 0x33b   : > { %4555 = vmatprep.subr.bf16.mxu0 %v10484_v24  ;;  %v10498_v24 = vld [vmem:[#allocation250_spill] sm:$0xff] }
 0x33c   : > { %4605 = vmatpush2.bf16.msra.mxu1 %v10483_v0  ;;  %v10497_v0 = vld [vmem:[#allocation249_spill] sm:$0xff] }
 0x33d   : > { %4606 = vmatprep.subr.bf16.mxu1 %v10485_v3  ;;  %v10499_v3 = vld [vmem:[#allocation251_spill] sm:$0xff] }
 0x33e   : > { %4556 = vmatpush2.bf16.msra.mxu0 %v10486_v23  ;;  %v10500_v23 = vld [vmem:[#allocation252_spill] sm:$0xff] }
 0x33f   : > { %4557 = vmatprep.subr.bf16.mxu0 %v10488_v34  ;;  %v10502_v34 = vld [vmem:[#allocation254_spill] sm:$0xff] }
 0x340   : > { %4607 = vmatpush2.bf16.msra.mxu1 %v10487_v4  ;;  %v10501_v4 = vld [vmem:[#allocation253_spill] sm:$0xff] }
 0x341   : > { %4608 = vmatprep.subr.bf16.mxu1 %v10489_v19  ;;  %v10503_v19 = vld [vmem:[#allocation255_spill] sm:$0xff] }
 0x342   : > { %4558 = vmatpush2.bf16.msra.mxu0 %v10490_v2  ;;  %v10504_v2 = vld [vmem:[#allocation256_spill] sm:$0xff] }
 0x343   : > { %4559 = vmatprep.subr.bf16.mxu0 %v10492_v5  ;;  %v10506_v5 = vld [vmem:[#allocation258_spill] sm:$0xff] }
 0x344   : > { %4609 = vmatpush2.bf16.msra.mxu1 %v10491_v18  ;;  %v10505_v18 = vld [vmem:[#allocation257_spill] sm:$0xff] }
 0x345   : > { %4610 = vmatprep.subr.bf16.mxu1 %v10493_v8  ;;  %v10507_v8 = vld [vmem:[#allocation259_spill] sm:$0xff] }
 0x346   : > { %4560 = vmatpush2.bf16.msra.mxu0 %v10494_v26  ;;  %v10508_v26 = vld [vmem:[#allocation260_spill] sm:$0xff] }
 0x347   : > { %4561 = vmatprep.subr.bf16.mxu0 %v10496_v35  ;;  %v10510_v35 = vld [vmem:[#allocation262_spill] sm:$0xff] }
 0x348   : > { %4611 = vmatpush2.bf16.msra.mxu1 %v10495_v17  ;;  %v10509_v17 = vld [vmem:[#allocation261_spill] sm:$0xff] }
 0x349   : > { %4612 = vmatprep.subr.bf16.mxu1 %v10497_v0  ;;  %v10511_v0 = vld [vmem:[#allocation263_spill] sm:$0xff] }
 0x34a   : > { %4562 = vmatpush2.bf16.msra.mxu0 %v10498_v24  ;;  %v10512_v24 = vld [vmem:[#allocation264_spill] sm:$0xff] }
 0x34b   : > { %4563 = vmatprep.subr.bf16.mxu0 %v10500_v23  ;;  %v10514_v23 = vld [vmem:[#allocation278_spill] sm:$0xff] }
 0x34c   : > { %4613 = vmatpush2.bf16.msra.mxu1 %v10499_v3  ;;  %v10513_v3 = vld [vmem:[#allocation275_spill] sm:$0xff] }
 0x34d   : > { %4614 = vmatprep.subr.bf16.mxu1 %v10501_v4  ;;  %v3507_v4 = vadd.f32 %v10514_v23, %v10513_v3  ;;  %v10521_v23 = vld [vmem:[#allocation341_spill] sm:$0xff] }
 0x34e   : > { %4564 = vmatpush2.bf16.msra.mxu0 %v10502_v34  ;;  %v10515_v34 = vld [vmem:[#allocation265_spill] sm:$0xff] }
 0x34f   : > { %4565 = vmatprep.subr.bf16.mxu0 %v10504_v2  ;;  %v10516_v2 = vld [vmem:[#allocation343_spill] sm:$0xff] }
 0x350   : > { %4615 = vmatpush2.bf16.msra.mxu1 %v10503_v19 }
 0x351   : > { %4616 = vmatprep.subr.bf16.mxu1 %v10505_v18  ;;  %v3558_v18 = vadd.f32 %v10516_v2, %v3507_v4 }
 0x352   : > { %4566 = vmatpush2.bf16.msra.mxu0 %v10506_v5  ;;  %v10517_v5 = vld [vmem:[#allocation339_spill] sm:$0xff] }
 0x353   : > { %4567 = vmatprep.subr.bf16.mxu0 %v10508_v26 }
 0x354   : > { %4617 = vmatpush2.bf16.msra.mxu1 %v10507_v8 }
 0x355   : > { %4618 = vmatprep.subr.bf16.mxu1 %v10509_v17  ;;  %v10518_v17 = vld [vmem:[#allocation266_spill] sm:$0xff] }
 0x356   : > { %4568 = vmatpush2.bf16.msra.mxu0 %v10510_v35  ;;  %v10519_v35 = vld [vmem:[#allocation267_spill] sm:$0xff] }
 0x357   : > { %4639 = vmatprep.subr.bf16.mxu0 %v10512_v24  ;;  %v10520_v24 = vld [vmem:[#allocation268_spill] sm:$0xff] }
 0x358   : > { %4619 = vmatpush2.bf16.msra.mxu1 %v10511_v0 }
 0x359   : > { %4690 = vmatprep.subr.bf16.mxu1 %v10515_v34  ;;  %v4265_v19 = vpop.f32.mrf.mxu0  ;;  %4570 = vmatmul.mubr.bf16.vlgmr.msra.gmra.mxu0 %v10374_v11 }
 0x35a   : > { %v4266_v8 = vadd.f32 %v4265_v19, %v10517_v5  ;;  %4640 = vmatpush1.bf16.msra.mxu0 %v10518_v17  ;;  %4579 = vmatprep.mubr.bf16.mxu0 %v10380_v27  ;;  %v10523_v19 = vld [vmem:[#allocation347_spill] sm:$0xff]  ;;  %v10524_v17 = vld [vmem:[#allocation346_spill] sm:$0xff] }
 0x35b   : > { %v4316_v26 = vpop.f32.mrf.mxu1  ;;  %4621 = vmatmul.mubr.bf16.vlgmr.msra.gmra.mxu1 %v10375_v52  ;;  %v4267_v0 = vpop.f32.mrf.mxu0  ;;  %4641 = vmatprep.subr.bf16.mxu0 %v10520_v24  ;;  %v3609_v2 = vadd.f32 %v10523_v19, %v3558_v18  ;;  %v10525_v24 = vld [vmem:[#allocation270_spill] sm:$0xff]  ;;  %v10529_v18 = vld [vmem:[#allocation352_spill] sm:$0xff] }
 0x35c   : > { %4691 = vmatpush1.bf16.msra.mxu1 %v10519_v35  ;;  %v8712_v3 = vadd.f32 %v4316_v26, %v4266_v8  ;;  %v4268_v34 = vadd.f32 %v4267_v0, %v10521_v23  ;;  %4630 = vmatprep.mubr.bf16.mxu1 %v10381_v29  ;;  %v10526_v8 = vld [vmem:[#allocation271_spill] sm:$0xff]  ;;  %v10527_v0 = vld [vmem:[#allocation272_spill] sm:$0xff] }
 0x35d   : > { %v4318_v16 = vpop.f32.mrf.mxu1  ;;  %4692 = vmatprep.subr.bf16.mxu1 %v10522_v12  ;;  %v4269_v4 = vpop.f32.mrf.mxu0 }
 0x35e   : > { %v8719_v5 = vadd.f32 %v4318_v16, %v4268_v34  ;;  %v4270_v35 = vadd.f32 %v4269_v4, %v10524_v17  ;;  %4642 = vmatpush1.bf16.msra.mxu0 %v10525_v24  ;;  %v10530_v4 = vld [vmem:[#allocation274_spill] sm:$0xff]  ;;  %v10531_v17 = vld [vmem:[#allocation276_spill] sm:$0xff] }
 0x35f   : > { %v4320_v30 = vpop.f32.mrf.mxu1  ;;  %v4271_v26 = vpop.f32.mrf.mxu0  ;;  %4643 = vmatprep.subr.bf16.mxu0 %v10527_v0  ;;  %v10535_v0 = vld [vmem:[#allocation280_spill] sm:$0xff] }
 0x360   : > { %4693 = vmatpush1.bf16.msra.mxu1 %v10526_v8  ;;  %v8725_v12 = vadd.f32 %v4320_v30, %v4270_v35  ;;  %v4272_v23 = vadd.f32 %v4271_v26, %v3609_v2  ;;  %v10532_v35 = vld [vmem:[#allocation277_spill] sm:$0xff]  ;;  %v10533_v2 = vld [vmem:[#allocation354_spill] sm:$0xff]  ;;  %v10534_v26 = vld [vmem:[#allocation279_spill] sm:$0xff] }
 0x361   : > { %v4322_v47 = vpop.f32.mrf.mxu1  ;;  %4694 = vmatprep.subr.bf16.mxu1 %v10528_v28  ;;  %v4275_v50 = vpop.f32.mrf.mxu0  ;;  %4580 = vmatmul.mubr.bf16.gmra.mxu0 %v10386_v14 }
 0x362   : > { %v8729_v16 = vadd.f32 %v4322_v47, %v4272_v23  ;;  %v4276_v34 = vadd.f32 %v4275_v50, %v10529_v18  ;;  %4644 = vmatpush1.bf16.msra.mxu0 %v10530_v4  ;;  %4671 = vmatprep.mubr.bf16.mxu0 %v6651_v58  ;;  %v10536_v18 = vld [vmem:[#allocation281_spill] sm:$0xff]  ;;  %v10537_v4 = vld [vmem:[#allocation282_spill] sm:$0xff] }
 0x363   : > { %v4326_v19 = vpop.f32.mrf.mxu1  ;;  %4631 = vmatmul.mubr.bf16.gmra.mxu1 %v10388_v6  ;;  %v4277_v30 = vpop.f32.mrf.mxu0  ;;  %4645 = vmatprep.subr.bf16.mxu0 %v10532_v35  ;;  %v10540_v35 = vld [vmem:[#allocation285_spill] sm:$0xff] }
 0x364   : > { %4695 = vmatpush1.bf16.msra.mxu1 %v10531_v17  ;;  %v4278_v24 = vadd.f32 %v4277_v30, %v10533_v2  ;;  %v8737_v28 = vadd.f32 %v4326_v19, %v4276_v34  ;;  %4722 = vmatprep.mubr.bf16.mxu1 %v6655_v63  ;;  %v10538_v34 = vld [vmem:[#allocation283_spill] sm:$0xff]  ;;  %v10539_v30 = vld [vmem:[#allocation284_spill] sm:$0xff]  ;;  %v10541_v2 = vld [vmem:[#allocation286_spill] sm:$0xff] }
 0x365   : > { %v4328_v8 = vpop.f32.mrf.mxu1  ;;  %4696 = vmatprep.subr.bf16.mxu1 %v10534_v26  ;;  %v4279_v50 = vpop.f32.mrf.mxu0  ;;  %v10542_v26 = vld [vmem:[#allocation287_spill] sm:$0xff] }
 0x366   : > { %v8742_v47 = vadd.f32 %v4328_v8, %v4278_v24  ;;  %4646 = vmatpush1.bf16.msra.mxu0 %v10535_v0  ;;  %v10543_v24 = vld [vmem:[#allocation288_spill] sm:$0xff]  ;;  %v10544_v8 = vld [vmem:[#allocation289_spill] sm:$0xff]  ;;  %v10545_v50 = vld [vmem:[#allocation290_spill] sm:$0xff] }
 0x367   : > { %v4330_v23 = vpop.f32.mrf.mxu1  ;;  %4647 = vmatprep.subr.bf16.mxu0 %v10537_v4  ;;  %v4280_v17 = vpop.f32.mrf.mxu0  ;;  %v10546_v0 = vld [vmem:[#allocation291_spill] sm:$0xff]  ;;  %v10549_v4 = vld [vmem:[#allocation294_spill] sm:$0xff] }
 0x368   : > { %4697 = vmatpush1.bf16.msra.mxu1 %v10536_v18  ;;  %v10547_v23 = vld [vmem:[#allocation292_spill] sm:$0xff]  ;;  %v10548_v18 = vld [vmem:[#allocation293_spill] sm:$0xff]  ;;  %v10550_v17 = vld [vmem:[#allocation295_spill] sm:$0xff] }
 0x369   : > { %4698 = vmatprep.subr.bf16.mxu1 %v10538_v34  ;;  %v4331_v19 = vpop.f32.mrf.mxu1  ;;  %v10551_v34 = vld [vmem:[#allocation296_spill] sm:$0xff] }
 0x36a   : > { %4648 = vmatpush1.bf16.msra.mxu0 %v10539_v30  ;;  %v10552_v19 = vld [vmem:[#allocation297_spill] sm:$0xff]  ;;  %v10553_v30 = vld [vmem:[#allocation298_spill] sm:$0xff] }
 0x36b   : > { %4649 = vmatprep.subr.bf16.mxu0 %v10541_v2  ;;  %v10555_v2 = vld [vmem:[#allocation300_spill] sm:$0xff] }
 0x36c   : > { %4699 = vmatpush1.bf16.msra.mxu1 %v10540_v35  ;;  %v10554_v35 = vld [vmem:[#allocation299_spill] sm:$0xff] }
 0x36d   : > { %4700 = vmatprep.subr.bf16.mxu1 %v10542_v26  ;;  %v10556_v26 = vld [vmem:[#allocation301_spill] sm:$0xff] }
 0x36e   : > { %4650 = vmatpush1.bf16.msra.mxu0 %v10543_v24  ;;  %v10557_v24 = vld [vmem:[#allocation302_spill] sm:$0xff] }
 0x36f   : > { %4651 = vmatprep.subr.bf16.mxu0 %v10545_v50  ;;  %v10559_v50 = vld [vmem:[#allocation304_spill] sm:$0xff] }
 0x370   : > { %4701 = vmatpush1.bf16.msra.mxu1 %v10544_v8  ;;  %v10558_v8 = vld [vmem:[#allocation303_spill] sm:$0xff] }
 0x371   : > { %4702 = vmatprep.subr.bf16.mxu1 %v10546_v0  ;;  %v10560_v0 = vld [vmem:[#allocation305_spill] sm:$0xff] }
 0x372   : > { %4652 = vmatpush1.bf16.msra.mxu0 %v10547_v23  ;;  %v10561_v23 = vld [vmem:[#allocation306_spill] sm:$0xff] }
 0x373   : > { %4653 = vmatprep.subr.bf16.mxu0 %v10549_v4  ;;  %v10563_v4 = vld [vmem:[#allocation308_spill] sm:$0xff] }
 0x374   : > { %4703 = vmatpush1.bf16.msra.mxu1 %v10548_v18  ;;  %v10562_v18 = vld [vmem:[#allocation307_spill] sm:$0xff] }
 0x375   : > { %4704 = vmatprep.subr.bf16.mxu1 %v10550_v17  ;;  %v10564_v17 = vld [vmem:[#allocation309_spill] sm:$0xff] }
 0x376   : > { %4654 = vmatpush1.bf16.msra.mxu0 %v10551_v34  ;;  %v10565_v34 = vld [vmem:[#allocation310_spill] sm:$0xff] }
 0x377   : > { %4655 = vmatprep.subr.bf16.mxu0 %v10553_v30  ;;  %v10567_v30 = vld [vmem:[#allocation312_spill] sm:$0xff] }
 0x378   : > { %4705 = vmatpush1.bf16.msra.mxu1 %v10552_v19  ;;  %v10566_v19 = vld [vmem:[#allocation311_spill] sm:$0xff] }
 0x379   : > { %4706 = vmatprep.subr.bf16.mxu1 %v10554_v35  ;;  %v10568_v35 = vld [vmem:[#allocation313_spill] sm:$0xff] }
 0x37a   : > { %4656 = vmatpush2.bf16.msra.mxu0 %v10555_v2  ;;  %v10569_v2 = vld [vmem:[#allocation314_spill] sm:$0xff] }
 0x37b   : > { %4657 = vmatprep.subr.bf16.mxu0 %v10557_v24  ;;  %v10571_v24 = vld [vmem:[#allocation316_spill] sm:$0xff] }
 0x37c   : > { %4707 = vmatpush2.bf16.msra.mxu1 %v10556_v26  ;;  %v10570_v26 = vld [vmem:[#allocation315_spill] sm:$0xff] }
 0x37d   : > { %4708 = vmatprep.subr.bf16.mxu1 %v10558_v8  ;;  %v10572_v8 = vld [vmem:[#allocation317_spill] sm:$0xff] }
 0x37e   : > { %4658 = vmatpush2.bf16.msra.mxu0 %v10559_v50  ;;  %v10573_v50 = vld [vmem:[#allocation318_spill] sm:$0xff] }
 0x37f   : > { %4659 = vmatprep.subr.bf16.mxu0 %v10561_v23  ;;  %v10575_v23 = vld [vmem:[#allocation320_spill] sm:$0xff] }
 0x380   : > { %4709 = vmatpush2.bf16.msra.mxu1 %v10560_v0  ;;  %v10574_v0 = vld [vmem:[#allocation319_spill] sm:$0xff] }
 0x381   : > { %4710 = vmatprep.subr.bf16.mxu1 %v10562_v18  ;;  %v10576_v18 = vld [vmem:[#allocation321_spill] sm:$0xff] }
 0x382   : > { %4660 = vmatpush2.bf16.msra.mxu0 %v10563_v4  ;;  %v10577_v4 = vld [vmem:[#allocation322_spill] sm:$0xff] }
 0x383   : > { %4661 = vmatprep.subr.bf16.mxu0 %v10565_v34  ;;  %v10579_v34 = vld [vmem:[#allocation324_spill] sm:$0xff] }
 0x384   : > { %4711 = vmatpush2.bf16.msra.mxu1 %v10564_v17  ;;  %v10578_v17 = vld [vmem:[#allocation323_spill] sm:$0xff] }
 0x385   : > { %4712 = vmatprep.subr.bf16.mxu1 %v10566_v19  ;;  %v10580_v19 = vld [vmem:[#allocation325_spill] sm:$0xff] }
 0x386   : > { %4662 = vmatpush2.bf16.msra.mxu0 %v10567_v30  ;;  %v10581_v30 = vld [vmem:[#allocation326_spill] sm:$0xff] }
 0x387   : > { %4663 = vmatprep.subr.bf16.mxu0 %v10569_v2  ;;  %v10583_v2 = vld [vmem:[#allocation328_spill] sm:$0xff] }
 0x388   : > { %4713 = vmatpush2.bf16.msra.mxu1 %v10568_v35  ;;  %v10582_v35 = vld [vmem:[#allocation327_spill] sm:$0xff] }
 0x389   : > { %4714 = vmatprep.subr.bf16.mxu1 %v10570_v26  ;;  %v10584_v26 = vld [vmem:[#allocation329_spill] sm:$0xff] }
 0x38a   : > { %4664 = vmatpush2.bf16.msra.mxu0 %v10571_v24  ;;  %v10585_v24 = vld [vmem:[#allocation330_spill] sm:$0xff] }
 0x38b   : > { %4665 = vmatprep.subr.bf16.mxu0 %v10573_v50 }
 0x38c   : > { %4715 = vmatpush2.bf16.msra.mxu1 %v10572_v8  ;;  %v10586_v8 = vld [vmem:[#allocation331_spill] sm:$0xff] }
 0x38d   : > { %4716 = vmatprep.subr.bf16.mxu1 %v10574_v0 }
 0x38e   : > { %4666 = vmatpush2.bf16.msra.mxu0 %v10575_v23 }
 0x38f   : > { %4667 = vmatprep.subr.bf16.mxu0 %v10577_v4  ;;  %v10588_v4 = vld [vmem:[#allocation333_spill] sm:$0xff] }
 0x390   : > { %4717 = vmatpush2.bf16.msra.mxu1 %v10576_v18  ;;  %v10587_v18 = vld [vmem:[#allocation332_spill] sm:$0xff] }
 0x391   : > { %4718 = vmatprep.subr.bf16.mxu1 %v10578_v17 }
 0x392   : > { %4668 = vmatpush2.bf16.msra.mxu0 %v10579_v34  ;;  %v10589_v34 = vld [vmem:[#allocation334_spill] sm:$0xff] }
 0x393   : > { %4669 = vmatprep.subr.bf16.mxu0 %v10581_v30 }
 0x394   : > { %4719 = vmatpush2.bf16.msra.mxu1 %v10580_v19 }
 0x395   : > { %4720 = vmatprep.subr.bf16.mxu1 %v10582_v35 }
 0x396   : > { %4670 = vmatpush2.bf16.msra.mxu0 %v10583_v2  ;;  %v10590_v2 = vld [vmem:[#allocation335_spill] sm:$0xff] }
 0x397   : > { %4741 = vmatprep.subr.bf16.mxu0 %v10585_v24 }
 0x398   : > { %4721 = vmatpush2.bf16.msra.mxu1 %v10584_v26 }
 0x399   : > { %4792 = vmatprep.subr.bf16.mxu1 %v10586_v8  ;;  %v4367_v50 = vpop.f32.mrf.mxu0  ;;  %4672 = vmatmul.mubr.bf16.vlgmr.msra.gmra.mxu0 %v10297_v46 }
 0x39a   : > { %v4368_v0 = vadd.f32 %v4367_v50, %v8712_v3  ;;  %4742 = vmatpush1.bf16.msra.mxu0 %v10587_v18  ;;  %4681 = vmatprep.mubr.bf16.mxu0 %v10304_v9  ;;  %v10591_v50 = vld [vmem:[#allocation336_spill] sm:$0xff]  ;;  %v10592_v18 = vld [vmem:[#allocation337_spill] sm:$0xff] }
 0x39b   : > { %v4418_v23 = vpop.f32.mrf.mxu1  ;;  %4723 = vmatmul.mubr.bf16.vlgmr.msra.gmra.mxu1 %v10298_v53  ;;  %v4369_v17 = vpop.f32.mrf.mxu0  ;;  %4743 = vmatprep.subr.bf16.mxu0 %v10589_v34  ;;  %v10594_v34 = vld [vmem:[#allocation340_spill] sm:$0xff] }
 0x39c   : > { %4793 = vmatpush1.bf16.msra.mxu1 %v10588_v4  ;;  %v8802_v19 = vadd.f32 %v4418_v23, %v4368_v0  ;;  %v4370_v30 = vadd.f32 %v4369_v17, %v8719_v5  ;;  %4732 = vmatprep.mubr.bf16.mxu1 %v10305_v10  ;;  %v10593_v23 = vld [vmem:[#allocation338_spill] sm:$0xff] }
 0x39d   : > { %v4420_v35 = vpop.f32.mrf.mxu1  ;;  %4794 = vmatprep.subr.bf16.mxu1 %v10590_v2  ;;  %v4371_v3 = vpop.f32.mrf.mxu0 }
 0x39e   : > { %v8808_v26 = vadd.f32 %v4420_v35, %v4370_v30  ;;  %v4372_v24 = vadd.f32 %v4371_v3, %v8725_v12  ;;  %4744 = vmatpush1.bf16.msra.mxu0 %v10591_v50  ;;  %v10595_v35 = vld [vmem:[#allocation342_spill] sm:$0xff]  ;;  %v10596_v50 = vld [vmem:[#allocation344_spill] sm:$0xff] }
 0x39f   : > { %v4422_v8 = vpop.f32.mrf.mxu1  ;;  %v4373_v0 = vpop.f32.mrf.mxu0  ;;  %4745 = vmatprep.subr.bf16.mxu0 %v10593_v23  ;;  %v10598_v23 = vld [vmem:[#allocation348_spill] sm:$0xff] }
 0x3a0   : > { %4795 = vmatpush1.bf16.msra.mxu1 %v10592_v18  ;;  %v8814_v5 = vadd.f32 %v4422_v8, %v4372_v24  ;;  %v4374_v4 = vadd.f32 %v4373_v0, %v8729_v16  ;;  %v10597_v8 = vld [vmem:[#allocation345_spill] sm:$0xff] }
 0x3a1   : > { %v4424_v17 = vpop.f32.mrf.mxu1  ;;  %4796 = vmatprep.subr.bf16.mxu1 %v10594_v34  ;;  %v4377_v2 = vpop.f32.mrf.mxu0  ;;  %4682 = vmatmul.mubr.bf16.gmra.mxu0 %v10312_v39 }
 0x3a2   : > { %v8819_v30 = vadd.f32 %v4424_v17, %v4374_v4  ;;  %v4378_v12 = vadd.f32 %v4377_v2, %v8737_v28  ;;  %4746 = vmatpush1.bf16.msra.mxu0 %v10595_v35  ;;  %4773 = vmatprep.mubr.bf16.mxu0 %v10320_v20  ;;  %v10599_v17 = vld [vmem:[#allocation349_spill] sm:$0xff]  ;;  %v10600_v2 = vld [vmem:[#allocation350_spill] sm:$0xff]  ;;  %v10601_v35 = vld [vmem:[#allocation351_spill] sm:$0xff] }
 0x3a3   : > { %v4428_v3 = vpop.f32.mrf.mxu1  ;;  %4733 = vmatmul.mubr.bf16.gmra.mxu1 %v10315_v36  ;;  %v4379_v24 = vpop.f32.mrf.mxu0  ;;  %4747 = vmatprep.subr.bf16.mxu0 %v10597_v8  ;;  %v10605_v8 = vld [vmem:[#allocation357_spill] sm:$0xff] }
 0x3a4   : > { %4797 = vmatpush1.bf16.msra.mxu1 %v10596_v50  ;;  %v4380_v16 = vadd.f32 %v4379_v24, %v8742_v47  ;;  %v8827_v18 = vadd.f32 %v4428_v3, %v4378_v12  ;;  %4824 = vmatprep.mubr.bf16.mxu1 %v10321_v21  ;;  %v10602_v12 = vld [vmem:[#allocation353_spill] sm:$0xff]  ;;  %v10603_v50 = vld [vmem:[#allocation355_spill] sm:$0xff]  ;;  %v10604_v24 = vld [vmem:[#allocation356_spill] sm:$0xff] }
 0x3a5   : > { %v4430_v0 = vpop.f32.mrf.mxu1  ;;  %4798 = vmatprep.subr.bf16.mxu1 %v10598_v23  ;;  %v4381_v28 = vpop.f32.mrf.mxu0  ;;  %v10606_v23 = vld [vmem:[#allocation358_spill] sm:$0xff] }
 0x3a6   : > { %v8832_v4 = vadd.f32 %v4430_v0, %v4380_v16  ;;  %4748 = vmatpush1.bf16.msra.mxu0 %v10599_v17  ;;  %v10607_v16 = vld [vmem:[#allocation359_spill] sm:$0xff]  ;;  %v10608_v0 = vld [vmem:[#allocation360_spill] sm:$0xff]  ;;  %v10609_v28 = vld [vmem:[#allocation361_spill] sm:$0xff] }
 0x3a7   : > { %v4432_v34 = vpop.f32.mrf.mxu1  ;;  %4749 = vmatprep.subr.bf16.mxu0 %v10601_v35  ;;  %v4382_v47 = vpop.f32.mrf.mxu0  ;;  %v10610_v17 = vld [vmem:[#allocation362_spill] sm:$0xff]  ;;  %v10613_v35 = vld [vmem:[#allocation365_spill] sm:$0xff] }
 0x3a8   : > { %4799 = vmatpush1.bf16.msra.mxu1 %v10600_v2  ;;  %v10611_v34 = vld [vmem:[#allocation363_spill] sm:$0xff]  ;;  %v10612_v2 = vld [vmem:[#allocation364_spill] sm:$0xff]  ;;  %v10614_v47 = vld [vmem:[#allocation366_spill] sm:$0xff] }
 0x3a9   : > { %4800 = vmatprep.subr.bf16.mxu1 %v10602_v12  ;;  %v4433_v3 = vpop.f32.mrf.mxu1  ;;  %v10615_v12 = vld [vmem:[#allocation367_spill] sm:$0xff] }
 0x3aa   : > { %4750 = vmatpush1.bf16.msra.mxu0 %v10603_v50  ;;  %v10616_v3 = vld [vmem:[#allocation368_spill] sm:$0xff]  ;;  %v10617_v50 = vld [vmem:[#allocation369_spill] sm:$0xff] }
 0x3ab   : > { %4751 = vmatprep.subr.bf16.mxu0 %v10605_v8  ;;  %v10619_v8 = vld [vmem:[#allocation371_spill] sm:$0xff] }
 0x3ac   : > { %4801 = vmatpush1.bf16.msra.mxu1 %v10604_v24  ;;  %v10618_v24 = vld [vmem:[#allocation370_spill] sm:$0xff] }
 0x3ad   : > { %4802 = vmatprep.subr.bf16.mxu1 %v10606_v23  ;;  %v10620_v23 = vld [vmem:[#allocation372_spill] sm:$0xff] }
 0x3ae   : > { %4752 = vmatpush1.bf16.msra.mxu0 %v10607_v16  ;;  %v10621_v16 = vld [vmem:[#allocation373_spill] sm:$0xff] }
 0x3af   : > { %4753 = vmatprep.subr.bf16.mxu0 %v10609_v28  ;;  %v10623_v28 = vld [vmem:[#allocation375_spill] sm:$0xff] }
 0x3b0   : > { %4803 = vmatpush1.bf16.msra.mxu1 %v10608_v0  ;;  %v10622_v0 = vld [vmem:[#allocation374_spill] sm:$0xff] }
 0x3b1   : > { %4804 = vmatprep.subr.bf16.mxu1 %v10610_v17  ;;  %v10624_v17 = vld [vmem:[#allocation376_spill] sm:$0xff] }
 0x3b2   : > { %4754 = vmatpush1.bf16.msra.mxu0 %v10611_v34  ;;  %v10625_v34 = vld [vmem:[#allocation377_spill] sm:$0xff] }
 0x3b3   : > { %4755 = vmatprep.subr.bf16.mxu0 %v10613_v35  ;;  %v10627_v35 = vld [vmem:[#allocation379_spill] sm:$0xff] }
 0x3b4   : > { %4805 = vmatpush1.bf16.msra.mxu1 %v10612_v2  ;;  %v10626_v2 = vld [vmem:[#allocation378_spill] sm:$0xff] }
 0x3b5   : > { %4806 = vmatprep.subr.bf16.mxu1 %v10614_v47  ;;  %v10628_v47 = vld [vmem:[#allocation380_spill] sm:$0xff] }
 0x3b6   : > { %4756 = vmatpush1.bf16.msra.mxu0 %v10615_v12  ;;  %v10629_v12 = vld [vmem:[#allocation381_spill] sm:$0xff] }
 0x3b7   : > { %4757 = vmatprep.subr.bf16.mxu0 %v10617_v50  ;;  %v10631_v50 = vld [vmem:[#allocation383_spill] sm:$0xff] }
 0x3b8   : > { %4807 = vmatpush1.bf16.msra.mxu1 %v10616_v3  ;;  %v10630_v3 = vld [vmem:[#allocation382_spill] sm:$0xff] }
 0x3b9   : > { %4808 = vmatprep.subr.bf16.mxu1 %v10618_v24  ;;  %v10632_v24 = vld [vmem:[#allocation384_spill] sm:$0xff] }
 0x3ba   : > { %4758 = vmatpush2.bf16.msra.mxu0 %v10619_v8  ;;  %v10633_v8 = vld [vmem:[#allocation385_spill] sm:$0xff] }
 0x3bb   : > { %4759 = vmatprep.subr.bf16.mxu0 %v10621_v16  ;;  %v10635_v16 = vld [vmem:[#allocation387_spill] sm:$0xff] }
 0x3bc   : > { %4809 = vmatpush2.bf16.msra.mxu1 %v10620_v23  ;;  %v10634_v23 = vld [vmem:[#allocation386_spill] sm:$0xff] }
 0x3bd   : > { %4810 = vmatprep.subr.bf16.mxu1 %v10622_v0  ;;  %v10636_v0 = vld [vmem:[#allocation388_spill] sm:$0xff] }
 0x3be   : > { %4760 = vmatpush2.bf16.msra.mxu0 %v10623_v28  ;;  %v10637_v28 = vld [vmem:[#allocation389_spill] sm:$0xff] }
 0x3bf   : > { %4761 = vmatprep.subr.bf16.mxu0 %v10625_v34  ;;  %v10639_v34 = vld [vmem:[#allocation391_spill] sm:$0xff] }
 0x3c0   : > { %4811 = vmatpush2.bf16.msra.mxu1 %v10624_v17  ;;  %v10638_v17 = vld [vmem:[#allocation390_spill] sm:$0xff] }
 0x3c1   : > { %4812 = vmatprep.subr.bf16.mxu1 %v10626_v2  ;;  %v10640_v2 = vld [vmem:[#allocation392_spill] sm:$0xff] }
 0x3c2   : > { %4762 = vmatpush2.bf16.msra.mxu0 %v10627_v35  ;;  %v10641_v35 = vld [vmem:[#allocation393_spill] sm:$0xff] }
 0x3c3   : > { %4763 = vmatprep.subr.bf16.mxu0 %v10629_v12  ;;  %v10643_v12 = vld [vmem:[#allocation395_spill] sm:$0xff] }
 0x3c4   : > { %4813 = vmatpush2.bf16.msra.mxu1 %v10628_v47  ;;  %v10642_v47 = vld [vmem:[#allocation394_spill] sm:$0xff] }
 0x3c5   : > { %4814 = vmatprep.subr.bf16.mxu1 %v10630_v3  ;;  %v10644_v3 = vld [vmem:[#allocation396_spill] sm:$0xff] }
 0x3c6   : > { %4764 = vmatpush2.bf16.msra.mxu0 %v10631_v50  ;;  %v10645_v50 = vld [vmem:[#allocation397_spill] sm:$0xff] }
 0x3c7   : > { %4765 = vmatprep.subr.bf16.mxu0 %v10633_v8  ;;  %v10647_v8 = vld [vmem:[#allocation399_spill] sm:$0xff] }
 0x3c8   : > { %4815 = vmatpush2.bf16.msra.mxu1 %v10632_v24  ;;  %v10646_v24 = vld [vmem:[#allocation398_spill] sm:$0xff] }
 0x3c9   : > { %4816 = vmatprep.subr.bf16.mxu1 %v10634_v23  ;;  %v10648_v23 = vld [vmem:[#allocation400_spill] sm:$0xff] }
 0x3ca   : > { %4766 = vmatpush2.bf16.msra.mxu0 %v10635_v16  ;;  %v10649_v16 = vld [vmem:[#allocation401_spill] sm:$0xff] }
 0x3cb   : > { %4767 = vmatprep.subr.bf16.mxu0 %v10637_v28 }
 0x3cc   : > { %4817 = vmatpush2.bf16.msra.mxu1 %v10636_v0  ;;  %v10650_v0 = vld [vmem:[#allocation402_spill] sm:$0xff] }
 0x3cd   : > { %4818 = vmatprep.subr.bf16.mxu1 %v10638_v17 }
 0x3ce   : > { %4768 = vmatpush2.bf16.msra.mxu0 %v10639_v34 }
 0x3cf   : > { %4769 = vmatprep.subr.bf16.mxu0 %v10641_v35  ;;  %v10652_v35 = vld [vmem:[#allocation404_spill] sm:$0xff] }
 0x3d0   : > { %4819 = vmatpush2.bf16.msra.mxu1 %v10640_v2  ;;  %v10651_v2 = vld [vmem:[#allocation403_spill] sm:$0xff] }
 0x3d1   : > { %4820 = vmatprep.subr.bf16.mxu1 %v10642_v47 }
 0x3d2   : > { %4770 = vmatpush2.bf16.msra.mxu0 %v10643_v12  ;;  %v10653_v12 = vld [vmem:[#allocation405_spill] sm:$0xff] }
 0x3d3   : > { %4771 = vmatprep.subr.bf16.mxu0 %v10645_v50 }
 0x3d4   : > { %4821 = vmatpush2.bf16.msra.mxu1 %v10644_v3 }
 0x3d5   : > { %4822 = vmatprep.subr.bf16.mxu1 %v10646_v24 }
 0x3d6   : > { %4772 = vmatpush2.bf16.msra.mxu0 %v10647_v8  ;;  %v10654_v8 = vld [vmem:[#allocation406_spill] sm:$0xff] }
 0x3d7   : > { %4843 = vmatprep.subr.bf16.mxu0 %v10649_v16 }
 0x3d8   : > { %4823 = vmatpush2.bf16.msra.mxu1 %v10648_v23 }
 0x3d9   : > { %4894 = vmatprep.subr.bf16.mxu1 %v10650_v0  ;;  %v4469_v28 = vpop.f32.mrf.mxu0  ;;  %4774 = vmatmul.mubr.bf16.vlgmr.msra.gmra.mxu0 %v10374_v11 }
 0x3da   : > { %v4470_v17 = vadd.f32 %v4469_v28, %v8160_v44  ;;  %4844 = vmatpush1.bf16.msra.mxu0 %v10651_v2  ;;  %4783 = vmatprep.mubr.bf16.mxu0 %v10380_v27  ;;  %v10655_v28 = vld [vmem:[#allocation407_spill] sm:$0xff]  ;;  %v10656_v2 = vld [vmem:[#allocation408_spill] sm:$0xff] }
 0x3db   : > { %v4520_v34 = vpop.f32.mrf.mxu1  ;;  %4825 = vmatmul.mubr.bf16.vlgmr.msra.gmra.mxu1 %v10375_v52  ;;  %v4471_v47 = vpop.f32.mrf.mxu0  ;;  %4845 = vmatprep.subr.bf16.mxu0 %v10653_v12  ;;  %v10658_v12 = vld [vmem:[#allocation410_spill] sm:$0xff] }
 0x3dc   : > { %4895 = vmatpush1.bf16.msra.mxu1 %v10652_v35  ;;  %v8892_v3 = vadd.f32 %v4520_v34, %v4470_v17  ;;  %v4472_v50 = vadd.f32 %v4471_v47, %v8169_v48  ;;  %4834 = vmatprep.mubr.bf16.mxu1 %v10381_v29  ;;  %v10657_v34 = vld [vmem:[#allocation409_spill] sm:$0xff] }
 0x3dd   : > { %v4522_v24 = vpop.f32.mrf.mxu1  ;;  %4896 = vmatprep.subr.bf16.mxu1 %v10654_v8  ;;  %v4473_v44 = vpop.f32.mrf.mxu0 }
 0x3de   : > { %v8898_v23 = vadd.f32 %v4522_v24, %v4472_v50  ;;  %v4474_v16 = vadd.f32 %v4473_v44, %v8181_v41  ;;  %4846 = vmatpush1.bf16.msra.mxu0 %v10655_v28  ;;  %v10659_v24 = vld [vmem:[#allocation411_spill] sm:$0xff]  ;;  %v10660_v28 = vld [vmem:[#allocation412_spill] sm:$0xff] }
 0x3df   : > { %v4524_v0 = vpop.f32.mrf.mxu1  ;;  %v4475_v17 = vpop.f32.mrf.mxu0  ;;  %4847 = vmatprep.subr.bf16.mxu0 %v10657_v34  ;;  %v10662_v34 = vld [vmem:[#allocation414_spill] sm:$0xff] }
 0x3e0   : > { %4897 = vmatpush1.bf16.msra.mxu1 %v10656_v2  ;;  %v8904_v48 = vadd.f32 %v4524_v0, %v4474_v16  ;;  %v4476_v35 = vadd.f32 %v4475_v17, %v8191_v59  ;;  %v10661_v0 = vld [vmem:[#allocation413_spill] sm:$0xff] }
 0x3e1   : > { %v4526_v47 = vpop.f32.mrf.mxu1  ;;  %4898 = vmatprep.subr.bf16.mxu1 %v10658_v12  ;;  %v4479_v8 = vpop.f32.mrf.mxu0  ;;  %4784 = vmatmul.mubr.bf16.gmra.mxu0 %v10386_v14 }
 0x3e2   : > { %v8909_v50 = vadd.f32 %v4526_v47, %v4476_v35  ;;  %v4480_v41 = vadd.f32 %v4479_v8, %v8202_v56  ;;  %4848 = vmatpush1.bf16.msra.mxu0 %v10659_v24  ;;  %4875 = vmatprep.mubr.bf16.mxu0 %v6651_v58  ;;  %v10663_v47 = vld [vmem:[#allocation415_spill] sm:$0xff]  ;;  %v10664_v8 = vld [vmem:[#allocation416_spill] sm:$0xff] }
 0x3e3   : > { %v4530_v44 = vpop.f32.mrf.mxu1  ;;  %4835 = vmatmul.mubr.bf16.gmra.mxu1 %v10388_v6  ;;  %v4481_v16 = vpop.f32.mrf.mxu0  ;;  %4849 = vmatprep.subr.bf16.mxu0 %v10661_v0  ;;  %v10668_v58 = vld [vmem:[#allocation420_spill] sm:$0xff]  ;;  %v10671_v0 = vld [vmem:[#allocation423_spill] sm:$0xff] }
 0x3e4   : > { %4899 = vmatpush1.bf16.msra.mxu1 %v10660_v28  ;;  %v4482_v59 = vadd.f32 %v4481_v16, %v8209_v7  ;;  %v8917_v2 = vadd.f32 %v4530_v44, %v4480_v41  ;;  %4926 = vmatprep.mubr.bf16.mxu1 %v6655_v63  ;;  %v10665_v41 = vld [vmem:[#allocation417_spill] sm:$0xff]  ;;  %v10666_v44 = vld [vmem:[#allocation418_spill] sm:$0xff]  ;;  %v10667_v28 = vld [vmem:[#allocation419_spill] sm:$0xff] }
 0x3e5   : > { %v4532_v17 = vpop.f32.mrf.mxu1  ;;  %4900 = vmatprep.subr.bf16.mxu1 %v10662_v34  ;;  %v4483_v56 = vpop.f32.mrf.mxu0  ;;  %v10669_v63 = vld [vmem:[#allocation421_spill] sm:$0xff]  ;;  %v10670_v16 = vld [vmem:[#allocation422_spill] sm:$0xff]  ;;  %v10675_v34 = vld [vmem:[#allocation427_spill] sm:$0xff] }
 0x3e6   : > { %v8922_v35 = vadd.f32 %v4532_v17, %v4482_v59  ;;  %4850 = vmatpush1.bf16.msra.mxu0 %v10663_v47  ;;  %v10672_v59 = vld [vmem:[#allocation424_spill] sm:$0xff]  ;;  %v10674_v17 = vld [vmem:[#allocation426_spill] sm:$0xff]  ;;  %v10677_v47 = vld [vmem:[#allocation429_spill] sm:$0xff] }
 0x3e7   : > { %v4534_v12 = vpop.f32.mrf.mxu1  ;;  %4851 = vmatprep.subr.bf16.mxu0 %v10664_v8  ;;  %v4484_v7 = vpop.f32.mrf.mxu0  ;;  %v10676_v56 = vld [vmem:[#allocation428_spill] sm:$0xff]  ;;  %v10679_v8 = vld [vmem:[#allocation431_spill] sm:$0xff] }
 0x3e8   : > { %4901 = vmatpush1.bf16.msra.mxu1 %v7975_v42  ;;  %v10673_v42 = vld [vmem:[#allocation425_spill] sm:$0xff]  ;;  %v10678_v12 = vld [vmem:[#allocation430_spill] sm:$0xff]  ;;  %v10680_v7 = vld [vmem:[#allocation432_spill] sm:$0xff] }
 0x3e9   : > { %4902 = vmatprep.subr.bf16.mxu1 %v10665_v41  ;;  %v4535_v24 = vpop.f32.mrf.mxu1  ;;  %v10681_v41 = vld [vmem:[#allocation433_spill] sm:$0xff] }
 0x3ea   : > { %4852 = vmatpush1.bf16.msra.mxu0 %v10666_v44  ;;  %v10682_v24 = vld [vmem:[#allocation434_spill] sm:$0xff]  ;;  %v10683_v44 = vld [vmem:[#allocation435_spill] sm:$0xff] }
 0x3eb   : > { %4853 = vmatprep.subr.bf16.mxu0 %v10668_v58  ;;  %v10685_v58 = vld [vmem:[#allocation437_spill] sm:$0xff] }
 0x3ec   : > { %4903 = vmatpush1.bf16.msra.mxu1 %v10667_v28  ;;  %v10684_v28 = vld [vmem:[#allocation436_spill] sm:$0xff] }
 0x3ed   : > { %4904 = vmatprep.subr.bf16.mxu1 %v10669_v63  ;;  %v10686_v63 = vld [vmem:[#allocation438_spill] sm:$0xff] }
 0x3ee   : > { %4854 = vmatpush1.bf16.msra.mxu0 %v10670_v16  ;;  %v10687_v16 = vld [vmem:[#allocation439_spill] sm:$0xff] }
 0x3ef   : > { %4855 = vmatprep.subr.bf16.mxu0 %v10672_v59  ;;  %v10689_v59 = vld [vmem:[#allocation441_spill] sm:$0xff] }
 0x3f0   : > { %4905 = vmatpush1.bf16.msra.mxu1 %v10671_v0  ;;  %v10688_v0 = vld [vmem:[#allocation440_spill] sm:$0xff] }
 0x3f1   : > { %4906 = vmatprep.subr.bf16.mxu1 %v10673_v42  ;;  %v10690_v42 = vld [vmem:[#allocation442_spill] sm:$0xff] }
 0x3f2   : > { %4856 = vmatpush1.bf16.msra.mxu0 %v10674_v17  ;;  %v10691_v17 = vld [vmem:[#allocation443_spill] sm:$0xff] }
 0x3f3   : > { %4857 = vmatprep.subr.bf16.mxu0 %v10676_v56  ;;  %v10693_v56 = vld [vmem:[#allocation445_spill] sm:$0xff] }
 0x3f4   : > { %4907 = vmatpush1.bf16.msra.mxu1 %v10675_v34  ;;  %v10692_v34 = vld [vmem:[#allocation444_spill] sm:$0xff] }
 0x3f5   : > { %4908 = vmatprep.subr.bf16.mxu1 %v10677_v47  ;;  %v10694_v47 = vld [vmem:[#allocation446_spill] sm:$0xff] }
 0x3f6   : > { %4858 = vmatpush1.bf16.msra.mxu0 %v10678_v12  ;;  %v10695_v12 = vld [vmem:[#allocation447_spill] sm:$0xff] }
 0x3f7   : > { %4859 = vmatprep.subr.bf16.mxu0 %v10680_v7  ;;  %v10697_v7 = vld [vmem:[#allocation449_spill] sm:$0xff] }
 0x3f8   : > { %4909 = vmatpush1.bf16.msra.mxu1 %v10679_v8  ;;  %v10696_v8 = vld [vmem:[#allocation448_spill] sm:$0xff] }
 0x3f9   : > { %4910 = vmatprep.subr.bf16.mxu1 %v10681_v41  ;;  %v10698_v41 = vld [vmem:[#allocation450_spill] sm:$0xff] }
 0x3fa   : > { %4860 = vmatpush2.bf16.msra.mxu0 %v10682_v24  ;;  %v10699_v24 = vld [vmem:[#allocation451_spill] sm:$0xff] }
 0x3fb   : > { %4861 = vmatprep.subr.bf16.mxu0 %v10684_v28  ;;  %v10701_v28 = vld [vmem:[#allocation453_spill] sm:$0xff] }
 0x3fc   : > { %4911 = vmatpush2.bf16.msra.mxu1 %v10683_v44  ;;  %v10700_v44 = vld [vmem:[#allocation452_spill] sm:$0xff] }
 0x3fd   : > { %4912 = vmatprep.subr.bf16.mxu1 %v10685_v58  ;;  %v10702_v58 = vld [vmem:[#allocation454_spill] sm:$0xff] }
 0x3fe   : > { %4862 = vmatpush2.bf16.msra.mxu0 %v10686_v63  ;;  %v10703_v63 = vld [vmem:[#allocation455_spill] sm:$0xff] }
 0x3ff   : > { %4863 = vmatprep.subr.bf16.mxu0 %v10688_v0  ;;  %v10705_v0 = vld [vmem:[#allocation457_spill] sm:$0xff] }
 0x400   : > { %4913 = vmatpush2.bf16.msra.mxu1 %v10687_v16  ;;  %v10704_v16 = vld [vmem:[#allocation456_spill] sm:$0xff] }
 0x401   : > { %4914 = vmatprep.subr.bf16.mxu1 %v10689_v59  ;;  %v10706_v59 = vld [vmem:[#allocation458_spill] sm:$0xff] }
 0x402   : > { %4864 = vmatpush2.bf16.msra.mxu0 %v10690_v42  ;;  %v10707_v42 = vld [vmem:[#allocation459_spill] sm:$0xff] }
 0x403   : > { %4865 = vmatprep.subr.bf16.mxu0 %v10692_v34  ;;  %v10709_v34 = vld [vmem:[#allocation461_spill] sm:$0xff] }
 0x404   : > { %4915 = vmatpush2.bf16.msra.mxu1 %v10691_v17  ;;  %v10708_v17 = vld [vmem:[#allocation460_spill] sm:$0xff] }
 0x405   : > { %4916 = vmatprep.subr.bf16.mxu1 %v10693_v56  ;;  %v10710_v56 = vld [vmem:[#allocation462_spill] sm:$0xff] }
 0x406   : > { %4866 = vmatpush2.bf16.msra.mxu0 %v10694_v47  ;;  %v10711_v47 = vld [vmem:[#allocation463_spill] sm:$0xff] }
 0x407   : > { %4867 = vmatprep.subr.bf16.mxu0 %v10696_v8  ;;  %v10713_v8 = vld [vmem:[#allocation465_spill] sm:$0xff] }
 0x408   : > { %4917 = vmatpush2.bf16.msra.mxu1 %v10695_v12  ;;  %v10712_v12 = vld [vmem:[#allocation464_spill] sm:$0xff] }
 0x409   : > { %4918 = vmatprep.subr.bf16.mxu1 %v10697_v7 }
 0x40a   : > { %4868 = vmatpush2.bf16.msra.mxu0 %v10698_v41 }
 0x40b   : > { %4869 = vmatprep.subr.bf16.mxu0 %v10700_v44  ;;  %v10714_v44 = vld [vmem:[#allocation466_spill] sm:$0xff] }
 0x40c   : > { %4919 = vmatpush2.bf16.msra.mxu1 %v10699_v24 }
 0x40d   : > { %4920 = vmatprep.subr.bf16.mxu1 %v10701_v28 }
 0x40e   : > { %4870 = vmatpush2.bf16.msra.mxu0 %v10702_v58 }
 0x40f   : > { %4871 = vmatprep.subr.bf16.mxu0 %v10704_v16 }
 0x410   : > { %4921 = vmatpush2.bf16.msra.mxu1 %v10703_v63 }
 0x411   : > { %4922 = vmatprep.subr.bf16.mxu1 %v10705_v0  ;;  %v10715_v0 = vld [vmem:[#allocation467_spill] sm:$0xff] }
 0x412   : > { %4872 = vmatpush2.bf16.msra.mxu0 %v10706_v59 }
 0x413   : > { %4873 = vmatprep.subr.bf16.mxu0 %v10708_v17 }
 0x414   : > { %4923 = vmatpush2.bf16.msra.mxu1 %v10707_v42 }
 0x415   : > { %4924 = vmatprep.subr.bf16.mxu1 %v10709_v34 }
 0x416   : > { %4874 = vmatpush2.bf16.msra.mxu0 %v10710_v56  ;;  %v10719_v56 = vld [vmem:[#allocation471_spill] sm:$0xff] }
 0x417   : > { %4945 = vmatprep.subr.bf16.mxu0 %v10712_v12  ;;  %v10725_v12 = vld [vmem:[#allocation477_spill] sm:$0xff] }
 0x418   : > { %4925 = vmatpush2.bf16.msra.mxu1 %v10711_v47  ;;  %v10723_v47 = vld [vmem:[#allocation475_spill] sm:$0xff] }
 0x419   : > { %4996 = vmatprep.subr.bf16.mxu1 %v10713_v8  ;;  %v4571_v7 = vpop.f32.mrf.mxu0  ;;  %4876 = vmatmul.mubr.bf16.vlgmr.msra.gmra.mxu0 %v10297_v46  ;;  %v10727_v8 = vld [vmem:[#allocation479_spill] sm:$0xff] }
 0x41a   : > { %v4572_v41 = vadd.f32 %v4571_v7, %v8892_v3  ;;  %4946 = vmatpush1.bf16.msra.mxu0 %v8135_v22  ;;  %4885 = vmatprep.mubr.bf16.mxu0 %v10304_v9  ;;  %v10728_v7 = vld [vmem:[#allocation480_spill] sm:$0xff] }
 0x41b   : > { %v4622_v24 = vpop.f32.mrf.mxu1  ;;  %4927 = vmatmul.mubr.bf16.vlgmr.msra.gmra.mxu1 %v10298_v53  ;;  %v4573_v28 = vpop.f32.mrf.mxu0  ;;  %4947 = vmatprep.subr.bf16.mxu0 %v8141_v55  ;;  %v10716_v55 = vld [vmem:[#allocation468_spill] sm:$0xff] }
 0x41c   : > { %4997 = vmatpush1.bf16.msra.mxu1 %v10714_v44  ;;  %v8982_v58 = vadd.f32 %v4622_v24, %v4572_v41  ;;  %v4574_v63 = vadd.f32 %v4573_v28, %v8898_v23  ;;  %4936 = vmatprep.mubr.bf16.mxu1 %v10305_v10  ;;  %v10729_v41 = vld [vmem:[#allocation481_spill] sm:$0xff]  ;;  %v10730_v24 = vld [vmem:[#allocation482_spill] sm:$0xff]  ;;  %v10731_v44 = vld [vmem:[#allocation483_spill] sm:$0xff] }
 0x41d   : > { %v4624_v16 = vpop.f32.mrf.mxu1  ;;  %4998 = vmatprep.subr.bf16.mxu1 %v10715_v0  ;;  %v4575_v46 = vpop.f32.mrf.mxu0  ;;  %v10732_v28 = vld [vmem:[#allocation484_spill] sm:$0xff]  ;;  %v10735_v0 = vld [vmem:[#allocation487_spill] sm:$0xff] }
 0x41e   : > { %v8988_v53 = vadd.f32 %v4624_v16, %v4574_v63  ;;  %v4576_v22 = vadd.f32 %v4575_v46, %v8904_v48  ;;  %4948 = vmatpush1.bf16.msra.mxu0 %v8152_v25  ;;  %v10733_v63 = vld [vmem:[#allocation485_spill] sm:$0xff]  ;;  %v10734_v16 = vld [vmem:[#allocation486_spill] sm:$0xff]  ;;  %v10736_v46 = vld [vmem:[#allocation488_spill] sm:$0xff] }
 0x41f   : > { %v4626_v3 = vpop.f32.mrf.mxu1  ;;  %v4577_v59 = vpop.f32.mrf.mxu0  ;;  %4949 = vmatprep.subr.bf16.mxu0 %v8158_v32 }
 0x420   : > { %4999 = vmatpush1.bf16.msra.mxu1 %v10716_v55  ;;  %v8994_v23 = vadd.f32 %v4626_v3, %v4576_v22  ;;  %v4578_v42 = vadd.f32 %v4577_v59, %v8909_v50  ;;  %v10737_v22 = vld [vmem:[#allocation489_spill] sm:$0xff]  ;;  %v10738_v3 = vld [vmem:[#allocation490_spill] sm:$0xff]  ;;  %v10739_v55 = vld [vmem:[#allocation491_spill] sm:$0xff] }
 0x421   : > { %v4628_v9 = vpop.f32.mrf.mxu1  ;;  %5000 = vmatprep.subr.bf16.mxu1 %v8163_v60  ;;  %v4581_v10 = vpop.f32.mrf.mxu0  ;;  %4886 = vmatmul.mubr.bf16.gmra.mxu0 %v10312_v39  ;;  %v10740_v59 = vld [vmem:[#allocation492_spill] sm:$0xff] }
 0x422   : > { %v8999_v17 = vadd.f32 %v4628_v9, %v4578_v42  ;;  %v4582_v48 = vadd.f32 %v4581_v10, %v8917_v2  ;;  %4950 = vmatpush1.bf16.msra.mxu0 %v8173_v49  ;;  %4977 = vmatprep.mubr.bf16.mxu0 %v10320_v20  ;;  %v10718_v2 = vld [vmem:[#allocation470_spill] sm:$0xff]  ;;  %v10721_v20 = vld [vmem:[#allocation473_spill] sm:$0xff]  ;;  %v10743_v10 = vld [vmem:[#allocation495_spill] sm:$0xff] }
 0x423   : > { %v4632_v25 = vpop.f32.mrf.mxu1  ;;  %4937 = vmatmul.mubr.bf16.gmra.mxu1 %v10315_v36  ;;  %v4583_v32 = vpop.f32.mrf.mxu0  ;;  %4951 = vmatprep.subr.bf16.mxu0 %v8179_v40  ;;  %v10717_v40 = vld [vmem:[#allocation469_spill] sm:$0xff]  ;;  %v10742_v9 = vld [vmem:[#allocation494_spill] sm:$0xff] }
 0x424   : > { %5001 = vmatpush1.bf16.msra.mxu1 %v8177_v38  ;;  %v4584_v50 = vadd.f32 %v4583_v32, %v8922_v35  ;;  %v9007_v60 = vadd.f32 %v4632_v25, %v4582_v48  ;;  %5028 = vmatprep.mubr.bf16.mxu1 %v10321_v21  ;;  %v10722_v21 = vld [vmem:[#allocation474_spill] sm:$0xff]  ;;  %v10741_v42 = vld [vmem:[#allocation493_spill] sm:$0xff]  ;;  %v10744_v48 = vld [vmem:[#allocation496_spill] sm:$0xff] }
 0x425   : > { %v4634_v34 = vpop.f32.mrf.mxu1  ;;  %5002 = vmatprep.subr.bf16.mxu1 %v8184_v57  ;;  %v4585_v39 = vpop.f32.mrf.mxu0  ;;  %v10720_v57 = vld [vmem:[#allocation472_spill] sm:$0xff]  ;;  %v10745_v25 = vld [vmem:[#allocation497_spill] sm:$0xff]  ;;  %v10746_v32 = vld [vmem:[#allocation498_spill] sm:$0xff] }
 0x426   : > { %v9012_v49 = vadd.f32 %v4634_v34, %v4584_v50  ;;  %4952 = vmatpush1.bf16.msra.mxu0 %v8186_v15  ;;  %v10724_v15 = vld [vmem:[#allocation476_spill] sm:$0xff]  ;;  %v10747_v50 = vld [vmem:[#allocation499_spill] sm:$0xff]  ;;  %v10749_v39 = vld [vmem:[#allocation501_spill] sm:$0xff] }
 0x427   : > { %v4636_v38 = vpop.f32.mrf.mxu1  ;;  %4953 = vmatprep.subr.bf16.mxu0 %v10717_v40  ;;  %v4586_v36 = vpop.f32.mrf.mxu0  ;;  %v10748_v34 = vld [vmem:[#allocation500_spill] sm:$0xff]  ;;  %v10751_v40 = vld [vmem:[#allocation503_spill] sm:$0xff] }
 0x428   : > { %5003 = vmatpush1.bf16.msra.mxu1 %v8198_v62  ;;  %v10726_v62 = vld [vmem:[#allocation478_spill] sm:$0xff] }
 0x429   : > { %5004 = vmatprep.subr.bf16.mxu1 %v10718_v2  ;;  %v4637_v35 = vpop.f32.mrf.mxu1  ;;  %v10750_v38 = vld [vmem:[#allocation502_spill] sm:$0xff] }
 0x42a   : > { %4954 = vmatpush1.bf16.msra.mxu0 %v10719_v56  ;;  %v10754_v36 = vld [vmem:[#allocation506_spill] sm:$0xff]  ;;  %v5196_v35 = vld [vmem:[#allocation7 + $0xe8] sm:$0xff] }
 0x42b   : > { %4955 = vmatprep.subr.bf16.mxu0 %v10721_v20 }
 0x42c   : > { %5005 = vmatpush1.bf16.msra.mxu1 %v10720_v57 }
 0x42d   : > { %5006 = vmatprep.subr.bf16.mxu1 %v10722_v21  ;;  %v5195_v21 = vld [vmem:[#allocation7 + $0xe0] sm:$0xff] }
 0x42e   : > { %4956 = vmatpush1.bf16.msra.mxu0 %v10723_v47  ;;  %v10756_v47 = vld [vmem:[#allocation14_spill] sm:$0xff] }
 0x42f   : > { %4957 = vmatprep.subr.bf16.mxu0 %v10725_v12  ;;  %v5179_v12 = vld [vmem:[#allocation7 + $0x60] sm:$0xff] }
 0x430   : > { %5007 = vmatpush1.bf16.msra.mxu1 %v10724_v15 }
 0x431   : > { %5008 = vmatprep.subr.bf16.mxu1 %v10726_v62 }
 0x432   : > { %4958 = vmatpush1.bf16.msra.mxu0 %v10727_v8  ;;  %v5194_v8 = vld [vmem:[#allocation7 + $0xd8] sm:$0xff] }
 0x433   : > { %4959 = vmatprep.subr.bf16.mxu0 %v10729_v41  ;;  %v5178_v41 = vld [vmem:[#allocation7 + $0x58] sm:$0xff] }
 0x434   : > { %5009 = vmatpush1.bf16.msra.mxu1 %v10728_v7 }
 0x435   : > { %5010 = vmatprep.subr.bf16.mxu1 %v10730_v24  ;;  %v10757_v24 = vld [vmem:[#allocation16_spill] sm:$0xff] }
 0x436   : > { %4960 = vmatpush1.bf16.msra.mxu0 %v10731_v44 }
 0x437   : > { %4961 = vmatprep.subr.bf16.mxu0 %v10733_v63  ;;  %v5193_v63 = vld [vmem:[#allocation7 + $0xd0] sm:$0xff] }
 0x438   : > { %5011 = vmatpush1.bf16.msra.mxu1 %v10732_v28 }
 0x439   : > { %5012 = vmatprep.subr.bf16.mxu1 %v10734_v16 }
 0x43a   : > { %4962 = vmatpush2.bf16.msra.mxu0 %v10735_v0  ;;  %v5177_v0 = vld [vmem:[#allocation7 + $0x50] sm:$0xff] }
 0x43b   : > { %4963 = vmatprep.subr.bf16.mxu0 %v10737_v22 }
 0x43c   : > { %5013 = vmatpush2.bf16.msra.mxu1 %v10736_v46 }
 0x43d   : > { %5014 = vmatprep.subr.bf16.mxu1 %v10738_v3  ;;  %v5192_v3 = vld [vmem:[#allocation7 + $0xc8] sm:$0xff] }
 0x43e   : > { %4964 = vmatpush2.bf16.msra.mxu0 %v10739_v55 }
 0x43f   : > { %4965 = vmatprep.subr.bf16.mxu0 %v10741_v42  ;;  %v5191_v42 = vld [vmem:[#allocation7 + $0xc0] sm:$0xff] }
 0x440   : > { %5015 = vmatpush2.bf16.msra.mxu1 %v10740_v59 }
 0x441   : > { %5016 = vmatprep.subr.bf16.mxu1 %v10742_v9  ;;  %v5175_v9 = vld [vmem:[#allocation7 + $0x40] sm:$0xff] }
 0x442   : > { %4966 = vmatpush2.bf16.msra.mxu0 %v10743_v10 }
 0x443   : > { %4967 = vmatprep.subr.bf16.mxu0 %v10745_v25  ;;  %v5230_v25 = vld [vmem:[#allocation7 + $0x1f8] sm:$0xff] }
 0x444   : > { %5017 = vmatpush2.bf16.msra.mxu1 %v10744_v48  ;;  %v5190_v48 = vld [vmem:[#allocation7 + $0xb8] sm:$0xff] }
 0x445   : > { %5018 = vmatprep.subr.bf16.mxu1 %v10746_v32  ;;  %v5214_v32 = vld [vmem:[#allocation7 + $0x178] sm:$0xff] }
 0x446   : > { %4968 = vmatpush2.bf16.msra.mxu0 %v10747_v50  ;;  %v5174_v50 = vld [vmem:[#allocation7 + $0x38] sm:$0xff] }
 0x447   : > { %4969 = vmatprep.subr.bf16.mxu0 %v10749_v39  ;;  %v5173_v39 = vld [vmem:[#allocation7 + $0x30] sm:$0xff] }
 0x448   : > { %5019 = vmatpush2.bf16.msra.mxu1 %v10748_v34  ;;  %v5189_v34 = vld [vmem:[#allocation7 + $0xb0] sm:$0xff] }
 0x449   : > { %5020 = vmatprep.subr.bf16.mxu1 %v10750_v38  ;;  %v5188_v38 = vld [vmem:[#allocation7 + $0xa8] sm:$0xff] }
 0x44a   : > { %4970 = vmatpush2.bf16.msra.mxu0 %v8308_v31  ;;  %v10752_v31 = vld [vmem:[#allocation504_spill] sm:$0xff] }
 0x44b   : > { %4971 = vmatprep.subr.bf16.mxu0 %v8314_v37  ;;  %v10753_v37 = vld [vmem:[#allocation505_spill] sm:$0xff] }
 0x44c   : > { %5021 = vmatpush2.bf16.msra.mxu1 %v8312_v13  ;;  %v5198_v13 = vld [vmem:[#allocation7 + $0xf8] sm:$0xff] }
 0x44d   : > { %5022 = vmatprep.subr.bf16.mxu1 %v10751_v40  ;;  %v5172_v40 = vld [vmem:[#allocation7 + $0x28] sm:$0xff] }
 0x44e   : > { %4972 = vmatpush2.bf16.msra.mxu0 %v8320_v33  ;;  %v5182_v33 = vld [vmem:[#allocation7 + $0x78] sm:$0xff] }
 0x44f   : > { %4973 = vmatprep.subr.bf16.mxu0 %v8326_v61  ;;  %v5197_v61 = vld [vmem:[#allocation7 + $0xf0] sm:$0xff] }
 0x450   : > { %5023 = vmatpush2.bf16.msra.mxu1 %v8324_v51 }
 0x451   : > { %5024 = vmatprep.subr.bf16.mxu1 %v8329_v45  ;;  %v10755_v45 = vld [vmem:[#allocation12_spill] sm:$0xff] }
 0x452   : > { %4974 = vmatpush2.bf16.msra.mxu0 %v8332_v1 }
 0x453   : > { %4975 = vmatprep.subr.bf16.mxu0 %v8338_v43 }
 0x454   : > { %5025 = vmatpush2.bf16.msra.mxu1 %v8336_v54  ;;  %v5181_v54 = vld [vmem:[#allocation7 + $0x70] sm:$0xff] }
 0x455   : > { %5026 = vmatprep.subr.bf16.mxu1 %v10752_v31  ;;  %v5187_v31 = vld [vmem:[#allocation7 + $0xa0] sm:$0xff] }
 0x456   : > { %4976 = vmatpush2.bf16.msra.mxu0 %v10753_v37  ;;  %v5186_v37 = vld [vmem:[#allocation7 + $0x98] sm:$0xff] }
 0x457   : > { %6041 = vmatprep.subr.mxu0 %v5198_v13  ;;  %v5171_v13 = vld [vmem:[#allocation7 + $0x20] sm:$0xff] }
 0x458   : > { %5027 = vmatpush2.bf16.msra.mxu1 %v10754_v36  ;;  %v5170_v36 = vld [vmem:[#allocation7 + $0x18] sm:$0xff] }
 0x459   : > { %v4673_v51 = vpop.f32.mrf.mxu0  ;;  %4978 = vmatmul.mubr.bf16.vlgmr.msra.gmra.mxu0 %v10374_v11  ;;  %v5180_v11 = vld [vmem:[#allocation7 + $0x68] sm:$0xff]  ;;  %6082 = vmatprep.subr.mxu1 %v5230_v25 }
 0x45a   : > { %v4674_v2 = vadd.f32 %v4673_v51, %v10755_v45  ;;  %4987 = vmatprep.mubr.bf16.mxu0 %v10380_v27  ;;  %6042 = vmatpush3.msra.mxu0 %v5182_v33  ;;  %v5185_v33 = vld [vmem:[#allocation7 + $0x90] sm:$0xff]  ;;  %v5168_v45 = vld [vmem:[#allocation7 + $0x8] sm:$0xff] }
 0x45b   : > { %v4724_v1 = vpop.f32.mrf.mxu1  ;;  %5029 = vmatmul.mubr.bf16.vlgmr.msra.gmra.mxu1 %v10375_v52  ;;  %v9068_v43 = vpop.f32.mrf.mxu0  ;;  %6043 = vmatprep.subr.mxu0 %v5197_v61  ;;  %v5169_v51 = vld [vmem:[#allocation7 + $0x10] sm:$0xff]  ;;  %v5184_v61 = vld [vmem:[#allocation7 + $0x88] sm:$0xff] }
 0x45c   : > { %5038 = vmatprep.mubr.bf16.mxu1 %v10381_v29  ;;  %v9071_v56 = vadd.f32 %v4724_v1, %v4674_v2  ;;  %6044 = vmatpush3.msra.mxu0 %v5181_v54  ;;  %v5183_v2 = vld [vmem:[#allocation7 + $0x80] sm:$0xff]  ;;  %v10758_v54 = vld [vmem:[#allocation13_spill] sm:$0xff] }
 0x45d   : > { %v9073_v57 = vpop.f32.mrf.mxu1  ;;  %v4677_v20 = vpop.f32.mrf.mxu0  ;;  %6045 = vmatprep.subr.mxu0 %v5196_v35  ;;  %6083 = vmatpush3.msra.mxu1 %v5214_v32  ;;  %v5167_v1 = vld [vmem:[#allocation7] sm:$0xff]  ;;  %v4676_v35 = vadd.f32 %v9068_v43, %v10758_v54  ;;  %v5212_v43 = vld [vmem:[#allocation7 + $0x168] sm:$0xff] }
 0x45e   : > { %v4678_v52 = vadd.f32 %v4677_v20, %v10756_v47  ;;  %6046 = vmatpush3.msra.mxu0 %v5180_v11  ;;  %v5229_v20 = vld [vmem:[#allocation7 + $0x1f0] sm:$0xff]  ;;  %v10759_v47 = vld [vmem:[#allocation15_spill] sm:$0xff] }
 0x45f   : > { %v4728_v15 = vpop.f32.mrf.mxu1  ;;  %v9076_v27 = vpop.f32.mrf.mxu0  ;;  %6047 = vmatprep.subr.mxu0 %v5195_v21  ;;  %v4727_v21 = vadd.f32 %v9073_v57, %v4676_v35  ;;  %6084 = vmatprep.subr.mxu1 %v5229_v20  ;;  %v10760_v57 = vld [vmem:[#allocation17_spill] sm:$0xff] }
 0x460   : > { %v9078_v29 = vadd.f32 %v4728_v15, %v4678_v52  ;;  %6048 = vmatpush3.msra.mxu0 %v5179_v12  ;;  %v4680_v52 = vadd.f32 %v9076_v27, %v10759_v47  ;;  %v5055_v47 = vmul.f32 %v8827_v18, %v8827_v18  ;;  %v5205_v18 = vld [vmem:[#allocation7 + $0x130] sm:$0xff] }
 0x461   : > { %v9080_v62 = vpop.f32.mrf.mxu1  ;;  %v4683_v7 = vpop.f32.mrf.mxu0  ;;  %4988 = vmatmul.mubr.bf16.gmra.mxu0 %v10386_v14  ;;  %6049 = vmatprep.subr.mxu0 %v5194_v8  ;;  %v5176_v14 = vld [vmem:[#allocation7 + $0x48] sm:$0xff]  ;;  %v5213_v8 = vld [vmem:[#allocation7 + $0x170] sm:$0xff] }
 0x462   : > { %v4684_v44 = vadd.f32 %v4683_v7, %v10757_v24  ;;  %6050 = vmatpush3.msra.mxu0 %v5178_v41  ;;  %6085 = vmatpush3.msra.mxu1 %v5213_v8  ;;  %v5228_v41 = vld [vmem:[#allocation7 + $0x1e8] sm:$0xff]  ;;  %v5056_v8 = vmul.f32 %v8832_v4, %v8832_v4 }
 0x463   : > { %5039 = vmatmul.mubr.bf16.gmra.mxu1 %v10388_v6  ;;  %v4734_v28 = vpop.f32.mrf.mxu1  ;;  %v9085_v16 = vpop.f32.mrf.mxu0  ;;  %6051 = vmatprep.subr.mxu0 %v5193_v63  ;;  %v5047_v63 = vmul.f32 %v8802_v19, %v8802_v19  ;;  %v5226_v19 = vld [vmem:[#allocation7 + $0x1d8] sm:$0xff]  ;;  %v5204_v4 = vld [vmem:[#allocation7 + $0x128] sm:$0xff] }
 0x464   : > { %v9087_v46 = vadd.f32 %v4734_v28, %v4684_v44  ;;  %6052 = vmatpush3.msra.mxu0 %v5177_v0  ;;  %6086 = vmatprep.subr.mxu1 %v5228_v41  ;;  %v4686_v0 = vadd.f32 %v9085_v16, %v10760_v57  ;;  %v5219_v57 = vld [vmem:[#allocation7 + $0x1a0] sm:$0xff] }
 0x465   : > { %v9089_v22 = vpop.f32.mrf.mxu1  ;;  %v4687_v55 = vpop.f32.mrf.mxu0  ;;  %6053 = vmatprep.subr.mxu0 %v5192_v3  ;;  %6087 = vmatpush3.msra.mxu1 %v5212_v43  ;;  %v4731_v3 = vadd.f32 %v9080_v62, %v4680_v52  ;;  %v5210_v62 = vld [vmem:[#allocation7 + $0x158] sm:$0xff] }
 0x466   : > { %6054 = vmatpush3.msra.mxu0 %v5176_v14 }
 0x467   : > { %v4738_v59 = vpop.f32.mrf.mxu1  ;;  %v4688_v6 = vpop.f32.mrf.mxu0  ;;  %6055 = vmatprep.subr.mxu0 %v5191_v42 }
 0x468   : > { %6056 = vmatpush3.msra.mxu0 %v5175_v9  ;;  %v5211_v6 = vld [vmem:[#allocation7 + $0x160] sm:$0xff]  ;;  %v5048_v9 = vmul.f32 %v8808_v26, %v8808_v26 }
 0x469   : > { %v4739_v10 = vpop.f32.mrf.mxu1  ;;  %6057 = vmatprep.subr.mxu0 %v5190_v48 }
 0x46a   : > { %6058 = vmatpush3.msra.mxu0 %v5174_v50 }
 0x46b   : > { %6059 = vmatprep.subr.mxu0 %v5189_v34  ;;  %v4737_v34 = vadd.f32 %v9089_v22, %v4686_v0  ;;  %v5224_v22 = vld [vmem:[#allocation7 + $0x1c8] sm:$0xff]  ;;  %v5203_v0 = vld [vmem:[#allocation7 + $0x120] sm:$0xff] }
 0x46c   : > { %6060 = vmatpush3.msra.mxu0 %v5173_v39 }
 0x46d   : > { %6061 = vmatprep.subr.mxu0 %v5188_v38  ;;  %v5225_v38 = vld [vmem:[#allocation7 + $0x1d0] sm:$0xff] }
 0x46e   : > { %6062 = vmatpush3.msra.mxu0 %v5172_v40 }
 0x46f   : > { %6063 = vmatprep.subr.mxu0 %v5187_v31 }
 0x470   : > { %6064 = vmatpush3.msra.mxu0 %v5171_v13 }
 0x471   : > { %6065 = vmatprep.subr.mxu0 %v5186_v37  ;;  %v5209_v37 = vld [vmem:[#allocation7 + $0x150] sm:$0xff] }
 0x472   : > { %6066 = vmatpush3.msra.mxu0 %v5170_v36  ;;  %v5052_v36 = vmul.f32 %v8819_v30, %v8819_v30 }
 0x473   : > { %6067 = vmatprep.subr.mxu0 %v5185_v33 }
 0x474   : > { %6068 = vmatpush3.msra.mxu0 %v5169_v51 }
 0x475   : > { %6069 = vmatprep.subr.mxu0 %v5184_v61 }
 0x476   : > { %6070 = vmatpush3.msra.mxu0 %v5168_v45 }
 0x477   : > { %6071 = vmatprep.subr.mxu0 %v5183_v2 }
 0x478   : > { %6072 = vmatpush3.msra.mxu0 %v5167_v1  ;;  %v5208_v1 = vld [vmem:[#allocation7 + $0x148] sm:$0xff] }
 0x499   : > { %v4775_v11 = vpop.f32.mrf.mxu0 }
 0x49a   : > { %v4776_v15 = vadd.f32 %v4775_v11, %v9071_v56  ;;  %v5227_v56 = vld [vmem:[#allocation7 + $0x1e0] sm:$0xff] }
 0x49b   : > { %v4826_v12 = vpop.f32.mrf.mxu1  ;;  %v4777_v7 = vpop.f32.mrf.mxu0  ;;  %6088 = vmatprep.subr.mxu1 %v5227_v56  ;;  %v5223_v11 = vld [vmem:[#allocation7 + $0x1c0] sm:$0xff]  ;;  %v5202_v56 = vld [vmem:[#allocation7 + $0x118] sm:$0xff] }
 0x49c   : > { %v4827_v24 = vadd.f32 %v4826_v12, %v4776_v15  ;;  %v4778_v44 = vadd.f32 %v4777_v7, %v4727_v21  ;;  %6089 = vmatpush3.msra.mxu1 %v5211_v6  ;;  %v5207_v21 = vld [vmem:[#allocation7 + $0x140] sm:$0xff]  ;;  %v5222_v12 = vld [vmem:[#allocation7 + $0x1b8] sm:$0xff]  ;;  %v5216_v6 = vld [vmem:[#allocation7 + $0x188] sm:$0xff] }
 0x49d   : > { %v4828_v28 = vpop.f32.mrf.mxu1  ;;  %v4779_v27 = vpop.f32.mrf.mxu0  ;;  %6090 = vmatprep.subr.mxu1 %v5226_v19 }
 0x49e   : > { %v5059_v55 = vmul.f32 %v4827_v24, %v4827_v24  ;;  %v4829_v14 = vadd.f32 %v4828_v28, %v4778_v44  ;;  %v4780_v59 = vadd.f32 %v4779_v27, %v9078_v29  ;;  %v5051_v29 = vmul.f32 %v8814_v5, %v8814_v5  ;;  %6091 = vmatpush3.msra.mxu1 %v5210_v62  ;;  %v5206_v24 = vld [vmem:[#allocation7 + $0x138] sm:$0xff]  ;;  %v5221_v28 = vld [vmem:[#allocation7 + $0x1b0] sm:$0xff] }
 0x49f   : > { %v4830_v42 = vpop.f32.mrf.mxu1  ;;  %v4781_v10 = vpop.f32.mrf.mxu0  ;;  %6092 = vmatprep.subr.mxu1 %v5225_v38  ;;  %v5218_v27 = vld [vmem:[#allocation7 + $0x198] sm:$0xff] }
 0x4a0   : > { %v9105_v48 = vadd.f32 %v5059_v55, %v5047_v63  ;;  %v5060_v16 = vmul.f32 %v4829_v14, %v4829_v14  ;;  %v4831_v25 = vadd.f32 %v4830_v42, %v4780_v59  ;;  %v4782_v32 = vadd.f32 %v4781_v10, %v4731_v3  ;;  %6093 = vmatpush3.msra.mxu1 %v5209_v37  ;;  %v5220_v63 = vld [vmem:[#allocation7 + $0x1a8] sm:$0xff]  ;;  %v5217_v55 = vld [vmem:[#allocation7 + $0x190] sm:$0xff] }
 0x4a1   : > { %v4832_v50 = vpop.f32.mrf.mxu1  ;;  %v4785_v39 = vpop.f32.mrf.mxu0  ;;  %6094 = vmatprep.subr.mxu1 %v5224_v22  ;;  %v5201_v59 = vld [vmem:[#allocation7 + $0x110] sm:$0xff]  ;;  %v5200_v10 = vld [vmem:[#allocation7 + $0x108] sm:$0xff] }
 0x4a2   : > { %6219 = vrsqrt.f32 %v9105_v48  ;;  %v9111_v26 = vadd.f32 %v5060_v16, %v5048_v9  ;;  %v5063_v40 = vmul.f32 %v4831_v25, %v4831_v25  ;;  %v4833_v31 = vadd.f32 %v4832_v50, %v4782_v32  ;;  %6095 = vmatpush3.msra.mxu1 %v5208_v1  ;;  %v5215_v32 = vld [vmem:[#allocation7 + $0x180] sm:$0xff] }
 0x4a3   : > { %v4836_v13 = vpop.f32.mrf.mxu1  ;;  %v4786_v33 = vadd.f32 %v4785_v39, %v9087_v46  ;;  %v4787_v5 = vpop.f32.mrf.mxu0  ;;  %6096 = vmatprep.subr.mxu1 %v5223_v11  ;;  %vm5085_vm0 = vcmp.eq.f32.partialorder %v9105_v48, inf  ;;  %v5088_v62 = vand.u32 2147483648, %v9105_v48  ;;  %vm5087_vm3 = vcmp.eq.f32.partialorder %v9105_v48, 0.0 }
 0x4a4   : > { %6221 = vrsqrt.f32 %v9111_v26  ;;  %v9117_v51 = vadd.f32 %v5063_v40, %v5051_v29  ;;  %v5064_v61 = vmul.f32 %v4833_v31, %v4833_v31  ;;  %v4788_v45 = vadd.f32 %v4787_v5, %v4737_v34  ;;  %6097 = vmatpush3.msra.mxu1 %v5207_v21  ;;  %v5199_v34 = vld [vmem:[#allocation7 + $0x100] sm:$0xff] }
 0x4a5   : > { %v4838_v2 = vpop.f32.mrf.mxu1  ;;  %v4837_v54 = vadd.f32 %v4836_v13, %v4786_v33  ;;  %v4789_v35 = vpop.f32.mrf.mxu0  ;;  %6098 = vmatprep.subr.mxu1 %v5222_v12  ;;  %vm5092_vm1 = vcmp.eq.f32.partialorder %v9111_v26, inf  ;;  %v5095_v16 = vand.u32 2147483648, %v9111_v26  ;;  %vm5094_vm2 = vcmp.eq.f32.partialorder %v9111_v26, 0.0 }
 0x4a6   : > { %6223 = vrsqrt.f32 %v9117_v51  ;;  %v9120_v30 = vadd.f32 %v5064_v61, %v5052_v36  ;;  %v4839_v46 = vadd.f32 %v4838_v2, %v4788_v45  ;;  %6099 = vmatpush3.msra.mxu1 %v5206_v24  ;;  %vm5113_vm4 = vcmp.eq.f32.partialorder %v9117_v51, inf }
 0x4a7   : > { %v4840_v20 = vpop.f32.mrf.mxu1  ;;  %v5067_v52 = vmul.f32 %v4837_v54, %v4837_v54  ;;  %v4790_v15 = vpop.f32.mrf.mxu0  ;;  %6100 = vmatprep.subr.mxu1 %v5221_v28  ;;  %vm5115_vm7 = vcmp.eq.f32.partialorder %v9117_v51, 0.0 }
 0x4a8   : > { %6225 = vrsqrt.f32 %v9120_v30  ;;  %v5068_v7 = vmul.f32 %v4839_v46, %v4839_v46  ;;  %6101 = vmatpush3.msra.mxu1 %v5205_v18  ;;  %vm5120_vm5 = vcmp.eq.f32.partialorder %v9120_v30, inf  ;;  %vm5122_vm6 = vcmp.eq.f32.partialorder %v9120_v30, 0.0  ;;  %v10761_v46 = vld [vmem:[#allocation18_spill] sm:$0xff] }
 0x4a9   : > { %v4841_v41 = vpop.f32.mrf.mxu1  ;;  %v9127_v44 = vadd.f32 %v5067_v52, %v5055_v47  ;;  %6102 = vmatprep.subr.mxu1 %v5220_v63  ;;  %v10763_v63 = vld [vmem:[#allocation22_spill] sm:$0xff] }
 0x4aa   : > { %v9129_v43 = vadd.f32 %v5068_v7, %v5056_v8  ;;  %6103 = vmatpush3.msra.mxu1 %v5204_v4  ;;  %v10762_v8 = vld [vmem:[#allocation20_spill] sm:$0xff] }
 0x4ab   : > { %6227 = vrsqrt.f32 %v9127_v44  ;;  %6104 = vmatprep.subr.mxu1 %v5219_v57  ;;  %vm5141_vm8 = vcmp.eq.f32.partialorder %v9127_v44, inf  ;;  %vm5143_vm11 = vcmp.eq.f32.partialorder %v9127_v44, 0.0 }
 0x4ac   : > { %6229 = vrsqrt.f32 %v9129_v43  ;;  %6105 = vmatpush3.msra.mxu1 %v5203_v0  ;;  %vm5148_vm9 = vcmp.eq.f32.partialorder %v9129_v43, inf  ;;  %v5151_v2 = vand.u32 2147483648, %v9129_v43  ;;  %vm5150_vm10 = vcmp.eq.f32.partialorder %v9129_v43, 0.0 }
 0x4ad   : > { %6106 = vmatprep.subr.mxu1 %v5218_v27 }
 0x4ae   : > { %6107 = vmatpush3.msra.mxu1 %v5202_v56 }
 0x4af   : > { %v6220_v3 = vpop.eup %6219  ;;  %6108 = vmatprep.subr.mxu1 %v5217_v55 }
 0x4b0   : > { %v5084_v14 = vmul.f32 %v6220_v3, %v9105_v48  ;;  %6109 = vmatpush3.msra.mxu1 %v5201_v59  ;;  %v10764_v59 = vld [vmem:[#allocation19_spill] sm:$0xff] }
 0x4b1   : > { %v6222_v42 = vpop.eup %6221  ;;  %6110 = vmatprep.subr.mxu1 %v5216_v6 }
 0x4b2   : > { %v5091_v9 = vmul.f32 %v6222_v42, %v9111_v26  ;;  %v5086_v25 = vsel %vm5085_vm0, %v9105_v48, %v5084_v14  ;;  %6111 = vmatpush3.msra.mxu1 %v5200_v10  ;;  %v5116_v48 = vand.u32 2147483648, %v9117_v51  ;;  %v10765_v10 = vld [vmem:[#allocation21_spill] sm:$0xff] }
 0x4b3   : > { %v6224_v19 = vpop.eup %6223  ;;  %v5089_v40 = vsel %vm5087_vm3, %v5088_v62, %v5086_v25  ;;  %6112 = vmatprep.subr.mxu1 %v5215_v32 }
 0x4b4   : > { %v5093_v50 = vsel %vm5092_vm1, %v9111_v26, %v5091_v9  ;;  %v5112_v29 = vmul.f32 %v6224_v19, %v9117_v51  ;;  %v5123_v26 = vand.u32 2147483648, %v9120_v30  ;;  %6113 = vmatpush3.msra.mxu1 %v5199_v34  ;;  %v5049_v34 = vmul.f32 %v8982_v58, %v8982_v58 }
 0x4b5   : > { %v6226_v39 = vpop.eup %6225  ;;  %v5096_v38 = vsel %vm5094_vm2, %v5095_v16, %v5093_v50  ;;  %v5053_v58 = vmul.f32 %v8994_v23, %v8994_v23 }
 0x4b6   : > { %5295 = vmatprep.mubr.f32.mxu0 %v5096_v38  ;;  %v5119_v31 = vmul.f32 %v6226_v39, %v9120_v30  ;;  %v5114_v13 = vsel %vm5113_vm4, %v9117_v51, %v5112_v29  ;;  %v5144_v51 = vand.u32 2147483648, %v9127_v44  ;;  %v10766_v39 = vld [vmem:[#allocation23_spill] sm:$0xff] }
 0x4b7   : > { %5296 = vmatmul.mubr.f32.vlgmr.msra.gmra.mxu0 %v5089_v40  ;;  %v5117_v61 = vsel %vm5115_vm7, %v5116_v48, %v5114_v13  ;;  %v5050_v48 = vmul.f32 %v8988_v53, %v8988_v53 }
 0x4b8   : > { %v6228_v37 = vpop.eup %6227  ;;  %v5121_v36 = vsel %vm5120_vm5, %v9120_v30, %v5119_v31 }
 0x4b9   : > { %v6230_v33 = vpop.eup %6229  ;;  %v5124_v5 = vsel %vm5122_vm6, %v5123_v26, %v5121_v36  ;;  %v5140_v22 = vmul.f32 %v6228_v37, %v9127_v44 }
 0x4ba   : > { %5300 = vmatprep.mubr.f32.mxu0 %v5124_v5  ;;  %v5147_v45 = vmul.f32 %v6230_v33, %v9129_v43 }
 0x4bb   : > { %5301 = vmatmul.mubr.f32.gmra.mxu0 %v5117_v61  ;;  %v5142_v1 = vsel %vm5141_vm8, %v9127_v44, %v5140_v22 }
 0x4bc   : > { %v5149_v54 = vsel %vm5148_vm9, %v9129_v43, %v5147_v45  ;;  %v5145_v11 = vsel %vm5143_vm11, %v5144_v51, %v5142_v1 }
 0x4bd   : > { %v5152_v35 = vsel %vm5150_vm10, %v5151_v2, %v5149_v54 }
 0x4be   : > { %5305 = vmatprep.mubr.f32.mxu0 %v5152_v35 }
 0x4bf   : > { %5306 = vmatmul.mubr.f32.gmra.mxu0 %v5145_v11 }
 0x4d9   : > { %v4877_v30 = vpop.f32.mrf.mxu0 }
 0x4da   : > { %v4878_v20 = vadd.f32 %v4877_v30, %v10761_v46  ;;  %v5054_v46 = vmul.f32 %v8999_v17, %v8999_v17  ;;  %v5058_v17 = vmul.f32 %v9012_v49, %v9012_v49 }
 0x4db   : > { %v4928_v21 = vpop.f32.mrf.mxu1  ;;  %v4879_v47 = vpop.f32.mrf.mxu0 }
 0x4dc   : > { %v4929_v52 = vadd.f32 %v4928_v21, %v4878_v20  ;;  %v4880_v42 = vadd.f32 %v4879_v47, %v10764_v59 }
 0x4dd   : > { %v4930_v15 = vpop.f32.mrf.mxu1  ;;  %v4881_v12 = vpop.f32.mrf.mxu0 }
 0x4de   : > { %v4882_v7 = vadd.f32 %v4881_v12, %v10762_v8  ;;  %v4931_v9 = vadd.f32 %v4930_v15, %v4880_v42 }
 0x4df   : > { %v4932_v41 = vpop.f32.mrf.mxu1  ;;  %v4883_v24 = vpop.f32.mrf.mxu0 }
 0x4e0   : > { %v4933_v28 = vadd.f32 %v4932_v41, %v4882_v7  ;;  %v4884_v19 = vadd.f32 %v4883_v24, %v10765_v10  ;;  %v5057_v24 = vmul.f32 %v9007_v60, %v9007_v60 }
 0x4e1   : > { %v4934_v43 = vpop.f32.mrf.mxu1  ;;  %v4887_v18 = vpop.f32.mrf.mxu0 }
 0x4e2   : > { %v4888_v44 = vadd.f32 %v4887_v18, %v10763_v63  ;;  %v4935_v31 = vadd.f32 %v4934_v43, %v4884_v19 }
 0x4e3   : > { %v4938_v4 = vpop.f32.mrf.mxu1  ;;  %v4889_v57 = vpop.f32.mrf.mxu0 }
 0x4e4   : > { %v4939_v0 = vadd.f32 %v4938_v4, %v4888_v44  ;;  %v4890_v38 = vadd.f32 %v4889_v57, %v10766_v39 }
 0x4e5   : > { %v4940_v27 = vpop.f32.mrf.mxu1  ;;  %v4891_v56 = vpop.f32.mrf.mxu0 }
 0x4e6   : > { %v4941_v1 = vadd.f32 %v4940_v27, %v4890_v38 }
 0x4e7   : > { %v4942_v3 = vpop.f32.mrf.mxu1  ;;  %v4892_v55 = vpop.f32.mrf.mxu0 }
 0x4e9   : > { %v4943_v14 = vpop.f32.mrf.mxu1 }
 0x519   : > { %v4979_v6 = vpop.f32.mrf.mxu0 }
 0x51a   : > { %v4980_v16 = vadd.f32 %v4979_v6, %v4929_v52 }
 0x51b   : > { %v5030_v25 = vpop.f32.mrf.mxu1  ;;  %v4981_v32 = vpop.f32.mrf.mxu0 }
 0x51c   : > { %v5031_v50 = vadd.f32 %v5030_v25, %v4980_v16  ;;  %v4982_v62 = vadd.f32 %v4981_v32, %v4931_v9 }
 0x51d   : > { %v5032_v29 = vpop.f32.mrf.mxu1  ;;  %v4983_v40 = vpop.f32.mrf.mxu0 }
 0x51e   : > { %v5061_v26 = vmul.f32 %v5031_v50, %v5031_v50  ;;  %v5033_v13 = vadd.f32 %v5032_v29, %v4982_v62  ;;  %v4984_v37 = vadd.f32 %v4983_v40, %v4933_v28 }
 0x51f   : > { %v5034_v36 = vpop.f32.mrf.mxu1  ;;  %v4985_v33 = vpop.f32.mrf.mxu0 }
 0x520   : > { %v5073_v5 = vadd.f32 %v5061_v26, %v5049_v34  ;;  %v5062_v22 = vmul.f32 %v5033_v13, %v5033_v13  ;;  %v5035_v61 = vadd.f32 %v5034_v36, %v4984_v37  ;;  %v4986_v45 = vadd.f32 %v4985_v33, %v4935_v31 }
 0x521   : > { %v5036_v2 = vpop.f32.mrf.mxu1  ;;  %v4989_v54 = vpop.f32.mrf.mxu0 }
 0x522   : > { %6231 = vrsqrt.f32 %v5073_v5  ;;  %v5074_v51 = vadd.f32 %v5062_v22, %v5050_v48  ;;  %v5065_v35 = vmul.f32 %v5035_v61, %v5035_v61  ;;  %v5037_v11 = vadd.f32 %v5036_v2, %v4986_v45 }
 0x523   : > { %v5040_v30 = vpop.f32.mrf.mxu1  ;;  %v4990_v53 = vadd.f32 %v4989_v54, %v4939_v0  ;;  %v4991_v20 = vpop.f32.mrf.mxu0  ;;  %vm5099_vm12 = vcmp.eq.f32.partialorder %v5073_v5, inf  ;;  %v5102_v59 = vand.u32 2147483648, %v5073_v5  ;;  %vm5101_vm15 = vcmp.eq.f32.partialorder %v5073_v5, 0.0 }
 0x524   : > { %6233 = vrsqrt.f32 %v5074_v51  ;;  %v5077_v21 = vadd.f32 %v5065_v35, %v5053_v58  ;;  %v5066_v47 = vmul.f32 %v5037_v11, %v5037_v11  ;;  %v4992_v52 = vadd.f32 %v4991_v20, %v4941_v1 }
 0x525   : > { %v5042_v15 = vpop.f32.mrf.mxu1  ;;  %v5041_v12 = vadd.f32 %v5040_v30, %v4990_v53  ;;  %v4993_v8 = vpop.f32.mrf.mxu0  ;;  %vm5106_vm13 = vcmp.eq.f32.partialorder %v5074_v51, inf  ;;  %v5109_v60 = vand.u32 2147483648, %v5074_v51  ;;  %vm5108_vm14 = vcmp.eq.f32.partialorder %v5074_v51, 0.0 }
 0x526   : > { %6235 = vrsqrt.f32 %v5077_v21  ;;  %v5078_v23 = vadd.f32 %v5066_v47, %v5054_v46  ;;  %v5043_v7 = vadd.f32 %v5042_v15, %v4992_v52  ;;  %vm5127_vm0 = vcmp.eq.f32.partialorder %v5077_v21, inf }
 0x527   : > { %v5044_v41 = vpop.f32.mrf.mxu1  ;;  %v5069_v28 = vmul.f32 %v5041_v12, %v5041_v12  ;;  %v4994_v43 = vpop.f32.mrf.mxu0  ;;  %v5130_v50 = vand.u32 2147483648, %v5077_v21  ;;  %vm5129_vm3 = vcmp.eq.f32.partialorder %v5077_v21, 0.0 }
 0x528   : > { %6237 = vrsqrt.f32 %v5078_v23  ;;  %v5070_v18 = vmul.f32 %v5043_v7, %v5043_v7  ;;  %vm5134_vm1 = vcmp.eq.f32.partialorder %v5078_v23, inf  ;;  %v5137_v19 = vand.u32 2147483648, %v5078_v23 }
 0x529   : > { %v5045_v63 = vpop.f32.mrf.mxu1  ;;  %v5081_v44 = vadd.f32 %v5069_v28, %v5057_v24  ;;  %vm5136_vm2 = vcmp.eq.f32.partialorder %v5078_v23, 0.0 }
 0x52a   : > { %v5082_v4 = vadd.f32 %v5070_v18, %v5058_v17 }
 0x52b   : > { %6239 = vrsqrt.f32 %v5081_v44  ;;  %vm5155_vm4 = vcmp.eq.f32.partialorder %v5081_v44, inf  ;;  %v5158_v13 = vand.u32 2147483648, %v5081_v44  ;;  %vm5157_vm7 = vcmp.eq.f32.partialorder %v5081_v44, 0.0 }
 0x52c   : > { %6241 = vrsqrt.f32 %v5082_v4  ;;  %vm5162_vm5 = vcmp.eq.f32.partialorder %v5082_v4, inf  ;;  %v5165_v40 = vand.u32 2147483648, %v5082_v4  ;;  %vm5164_vm6 = vcmp.eq.f32.partialorder %v5082_v4, 0.0 }
 0x52f   : > { %v6232_v57 = vpop.eup %6231 }
 0x530   : > { %v5098_v0 = vmul.f32 %v6232_v57, %v5073_v5 }
 0x531   : > { %v6234_v27 = vpop.eup %6233 }
 0x532   : > { %v5105_v56 = vmul.f32 %v6234_v27, %v5074_v51  ;;  %v5100_v55 = vsel %vm5099_vm12, %v5073_v5, %v5098_v0 }
 0x533   : > { %v6236_v3 = vpop.eup %6235  ;;  %v5103_v9 = vsel %vm5101_vm15, %v5102_v59, %v5100_v55 }
 0x534   : > { %v5107_v14 = vsel %vm5106_vm13, %v5074_v51, %v5105_v56  ;;  %v5126_v49 = vmul.f32 %v6236_v3, %v5077_v21 }
 0x535   : > { %v6238_v42 = vpop.eup %6237  ;;  %v5110_v6 = vsel %vm5108_vm14, %v5109_v60, %v5107_v14 }
 0x536   : > { %5375 = vmatprep.mubr.f32.mxu1 %v5110_v6  ;;  %v5133_v10 = vmul.f32 %v6238_v42, %v5078_v23  ;;  %v5128_v16 = vsel %vm5127_vm0, %v5077_v21, %v5126_v49 }
 0x537   : > { %5376 = vmatmul.mubr.f32.vlgmr.msra.gmra.mxu1 %v5103_v9  ;;  %v5131_v39 = vsel %vm5129_vm3, %v5130_v50, %v5128_v16 }
 0x538   : > { %v6240_v25 = vpop.eup %6239  ;;  %v5135_v32 = vsel %vm5134_vm1, %v5078_v23, %v5133_v10 }
 0x539   : > { %v6242_v62 = vpop.eup %6241  ;;  %v5138_v29 = vsel %vm5136_vm2, %v5137_v19, %v5135_v32  ;;  %v5154_v34 = vmul.f32 %v6240_v25, %v5081_v44 }
 0x53a   : > { %5380 = vmatprep.mubr.f32.mxu1 %v5138_v29  ;;  %v5161_v38 = vmul.f32 %v6242_v62, %v5082_v4 }
 0x53b   : > { %5381 = vmatmul.mubr.f32.gmra.mxu1 %v5131_v39  ;;  %v5156_v31 = vsel %vm5155_vm4, %v5081_v44, %v5154_v34 }
 0x53c   : > { %v5163_v26 = vsel %vm5162_vm5, %v5082_v4, %v5161_v38  ;;  %v5159_v36 = vsel %vm5157_vm7, %v5158_v13, %v5156_v31 }
 0x53d   : > { %v5166_v37 = vsel %vm5164_vm6, %v5165_v40, %v5163_v26 }
 0x53e   : > { %5385 = vmatprep.mubr.f32.mxu1 %v5166_v37 }
 0x53f   : > { %5386 = vmatmul.mubr.f32.gmra.mxu1 %v5159_v36 }
 0x577   : > { %v6073_v48 = vpop.f32.mrf.mxu0 }
 0x579   : > { %v6074_v33 = vpop.f32.mrf.mxu0 }
 0x57a   : > { %v6075_v2 = vadd.f32 %v6074_v33, %v6073_v48 }
 0x57b   : > { %v6076_v5 = vpop.f32.mrf.mxu0 }
 0x57d   : > { %v6077_v22 = vpop.f32.mrf.mxu0 }
 0x57e   : > { %v6078_v11 = vadd.f32 %v6077_v22, %v6076_v5 }
 0x57f   : > { %v6079_v1 = vpop.f32.mrf.mxu0 }
 0x581   : > { %v6080_v46 = vpop.f32.mrf.mxu0 }
 0x582   : > { %v6081_v47 = vadd.f32 %v6080_v46, %v6079_v1 }
 0x5f7   : > { %v6114_v61 = vpop.f32.mrf.mxu1 }
 0x5f9   : > { %v6115_v45 = vpop.f32.mrf.mxu1 }
 0x5fa   : > { %v6116_v58 = vadd.f32 %v6115_v45, %v6114_v61 }
 0x5fb   : > { %v6117_v54 = vpop.f32.mrf.mxu1 }
 0x5fc   : > { %v5378_v51 = vadd.f32 %v6116_v58, %v6075_v2 }
 0x5fd   : > { %v6118_v35 = vpop.f32.mrf.mxu1 }
 0x5fe   : > { %5391 = vst [vmem:[%s236_s22] sm:$0xff] %v5378_v51  ;;  %v6119_v30 = vadd.f32 %v6118_v35, %v6117_v54 }
 0x5ff   : > { %v6120_v53 = vpop.f32.mrf.mxu1 }
 0x600   : > { %v5383_v20 = vadd.f32 %v6119_v30, %v6078_v11 }
 0x601   : > { %v6121_v21 = vpop.f32.mrf.mxu1 }
 0x602   : > { %5392 = vst [vmem:[%s236_s22 + $0x8] sm:$0xff] %v5383_v20  ;;  %v6122_v52 = vadd.f32 %v6121_v21, %v6120_v53 }
 0x604   : > { %v5388_v15 = vadd.f32 %v6122_v52, %v6081_v47 }
 0x606   : > { %5393 = vst [vmem:[%s236_s22 + $0x10] sm:$0xff] %v5388_v15 }
 0x607   : > { %6336 = shalt.err (!%p6333_p5)
}
 0x608   : > { %s6337_s29 = scalar_lea.hbm %s9188_s10, 384  ;;  %s6341_s8 = scalar_lea.hbm %s9239_s3, 768 }
 0x609   : > { %p6338_p10 = scmp.ne.s32.totalorder %s9188_s10, %s6337_s29  ;;  %p6342_p6 = scmp.lt.s32.totalorder %s9188_s10, %s9239_s3 }
 0x60a   : > { %p6343_p12 = scmp.lt.s32.totalorder %s6341_s8, %s6337_s29 }
 0x60b   : > { %p6339_p1 = pnand %p6338_p10, %p6536_p7 }
 0x60c   : > { %p6344_p3 = por %p6343_p12, %p6342_p6 }
 0x60d   : > { %p6340_p4 = pneg %p6339_p1 }
 0x60f   : > { %p6345_p8 = pnand %p6344_p3, %p6340_p4 }
 0x611   : > { %6348 = shalt.err (!%p6345_p8)
}
 0x612   : > { %s6419_s22 = smov 128   ;;  %s6420_s30 = smov 8  }
 0x613   : > { %6138 = dma.vmem_to_hbm [thread:$0]  (%p6536_p7), %s9183_s24, 384, %s9188_s10, %s5395_s11, %s6419_s22, %s6419_s22, %s6420_s30  }
 0x614 PF: > { %s5425_s7 = sand.u32 1, %s6387_s12   ;;  %p10767_p9 = scmp.ne.s32.totalorder %s9746_s23, 0 }
 0x615   : > { %p10768_p11 = scmp.ge.s32.totalorder %s6407_s17, 2  ;;  %s5426_s9 = scalar_lea.sflag [#allocation4], %s5425_s7 }
 0x617   : > { %p6152_p2 = pnand %p10768_p11, %p10767_p9 }
 0x619   : > { %p6153_p13 = pneg %p6152_p2 }
 0x61b   : > { %6382 = dma.done.wait (%p6153_p13), %s5426_s9, 384  }
 0x61c   : > { %6384 = vsyncadd (%p6153_p13), %s5426_s9, 4294966912  ;;  %s20_s17 = sadd.s32 1, %s6407_s17   ;;  %s10769_s12 = smov %s6391_s13 }
 0x61d   : > { %p17_p0 = scmp.ge.s32.totalorder %s20_s17, 4   ;;  %s10770_s13 = smov %s6395_s14 }
 0x61e   : > { %s10771_s14 = smov %s6548_s4  ;;  %s10772_s15 = smov %s6403_s16 }
 0x61f   : > { %s10773_s16 = smov %s10775_s19  ;;  %19 = sbr.rel (!%p17_p0) target bundleno = 7 (0x7), region = 85 }
 0x624   :  { %5431 = vsyncpa [#allocation3], 1 }
 0x625   :  { %5433 = vsyncpa [#allocation3 + $0x1], 1 }
 0x626   :  { %5434 = vsyncpa [#allocation6], 1 }
 0x627   :  { %5435 = vsyncpa [#allocation4], 1 }
 0x628   :  { %5437 = vsyncpa [#allocation4 + $0x1], 1 }

</bundles_post_ra>
